<compile_context>
chip_gen: v6e
topology: v6e:2x2x1
jax: 0.10.0
libtpu: 0.0.40
codegen_flags: <defaults>
</compile_context>

<pallas_src>
import math
import functools

import jax
import jax.numpy as jnp
from jax.experimental import pallas as pl
from jax.experimental.pallas import tpu as pltpu


# ------------------------------ VMEM budget ---------------------------------

def _vmem_limit_bytes():
    """~3/4 of physical VMEM: ~96 MiB on v5e/v6e, ~48 MiB on v7x; safe fallback 48 MiB."""
    try:
        phys = getattr(pltpu.get_tpu_info(), "vmem_capacity_bytes", None)
    except Exception:
        phys = None
    if not phys:
        return 48 * 1024 * 1024
    return int(min((phys * 3) // 4, 100 * 1024 * 1024))


VMEM_LIMIT = _vmem_limit_bytes()
NEG_INF = -1e30  # finite mask constant (avoids exp(-inf - -inf) NaN hazards)


# ------------------------------ small helpers ------------------------------

def _round_up(n, m):
    return ((n + m - 1) // m) * m


def _pick_div(n, candidates):
    """Largest candidate that divides n exactly (reduction axis must not overhang)."""
    for c in candidates:
        if n % c == 0:
            return c
    return n


def _row_tile(m, cap):
    """Row tile: multiple of 16 (bf16 sublane packing); ragged tail handled by Pallas."""
    return min(cap, _round_up(m, 16))


# --------------------------- projection kernels ----------------------------

def _linear_rms_kernel(x_ref, w_ref, b_ref, g_ref, o_ref, acc_ref, *, eps):
    """out = RMSNorm(x @ w + b) * g  — bf16 matmul operands, f32 accumulation."""
    @pl.when(pl.program_id(1) == 0)
    def _():
        acc_ref[...] = jnp.zeros_like(acc_ref)

    acc_ref[...] += jnp.dot(x_ref[...].astype(jnp.bfloat16), w_ref[...],
                            preferred_element_type=jnp.float32)

    @pl.when(pl.program_id(1) == pl.num_programs(1) - 1)
    def _():
        y = acc_ref[...] + b_ref[...]                       # f32 epilogue (v5e-safe)
        ms = jnp.mean(y * y, axis=-1, keepdims=True)
        o_ref[...] = (y * jax.lax.rsqrt(ms + eps) * g_ref[...]).astype(o_ref.dtype)


def _linear_kernel(x_ref, w_ref, b_ref, o_ref, acc_ref):
    """out = x @ w + b"""
    @pl.when(pl.program_id(1) == 0)
    def _():
        acc_ref[...] = jnp.zeros_like(acc_ref)

    acc_ref[...] += jnp.dot(x_ref[...].astype(jnp.bfloat16), w_ref[...],
                            preferred_element_type=jnp.float32)

    @pl.when(pl.program_id(1) == pl.num_programs(1) - 1)
    def _():
        o_ref[...] = (acc_ref[...] + b_ref[...]).astype(o_ref.dtype)


def _kv_proj_kernel(x_ref, wk_ref, wv_ref, bk_ref, bv_ref, gk_ref,
                    k_ref, v_ref, acck_ref, accv_ref, *, eps):
    """Fused k/v projections: k = RMSNorm(x@Wk+bk)*gk, v = x@Wv+bv (x read once/step)."""
    @pl.when(pl.program_id(1) == 0)
    def _():
        acck_ref[...] = jnp.zeros_like(acck_ref)
        accv_ref[...] = jnp.zeros_like(accv_ref)

    xb = x_ref[...].astype(jnp.bfloat16)
    acck_ref[...] += jnp.dot(xb, wk_ref[...], preferred_element_type=jnp.float32)
    accv_ref[...] += jnp.dot(xb, wv_ref[...], preferred_element_type=jnp.float32)

    @pl.when(pl.program_id(1) == pl.num_programs(1) - 1)
    def _():
        kk = acck_ref[...] + bk_ref[...]
        ms = jnp.mean(kk * kk, axis=-1, keepdims=True)
        k_ref[...] = (kk * jax.lax.rsqrt(ms + eps) * gk_ref[...]).astype(k_ref.dtype)
        v_ref[...] = (accv_ref[...] + bv_ref[...]).astype(v_ref.dtype)


def linear_rms(x, w, b, gamma, eps, out_dtype=jnp.bfloat16,
               tm_cap=512, tk_cands=(512, 256, 128)):
    """x:[M,K] -> RMSNorm(x@w + b)*gamma : [M,N].  No padding: ragged last row tile is
    handled by Pallas partial-tile writeback (garbage stays in dropped rows)."""
    M, K = x.shape
    N = w.shape[1]
    tm = _row_tile(M, tm_cap)
    tk = _pick_div(K, tk_cands)
    return pl.pallas_call(
        functools.partial(_linear_rms_kernel, eps=eps),
        out_shape=jax.ShapeDtypeStruct((M, N), out_dtype),
        grid=(pl.cdiv(M, tm), K // tk),
        in_specs=[
            pl.BlockSpec((tm, tk), lambda i, k: (i, k)),
            pl.BlockSpec((tk, N), lambda i, k: (k, 0)),
            pl.BlockSpec((1, N), lambda i, k: (0, 0)),
            pl.BlockSpec((1, N), lambda i, k: (0, 0)),
        ],
        out_specs=pl.BlockSpec((tm, N), lambda i, k: (i, 0)),
        scratch_shapes=[pltpu.VMEM((tm, N), jnp.float32)],
        compiler_params=pltpu.CompilerParams(
            dimension_semantics=("parallel", "arbitrary"),
            vmem_limit_bytes=VMEM_LIMIT),
    )(x, w, b.reshape(1, N), gamma.reshape(1, N))


def linear(x, w, b, out_dtype=jnp.float32, tm_cap=512, tk_cands=(512, 256, 128)):
    """x:[M,K] -> x@w + b : [M,N].  (o-projection; pass out_dtype=bf16 to halve the
    writeback if the downstream residual add is bf16.)"""
    M, K = x.shape
    N = w.shape[1]
    tm = _row_tile(M, tm_cap)
    tk = _pick_div(K, tk_cands)
    return pl.pallas_call(
        _linear_kernel,
        out_shape=jax.ShapeDtypeStruct((M, N), out_dtype),
        grid=(pl.cdiv(M, tm), K // tk),
        in_specs=[
            pl.BlockSpec((tm, tk), lambda i, k: (i, k)),
            pl.BlockSpec((tk, N), lambda i, k: (k, 0)),
            pl.BlockSpec((1, N), lambda i, k: (0, 0)),
        ],
        out_specs=pl.BlockSpec((tm, N), lambda i, k: (i, 0)),
        scratch_shapes=[pltpu.VMEM((tm, N), jnp.float32)],
        compiler_params=pltpu.CompilerParams(
            dimension_semantics=("parallel", "arbitrary"),
            vmem_limit_bytes=VMEM_LIMIT),
    )(x, w, b.reshape(1, N))


def kv_proj(x, wk, bk, wv, bv, gk, eps, out_dtype=jnp.bfloat16,
            tm_cap=256, tk_cands=(256, 128)):
    """Fused (k, v) projections for one context tensor.  Smaller tiles than linear_rms:
    two weight streams + two f32 accumulators live in VMEM (fits v7x's 64 MiB)."""
    M, K = x.shape
    N = wk.shape[1]
    tm = _row_tile(M, tm_cap)
    tk = _pick_div(K, tk_cands)
    return pl.pallas_call(
        functools.partial(_kv_proj_kernel, eps=eps),
        out_shape=(jax.ShapeDtypeStruct((M, N), out_dtype),
                   jax.ShapeDtypeStruct((M, N), out_dtype)),
        grid=(pl.cdiv(M, tm), K // tk),
        in_specs=[
            pl.BlockSpec((tm, tk), lambda i, k: (i, k)),
            pl.BlockSpec((tk, N), lambda i, k: (k, 0)),
            pl.BlockSpec((tk, N), lambda i, k: (k, 0)),
            pl.BlockSpec((1, N), lambda i, k: (0, 0)),
            pl.BlockSpec((1, N), lambda i, k: (0, 0)),
            pl.BlockSpec((1, N), lambda i, k: (0, 0)),
        ],
        out_specs=(pl.BlockSpec((tm, N), lambda i, k: (i, 0)),
                   pl.BlockSpec((tm, N), lambda i, k: (i, 0))),
        scratch_shapes=[pltpu.VMEM((tm, N), jnp.float32),
                        pltpu.VMEM((tm, N), jnp.float32)],
        compiler_params=pltpu.CompilerParams(
            dimension_semantics=("parallel", "arbitrary"),
            vmem_limit_bytes=VMEM_LIMIT),
    )(x, wk, wv, bk.reshape(1, N), bv.reshape(1, N), gk.reshape(1, N))


# ---------------------- fused dual-KV cross-attention -----------------------

def _cross_attn_kernel(q_ref, kt_ref, vt_ref, ki_ref, vi_ref, o_ref, *,
                       txt_len, img_len):
    """out = softmax(q kt^T) vt + softmax(q ki^T) vi for one (batch, head, q-tile).
    Whole (padded) KV is resident -> one-shot softmax, no online recurrence.
    q already carries the 1/sqrt(d) scale (folded into norm_q gamma)."""
    q = q_ref[0]                                            # [tq, d] bf16

    def attend(k, v, valid_len):
        s = jax.lax.dot_general(q, k, (((1,), (1,)), ((), ())),
                                preferred_element_type=jnp.float32)   # [tq, Lk]
        if valid_len != k.shape[0]:                         # mask zero-padded keys
            col = jax.lax.broadcasted_iota(jnp.int32, s.shape, 1)
            s = jnp.where(col < valid_len, s, NEG_INF)
        m = jnp.max(s, axis=-1, keepdims=True)
        p = jnp.exp(s - m)
        l = jnp.sum(p, axis=-1, keepdims=True)
        o = jnp.dot(p.astype(jnp.bfloat16), v, preferred_element_type=jnp.float32)
        return o * pl.reciprocal(l, approx=True)            # [tq, d] f32

    o_txt = attend(kt_ref[0], vt_ref[0], txt_len)
    o_img = attend(ki_ref[0], vi_ref[0], img_len)
    o_ref[0] = (o_txt + o_img).astype(o_ref.dtype)


def fused_cross_attention(q, k_txt, v_txt, k_img, v_img, num_heads,
                          out_dtype=jnp.bfloat16, tq_cap=256):
    """q:[B,Lq,C]; k/v_txt:[B,Lt,C]; k/v_img:[B,Li,C] -> SDPA(q,kt,vt)+SDPA(q,ki,vi).
    Heads are sliced out of the feature axis by the BlockSpec index_map (no
    reshape/transpose in JAX).  KV tensors (tiny in cross-attention) are zero-padded to
    a multiple of 128 so the MXU contraction depth stays >= 128; q / out are not padded."""
    B, Lq, C = q.shape
    d = C // num_heads
    # TODO(synk): head_dim % 128 != 0 would need a different head-slicing scheme (Wan: 128).
    assert C % num_heads == 0 and d % 128 == 0, "head_dim must be a multiple of 128"

    Lt, Li = k_txt.shape[1], k_img.shape[1]
    Ltp, Lip = _round_up(Lt, 128), _round_up(Li, 128)
    if Ltp != Lt:   # cheap: KV is a few hundred tokens; zero pad keeps p@v NaN-free
        k_txt = jnp.pad(k_txt, ((0, 0), (0, Ltp - Lt), (0, 0)))
        v_txt = jnp.pad(v_txt, ((0, 0), (0, Ltp - Lt), (0, 0)))
    if Lip != Li:
        k_img = jnp.pad(k_img, ((0, 0), (0, Lip - Li), (0, 0)))
        v_img = jnp.pad(v_img, ((0, 0), (0, Lip - Li), (0, 0)))

    tq = _row_tile(Lq, tq_cap)
    return pl.pallas_call(
        functools.partial(_cross_attn_kernel, txt_len=Lt, img_len=Li),
        out_shape=jax.ShapeDtypeStruct((B, Lq, C), out_dtype),
        grid=(B, num_heads, pl.cdiv(Lq, tq)),   # q-tile axis innermost: KV DMA reused
        in_specs=[
            pl.BlockSpec((1, tq, d), lambda b, h, i: (b, i, h)),
            pl.BlockSpec((1, Ltp, d), lambda b, h, i: (b, 0, h)),
            pl.BlockSpec((1, Ltp, d), lambda b, h, i: (b, 0, h)),
            pl.BlockSpec((1, Lip, d), lambda b, h, i: (b, 0, h)),
            pl.BlockSpec((1, Lip, d), lambda b, h, i: (b, 0, h)),
        ],
        out_specs=pl.BlockSpec((1, tq, d), lambda b, h, i: (b, i, h)),
        compiler_params=pltpu.CompilerParams(
            dimension_semantics=("parallel", "parallel", "parallel"),
            vmem_limit_bytes=VMEM_LIMIT),
    )(q, k_txt, v_txt, k_img, v_img)


# ------------------------------ module forward ------------------------------

def wan_i2v_cross_attention(params, x, context, context_img_len, num_heads, eps=1e-6):
    """Forward of WanI2VCrossAttention.  x:[B,L1,C], context:[B,L2,C] (img tokens first)."""
    B, L1, C = x.shape
    d = C // num_heads
    ctx_img = context[:, :context_img_len]          # context_img_len is a Python int
    ctx_txt = context[:, context_img_len:]
    L_img, L_txt = ctx_img.shape[1], ctx_txt.shape[1]

    # q projection with fused RMSNorm epilogue; softmax scale folded into gamma_q
    gamma_q = params["norm_q"] * (d ** -0.5)
    q = linear_rms(x.reshape(B * L1, C), params["q"]["w"], params["q"]["b"],
                   gamma_q, eps).reshape(B, L1, C)

    # fused k/v projections (context read once per grid step); RMSNorm fused on k
    k, v = kv_proj(ctx_txt.reshape(B * L_txt, C),
                   params["k"]["w"], params["k"]["b"],
                   params["v"]["w"], params["v"]["b"], params["norm_k"], eps)
    k, v = k.reshape(B, L_txt, C), v.reshape(B, L_txt, C)

    ki, vi = kv_proj(ctx_img.reshape(B * L_img, C),
                     params["k_img"]["w"], params["k_img"]["b"],
                     params["v_img"]["w"], params["v_img"]["b"], params["norm_k_img"], eps)
    ki, vi = ki.reshape(B, L_img, C), vi.reshape(B, L_img, C)

    # single fused attention: txt + img phases on the same resident q, summed in-kernel
    attn = fused_cross_attention(q, k, v, ki, vi, num_heads)

    # plain o-projection (out_dtype=bf16 halves writeback for bf16 residual pipelines)
    out = linear(attn.reshape(B * L1, C), params["o"]["w"], params["o"]["b"],
                 out_dtype=jnp.float32)
    return out.reshape(B, L1, C)


# --------------------------- pure-JAX reference ------------------------------

def reference(params, x, context, context_img_len, num_heads, eps=1e-6):
    def lin(t, p):
        return t @ p["w"].astype(jnp.float32) + p["b"]

    def rms(t, g):
        return t * jax.lax.rsqrt(jnp.mean(t * t, -1, keepdims=True) + eps) * g

    def attn(q, k, v, H):
        B, Lq, C = q.shape
        d = C // H
        qh = q.reshape(B, Lq, H, d).transpose(0, 2, 1, 3)
        kh = k.reshape(B, -1, H, d).transpose(0, 2, 1, 3)
        vh = v.reshape(B, -1, H, d).transpose(0, 2, 1, 3)
        s = jnp.einsum("bhqd,bhkd->bhqk", qh, kh) / math.sqrt(d)
        p = jax.nn.softmax(s, axis=-1)
        o = jnp.einsum("bhqk,bhkd->bhqd", p, vh)
        return o.transpose(0, 2, 1, 3).reshape(B, Lq, C)

    ci, ct = context[:, :context_img_len], context[:, context_img_len:]
    q = rms(lin(x, params["q"]), params["norm_q"])
    k = rms(lin(ct, params["k"]), params["norm_k"])
    v = lin(ct, params["v"])
    ki = rms(lin(ci, params["k_img"]), params["norm_k_img"])
    vi = lin(ci, params["v_img"])
    o = attn(q, k, v, num_heads) + attn(q, ki, vi, num_heads)
    return lin(o, params["o"])


# ------------------------------ parameter init -------------------------------

def init_params(key, dim):
    keys = iter(jax.random.split(key, 32))

    def lin():
        w = (jax.random.normal(next(keys), (dim, dim), jnp.float32) * 0.02).astype(jnp.bfloat16)
        b = jax.random.normal(next(keys), (dim,), jnp.float32) * 0.02
        return {"w": w, "b": b}

    def gamma():
        return 1.0 + 0.02 * jax.random.normal(next(keys), (dim,), jnp.float32)

    return {
        "q": lin(), "k": lin(), "v": lin(), "o": lin(),
        "k_img": lin(), "v_img": lin(),
        "norm_q": gamma(), "norm_k": gamma(), "norm_k_img": gamma(),
    }


# ----------------------------------- main ------------------------------------

if __name__ == "__main__":
    # head_dim = 128 (as in real Wan), dim = 640 / heads = 5.  L1=320 / L_txt=144 / L_img=32
    # exercise: K-tiling (tk=128, 5 steps), ragged row tiles (Pallas partial-tile writeback
    # on the projections and the attention q axis), and masked zero-padded KV (144->256,
    # 32->128) in the fused dual-KV attention.
    dim, num_heads, eps = 640, 5, 1e-6
    B, L1 = 2, 320
    context_img_len, L_txt = 32, 144

    key = jax.random.PRNGKey(0)
    kp, kx, kc = jax.random.split(key, 3)
    params = init_params(kp, dim)
    x = jax.random.normal(kx, (B, L1, dim), jnp.float32)
    context = jax.random.normal(kc, (B, context_img_len + L_txt, dim), jnp.float32)

    out = wan_i2v_cross_attention(params, x, context, context_img_len, num_heads, eps)
    out = jax.block_until_ready(out)

    assert out.shape == (B, L1, dim), out.shape
    assert bool(jnp.all(jnp.isfinite(out)))

    ref = reference(params, x, context, context_img_len, num_heads, eps)
    max_err = float(jnp.max(jnp.abs(out - ref)))
    # bf16 matmul operands + approx reciprocal -> small numerical drift is expected
    assert max_err < 5e-2, f"max abs error vs reference too large: {max_err}"

    print("KERNEL_OK")
</pallas_src>

<mosaic_0001>
module attributes {stable_mosaic.version = 11 : i64} {
  func.func @_linear_rms_kernel(%arg0: i32, %arg1: i32, %arg2: memref<512x128xf32, #tpu.memory_space<vmem>>, %arg3: memref<128x640xbf16, #tpu.memory_space<vmem>>, %arg4: memref<1x640xf32, #tpu.memory_space<vmem>>, %arg5: memref<1x640xf32, #tpu.memory_space<vmem>>, %arg6: memref<512x640xbf16, #tpu.memory_space<vmem>>, %arg7: memref<512x640xf32, #tpu.memory_space<vmem>>) attributes {dimension_semantics = [#tpu.dimension_semantics<parallel>, #tpu.dimension_semantics<arbitrary>], iteration_bounds = array<i64: 2, 5>, scalar_prefetch = 0 : i64, scratch_operands = 1 : i64, tpu.core_type = #tpu.core_type<tc>, window_params = [{transform_indices = @transform_0, window_bounds = array<i64: 512, 128>}, {transform_indices = @transform_1, window_bounds = array<i64: 128, 640>}, {pipeline_mode = #tpu.pipeline_mode<synchronous>, transform_indices = @transform_2, window_bounds = array<i64: 1, 640>}, {pipeline_mode = #tpu.pipeline_mode<synchronous>, transform_indices = @transform_3, window_bounds = array<i64: 1, 640>}, {transform_indices = @transform_4, window_bounds = array<i64: 512, 640>}]} {
    %c0_i32 = arith.constant 0 : i32
    %0 = arith.cmpi eq, %arg1, %c0_i32 : i32
    %1 = arith.extui %0 : i1 to i32
    %c0_i32_0 = arith.constant 0 : i32
    %2 = arith.cmpi ne, %1, %c0_i32_0 : i32
    scf.if %2 {
      %cst_9 = arith.constant 0.000000e+00 : f32
      %13 = vector.broadcast %cst_9 : f32 to vector<512x640xf32>
      %c0_10 = arith.constant 0 : index
      %c0_11 = arith.constant 0 : index
      %14 = vector.load %arg7[%c0_10, %c0_11] : memref<512x640xf32, #tpu.memory_space<vmem>>, vector<512x640xf32>
      tpu.vector_store %arg7[%c0_10, %c0_11], %13 {strides = array<i32>} : memref<512x640xf32, #tpu.memory_space<vmem>>, vector<512x640xf32>,
    } else {
    }
    %c0 = arith.constant 0 : index
    %c0_1 = arith.constant 0 : index
    %3 = vector.load %arg7[%c0, %c0_1] : memref<512x640xf32, #tpu.memory_space<vmem>>, vector<512x640xf32>
    %c0_2 = arith.constant 0 : index
    %c0_3 = arith.constant 0 : index
    %4 = vector.load %arg2[%c0_2, %c0_3] : memref<512x128xf32, #tpu.memory_space<vmem>>, vector<512x128xf32>
    %5 = arith.truncf %4 : vector<512x128xf32> to vector<512x128xbf16>
    %c0_4 = arith.constant 0 : index
    %c0_5 = arith.constant 0 : index
    %6 = vector.load %arg3[%c0_4, %c0_5] : memref<128x640xbf16, #tpu.memory_space<vmem>>, vector<128x640xbf16>
    %cst = arith.constant dense<0.000000e+00> : vector<512x640xf32>
    %7 = tpu.matmul %5, %6, %cst {dimension_numbers = #tpu.dot_dimension_numbers<[1], [0], [0], [1], [0, 0, 1, 1], [], []>} : vector<512x128xbf16>, vector<128x640xbf16>, vector<512x640xf32> -> vector<512x640xf32>
    %8 = arith.addf %3, %7 : vector<512x640xf32>
    %c0_6 = arith.constant 0 : index
    %c0_7 = arith.constant 0 : index
    %9 = vector.load %arg7[%c0_6, %c0_7] : memref<512x640xf32, #tpu.memory_space<vmem>>, vector<512x640xf32>
    tpu.vector_store %arg7[%c0_6, %c0_7], %8 {strides = array<i32>} : memref<512x640xf32, #tpu.memory_space<vmem>>, vector<512x640xf32>,
    %c4_i32 = arith.constant 4 : i32
    %10 = arith.cmpi eq, %arg1, %c4_i32 : i32
    %11 = arith.extui %10 : i1 to i32
    %c0_i32_8 = arith.constant 0 : i32
    %12 = arith.cmpi ne, %11, %c0_i32_8 : i32
    scf.if %12 {
      %c0_9 = arith.constant 0 : index
      %c0_10 = arith.constant 0 : index
      %13 = vector.load %arg7[%c0_9, %c0_10] : memref<512x640xf32, #tpu.memory_space<vmem>>, vector<512x640xf32>
      %c0_11 = arith.constant 0 : index
      %c0_12 = arith.constant 0 : index
      %14 = vector.load %arg4[%c0_11, %c0_12] : memref<1x640xf32, #tpu.memory_space<vmem>>, vector<1x640xf32>
      %15 = vector.broadcast %14 : vector<1x640xf32> to vector<512x640xf32>
      %16 = arith.addf %13, %15 : vector<512x640xf32>
      %17 = arith.mulf %16, %16 : vector<512x640xf32>
      %cst_13 = arith.constant dense<0.000000e+00> : vector<512xf32>
      %18 = vector.multi_reduction <add>, %17, %cst_13 [1] : vector<512x640xf32> to vector<512xf32>
      %19 = vector.shape_cast %18 : vector<512xf32> to vector<512x1xf32>
      %cst_14 = arith.constant 6.400000e+02 : f32
      %20 = vector.broadcast %cst_14 : f32 to vector<512x1xf32>
      %21 = arith.divf %19, %20 : vector<512x1xf32>
      %cst_15 = arith.constant 9.99999997E-7 : f32
      %22 = vector.broadcast %cst_15 : f32 to vector<512x1xf32>
      %23 = arith.addf %21, %22 : vector<512x1xf32>
      %24 = math.rsqrt %23 : vector<512x1xf32>
      %25 = vector.broadcast %24 : vector<512x1xf32> to vector<512x640xf32>
      %26 = arith.mulf %16, %25 : vector<512x640xf32>
      %c0_16 = arith.constant 0 : index
      %c0_17 = arith.constant 0 : index
      %27 = vector.load %arg5[%c0_16, %c0_17] : memref<1x640xf32, #tpu.memory_space<vmem>>, vector<1x640xf32>
      %28 = vector.broadcast %27 : vector<1x640xf32> to vector<512x640xf32>
      %29 = arith.mulf %26, %28 : vector<512x640xf32>
      %30 = arith.truncf %29 : vector<512x640xf32> to vector<512x640xbf16>
      %c0_18 = arith.constant 0 : index
      %c0_19 = arith.constant 0 : index
      %31 = vector.load %arg6[%c0_18, %c0_19] : memref<512x640xbf16, #tpu.memory_space<vmem>>, vector<512x640xbf16>
      tpu.vector_store %arg6[%c0_18, %c0_19], %30 {strides = array<i32>} : memref<512x640xbf16, #tpu.memory_space<vmem>>, vector<512x640xbf16>,
    } else {
    }
    return
  }
  func.func @transform_0(%arg0: i32, %arg1: i32) -> (i32, i32) {
    %c0_i32 = arith.constant 0 : i32
    return %arg0, %arg1 : i32, i32
  }
  func.func @transform_1(%arg0: i32, %arg1: i32) -> (i32, i32) {
    %c0_i32 = arith.constant 0 : i32
    %c0_i32_0 = arith.constant 0 : i32
    return %arg1, %c0_i32 : i32, i32
  }
  func.func @transform_2(%arg0: i32, %arg1: i32) -> (i32, i32) {
    %c0_i32 = arith.constant 0 : i32
    %c0_i32_0 = arith.constant 0 : i32
    %c0_i32_1 = arith.constant 0 : i32
    return %c0_i32, %c0_i32_0 : i32, i32
  }
  func.func @transform_3(%arg0: i32, %arg1: i32) -> (i32, i32) {
    %c0_i32 = arith.constant 0 : i32
    %c0_i32_0 = arith.constant 0 : i32
    %c0_i32_1 = arith.constant 0 : i32
    return %c0_i32, %c0_i32_0 : i32, i32
  }
  func.func @transform_4(%arg0: i32, %arg1: i32) -> (i32, i32) {
    %c0_i32 = arith.constant 0 : i32
    %c0_i32_0 = arith.constant 0 : i32
    return %arg0, %c0_i32 : i32, i32
  }
}

</mosaic_0001>

<bundles_post_ra>
// kernel: tpu_custom_call.1
= control target key start
LH: loop header
LB: loop body
LE: loop exit
PB: predicated region body
PF: predicated region fallthrough
CT: control target
= control target key end

     0   :  { %s11698_s0 = inlined_call_operand.hbm [shape: f32[640,640], index: 0, kind: input, shape index: {}]   ;;  %s11699_s1 = inlined_call_operand.hbm [shape: bf16[640,640], index: 1, kind: input, shape index: {}]   ;;  %s11700_s2 = inlined_call_operand.hbm [shape: f32[1,640], index: 2, kind: input, shape index: {}]   ;;  %s11701_s3 = inlined_call_operand.hbm [shape: f32[1,640], index: 3, kind: input, shape index: {}]   ;;  %s11702_s4 = inlined_call_operand.hbm [shape: bf16[640,640], index: 4, kind: output, shape index: {}]  }
   0x1   :  { %12019 = sst [smem:[#allocation326_spill]] %s11698_s0 }
   0x2   :  { %12020 = sst [smem:[#allocation327_spill]] %s11700_s2 }
   0x3   :  { %12021 = sst [smem:[#allocation328_spill]] %s11701_s3 }
   0x4   :  { %12022 = sst [smem:[#allocation329_spill]] %s11702_s4 }
   0x5   :  { %9 = vsyncpa [#allocation4], 0 }
   0x6   :  { %11 = vsyncpa [#allocation4 + $0x1], 0 }
   0x7   :  { %12 = vsyncpa [#allocation7], 0 }
   0x8   :  { %14 = vsyncpa [#allocation7 + $0x1], 0 }
   0x9   :  { %15 = vsyncpa [#allocation10], 0 }
   0xa   :  { %16 = vsyncpa [#allocation5], 0 }
   0xb   :  { %18 = vsyncpa [#allocation5 + $0x1], 0  ;;  %s7784_s15 = smov 0   ;;  %s7786_s16 = smov 0  }
   0xc   :  { %s7788_s17 = smov 0   ;;  %s7790_s18 = smov 0  }
   0xd   :  { %s7792_s19 = smov 0   ;;  %s7794_s20 = smov 0  }
   0xe   :  { %s7796_s21 = smov 0   ;;  %s7798_s22 = smov 0  }
   0xf   :  { %s7800_s23 = smov 0   ;;  %s7802_s24 = smov 0  }
  0x10   :  { %s7804_s25 = smov 0   ;;  %s7806_s26 = smov 0  }
  0x11   :  { %s7808_s27 = smov 0   ;;  %s7810_s28 = smov 0  }
  0x12 LB: > { %12023 = sst [smem:[#allocation17_spill]] %s7691_s15  ;;  %s7853_s29 = sadd.s32 4294967295, %s7743_s28   ;;  %s7743_s28 = sphi %s7810_s28, %s24_s28   ;;  %s7739_s27 = sphi %s7808_s27, %s12669_s27   ;;  %s7735_s26 = sphi %s7806_s26, %s12680_s26   ;;  %s7731_s25 = sphi %s7804_s25, %s12667_s25   ;;  %s7727_s24 = sphi %s7802_s24, %s12679_s24   ;;  %s7723_s23 = sphi %s7800_s23, %s12678_s23   ;;  %s7719_s22 = sphi %s7798_s22, %s12677_s22   ;;  %s7715_s21 = sphi %s7796_s21, %s12676_s21   ;;  %s7711_s20 = sphi %s7794_s20, %s12675_s20   ;;  %s7707_s19 = sphi %s7792_s19, %s12674_s19   ;;  %s7703_s18 = sphi %s7790_s18, %s12673_s18   ;;  %s7699_s17 = sphi %s7788_s17, %s12663_s17   ;;  %s7695_s16 = sphi %s7786_s16, %s12672_s16   ;;  %s7691_s15 = sphi %s7784_s15, %s12671_s15  }
  0x13   : > { %12024 = sst [smem:[#allocation18_spill]] %s7699_s17  ;;  %s33_s5 = sadd.s32 1, %s7735_s26 }
  0x14   : > { %12025 = sst [smem:[#allocation19_spill]] %s7723_s23  ;;  %s36_s6 = sadd.s32 1, %s7739_s27 }
  0x15   : > { %12026 = sst [smem:[#allocation20_spill]] %s7731_s25  ;;  %p34_p0 = scmp.ge.s32.totalorder %s33_s5, 5 }
  0x16   : > { %12027 = sst [smem:[#allocation21_spill]] %s7739_s27  ;;  %s45_s7 = sadd.s32 1, %s7723_s23 }
  0x17   : > { %p52_p1 = scmp.ne.s32.totalorder %s7723_s23, %s7719_s22  ;;  %p53_p2 = scmp.eq.s32.totalorder %s7743_s28, 0 }
  0x18   : > { %s12682_s5 = smov (%p34_p0, %s33_s5), 0  ;;  %s12684_s6 = smov (!%p34_p0, %s36_s6), %s7739_s27 }
  0x19   : > { %12028 = sst [smem:[#allocation22_spill]] %s12682_s5  ;;  %s41_s8 = ssub.s32 %s7735_s26, %s12682_s5 }
  0x1a   : > { %p7869_p3 = por %p53_p2, %p52_p1  ;;  %p38_p4 = scmp.ge.s32.totalorder %s12684_s6, 2 }
  0x1b   : > { %p58_p5 = scmp.ne.s32.totalorder %s7719_s22, %s7715_s21  ;;  %p11705_p6 = scmp.eq.s32.totalorder %s7853_s29, 0 }
  0x1c   : > { %p69_p7 = scmp.eq.s32.totalorder %s41_s8, 0  ;;  %s12686_s6 = smov (%p38_p4, %s12684_s6), 0 }
  0x1d   : > { %12030 = sst [smem:[#allocation23_spill]] %s12686_s6  ;;  %p7879_p8 = por %p11705_p6, %p58_p5 }
  0x1e   : > { %s71_s11 = sadd.s32 1, %s7711_s20  ;;  %s40_s12 = ssub.s32 %s7739_s27, %s12686_s6 }
  0x1f   : > { %s12031_s10 = scalar_select %p7879_p8, 1, 0 }
  0x20   : > { %p78_p9 = scmp.ne.s32.totalorder %s7711_s20, %s7707_s19  ;;  %s42_s13 = sor.u32 %s41_s8, %s40_s12 }
  0x21   : > { %p84_p10 = scmp.ne.s32.totalorder %s7707_s19, %s7703_s18  ;;  %p43_p11 = scmp.eq.s32.totalorder %s42_s13, 0 }
  0x22   : > { %p7892_p12 = por %p78_p9, %p53_p2  ;;  %p137_p0 = scmp.eq.s32.totalorder %s40_s12, 0 }
  0x23   : > { %s7897_s21 = scalar_select %p69_p7, %s7711_s20, %s71_s11  }
  0x24   : > { %s12032_s14 = scalar_select %p7892_p12, 1, 0 }
  0x25   : > { %12033 = sst [smem:[#allocation24_spill]] %s7897_s21  ;;  %p7904_p13 = por %p84_p10, %p11705_p6 }
  0x26   : > { %s7900_s30 = scalar_select %p43_p11, %s7723_s23, %s45_s7  }
  0x27   : > { %s12035_s5 = scalar_select %p7904_p13, 1, 0 }
  0x28   : > { %12034 = sst [smem:[#allocation25_spill]] %s7900_s30  ;;  %s139_s6 = sadd.s32 1, %s7699_s17 }
  0x29   : > { %p149_p1 = scmp.ne.s32.totalorder %s7699_s17, %s7695_s16  ;;  %p150_p4 = scmp.eq.s32.totalorder %s7853_s29, 9 }
  0x2a   : > { %s7912_s18 = scalar_select %p137_p0, %s7699_s17, %s139_s6  }
  0x2b   : > { %p155_p2 = scmp.ne.s32.totalorder %s7695_s16, %s7691_s15  ;;  %s12037_s8 = sadd.s32 4294967294, %s7743_s28  }
  0x2c   : > { %12036 = sst [smem:[#allocation26_spill]] %s7912_s18  ;;  %p156_p5 = scmp.eq.s32.totalorder %s12037_s8, 9 }
  0x2d   : > { %p6551_p9 = scmp.ge.s32.totalorder %s7743_s28, 1  ;;  %p7920_p7 = por %p150_p4, %p149_p1 }
  0x2e   : > { %p163_p11 = scmp.lt.s32.totalorder %s7743_s28, 11  ;;  %p7925_p10 = por %p156_p5, %p155_p2 }
  0x2f   : > { %s12038_s11 = scalar_select %p7920_p7, 1, 0 }
  0x30   : > { %s12040_s7 = scalar_select %p7925_p10, 1, 0 }
  0x31   : > { %12039 = sst [smem:[#allocation27_spill]] %s12038_s11  ;;  %p7929_p6 = pnand %p6551_p9, %p163_p11 }
  0x32   : > { %12041 = sst [smem:[#allocation28_spill]] %s12040_s7  ;;  %s7745_s6 = smov [#allocation8]  }
  0x33   : > { %s12042_s12 = scalar_select %p7929_p6, 1, 0 }
  0x34   : > { %s176_s13 = sshll.u32 %s7745_s6, 4  ;;  %p7159_p0 = pneg %p7929_p6  ;;  %s177_s13 = int_to_ptr.vmem [resolvable:$true] %s176_s13 }
  0x35   : > { %s7746_s8 = smov [#allocation9]   ;;  %p12043_p1 = scmp.eq.s32.totalorder %s7853_s29, 0 }
  0x36   : > { %s187_s30 = sshll.u32 %s7746_s8, 4  ;;  %s7494_s18 = scalar_lea.vmem %s177_s13, 80  ;;  %s188_s30 = int_to_ptr.vmem [resolvable:$true] %s187_s30 }
  0x37   : > { %p7937_p4 = pnand %p7159_p0, %p12043_p1  ;;  %p7495_p5 = scmp.ne.s32.totalorder %s177_s13, %s7494_s18 }
  0x38   : > { %s7501_s6 = scalar_lea.vmem %s177_s13, 96  ;;  %p7502_p10 = scmp.lt.s32.totalorder %s177_s13, %s177_s13 }
  0x39   : > { %p7485_p2 = pneg %p7937_p4  ;;  %p7503_p7 = scmp.lt.s32.totalorder %s7501_s6, %s7494_s18 }
  0x3b   : > { %p7497_p9 = pnand %p7495_p5, %p7485_p2  ;;  %p7504_p13 = por %p7503_p7, %p7502_p10 }
  0x3d   : > { %p7498_p11 = pneg %p7497_p9 }
  0x3f   : > { %p7505_p8 = pnand %p7504_p13, %p7498_p11 }
  0x41   : > { %7508 = shalt.err (!%p7505_p8)
}
  0x42   : > { %s12045_s2 = sld [smem:[#allocation327_spill]]  ;;  %s7520_s7 = scalar_lea.vmem %s188_s30, 80 }
  0x43   : > { %p7521_p0 = scmp.ne.s32.totalorder %s188_s30, %s7520_s7  ;;  %s7527_s15 = scalar_lea.vmem %s188_s30, 96 }
  0x44   : > { %p7528_p9 = scmp.lt.s32.totalorder %s188_s30, %s188_s30  ;;  %p7529_p6 = scmp.lt.s32.totalorder %s7527_s15, %s7520_s7 }
  0x45   : > { %p7523_p1 = pnand %p7521_p0, %p7485_p2 }
  0x46   : > { %p7530_p12 = por %p7529_p6, %p7528_p9 }
  0x47   : > { %p7524_p5 = pneg %p7523_p1 }
  0x48   : > { %7162 = dma.hbm_to_vmem [thread:$0]  (!%p7937_p4), %s12045_s2, 80, %s177_s13, [#allocation7]  }
  0x49   : > { %p7531_p7 = pnand %p7530_p12, %p7524_p5 }
  0x4b   : > { %7534 = shalt.err (!%p7531_p7)
}
  0x4c   : > { %s12046_s3 = sld [smem:[#allocation328_spill]]  ;;  %p6554_p8 = scmp.ge.s32.totalorder %s7743_s28, 10 }
  0x4e   : > { %194 = sbr.rel (%p6554_p8) target bundleno = 126 (0x7e), region = 24 }
  0x52   : > { %7165 = dma.hbm_to_vmem [thread:$0]  (!%p7937_p4), %s12046_s3, 80, %s188_s30, [#allocation10]  }
  0x53   : > { %197 = sbr.rel (!%p7869_p3) target bundleno = 109 (0x6d), region = 28  ;;  %s198_s17 = sand.u32 (%p7869_p3), 1, %s7723_s23  }
  0x54   : > { %s6556_s13 = sshll.u32 (%p7869_p3), %s7739_s27, 6  ;;  %s6555_s15 = sshll.u32 (%p7869_p3), %s198_s17, 9 }
  0x55   : > { %s204_s7 = ssub.s32 (%p7869_p3), 80, %s6556_s13  ;;  %s7967_s18 = scalar_lea.sflag (%p7869_p3), [#allocation4], %s198_s17 }
  0x56   : > { %p205_p6 = scmp.lt.s32.totalorder (%p7869_p3), %s204_s7, 64  ;;  %s202_s30 = scalar_lea.vmem (%p7869_p3), [#allocation3], %s6555_s15 }
  0x58   : > { %s12688_s7 = smov (!%p205_p6, %s204_s7), 64 }
  0x59   : > { %s7964_s8 = sshll.u32 %s12688_s7, 7 }
  0x5a   : > { %s209_s21 = ssub.s32 8192, %s7964_s8 }
  0x5b   : > { %210 = vsyncadd %s7967_s18, %s209_s21  ;;  %p6558_p3 = scmp.ne.s32.totalorder %s7964_s8, 0  ;;  %s7141_s9 = smul.u32 320, %s7739_s27 }
  0x5c   : > { %s217_s6 = sshll.u32 %s202_s30, 4  ;;  %s12047_s0 = sld [smem:[#allocation326_spill]]  ;;  %s218_s6 = int_to_ptr.vmem [resolvable:$true] %s217_s6 }
  0x5d   : > { %s213_s13 = sadd.s32 %s7735_s26, %s7141_s9  ;;  %s7547_s17 = scalar_lea.vmem %s218_s6, %s7964_s8 }
  0x5e   : > { %s6560_s2 = sshll.u32 %s213_s13, 7  ;;  %p7548_p12 = scmp.ne.s32.totalorder %s218_s6, %s7547_s17 }
  0x5f   : > { %s7747_s15 = smov [#allocation3]  }
  0x60   : > { %p7549_p13 = pnand %p7548_p12, %p6558_p3  ;;  %s7551_s21 = sshll.u32 %s7747_s15, 4  ;;  %s7552_s21 = int_to_ptr.vmem [resolvable:$false] %s7551_s21 }
  0x61   : > { %s7553_s4 = scalar_lea.vmem %s7552_s21, 16384  ;;  %p7554_p4 = scmp.lt.s32.totalorder %s218_s6, %s7552_s21 }
  0x62   : > { %s215_s23 = scalar_lea.hbm %s12047_s0, %s6560_s2  ;;  %p7550_p10 = pneg %p7549_p13 }
  0x63   : > { %p7555_p2 = scmp.lt.s32.totalorder %s7553_s4, %s7547_s17 }
  0x65   : > { %p7556_p11 = por %p7555_p2, %p7554_p4 }
  0x67   : > { %p7557_p0 = pnand %p7556_p11, %p7550_p10 }
  0x69   : > { %7560 = shalt.err (!%p7557_p0)
}
  0x6a   : > { %s7748_s30 = smov 640   ;;  %s7749_s3 = smov 128  }
  0x6b   : > { %s7750_s2 = smov 8  }
  0x6c   : > { %223 = dma.hbm_to_vmem [thread:$0]  (%p6558_p3), %s215_s23, %s7964_s8, %s218_s6, %s7967_s18, %s7748_s30, %s7749_s3, %s7750_s2  }
  0x6d PF: > { %s227_s9 = sand.u32 1, %s7743_s28   ;;  %s229_s13 = sand.u32 1, %s7711_s20  }
  0x6e   : > { %s7142_s7 = smul.u32 320, %s229_s13  ;;  %s228_s25 = scalar_lea.sflag [#allocation7], %s227_s9 }
  0x6f   : > { %s7143_s4 = smul.u32 5120, %s7735_s26  ;;  %p12048_p5 = scmp.ne.s32.totalorder %s12032_s14, 0 }
  0x70   : > { %s231_s0 = scalar_lea.vmem [#allocation6], %s7142_s7  ;;  %s7751_s23 = smov [#allocation6]  }
  0x71   : > { %s238_s21 = scalar_lea.hbm %s11699_s1, %s7143_s4  ;;  %s239_s27 = sshll.u32 %s231_s0, 4  ;;  %s240_s27 = int_to_ptr.vmem [resolvable:$true] %s239_s27 }
  0x72   : > { %s7573_s11 = scalar_lea.vmem %s240_s27, 5120  ;;  %s7577_s8 = sshll.u32 %s7751_s23, 4  ;;  %s7578_s8 = int_to_ptr.vmem [resolvable:$false] %s7577_s8 }
  0x73   : > { %p7574_p1 = scmp.ne.s32.totalorder %s240_s27, %s7573_s11  ;;  %s7579_s18 = scalar_lea.vmem %s7578_s8, 10240 }
  0x74   : > { %p7580_p8 = scmp.lt.s32.totalorder %s240_s27, %s7578_s8  ;;  %p7581_p6 = scmp.lt.s32.totalorder %s7579_s18, %s7573_s11 }
  0x75   : > { %p7575_p9 = pnand %p7574_p1, %p12048_p5 }
  0x76   : > { %p7582_p3 = por %p7581_p6, %p7580_p8 }
  0x77   : > { %p7576_p7 = pneg %p7575_p9 }
  0x79   : > { %p7583_p12 = pnand %p7582_p3, %p7576_p7 }
  0x7b   : > { %7586 = shalt.err (!%p7583_p12)
}
  0x7c   : > { %s7752_s6 = smov 320   ;;  %s7753_s30 = smov 20  }
  0x7d   : > { %7151 = dma.hbm_to_vmem [thread:$0]  (%p12048_p5), %s238_s21, 5120, %s240_s27, %s228_s25, %s7752_s6, %s7752_s6, %s7753_s30  }
  0x7e PF: > { %p12049_p13 = scmp.ne.s32.totalorder %s12042_s12, 0 }
  0x7f   : > { %s253_s0 = sand.u32 (!%p12049_p13), 1, %s7719_s22   ;;  %p12050_p10 = scmp.ne.s32.totalorder (!%p12049_p13), %s12031_s10, 0 }
  0x80   : > { %251 = sbr.rel (%p12049_p13) target bundleno = 1435 (0x59b), region = 36  ;;  %s6567_s3 = sshll.u32 (!%p12049_p13), %s253_s0, 9 }
  0x81   : > { %s254_s2 = scalar_lea.sflag (!%p12049_p13), [#allocation4], %s253_s0  ;;  %s7996_s9 = scalar_lea.vmem (!%p12049_p13), [#allocation3], %s6567_s3 }
  0x85   : > { %7670 = dma.done.wait (%p12050_p10), %s254_s2, 8192  }
  0x86   : > { %7672 = vsyncadd (%p12050_p10), %s254_s2, 4294959104  ;;  %s262_s25 = sand.u32 1, %s7853_s29   ;;  %s264_s27 = sand.u32 1, %s7707_s19  }
  0x87   : > { %s7144_s14 = smul.u32 320, %s264_s27  ;;  %s263_s11 = scalar_lea.sflag [#allocation7], %s262_s25 }
  0x88   : > { %p12051_p4 = scmp.ne.s32.totalorder %s12035_s5, 0 }
  0x89   : > { %s8004_s12 = scalar_lea.vmem [#allocation6], %s7144_s14 }
  0x8a   : > { %7674 = dma.done.wait (%p12051_p4), %s263_s11, 5120  }
  0x8b   : > { %7676 = vsyncadd (%p12051_p4), %s263_s11, 4294962176  ;;  %p12052_p2 = scmp.eq.s32.totalorder %s7853_s29, 0 }
  0x8d   : > { %7678 = dma.done.wait (%p12052_p2), [#allocation7], 80   ;;  %p12053_p11 = pmov %p12052_p2 }
  0x8e   : > { %p12054_p0 = pmov %p12052_p2 }
  0x8f   : > { %7680 = vsyncadd (%p12053_p11), [#allocation7], 4294967216 }
  0x90   : > { %7682 = dma.done.wait (%p12054_p0), [#allocation10], 80   ;;  %p12055_p1 = pmov %p12054_p0 }
  0x91   : > { %s301_s10 = sand.u32 1, %s7695_s16   ;;  %p6570_p5 = scmp.ne.s32.totalorder %s7727_s24, 0 }
  0x92   : > { %7684 = vsyncadd (%p12055_p1), [#allocation10], 4294967216  ;;  %s7145_s13 = smul.u32 1280, %s301_s10 }
  0x93   : > { %320 = sbr.rel (%p6570_p5) target bundleno = 313 (0x139), region = 56 }
  0x94   : > { %s8021_s7 = scalar_lea.vmem [#allocation11], %s7145_s13 }
  0x98   : > { %v7754_v0 = vmov 0.0  }
  0x99   : > { %321 = vst [vmem:[#allocation2 + $0x4c8] sm:$0xff] %v7754_v0  ;;  %322 = vst [vmem:[#allocation2 + $0x808] sm:$0xff] %v7754_v0 }
  0x9a   : > { %323 = vst [vmem:[#allocation2 + $0x7f8] sm:$0xff] %v7754_v0  ;;  %324 = vst [vmem:[#allocation2 + $0x758] sm:$0xff] %v7754_v0 }
  0x9b   : > { %325 = vst [vmem:[#allocation2 + $0x320] sm:$0xff] %v7754_v0  ;;  %326 = vst [vmem:[#allocation2 + $0x438] sm:$0xff] %v7754_v0 }
  0x9c   : > { %327 = vst [vmem:[#allocation2 + $0x8f8] sm:$0xff] %v7754_v0  ;;  %328 = vst [vmem:[#allocation2 + $0x4d0] sm:$0xff] %v7754_v0 }
  0x9d   : > { %329 = vst [vmem:[#allocation2 + $0x6e8] sm:$0xff] %v7754_v0  ;;  %330 = vst [vmem:[#allocation2 + $0x6a8] sm:$0xff] %v7754_v0 }
  0x9e   : > { %331 = vst [vmem:[#allocation2 + $0x750] sm:$0xff] %v7754_v0  ;;  %332 = vst [vmem:[#allocation2 + $0x300] sm:$0xff] %v7754_v0 }
  0x9f   : > { %333 = vst [vmem:[#allocation2 + $0x708] sm:$0xff] %v7754_v0  ;;  %334 = vst [vmem:[#allocation2 + $0x7f0] sm:$0xff] %v7754_v0 }
  0xa0   : > { %335 = vst [vmem:[#allocation2 + $0x570] sm:$0xff] %v7754_v0  ;;  %336 = vst [vmem:[#allocation2 + $0x580] sm:$0xff] %v7754_v0 }
  0xa1   : > { %337 = vst [vmem:[#allocation2 + $0x3a8] sm:$0xff] %v7754_v0  ;;  %338 = vst [vmem:[#allocation2 + $0x8e0] sm:$0xff] %v7754_v0 }
  0xa2   : > { %339 = vst [vmem:[#allocation2 + $0x960] sm:$0xff] %v7754_v0  ;;  %340 = vst [vmem:[#allocation2 + $0x898] sm:$0xff] %v7754_v0 }
  0xa3   : > { %341 = vst [vmem:[#allocation2 + $0x7d8] sm:$0xff] %v7754_v0  ;;  %342 = vst [vmem:[#allocation2 + $0x778] sm:$0xff] %v7754_v0 }
  0xa4   : > { %343 = vst [vmem:[#allocation2 + $0x488] sm:$0xff] %v7754_v0  ;;  %344 = vst [vmem:[#allocation2 + $0x378] sm:$0xff] %v7754_v0 }
  0xa5   : > { %345 = vst [vmem:[#allocation2 + $0x98] sm:$0xff] %v7754_v0  ;;  %346 = vst [vmem:[#allocation2 + $0x370] sm:$0xff] %v7754_v0 }
  0xa6   : > { %347 = vst [vmem:[#allocation2 + $0x838] sm:$0xff] %v7754_v0  ;;  %348 = vst [vmem:[#allocation2 + $0x800] sm:$0xff] %v7754_v0 }
  0xa7   : > { %349 = vst [vmem:[#allocation2 + $0x270] sm:$0xff] %v7754_v0  ;;  %350 = vst [vmem:[#allocation2 + $0x650] sm:$0xff] %v7754_v0 }
  0xa8   : > { %351 = vst [vmem:[#allocation2 + $0x548] sm:$0xff] %v7754_v0  ;;  %352 = vst [vmem:[#allocation2 + $0x70] sm:$0xff] %v7754_v0 }
  0xa9   : > { %353 = vst [vmem:[#allocation2 + $0x78] sm:$0xff] %v7754_v0  ;;  %354 = vst [vmem:[#allocation2 + $0x6f8] sm:$0xff] %v7754_v0 }
  0xaa   : > { %355 = vst [vmem:[#allocation2 + $0x5c0] sm:$0xff] %v7754_v0  ;;  %356 = vst [vmem:[#allocation2 + $0x9d0] sm:$0xff] %v7754_v0 }
  0xab   : > { %357 = vst [vmem:[#allocation2 + $0x810] sm:$0xff] %v7754_v0  ;;  %358 = vst [vmem:[#allocation2 + $0x910] sm:$0xff] %v7754_v0 }
  0xac   : > { %359 = vst [vmem:[#allocation2 + $0x738] sm:$0xff] %v7754_v0  ;;  %360 = vst [vmem:[#allocation2 + $0x620] sm:$0xff] %v7754_v0 }
  0xad   : > { %361 = vst [vmem:[#allocation2 + $0x278] sm:$0xff] %v7754_v0  ;;  %362 = vst [vmem:[#allocation2 + $0x3b0] sm:$0xff] %v7754_v0 }
  0xae   : > { %363 = vst [vmem:[#allocation2 + $0x80] sm:$0xff] %v7754_v0  ;;  %364 = vst [vmem:[#allocation2 + $0x490] sm:$0xff] %v7754_v0 }
  0xaf   : > { %365 = vst [vmem:[#allocation2 + $0x600] sm:$0xff] %v7754_v0  ;;  %366 = vst [vmem:[#allocation2 + $0x558] sm:$0xff] %v7754_v0 }
  0xb0   : > { %367 = vst [vmem:[#allocation2 + $0x5d0] sm:$0xff] %v7754_v0  ;;  %368 = vst [vmem:[#allocation2 + $0x228] sm:$0xff] %v7754_v0 }
  0xb1   : > { %369 = vst [vmem:[#allocation2 + $0x930] sm:$0xff] %v7754_v0  ;;  %370 = vst [vmem:[#allocation2 + $0x690] sm:$0xff] %v7754_v0 }
  0xb2   : > { %371 = vst [vmem:[#allocation2 + $0x798] sm:$0xff] %v7754_v0  ;;  %372 = vst [vmem:[#allocation2 + $0x538] sm:$0xff] %v7754_v0 }
  0xb3   : > { %373 = vst [vmem:[#allocation2 + $0x678] sm:$0xff] %v7754_v0  ;;  %374 = vst [vmem:[#allocation2 + $0x890] sm:$0xff] %v7754_v0 }
  0xb4   : > { %375 = vst [vmem:[#allocation2 + $0x7c8] sm:$0xff] %v7754_v0  ;;  %376 = vst [vmem:[#allocation2 + $0x7b8] sm:$0xff] %v7754_v0 }
  0xb5   : > { %377 = vst [vmem:[#allocation2 + $0x358] sm:$0xff] %v7754_v0  ;;  %378 = vst [vmem:[#allocation2 + $0x7b0] sm:$0xff] %v7754_v0 }
  0xb6   : > { %379 = vst [vmem:[#allocation2 + $0x5d8] sm:$0xff] %v7754_v0  ;;  %380 = vst [vmem:[#allocation2 + $0x2f8] sm:$0xff] %v7754_v0 }
  0xb7   : > { %381 = vst [vmem:[#allocation2 + $0x5b0] sm:$0xff] %v7754_v0  ;;  %382 = vst [vmem:[#allocation2 + $0x240] sm:$0xff] %v7754_v0 }
  0xb8   : > { %383 = vst [vmem:[#allocation2 + $0x918] sm:$0xff] %v7754_v0  ;;  %384 = vst [vmem:[#allocation2 + $0x9a0] sm:$0xff] %v7754_v0 }
  0xb9   : > { %385 = vst [vmem:[#allocation2 + $0x950] sm:$0xff] %v7754_v0  ;;  %386 = vst [vmem:[#allocation2 + $0xf8] sm:$0xff] %v7754_v0 }
  0xba   : > { %387 = vst [vmem:[#allocation2 + $0x888] sm:$0xff] %v7754_v0  ;;  %388 = vst [vmem:[#allocation2 + $0x2e0] sm:$0xff] %v7754_v0 }
  0xbb   : > { %389 = vst [vmem:[#allocation2 + $0x2d8] sm:$0xff] %v7754_v0  ;;  %390 = vst [vmem:[#allocation2 + $0x628] sm:$0xff] %v7754_v0 }
  0xbc   : > { %391 = vst [vmem:[#allocation2 + $0x780] sm:$0xff] %v7754_v0  ;;  %392 = vst [vmem:[#allocation2 + $0x8b0] sm:$0xff] %v7754_v0 }
  0xbd   : > { %393 = vst [vmem:[#allocation2 + $0x8a0] sm:$0xff] %v7754_v0  ;;  %394 = vst [vmem:[#allocation2 + $0x920] sm:$0xff] %v7754_v0 }
  0xbe   : > { %395 = vst [vmem:[#allocation2 + $0x3e8] sm:$0xff] %v7754_v0  ;;  %396 = vst [vmem:[#allocation2 + $0x598] sm:$0xff] %v7754_v0 }
  0xbf   : > { %397 = vst [vmem:[#allocation2 + $0x310] sm:$0xff] %v7754_v0  ;;  %398 = vst [vmem:[#allocation2 + $0x730] sm:$0xff] %v7754_v0 }
  0xc0   : > { %399 = vst [vmem:[#allocation2 + $0x388] sm:$0xff] %v7754_v0  ;;  %400 = vst [vmem:[#allocation2 + $0x9d8] sm:$0xff] %v7754_v0 }
  0xc1   : > { %401 = vst [vmem:[#allocation2 + $0x908] sm:$0xff] %v7754_v0  ;;  %402 = vst [vmem:[#allocation2 + $0x900] sm:$0xff] %v7754_v0 }
  0xc2   : > { %403 = vst [vmem:[#allocation2 + $0xa8] sm:$0xff] %v7754_v0  ;;  %404 = vst [vmem:[#allocation2 + $0x28] sm:$0xff] %v7754_v0 }
  0xc3   : > { %405 = vst [vmem:[#allocation2 + $0x2a0] sm:$0xff] %v7754_v0  ;;  %406 = vst [vmem:[#allocation2 + $0x2c0] sm:$0xff] %v7754_v0 }
  0xc4   : > { %407 = vst [vmem:[#allocation2] sm:$0xff] %v7754_v0  ;;  %408 = vst [vmem:[#allocation2 + $0x868] sm:$0xff] %v7754_v0 }
  0xc5   : > { %409 = vst [vmem:[#allocation2 + $0x878] sm:$0xff] %v7754_v0  ;;  %410 = vst [vmem:[#allocation2 + $0x9f8] sm:$0xff] %v7754_v0 }
  0xc6   : > { %411 = vst [vmem:[#allocation2 + $0x848] sm:$0xff] %v7754_v0  ;;  %412 = vst [vmem:[#allocation2 + $0x530] sm:$0xff] %v7754_v0 }
  0xc7   : > { %413 = vst [vmem:[#allocation2 + $0x5f0] sm:$0xff] %v7754_v0  ;;  %414 = vst [vmem:[#allocation2 + $0x440] sm:$0xff] %v7754_v0 }
  0xc8   : > { %415 = vst [vmem:[#allocation2 + $0x880] sm:$0xff] %v7754_v0  ;;  %416 = vst [vmem:[#allocation2 + $0x7e8] sm:$0xff] %v7754_v0 }
  0xc9   : > { %417 = vst [vmem:[#allocation2 + $0x9c0] sm:$0xff] %v7754_v0  ;;  %418 = vst [vmem:[#allocation2 + $0x9c8] sm:$0xff] %v7754_v0 }
  0xca   : > { %419 = vst [vmem:[#allocation2 + $0x720] sm:$0xff] %v7754_v0  ;;  %420 = vst [vmem:[#allocation2 + $0x1b0] sm:$0xff] %v7754_v0 }
  0xcb   : > { %421 = vst [vmem:[#allocation2 + $0x520] sm:$0xff] %v7754_v0  ;;  %422 = vst [vmem:[#allocation2 + $0x170] sm:$0xff] %v7754_v0 }
  0xcc   : > { %423 = vst [vmem:[#allocation2 + $0xb8] sm:$0xff] %v7754_v0  ;;  %424 = vst [vmem:[#allocation2 + $0x2d0] sm:$0xff] %v7754_v0 }
  0xcd   : > { %425 = vst [vmem:[#allocation2 + $0x9b8] sm:$0xff] %v7754_v0  ;;  %426 = vst [vmem:[#allocation2 + $0x258] sm:$0xff] %v7754_v0 }
  0xce   : > { %427 = vst [vmem:[#allocation2 + $0x1d8] sm:$0xff] %v7754_v0  ;;  %428 = vst [vmem:[#allocation2 + $0x618] sm:$0xff] %v7754_v0 }
  0xcf   : > { %429 = vst [vmem:[#allocation2 + $0x610] sm:$0xff] %v7754_v0  ;;  %430 = vst [vmem:[#allocation2 + $0x1c0] sm:$0xff] %v7754_v0 }
  0xd0   : > { %431 = vst [vmem:[#allocation2 + $0x248] sm:$0xff] %v7754_v0  ;;  %432 = vst [vmem:[#allocation2 + $0x828] sm:$0xff] %v7754_v0 }
  0xd1   : > { %433 = vst [vmem:[#allocation2 + $0x2e8] sm:$0xff] %v7754_v0  ;;  %434 = vst [vmem:[#allocation2 + $0x120] sm:$0xff] %v7754_v0 }
  0xd2   : > { %435 = vst [vmem:[#allocation2 + $0x1c8] sm:$0xff] %v7754_v0  ;;  %436 = vst [vmem:[#allocation2 + $0x8a8] sm:$0xff] %v7754_v0 }
  0xd3   : > { %437 = vst [vmem:[#allocation2 + $0x6c8] sm:$0xff] %v7754_v0  ;;  %438 = vst [vmem:[#allocation2 + $0x110] sm:$0xff] %v7754_v0 }
  0xd4   : > { %439 = vst [vmem:[#allocation2 + $0x1a8] sm:$0xff] %v7754_v0  ;;  %440 = vst [vmem:[#allocation2 + $0x3a0] sm:$0xff] %v7754_v0 }
  0xd5   : > { %441 = vst [vmem:[#allocation2 + $0x410] sm:$0xff] %v7754_v0  ;;  %442 = vst [vmem:[#allocation2 + $0x150] sm:$0xff] %v7754_v0 }
  0xd6   : > { %443 = vst [vmem:[#allocation2 + $0x830] sm:$0xff] %v7754_v0  ;;  %444 = vst [vmem:[#allocation2 + $0x5a0] sm:$0xff] %v7754_v0 }
  0xd7   : > { %445 = vst [vmem:[#allocation2 + $0x4d8] sm:$0xff] %v7754_v0  ;;  %446 = vst [vmem:[#allocation2 + $0x770] sm:$0xff] %v7754_v0 }
  0xd8   : > { %447 = vst [vmem:[#allocation2 + $0x608] sm:$0xff] %v7754_v0  ;;  %448 = vst [vmem:[#allocation2 + $0x688] sm:$0xff] %v7754_v0 }
  0xd9   : > { %449 = vst [vmem:[#allocation2 + $0x60] sm:$0xff] %v7754_v0  ;;  %450 = vst [vmem:[#allocation2 + $0x3f8] sm:$0xff] %v7754_v0 }
  0xda   : > { %451 = vst [vmem:[#allocation2 + $0x1e0] sm:$0xff] %v7754_v0  ;;  %452 = vst [vmem:[#allocation2 + $0x4c0] sm:$0xff] %v7754_v0 }
  0xdb   : > { %453 = vst [vmem:[#allocation2 + $0x9e0] sm:$0xff] %v7754_v0  ;;  %454 = vst [vmem:[#allocation2 + $0x450] sm:$0xff] %v7754_v0 }
  0xdc   : > { %455 = vst [vmem:[#allocation2 + $0x968] sm:$0xff] %v7754_v0  ;;  %456 = vst [vmem:[#allocation2 + $0x318] sm:$0xff] %v7754_v0 }
  0xdd   : > { %457 = vst [vmem:[#allocation2 + $0x6d8] sm:$0xff] %v7754_v0  ;;  %458 = vst [vmem:[#allocation2 + $0x4a0] sm:$0xff] %v7754_v0 }
  0xde   : > { %459 = vst [vmem:[#allocation2 + $0x8d0] sm:$0xff] %v7754_v0  ;;  %460 = vst [vmem:[#allocation2 + $0x38] sm:$0xff] %v7754_v0 }
  0xdf   : > { %461 = vst [vmem:[#allocation2 + $0x6e0] sm:$0xff] %v7754_v0  ;;  %462 = vst [vmem:[#allocation2 + $0x130] sm:$0xff] %v7754_v0 }
  0xe0   : > { %463 = vst [vmem:[#allocation2 + $0x660] sm:$0xff] %v7754_v0  ;;  %464 = vst [vmem:[#allocation2 + $0x88] sm:$0xff] %v7754_v0 }
  0xe1   : > { %465 = vst [vmem:[#allocation2 + $0x518] sm:$0xff] %v7754_v0  ;;  %466 = vst [vmem:[#allocation2 + $0x5e8] sm:$0xff] %v7754_v0 }
  0xe2   : > { %467 = vst [vmem:[#allocation2 + $0x8c0] sm:$0xff] %v7754_v0  ;;  %468 = vst [vmem:[#allocation2 + $0x4e8] sm:$0xff] %v7754_v0 }
  0xe3   : > { %469 = vst [vmem:[#allocation2 + $0x3c8] sm:$0xff] %v7754_v0  ;;  %470 = vst [vmem:[#allocation2 + $0x158] sm:$0xff] %v7754_v0 }
  0xe4   : > { %471 = vst [vmem:[#allocation2 + $0x788] sm:$0xff] %v7754_v0  ;;  %472 = vst [vmem:[#allocation2 + $0x860] sm:$0xff] %v7754_v0 }
  0xe5   : > { %473 = vst [vmem:[#allocation2 + $0x480] sm:$0xff] %v7754_v0  ;;  %474 = vst [vmem:[#allocation2 + $0x978] sm:$0xff] %v7754_v0 }
  0xe6   : > { %475 = vst [vmem:[#allocation2 + $0xe0] sm:$0xff] %v7754_v0  ;;  %476 = vst [vmem:[#allocation2 + $0xb0] sm:$0xff] %v7754_v0 }
  0xe7   : > { %477 = vst [vmem:[#allocation2 + $0x4a8] sm:$0xff] %v7754_v0  ;;  %478 = vst [vmem:[#allocation2 + $0x420] sm:$0xff] %v7754_v0 }
  0xe8   : > { %479 = vst [vmem:[#allocation2 + $0x588] sm:$0xff] %v7754_v0  ;;  %480 = vst [vmem:[#allocation2 + $0x8f0] sm:$0xff] %v7754_v0 }
  0xe9   : > { %481 = vst [vmem:[#allocation2 + $0x1a0] sm:$0xff] %v7754_v0  ;;  %482 = vst [vmem:[#allocation2 + $0xf0] sm:$0xff] %v7754_v0 }
  0xea   : > { %483 = vst [vmem:[#allocation2 + $0x7e0] sm:$0xff] %v7754_v0  ;;  %484 = vst [vmem:[#allocation2 + $0x2b0] sm:$0xff] %v7754_v0 }
  0xeb   : > { %485 = vst [vmem:[#allocation2 + $0x20] sm:$0xff] %v7754_v0  ;;  %486 = vst [vmem:[#allocation2 + $0x640] sm:$0xff] %v7754_v0 }
  0xec   : > { %487 = vst [vmem:[#allocation2 + $0x2c8] sm:$0xff] %v7754_v0  ;;  %488 = vst [vmem:[#allocation2 + $0x468] sm:$0xff] %v7754_v0 }
  0xed   : > { %489 = vst [vmem:[#allocation2 + $0x148] sm:$0xff] %v7754_v0  ;;  %490 = vst [vmem:[#allocation2 + $0x428] sm:$0xff] %v7754_v0 }
  0xee   : > { %491 = vst [vmem:[#allocation2 + $0x4f0] sm:$0xff] %v7754_v0  ;;  %492 = vst [vmem:[#allocation2 + $0x10] sm:$0xff] %v7754_v0 }
  0xef   : > { %493 = vst [vmem:[#allocation2 + $0x508] sm:$0xff] %v7754_v0  ;;  %494 = vst [vmem:[#allocation2 + $0x5b8] sm:$0xff] %v7754_v0 }
  0xf0   : > { %495 = vst [vmem:[#allocation2 + $0x948] sm:$0xff] %v7754_v0  ;;  %496 = vst [vmem:[#allocation2 + $0x3f0] sm:$0xff] %v7754_v0 }
  0xf1   : > { %497 = vst [vmem:[#allocation2 + $0x840] sm:$0xff] %v7754_v0  ;;  %498 = vst [vmem:[#allocation2 + $0x818] sm:$0xff] %v7754_v0 }
  0xf2   : > { %499 = vst [vmem:[#allocation2 + $0xc8] sm:$0xff] %v7754_v0  ;;  %500 = vst [vmem:[#allocation2 + $0x190] sm:$0xff] %v7754_v0 }
  0xf3   : > { %501 = vst [vmem:[#allocation2 + $0x338] sm:$0xff] %v7754_v0  ;;  %502 = vst [vmem:[#allocation2 + $0x858] sm:$0xff] %v7754_v0 }
  0xf4   : > { %503 = vst [vmem:[#allocation2 + $0x4b0] sm:$0xff] %v7754_v0  ;;  %504 = vst [vmem:[#allocation2 + $0x6b0] sm:$0xff] %v7754_v0 }
  0xf5   : > { %505 = vst [vmem:[#allocation2 + $0x3c0] sm:$0xff] %v7754_v0  ;;  %506 = vst [vmem:[#allocation2 + $0x220] sm:$0xff] %v7754_v0 }
  0xf6   : > { %507 = vst [vmem:[#allocation2 + $0x648] sm:$0xff] %v7754_v0  ;;  %508 = vst [vmem:[#allocation2 + $0x128] sm:$0xff] %v7754_v0 }
  0xf7   : > { %509 = vst [vmem:[#allocation2 + $0x668] sm:$0xff] %v7754_v0  ;;  %510 = vst [vmem:[#allocation2 + $0x448] sm:$0xff] %v7754_v0 }
  0xf8   : > { %511 = vst [vmem:[#allocation2 + $0xe8] sm:$0xff] %v7754_v0  ;;  %512 = vst [vmem:[#allocation2 + $0x238] sm:$0xff] %v7754_v0 }
  0xf9   : > { %513 = vst [vmem:[#allocation2 + $0x870] sm:$0xff] %v7754_v0  ;;  %514 = vst [vmem:[#allocation2 + $0x760] sm:$0xff] %v7754_v0 }
  0xfa   : > { %515 = vst [vmem:[#allocation2 + $0x990] sm:$0xff] %v7754_v0  ;;  %516 = vst [vmem:[#allocation2 + $0x680] sm:$0xff] %v7754_v0 }
  0xfb   : > { %517 = vst [vmem:[#allocation2 + $0x7a0] sm:$0xff] %v7754_v0  ;;  %518 = vst [vmem:[#allocation2 + $0x9e8] sm:$0xff] %v7754_v0 }
  0xfc   : > { %519 = vst [vmem:[#allocation2 + $0x510] sm:$0xff] %v7754_v0  ;;  %520 = vst [vmem:[#allocation2 + $0xd8] sm:$0xff] %v7754_v0 }
  0xfd   : > { %521 = vst [vmem:[#allocation2 + $0x50] sm:$0xff] %v7754_v0  ;;  %522 = vst [vmem:[#allocation2 + $0x5f8] sm:$0xff] %v7754_v0 }
  0xfe   : > { %523 = vst [vmem:[#allocation2 + $0x2a8] sm:$0xff] %v7754_v0  ;;  %524 = vst [vmem:[#allocation2 + $0x498] sm:$0xff] %v7754_v0 }
  0xff   : > { %525 = vst [vmem:[#allocation2 + $0x390] sm:$0xff] %v7754_v0  ;;  %526 = vst [vmem:[#allocation2 + $0x670] sm:$0xff] %v7754_v0 }
 0x100   : > { %527 = vst [vmem:[#allocation2 + $0x350] sm:$0xff] %v7754_v0  ;;  %528 = vst [vmem:[#allocation2 + $0x748] sm:$0xff] %v7754_v0 }
 0x101   : > { %529 = vst [vmem:[#allocation2 + $0x118] sm:$0xff] %v7754_v0  ;;  %530 = vst [vmem:[#allocation2 + $0x740] sm:$0xff] %v7754_v0 }
 0x102   : > { %531 = vst [vmem:[#allocation2 + $0x408] sm:$0xff] %v7754_v0  ;;  %532 = vst [vmem:[#allocation2 + $0x3b8] sm:$0xff] %v7754_v0 }
 0x103   : > { %533 = vst [vmem:[#allocation2 + $0x298] sm:$0xff] %v7754_v0  ;;  %534 = vst [vmem:[#allocation2 + $0x58] sm:$0xff] %v7754_v0 }
 0x104   : > { %535 = vst [vmem:[#allocation2 + $0x940] sm:$0xff] %v7754_v0  ;;  %536 = vst [vmem:[#allocation2 + $0x380] sm:$0xff] %v7754_v0 }
 0x105   : > { %537 = vst [vmem:[#allocation2 + $0x768] sm:$0xff] %v7754_v0  ;;  %538 = vst [vmem:[#allocation2 + $0x980] sm:$0xff] %v7754_v0 }
 0x106   : > { %539 = vst [vmem:[#allocation2 + $0xc0] sm:$0xff] %v7754_v0  ;;  %540 = vst [vmem:[#allocation2 + $0x5e0] sm:$0xff] %v7754_v0 }
 0x107   : > { %541 = vst [vmem:[#allocation2 + $0x180] sm:$0xff] %v7754_v0  ;;  %542 = vst [vmem:[#allocation2 + $0xa0] sm:$0xff] %v7754_v0 }
 0x108   : > { %543 = vst [vmem:[#allocation2 + $0x568] sm:$0xff] %v7754_v0  ;;  %544 = vst [vmem:[#allocation2 + $0x820] sm:$0xff] %v7754_v0 }
 0x109   : > { %545 = vst [vmem:[#allocation2 + $0x998] sm:$0xff] %v7754_v0  ;;  %546 = vst [vmem:[#allocation2 + $0x460] sm:$0xff] %v7754_v0 }
 0x10a   : > { %547 = vst [vmem:[#allocation2 + $0x210] sm:$0xff] %v7754_v0  ;;  %548 = vst [vmem:[#allocation2 + $0x458] sm:$0xff] %v7754_v0 }
 0x10b   : > { %549 = vst [vmem:[#allocation2 + $0x398] sm:$0xff] %v7754_v0  ;;  %550 = vst [vmem:[#allocation2 + $0x6c0] sm:$0xff] %v7754_v0 }
 0x10c   : > { %551 = vst [vmem:[#allocation2 + $0x1e8] sm:$0xff] %v7754_v0  ;;  %552 = vst [vmem:[#allocation2 + $0x5a8] sm:$0xff] %v7754_v0 }
 0x10d   : > { %553 = vst [vmem:[#allocation2 + $0x3e0] sm:$0xff] %v7754_v0  ;;  %554 = vst [vmem:[#allocation2 + $0x288] sm:$0xff] %v7754_v0 }
 0x10e   : > { %555 = vst [vmem:[#allocation2 + $0x340] sm:$0xff] %v7754_v0  ;;  %556 = vst [vmem:[#allocation2 + $0x728] sm:$0xff] %v7754_v0 }
 0x10f   : > { %557 = vst [vmem:[#allocation2 + $0x7d0] sm:$0xff] %v7754_v0  ;;  %558 = vst [vmem:[#allocation2 + $0x4f8] sm:$0xff] %v7754_v0 }
 0x110   : > { %559 = vst [vmem:[#allocation2 + $0x5c8] sm:$0xff] %v7754_v0  ;;  %560 = vst [vmem:[#allocation2 + $0x140] sm:$0xff] %v7754_v0 }
 0x111   : > { %561 = vst [vmem:[#allocation2 + $0x1f8] sm:$0xff] %v7754_v0  ;;  %562 = vst [vmem:[#allocation2 + $0x430] sm:$0xff] %v7754_v0 }
 0x112   : > { %563 = vst [vmem:[#allocation2 + $0x250] sm:$0xff] %v7754_v0  ;;  %564 = vst [vmem:[#allocation2 + $0x9f0] sm:$0xff] %v7754_v0 }
 0x113   : > { %565 = vst [vmem:[#allocation2 + $0x8c8] sm:$0xff] %v7754_v0  ;;  %566 = vst [vmem:[#allocation2 + $0x3d8] sm:$0xff] %v7754_v0 }
 0x114   : > { %567 = vst [vmem:[#allocation2 + $0x938] sm:$0xff] %v7754_v0  ;;  %568 = vst [vmem:[#allocation2 + $0x100] sm:$0xff] %v7754_v0 }
 0x115   : > { %569 = vst [vmem:[#allocation2 + $0xd0] sm:$0xff] %v7754_v0  ;;  %570 = vst [vmem:[#allocation2 + $0x418] sm:$0xff] %v7754_v0 }
 0x116   : > { %571 = vst [vmem:[#allocation2 + $0x988] sm:$0xff] %v7754_v0  ;;  %572 = vst [vmem:[#allocation2 + $0x9b0] sm:$0xff] %v7754_v0 }
 0x117   : > { %573 = vst [vmem:[#allocation2 + $0x7a8] sm:$0xff] %v7754_v0  ;;  %574 = vst [vmem:[#allocation2 + $0x198] sm:$0xff] %v7754_v0 }
 0x118   : > { %575 = vst [vmem:[#allocation2 + $0x630] sm:$0xff] %v7754_v0  ;;  %576 = vst [vmem:[#allocation2 + $0x208] sm:$0xff] %v7754_v0 }
 0x119   : > { %577 = vst [vmem:[#allocation2 + $0x8d8] sm:$0xff] %v7754_v0  ;;  %578 = vst [vmem:[#allocation2 + $0x40] sm:$0xff] %v7754_v0 }
 0x11a   : > { %579 = vst [vmem:[#allocation2 + $0x1f0] sm:$0xff] %v7754_v0  ;;  %580 = vst [vmem:[#allocation2 + $0x308] sm:$0xff] %v7754_v0 }
 0x11b   : > { %581 = vst [vmem:[#allocation2 + $0x6a0] sm:$0xff] %v7754_v0  ;;  %582 = vst [vmem:[#allocation2 + $0x578] sm:$0xff] %v7754_v0 }
 0x11c   : > { %583 = vst [vmem:[#allocation2 + $0x698] sm:$0xff] %v7754_v0  ;;  %584 = vst [vmem:[#allocation2 + $0x478] sm:$0xff] %v7754_v0 }
 0x11d   : > { %585 = vst [vmem:[#allocation2 + $0x9a8] sm:$0xff] %v7754_v0  ;;  %586 = vst [vmem:[#allocation2 + $0x700] sm:$0xff] %v7754_v0 }
 0x11e   : > { %587 = vst [vmem:[#allocation2 + $0x8e8] sm:$0xff] %v7754_v0  ;;  %588 = vst [vmem:[#allocation2 + $0x658] sm:$0xff] %v7754_v0 }
 0x11f   : > { %589 = vst [vmem:[#allocation2 + $0x178] sm:$0xff] %v7754_v0  ;;  %590 = vst [vmem:[#allocation2 + $0x970] sm:$0xff] %v7754_v0 }
 0x120   : > { %591 = vst [vmem:[#allocation2 + $0x348] sm:$0xff] %v7754_v0  ;;  %592 = vst [vmem:[#allocation2 + $0x168] sm:$0xff] %v7754_v0 }
 0x121   : > { %593 = vst [vmem:[#allocation2 + $0x6b8] sm:$0xff] %v7754_v0  ;;  %594 = vst [vmem:[#allocation2 + $0x560] sm:$0xff] %v7754_v0 }
 0x122   : > { %595 = vst [vmem:[#allocation2 + $0x1d0] sm:$0xff] %v7754_v0  ;;  %596 = vst [vmem:[#allocation2 + $0x400] sm:$0xff] %v7754_v0 }
 0x123   : > { %597 = vst [vmem:[#allocation2 + $0x1b8] sm:$0xff] %v7754_v0  ;;  %598 = vst [vmem:[#allocation2 + $0x2f0] sm:$0xff] %v7754_v0 }
 0x124   : > { %599 = vst [vmem:[#allocation2 + $0x30] sm:$0xff] %v7754_v0  ;;  %600 = vst [vmem:[#allocation2 + $0x8] sm:$0xff] %v7754_v0 }
 0x125   : > { %601 = vst [vmem:[#allocation2 + $0x710] sm:$0xff] %v7754_v0  ;;  %602 = vst [vmem:[#allocation2 + $0x160] sm:$0xff] %v7754_v0 }
 0x126   : > { %603 = vst [vmem:[#allocation2 + $0x280] sm:$0xff] %v7754_v0  ;;  %604 = vst [vmem:[#allocation2 + $0x500] sm:$0xff] %v7754_v0 }
 0x127   : > { %605 = vst [vmem:[#allocation2 + $0x218] sm:$0xff] %v7754_v0  ;;  %606 = vst [vmem:[#allocation2 + $0x550] sm:$0xff] %v7754_v0 }
 0x128   : > { %607 = vst [vmem:[#allocation2 + $0x90] sm:$0xff] %v7754_v0  ;;  %608 = vst [vmem:[#allocation2 + $0x6f0] sm:$0xff] %v7754_v0 }
 0x129   : > { %609 = vst [vmem:[#allocation2 + $0x718] sm:$0xff] %v7754_v0  ;;  %610 = vst [vmem:[#allocation2 + $0x928] sm:$0xff] %v7754_v0 }
 0x12a   : > { %611 = vst [vmem:[#allocation2 + $0x368] sm:$0xff] %v7754_v0  ;;  %612 = vst [vmem:[#allocation2 + $0x230] sm:$0xff] %v7754_v0 }
 0x12b   : > { %613 = vst [vmem:[#allocation2 + $0x108] sm:$0xff] %v7754_v0  ;;  %614 = vst [vmem:[#allocation2 + $0x18] sm:$0xff] %v7754_v0 }
 0x12c   : > { %615 = vst [vmem:[#allocation2 + $0x7c0] sm:$0xff] %v7754_v0  ;;  %616 = vst [vmem:[#allocation2 + $0x4e0] sm:$0xff] %v7754_v0 }
 0x12d   : > { %617 = vst [vmem:[#allocation2 + $0x188] sm:$0xff] %v7754_v0  ;;  %618 = vst [vmem:[#allocation2 + $0x2b8] sm:$0xff] %v7754_v0 }
 0x12e   : > { %619 = vst [vmem:[#allocation2 + $0x6d0] sm:$0xff] %v7754_v0  ;;  %620 = vst [vmem:[#allocation2 + $0x638] sm:$0xff] %v7754_v0 }
 0x12f   : > { %621 = vst [vmem:[#allocation2 + $0x590] sm:$0xff] %v7754_v0  ;;  %622 = vst [vmem:[#allocation2 + $0x360] sm:$0xff] %v7754_v0 }
 0x130   : > { %623 = vst [vmem:[#allocation2 + $0x200] sm:$0xff] %v7754_v0  ;;  %624 = vst [vmem:[#allocation2 + $0x540] sm:$0xff] %v7754_v0 }
 0x131   : > { %625 = vst [vmem:[#allocation2 + $0x3d0] sm:$0xff] %v7754_v0  ;;  %626 = vst [vmem:[#allocation2 + $0x268] sm:$0xff] %v7754_v0 }
 0x132   : > { %627 = vst [vmem:[#allocation2 + $0x850] sm:$0xff] %v7754_v0  ;;  %628 = vst [vmem:[#allocation2 + $0x48] sm:$0xff] %v7754_v0 }
 0x133   : > { %629 = vst [vmem:[#allocation2 + $0x138] sm:$0xff] %v7754_v0  ;;  %630 = vst [vmem:[#allocation2 + $0x8b8] sm:$0xff] %v7754_v0 }
 0x134   : > { %631 = vst [vmem:[#allocation2 + $0x290] sm:$0xff] %v7754_v0  ;;  %632 = vst [vmem:[#allocation2 + $0x260] sm:$0xff] %v7754_v0 }
 0x135   : > { %633 = vst [vmem:[#allocation2 + $0x470] sm:$0xff] %v7754_v0  ;;  %634 = vst [vmem:[#allocation2 + $0x528] sm:$0xff] %v7754_v0 }
 0x136   : > { %635 = vst [vmem:[#allocation2 + $0x330] sm:$0xff] %v7754_v0  ;;  %636 = vst [vmem:[#allocation2 + $0x958] sm:$0xff] %v7754_v0 }
 0x137   : > { %637 = vst [vmem:[#allocation2 + $0x68] sm:$0xff] %v7754_v0  ;;  %638 = vst [vmem:[#allocation2 + $0x328] sm:$0xff] %v7754_v0 }
 0x138   : > { %639 = vst [vmem:[#allocation2 + $0x4b8] sm:$0xff] %v7754_v0  ;;  %640 = vst [vmem:[#allocation2 + $0x790] sm:$0xff] %v7754_v0 }
 0x139 PF: > { %v7298_v1 = vld [vmem:[%s8004_s12 + $0x11c] ss:$20 sps:$4 sm:$0xff]   ;;  %v7300_v2 = vld [vmem:[%s8004_s12 + $0x118] ss:$20 sps:$4 sm:$0xff]   ;;  %v7755_v3 = vmov 0   ;;  %v961_v18 = vld [vmem:[%s7996_s9] sm:$0xff] }
 0x13a   : > { %1345 = vmatprep.mubr.bf16.mxu0 %v7755_v3  ;;  %1585 = vmatprep.mubr.bf16.mxu1 %v7755_v3  ;;  %v7301_v4 = vld [vmem:[%s8004_s12 + $0xf4] ss:$20 sps:$4 sm:$0xff]   ;;  %v7303_v5 = vld [vmem:[%s8004_s12 + $0xf0] ss:$20 sps:$4 sm:$0xff]   ;;  %v7304_v6 = vld [vmem:[%s8004_s12 + $0xcc] ss:$20 sps:$4 sm:$0xff]  }
 0x13b   : > { %1313 = vmatprep.subr.bf16.mxu0 %v7298_v1  ;;  %7125 = vmatprep.subr.bf16.mxu1 %v7298_v1  ;;  %v7306_v7 = vld [vmem:[%s8004_s12 + $0xc8] ss:$20 sps:$4 sm:$0xff]   ;;  %v7307_v8 = vld [vmem:[%s8004_s12 + $0xa4] ss:$20 sps:$4 sm:$0xff]   ;;  %v7309_v9 = vld [vmem:[%s8004_s12 + $0xa0] ss:$20 sps:$4 sm:$0xff]  }
 0x13c   : > { %1314 = vmatpush1.bf16.msra.mxu0 %v7300_v2  ;;  %7133 = vmatpush1.bf16.msra.mxu1 %v7300_v2  ;;  %v7310_v10 = vld [vmem:[%s8004_s12 + $0x7c] ss:$20 sps:$4 sm:$0xff]   ;;  %v7312_v11 = vld [vmem:[%s8004_s12 + $0x78] ss:$20 sps:$4 sm:$0xff]   ;;  %v7313_v12 = vld [vmem:[%s8004_s12 + $0x54] ss:$20 sps:$4 sm:$0xff]  }
 0x13d   : > { %1315 = vmatprep.subr.bf16.mxu0 %v7301_v4  ;;  %7126 = vmatprep.subr.bf16.mxu1 %v7301_v4  ;;  %v7315_v13 = vld [vmem:[%s8004_s12 + $0x50] ss:$20 sps:$4 sm:$0xff]   ;;  %v7316_v14 = vld [vmem:[%s8004_s12 + $0x2c] ss:$20 sps:$4 sm:$0xff]   ;;  %v7318_v15 = vld [vmem:[%s8004_s12 + $0x28] ss:$20 sps:$4 sm:$0xff]  }
 0x13e   : > { %v7319_v16 = vld [vmem:[%s8004_s12 + $0x4] ss:$20 sps:$4 sm:$0xff]   ;;  %v7321_v17 = vld [vmem:[%s8004_s12] ss:$20 sps:$4 sm:$0xff]   ;;  %v962_v19 = vld [vmem:[%s7996_s9 + $0x8] sm:$0xff]  ;;  %p6611_p9 = scmp.ne.s32.totalorder %s7727_s24, 4 }
 0x13f   : > { %v1009_v20 = vld [vmem:[%s7996_s9 + $0x180] sm:$0xff]  ;;  %v1010_v21 = vld [vmem:[%s7996_s9 + $0x188] sm:$0xff]  ;;  %v8368_v24 = vpack.c.bf16 %v962_v19, %v961_v18  ;;  %v963_v27 = vld [vmem:[%s7996_s9 + $0x10] sm:$0xff] }
 0x140   : > { %1316 = vmatpush1.bf16.msra.mxu0 %v7303_v5  ;;  %7134 = vmatpush1.bf16.msra.mxu1 %v7303_v5  ;;  %v7324_v22 = vld [vmem:[%s8004_s12 + $0x124] ss:$20 sps:$4 sm:$0xff]   ;;  %v7325_v23 = vld [vmem:[%s8004_s12 + $0x128] ss:$20 sps:$4 sm:$0xff]   ;;  %v8370_v25 = vpack.c.bf16 %v1010_v21, %v1009_v20  ;;  %v7322_v26 = vld [vmem:[%s8004_s12 + $0x120] ss:$20 sps:$4 sm:$0xff]  }
 0x141   : > { %1317 = vmatprep.subr.bf16.mxu0 %v7304_v6  ;;  %7127 = vmatprep.subr.bf16.mxu1 %v7304_v6  ;;  %v7328_v28 = vld [vmem:[%s8004_s12 + $0xfc] ss:$20 sps:$4 sm:$0xff]   ;;  %v7335_v29 = vld [vmem:[%s8004_s12 + $0x100] ss:$20 sps:$4 sm:$0xff]   ;;  %v7326_v33 = vld [vmem:[%s8004_s12 + $0xf8] ss:$20 sps:$4 sm:$0xff]  }
 0x142   : > { %v964_v30 = vld [vmem:[%s7996_s9 + $0x18] sm:$0xff]  ;;  %v1011_v31 = vld [vmem:[%s7996_s9 + $0x190] sm:$0xff]  ;;  %v7334_v39 = vld [vmem:[%s8004_s12 + $0xac] ss:$20 sps:$4 sm:$0xff]  }
 0x143   : > { %v1012_v32 = vld [vmem:[%s7996_s9 + $0x198] sm:$0xff]  ;;  %v7331_v34 = vld [vmem:[%s8004_s12 + $0xd4] ss:$20 sps:$4 sm:$0xff]   ;;  %v8386_v36 = vpack.c.bf16 %v964_v30, %v963_v27  ;;  %v7329_v38 = vld [vmem:[%s8004_s12 + $0xd0] ss:$20 sps:$4 sm:$0xff]  }
 0x144   : > { %1318 = vmatpush1.bf16.msra.mxu0 %v7306_v7  ;;  %7135 = vmatpush1.bf16.msra.mxu1 %v7306_v7  ;;  %v7345_v35 = vld [vmem:[%s8004_s12 + $0xd8] ss:$20 sps:$4 sm:$0xff]   ;;  %v8388_v37 = vpack.c.bf16 %v1012_v32, %v1011_v31  ;;  %v7349_v40 = vld [vmem:[%s8004_s12 + $0xb0] ss:$20 sps:$4 sm:$0xff]   ;;  %v7332_v45 = vld [vmem:[%s8004_s12 + $0xa8] ss:$20 sps:$4 sm:$0xff]  }
 0x145   : > { %1319 = vmatprep.subr.bf16.mxu0 %v7307_v8  ;;  %7128 = vmatprep.subr.bf16.mxu1 %v7307_v8  ;;  %v965_v41 = vld [vmem:[%s7996_s9 + $0x20] sm:$0xff]  ;;  %v966_v42 = vld [vmem:[%s7996_s9 + $0x28] sm:$0xff]  ;;  %v7341_v51 = vld [vmem:[%s8004_s12 + $0x5c] ss:$20 sps:$4 sm:$0xff]  }
 0x146   : > { %v1013_v43 = vld [vmem:[%s7996_s9 + $0x1a0] sm:$0xff]  ;;  %v1014_v44 = vld [vmem:[%s7996_s9 + $0x1a8] sm:$0xff]  ;;  %v8404_v48 = vpack.c.bf16 %v966_v42, %v965_v41  ;;  %v967_v53 = vld [vmem:[%s7996_s9 + $0x30] sm:$0xff] }
 0x147   : > { %v7338_v46 = vld [vmem:[%s8004_s12 + $0x84] ss:$20 sps:$4 sm:$0xff]   ;;  %v7350_v47 = vld [vmem:[%s8004_s12 + $0x88] ss:$20 sps:$4 sm:$0xff]   ;;  %v8406_v49 = vpack.c.bf16 %v1014_v44, %v1013_v43  ;;  %v7336_v50 = vld [vmem:[%s8004_s12 + $0x80] ss:$20 sps:$4 sm:$0xff]  }
 0x148   : > { %1320 = vmatpush1.bf16.msra.mxu0 %v7309_v9  ;;  %7136 = vmatpush1.bf16.msra.mxu1 %v7309_v9  ;;  %v7351_v52 = vld [vmem:[%s8004_s12 + $0x60] ss:$20 sps:$4 sm:$0xff]   ;;  %v968_v54 = vld [vmem:[%s7996_s9 + $0x38] sm:$0xff]  ;;  %v7342_v62 = vld [vmem:[%s8004_s12 + $0x30] ss:$20 sps:$4 sm:$0xff]  }
 0x149   : > { %1321 = vmatprep.subr.bf16.mxu0 %v7310_v10  ;;  %7129 = vmatprep.subr.bf16.mxu1 %v7310_v10  ;;  %v1015_v55 = vld [vmem:[%s7996_s9 + $0x1b0] sm:$0xff]  ;;  %v1016_v56 = vld [vmem:[%s7996_s9 + $0x1b8] sm:$0xff]  ;;  %v8422_v60 = vpack.c.bf16 %v968_v54, %v967_v53  ;;  %v7348_v63 = vld [vmem:[%s8004_s12 + $0xc] ss:$20 sps:$4 sm:$0xff]  }
 0x14a   : > { %v7339_v57 = vld [vmem:[%s8004_s12 + $0x58] ss:$20 sps:$4 sm:$0xff]   ;;  %v7344_v58 = vld [vmem:[%s8004_s12 + $0x34] ss:$20 sps:$4 sm:$0xff]   ;;  %v8424_v61 = vpack.c.bf16 %v1016_v56, %v1015_v55  ;;  %v969_v0 = vld [vmem:[%s7996_s9 + $0x40] sm:$0xff] }
 0x14b   : > { %v7352_v59 = vld [vmem:[%s8004_s12 + $0x38] ss:$20 sps:$4 sm:$0xff]   ;;  %v1017_v2 = vld [vmem:[%s7996_s9 + $0x1c0] sm:$0xff]  ;;  %v7346_v5 = vld [vmem:[%s8004_s12 + $0x8] ss:$20 sps:$4 sm:$0xff]  }
 0x14c   : > { %1322 = vmatpush1.bf16.msra.mxu0 %v7312_v11  ;;  %7137 = vmatpush1.bf16.msra.mxu1 %v7312_v11  ;;  %v970_v1 = vld [vmem:[%s7996_s9 + $0x48] sm:$0xff]  ;;  %v971_v8 = vld [vmem:[%s7996_s9 + $0x50] sm:$0xff]  ;;  %v972_v9 = vld [vmem:[%s7996_s9 + $0x58] sm:$0xff] }
 0x14d   : > { %1323 = vmatprep.subr.bf16.mxu0 %v7313_v12  ;;  %7130 = vmatprep.subr.bf16.mxu1 %v7313_v12  ;;  %v1018_v4 = vld [vmem:[%s7996_s9 + $0x1c8] sm:$0xff]  ;;  %v8437_v6 = vpack.c.bf16 %v970_v1, %v969_v0  ;;  %v1019_v10 = vld [vmem:[%s7996_s9 + $0x1d0] sm:$0xff]  ;;  %v1020_v11 = vld [vmem:[%s7996_s9 + $0x1d8] sm:$0xff]  ;;  %v8449_v12 = vpack.c.bf16 %v972_v9, %v971_v8 }
 0x14e   : > { %v8439_v7 = vpack.c.bf16 %v1018_v4, %v1017_v2  ;;  %v1022_v18 = vld [vmem:[%s7996_s9 + $0x1e8] sm:$0xff]  ;;  %v975_v21 = vld [vmem:[%s7996_s9 + $0x70] sm:$0xff]  ;;  %v984_v41 = vld [vmem:[%s7996_s9 + $0xb8] sm:$0xff] }
 0x14f   : > { %v978_v30 = vld [vmem:[%s7996_s9 + $0x88] sm:$0xff]  ;;  %v979_v32 = vld [vmem:[%s7996_s9 + $0x90] sm:$0xff]  ;;  %v985_v43 = vld [vmem:[%s7996_s9 + $0xc0] sm:$0xff] }
 0x150   : > { %1324 = vmatpush1.bf16.msra.mxu0 %v7315_v13  ;;  %7138 = vmatpush1.bf16.msra.mxu1 %v7315_v13  ;;  %v8451_v13 = vpack.c.bf16 %v1020_v11, %v1019_v10  ;;  %v986_v44 = vld [vmem:[%s7996_s9 + $0xc8] sm:$0xff]  ;;  %v991_v54 = vld [vmem:[%s7996_s9 + $0xf0] sm:$0xff]  ;;  %v992_v55 = vld [vmem:[%s7996_s9 + $0xf8] sm:$0xff] }
 0x151   : > { %1325 = vmatprep.subr.bf16.mxu0 %v7316_v14  ;;  %7131 = vmatprep.subr.bf16.mxu1 %v7316_v14  ;;  %v973_v14 = vld [vmem:[%s7996_s9 + $0x60] sm:$0xff]  ;;  %v8540_v56 = vpack.c.bf16 %v992_v55, %v991_v54  ;;  %v998_v2 = vld [vmem:[%s7996_s9 + $0x128] sm:$0xff]  ;;  %v1000_v8 = vld [vmem:[%s7996_s9 + $0x138] sm:$0xff] }
 0x152   : > { %v997_v1 = vld [vmem:[%s7996_s9 + $0x120] sm:$0xff]  ;;  %v1002_v11 = vld [vmem:[%s7996_s9 + $0x148] sm:$0xff] }
 0x153   : > { %v8564_v4 = vpack.c.bf16 %v998_v2, %v997_v1  ;;  %v1001_v10 = vld [vmem:[%s7996_s9 + $0x140] sm:$0xff]  ;;  %v651_v2 = vld [vmem:[#allocation2 + $0x750] sm:$0xff] }
 0x154   : > { %1326 = vmatpush1.bf16.msra.mxu0 %v7318_v15  ;;  %7139 = vmatpush1.bf16.msra.mxu1 %v7318_v15  ;;  %v7353_v15 = vld [vmem:[%s8004_s12 + $0x10] ss:$20 sps:$4 sm:$0xff]  }
 0x155   : > { %1327 = vmatprep.subr.bf16.mxu0 %v7319_v16  ;;  %7132 = vmatprep.subr.bf16.mxu1 %v7319_v16  ;;  %v974_v16 = vld [vmem:[%s7996_s9 + $0x68] sm:$0xff] }
 0x156   : > { %v8462_v19 = vpack.c.bf16 %v974_v16, %v973_v14  ;;  %v8580_v14 = vpack.c.bf16 %v1002_v11, %v1001_v10  ;;  %v1004_v16 = vld [vmem:[%s7996_s9 + $0x158] sm:$0xff] }
 0x158   : > { %1328 = vmatpush1.bf16.msra.mxu0 %v7321_v17  ;;  %7140 = vmatpush1.bf16.msra.mxu1 %v7321_v17  ;;  %v1021_v17 = vld [vmem:[%s7996_s9 + $0x1e0] sm:$0xff] }
 0x159   : > { %1666 = vmatprep.subr.bf16.mxu1 %v7324_v22  ;;  %7045 = vmatprep.subr.bf16.mxu0 %v7325_v23  ;;  %v8464_v20 = vpack.c.bf16 %v1022_v18, %v1021_v17  ;;  %v976_v22 = vld [vmem:[%s7996_s9 + $0x78] sm:$0xff]  ;;  %v1005_v18 = vld [vmem:[%s7996_s9 + $0x160] sm:$0xff] }
 0x15a   : > { %v8474_v27 = vpack.c.bf16 %v976_v22, %v975_v21  ;;  %v1006_v21 = vld [vmem:[%s7996_s9 + $0x168] sm:$0xff] }
 0x15b   : > { %1346 = vmatmul.mubr.bf16.vlgmr.msra.gmra.mxu0 %v8368_v24  ;;  %1586 = vmatmul.mubr.bf16.vlgmr.msra.gmra.mxu1 %v8370_v25  ;;  %v8596_v22 = vpack.c.bf16 %v1006_v21, %v1005_v18 }
 0x15c   : > { %1667 = vmatpush1.bf16.msra.mxu1 %v7322_v26  ;;  %7046 = vmatpush3.bf16.msra.mxu0 %v7325_v23  ;;  %v1023_v23 = vld [vmem:[%s7996_s9 + $0x1f0] sm:$0xff]  ;;  %v1024_v26 = vld [vmem:[%s7996_s9 + $0x1f8] sm:$0xff] }
 0x15d   : > { %1355 = vmatprep.mubr.bf16.mxu0 %v7755_v3  ;;  %1595 = vmatprep.mubr.bf16.mxu1 %v7755_v3 }
 0x15e   : > { %1668 = vmatprep.subr.bf16.mxu1 %v7328_v28  ;;  %7047 = vmatprep.subr.bf16.mxu0 %v7335_v29  ;;  %v8476_v28 = vpack.c.bf16 %v1024_v26, %v1023_v23  ;;  %v1007_v23 = vld [vmem:[%s7996_s9 + $0x170] sm:$0xff]  ;;  %v1008_v26 = vld [vmem:[%s7996_s9 + $0x178] sm:$0xff] }
 0x160   : > { %1669 = vmatpush1.bf16.msra.mxu1 %v7326_v33  ;;  %7048 = vmatpush3.bf16.msra.mxu0 %v7335_v29  ;;  %v977_v29 = vld [vmem:[%s7996_s9 + $0x80] sm:$0xff]  ;;  %v980_v33 = vld [vmem:[%s7996_s9 + $0x98] sm:$0xff] }
 0x161   : > { %1670 = vmatprep.subr.bf16.mxu1 %v7331_v34  ;;  %7049 = vmatprep.subr.bf16.mxu0 %v7345_v35  ;;  %v8484_v31 = vpack.c.bf16 %v978_v30, %v977_v29  ;;  %v8492_v34 = vpack.c.bf16 %v980_v33, %v979_v32  ;;  %v8604_v29 = vpack.c.bf16 %v1008_v26, %v1007_v23  ;;  %v641_v30 = vld [vmem:[#allocation2 + $0x4c8] sm:$0xff]  ;;  %v881_v32 = vld [vmem:[#allocation2 + $0x1f8] sm:$0xff] }
 0x163   : > { %1356 = vmatmul.mubr.bf16.gmra.mxu0 %v8386_v36  ;;  %1596 = vmatmul.mubr.bf16.gmra.mxu1 %v8388_v37 }
 0x164   : > { %1365 = vmatprep.mubr.bf16.mxu0 %v7755_v3  ;;  %1605 = vmatprep.mubr.bf16.mxu1 %v7755_v3 }
 0x165   : > { %1671 = vmatpush1.bf16.msra.mxu1 %v7329_v38  ;;  %7050 = vmatpush3.bf16.msra.mxu0 %v7345_v35  ;;  %v981_v35 = vld [vmem:[%s7996_s9 + $0xa0] sm:$0xff]  ;;  %v982_v38 = vld [vmem:[%s7996_s9 + $0xa8] sm:$0xff] }
 0x166   : > { %1672 = vmatprep.subr.bf16.mxu1 %v7334_v39  ;;  %7051 = vmatprep.subr.bf16.mxu0 %v7349_v40  ;;  %v8500_v39 = vpack.c.bf16 %v982_v38, %v981_v35  ;;  %v642_v38 = vld [vmem:[#allocation2 + $0x808] sm:$0xff] }
 0x169   : > { %1673 = vmatpush1.bf16.msra.mxu1 %v7332_v45  ;;  %7052 = vmatpush3.bf16.msra.mxu0 %v7349_v40  ;;  %v983_v40 = vld [vmem:[%s7996_s9 + $0xb0] sm:$0xff]  ;;  %v8516_v45 = vpack.c.bf16 %v986_v44, %v985_v43 }
 0x16a   : > { %1674 = vmatprep.subr.bf16.mxu1 %v7338_v46  ;;  %7053 = vmatprep.subr.bf16.mxu0 %v7350_v47  ;;  %v8508_v42 = vpack.c.bf16 %v984_v41, %v983_v40  ;;  %v987_v46 = vld [vmem:[%s7996_s9 + $0xd0] sm:$0xff] }
 0x16b   : > { %1366 = vmatmul.mubr.bf16.gmra.mxu0 %v8404_v48  ;;  %1606 = vmatmul.mubr.bf16.gmra.mxu1 %v8406_v49  ;;  %v882_v40 = vld [vmem:[#allocation2 + $0x430] sm:$0xff] }
 0x16c   : > { %1375 = vmatprep.mubr.bf16.mxu0 %v7755_v3  ;;  %1615 = vmatprep.mubr.bf16.mxu1 %v7755_v3 }
 0x16d   : > { %1675 = vmatpush1.bf16.msra.mxu1 %v7336_v50  ;;  %7054 = vmatpush3.bf16.msra.mxu0 %v7350_v47  ;;  %v988_v47 = vld [vmem:[%s7996_s9 + $0xd8] sm:$0xff] }
 0x16e   : > { %1676 = vmatprep.subr.bf16.mxu1 %v7341_v51  ;;  %7055 = vmatprep.subr.bf16.mxu0 %v7351_v52  ;;  %v8524_v50 = vpack.c.bf16 %v988_v47, %v987_v46  ;;  %v989_v51 = vld [vmem:[%s7996_s9 + $0xe0] sm:$0xff]  ;;  %v646_v47 = vld [vmem:[#allocation2 + $0x438] sm:$0xff] }
 0x171   : > { %1677 = vmatpush1.bf16.msra.mxu1 %v7339_v57  ;;  %7056 = vmatpush3.bf16.msra.mxu0 %v7351_v52  ;;  %v990_v52 = vld [vmem:[%s7996_s9 + $0xe8] sm:$0xff]  ;;  %v993_v57 = vld [vmem:[%s7996_s9 + $0x100] sm:$0xff] }
 0x172   : > { %1678 = vmatprep.subr.bf16.mxu1 %v7344_v58  ;;  %7057 = vmatprep.subr.bf16.mxu0 %v7352_v59  ;;  %v8532_v53 = vpack.c.bf16 %v990_v52, %v989_v51  ;;  %v994_v58 = vld [vmem:[%s7996_s9 + $0x108] sm:$0xff] }
 0x173   : > { %1376 = vmatmul.mubr.bf16.gmra.mxu0 %v8422_v60  ;;  %1616 = vmatmul.mubr.bf16.gmra.mxu1 %v8424_v61 }
 0x174   : > { %1385 = vmatprep.mubr.bf16.mxu0 %v7755_v3  ;;  %1625 = vmatprep.mubr.bf16.mxu1 %v7755_v3 }
 0x175   : > { %1679 = vmatpush1.bf16.msra.mxu1 %v7342_v62  ;;  %7058 = vmatpush3.bf16.msra.mxu0 %v7352_v59  ;;  %v8548_v59 = vpack.c.bf16 %v994_v58, %v993_v57  ;;  %v995_v62 = vld [vmem:[%s7996_s9 + $0x110] sm:$0xff]  ;;  %v647_v57 = vld [vmem:[#allocation2 + $0x8f8] sm:$0xff] }
 0x176   : > { %1680 = vmatprep.subr.bf16.mxu1 %v7348_v63  ;;  %7059 = vmatprep.subr.bf16.mxu0 %v7353_v15  ;;  %v996_v63 = vld [vmem:[%s7996_s9 + $0x118] sm:$0xff] }
 0x177   : > { %v8556_v0 = vpack.c.bf16 %v996_v63, %v995_v62 }
 0x179   : > { %1681 = vmatpush1.bf16.msra.mxu1 %v7346_v5  ;;  %7060 = vmatpush3.bf16.msra.mxu0 %v7353_v15  ;;  %v999_v5 = vld [vmem:[%s7996_s9 + $0x130] sm:$0xff] }
 0x17a   : > { %v8572_v9 = vpack.c.bf16 %v1000_v8, %v999_v5  ;;  %v1003_v15 = vld [vmem:[%s7996_s9 + $0x150] sm:$0xff] }
 0x17b   : > { %1386 = vmatmul.mubr.bf16.gmra.mxu0 %v8437_v6  ;;  %1626 = vmatmul.mubr.bf16.gmra.mxu1 %v8439_v7  ;;  %v8588_v17 = vpack.c.bf16 %v1004_v16, %v1003_v15  ;;  %v652_v15 = vld [vmem:[#allocation2 + $0x300] sm:$0xff]  ;;  %v892_v16 = vld [vmem:[#allocation2 + $0x9b0] sm:$0xff] }
 0x17c   : > { %1395 = vmatprep.mubr.bf16.mxu0 %v7755_v3  ;;  %1635 = vmatprep.mubr.bf16.mxu1 %v7755_v3 }
 0x183   : > { %1396 = vmatmul.mubr.bf16.gmra.mxu0 %v8449_v12  ;;  %1636 = vmatmul.mubr.bf16.gmra.mxu1 %v8451_v13 }
 0x184   : > { %1405 = vmatprep.mubr.bf16.mxu0 %v7755_v3  ;;  %1645 = vmatprep.mubr.bf16.mxu1 %v7755_v3 }
 0x18b   : > { %1406 = vmatmul.mubr.bf16.gmra.mxu0 %v8462_v19  ;;  %1646 = vmatmul.mubr.bf16.gmra.mxu1 %v8464_v20 }
 0x18c   : > { %1415 = vmatprep.mubr.bf16.mxu0 %v7755_v3  ;;  %1655 = vmatprep.mubr.bf16.mxu1 %v7755_v3 }
 0x193   : > { %1416 = vmatmul.mubr.bf16.gmra.mxu0 %v8474_v27  ;;  %1656 = vmatmul.mubr.bf16.gmra.mxu1 %v8476_v28 }
 0x194   : > { %1425 = vmatprep.mubr.bf16.mxu0 %v7755_v3  ;;  %1698 = vmatprep.mubr.bf16.mxu1 %v7755_v3 }
 0x19b   : > { %1426 = vmatmul.mubr.bf16.gmra.mxu0 %v8484_v31  ;;  %1699 = vmatmul.mubr.bf16.vlgmr.msra.gmra.mxu1 %v8368_v24 }
 0x19c   : > { %1435 = vmatprep.mubr.bf16.mxu0 %v7755_v3  ;;  %1708 = vmatprep.mubr.bf16.mxu1 %v7755_v3 }
 0x1a3   : > { %1436 = vmatmul.mubr.bf16.gmra.mxu0 %v8492_v34  ;;  %1709 = vmatmul.mubr.bf16.gmra.mxu1 %v8386_v36 }
 0x1a4   : > { %1445 = vmatprep.mubr.bf16.mxu0 %v7755_v3  ;;  %1718 = vmatprep.mubr.bf16.mxu1 %v7755_v3 }
 0x1ab   : > { %1446 = vmatmul.mubr.bf16.gmra.mxu0 %v8500_v39  ;;  %1719 = vmatmul.mubr.bf16.gmra.mxu1 %v8404_v48 }
 0x1ac   : > { %1455 = vmatprep.mubr.bf16.mxu0 %v7755_v3  ;;  %1728 = vmatprep.mubr.bf16.mxu1 %v7755_v3 }
 0x1b3   : > { %1456 = vmatmul.mubr.bf16.gmra.mxu0 %v8508_v42  ;;  %1729 = vmatmul.mubr.bf16.gmra.mxu1 %v8422_v60 }
 0x1b4   : > { %1465 = vmatprep.mubr.bf16.mxu0 %v7755_v3  ;;  %1738 = vmatprep.mubr.bf16.mxu1 %v7755_v3 }
 0x1bb   : > { %1466 = vmatmul.mubr.bf16.gmra.mxu0 %v8516_v45  ;;  %1739 = vmatmul.mubr.bf16.gmra.mxu1 %v8437_v6 }
 0x1bc   : > { %1475 = vmatprep.mubr.bf16.mxu0 %v7755_v3  ;;  %1748 = vmatprep.mubr.bf16.mxu1 %v7755_v3 }
 0x1c3   : > { %1476 = vmatmul.mubr.bf16.gmra.mxu0 %v8524_v50  ;;  %1749 = vmatmul.mubr.bf16.gmra.mxu1 %v8449_v12 }
 0x1c4   : > { %1485 = vmatprep.mubr.bf16.mxu0 %v7755_v3  ;;  %1758 = vmatprep.mubr.bf16.mxu1 %v7755_v3 }
 0x1cb   : > { %1486 = vmatmul.mubr.bf16.gmra.mxu0 %v8532_v53  ;;  %1759 = vmatmul.mubr.bf16.gmra.mxu1 %v8462_v19 }
 0x1cc   : > { %1495 = vmatprep.mubr.bf16.mxu0 %v7755_v3  ;;  %1768 = vmatprep.mubr.bf16.mxu1 %v7755_v3 }
 0x1d3   : > { %1496 = vmatmul.mubr.bf16.gmra.mxu0 %v8540_v56  ;;  %1769 = vmatmul.mubr.bf16.gmra.mxu1 %v8474_v27 }
 0x1d4   : > { %1505 = vmatprep.mubr.bf16.mxu0 %v7755_v3  ;;  %1778 = vmatprep.mubr.bf16.mxu1 %v7755_v3 }
 0x1db   : > { %1506 = vmatmul.mubr.bf16.gmra.mxu0 %v8548_v59  ;;  %1779 = vmatmul.mubr.bf16.gmra.mxu1 %v8484_v31 }
 0x1dc   : > { %1515 = vmatprep.mubr.bf16.mxu0 %v7755_v3  ;;  %1788 = vmatprep.mubr.bf16.mxu1 %v7755_v3 }
 0x1e3   : > { %1516 = vmatmul.mubr.bf16.gmra.mxu0 %v8556_v0  ;;  %1789 = vmatmul.mubr.bf16.gmra.mxu1 %v8492_v34 }
 0x1e4   : > { %1525 = vmatprep.mubr.bf16.mxu0 %v7755_v3  ;;  %1798 = vmatprep.mubr.bf16.mxu1 %v7755_v3 }
 0x1eb   : > { %1526 = vmatmul.mubr.bf16.gmra.mxu0 %v8564_v4  ;;  %1799 = vmatmul.mubr.bf16.gmra.mxu1 %v8500_v39 }
 0x1ec   : > { %1535 = vmatprep.mubr.bf16.mxu0 %v7755_v3  ;;  %1808 = vmatprep.mubr.bf16.mxu1 %v7755_v3 }
 0x1f3   : > { %1536 = vmatmul.mubr.bf16.gmra.mxu0 %v8572_v9  ;;  %1809 = vmatmul.mubr.bf16.gmra.mxu1 %v8508_v42 }
 0x1f4   : > { %1545 = vmatprep.mubr.bf16.mxu0 %v7755_v3  ;;  %1818 = vmatprep.mubr.bf16.mxu1 %v7755_v3 }
 0x1fb   : > { %1546 = vmatmul.mubr.bf16.gmra.mxu0 %v8580_v14  ;;  %1819 = vmatmul.mubr.bf16.gmra.mxu1 %v8516_v45 }
 0x1fc   : > { %1555 = vmatprep.mubr.bf16.mxu0 %v7755_v3  ;;  %1828 = vmatprep.mubr.bf16.mxu1 %v7755_v3 }
 0x203   : > { %1556 = vmatmul.mubr.bf16.gmra.mxu0 %v8588_v17  ;;  %1829 = vmatmul.mubr.bf16.gmra.mxu1 %v8524_v50 }
 0x204   : > { %1565 = vmatprep.mubr.bf16.mxu0 %v7755_v3  ;;  %1838 = vmatprep.mubr.bf16.mxu1 %v7755_v3 }
 0x20b   : > { %1566 = vmatmul.mubr.bf16.gmra.mxu0 %v8596_v22  ;;  %1839 = vmatmul.mubr.bf16.gmra.mxu1 %v8532_v53 }
 0x20c   : > { %1575 = vmatprep.mubr.bf16.mxu0 %v7755_v3  ;;  %1848 = vmatprep.mubr.bf16.mxu1 %v7755_v3 }
 0x213   : > { %1576 = vmatmul.mubr.bf16.gmra.mxu0 %v8604_v29  ;;  %1849 = vmatmul.mubr.bf16.gmra.mxu1 %v8540_v56 }
 0x214   : > { %1858 = vmatprep.mubr.bf16.mxu1 %v7755_v3  ;;  %7061 = vmatprep.mubr.bf16.mxu0 %v8368_v24  ;;  %v886_v24 = vld [vmem:[#allocation2 + $0x3d8] sm:$0xff] }
 0x21b   : > { %v1347_v33 = vpop.f32.mrf.mxu0  ;;  %v1587_v35 = vpop.f32.mrf.mxu1  ;;  %1859 = vmatmul.mubr.bf16.gmra.mxu1 %v8548_v59  ;;  %7062 = vmatmul.mubr.bf16.vlgmr.msra.gmra.mxu0 %v8386_v36  ;;  %v887_v36 = vld [vmem:[#allocation2 + $0x938] sm:$0xff] }
 0x21c   : > { %v2308_v41 = vadd.f32 %v1347_v33, %v641_v30  ;;  %v2548_v43 = vadd.f32 %v1587_v35, %v881_v32  ;;  %1868 = vmatprep.mubr.bf16.mxu1 %v7755_v3  ;;  %7065 = vmatprep.mubr.bf16.mxu0 %v8404_v48  ;;  %v891_v48 = vld [vmem:[#allocation2 + $0x988] sm:$0xff]  ;;  %v656_v30 = vld [vmem:[#allocation2 + $0x580] sm:$0xff] }
 0x21d   : > { %v1349_v44 = vpop.f32.mrf.mxu0  ;;  %v1589_v46 = vpop.f32.mrf.mxu1  ;;  %v896_v32 = vld [vmem:[#allocation2 + $0x208] sm:$0xff] }
 0x21e   : > { %2628 = vst [vmem:[#allocation2 + $0x4c8] sm:$0xff] %v2308_v41  ;;  %2868 = vst [vmem:[#allocation2 + $0x1f8] sm:$0xff] %v2548_v43  ;;  %v2309_v51 = vadd.f32 %v1349_v44, %v642_v38  ;;  %v2549_v52 = vadd.f32 %v1589_v46, %v882_v40  ;;  %v657_v40 = vld [vmem:[#allocation2 + $0x3a8] sm:$0xff]  ;;  %v897_v41 = vld [vmem:[#allocation2 + $0x8d8] sm:$0xff] }
 0x21f   : > { %v1351_v54 = vpop.f32.mrf.mxu0  ;;  %v1591_v55 = vpop.f32.mrf.mxu1 }
 0x220   : > { %2629 = vst [vmem:[#allocation2 + $0x808] sm:$0xff] %v2309_v51  ;;  %2869 = vst [vmem:[#allocation2 + $0x430] sm:$0xff] %v2549_v52  ;;  %v2313_v58 = vadd.f32 %v1351_v54, %v646_v47  ;;  %v2553_v62 = vadd.f32 %v1591_v55, %v886_v24  ;;  %v661_v24 = vld [vmem:[#allocation2 + $0x7d8] sm:$0xff] }
 0x221   : > { %v1353_v63 = vpop.f32.mrf.mxu0  ;;  %v1593_v1 = vpop.f32.mrf.mxu1 }
 0x222   : > { %2633 = vst [vmem:[#allocation2 + $0x438] sm:$0xff] %v2313_v58  ;;  %2873 = vst [vmem:[#allocation2 + $0x3d8] sm:$0xff] %v2553_v62  ;;  %v2314_v5 = vadd.f32 %v1353_v63, %v647_v57  ;;  %v2554_v8 = vadd.f32 %v1593_v1, %v887_v36  ;;  %v662_v57 = vld [vmem:[#allocation2 + $0x778] sm:$0xff] }
 0x223   : > { %v1357_v10 = vpop.f32.mrf.mxu0  ;;  %v1597_v11 = vpop.f32.mrf.mxu1  ;;  %1869 = vmatmul.mubr.bf16.gmra.mxu1 %v8556_v0  ;;  %7066 = vmatmul.mubr.bf16.gmra.mxu0 %v8422_v60  ;;  %v902_v36 = vld [vmem:[#allocation2 + $0x578] sm:$0xff] }
 0x224   : > { %2634 = vst [vmem:[#allocation2 + $0x8f8] sm:$0xff] %v2314_v5  ;;  %2874 = vst [vmem:[#allocation2 + $0x938] sm:$0xff] %v2554_v8  ;;  %v2318_v18 = vadd.f32 %v1357_v10, %v651_v2  ;;  %v2558_v21 = vadd.f32 %v1597_v11, %v891_v48  ;;  %1878 = vmatprep.mubr.bf16.mxu1 %v7755_v3  ;;  %7069 = vmatprep.mubr.bf16.mxu0 %v8437_v6  ;;  %v901_v6 = vld [vmem:[#allocation2 + $0x6a0] sm:$0xff]  ;;  %v666_v2 = vld [vmem:[#allocation2 + $0x370] sm:$0xff] }
 0x225   : > { %v1359_v23 = vpop.f32.mrf.mxu0  ;;  %v1599_v26 = vpop.f32.mrf.mxu1  ;;  %v906_v48 = vld [vmem:[#allocation2 + $0x700] sm:$0xff]  ;;  %v667_v11 = vld [vmem:[#allocation2 + $0x838] sm:$0xff] }
 0x226   : > { %2638 = vst [vmem:[#allocation2 + $0x750] sm:$0xff] %v2318_v18  ;;  %2878 = vst [vmem:[#allocation2 + $0x988] sm:$0xff] %v2558_v21  ;;  %v2319_v33 = vadd.f32 %v1359_v23, %v652_v15  ;;  %v2559_v35 = vadd.f32 %v1599_v26, %v892_v16  ;;  %v907_v15 = vld [vmem:[#allocation2 + $0x8e8] sm:$0xff] }
 0x227   : > { %v1361_v38 = vpop.f32.mrf.mxu0  ;;  %v1601_v60 = vpop.f32.mrf.mxu1  ;;  %v671_v26 = vld [vmem:[#allocation2 + $0x548] sm:$0xff] }
 0x228   : > { %2639 = vst [vmem:[#allocation2 + $0x300] sm:$0xff] %v2319_v33  ;;  %2879 = vst [vmem:[#allocation2 + $0x9b0] sm:$0xff] %v2559_v35  ;;  %v2323_v43 = vadd.f32 %v1361_v38, %v656_v30  ;;  %v2563_v44 = vadd.f32 %v1601_v60, %v896_v32  ;;  %v672_v38 = vld [vmem:[#allocation2 + $0x70] sm:$0xff]  ;;  %v912_v60 = vld [vmem:[#allocation2 + $0x168] sm:$0xff] }
 0x229   : > { %v1363_v46 = vpop.f32.mrf.mxu0  ;;  %v1603_v47 = vpop.f32.mrf.mxu1 }
 0x22a   : > { %2643 = vst [vmem:[#allocation2 + $0x580] sm:$0xff] %v2323_v43  ;;  %2883 = vst [vmem:[#allocation2 + $0x208] sm:$0xff] %v2563_v44  ;;  %v2324_v51 = vadd.f32 %v1363_v46, %v657_v40  ;;  %v2564_v52 = vadd.f32 %v1603_v47, %v897_v41  ;;  %v676_v46 = vld [vmem:[#allocation2 + $0x9d0] sm:$0xff]  ;;  %v916_v47 = vld [vmem:[#allocation2 + $0x400] sm:$0xff] }
 0x22b   : > { %v1367_v54 = vpop.f32.mrf.mxu0  ;;  %v1607_v55 = vpop.f32.mrf.mxu1  ;;  %1879 = vmatmul.mubr.bf16.gmra.mxu1 %v8564_v4  ;;  %7070 = vmatmul.mubr.bf16.gmra.mxu0 %v8449_v12 }
 0x22c   : > { %2644 = vst [vmem:[#allocation2 + $0x3a8] sm:$0xff] %v2324_v51  ;;  %2884 = vst [vmem:[#allocation2 + $0x8d8] sm:$0xff] %v2564_v52  ;;  %v2328_v58 = vadd.f32 %v1367_v54, %v661_v24  ;;  %v2568_v62 = vadd.f32 %v1607_v55, %v901_v6  ;;  %1888 = vmatprep.mubr.bf16.mxu1 %v7755_v3  ;;  %7073 = vmatprep.mubr.bf16.mxu0 %v8462_v19  ;;  %v911_v19 = vld [vmem:[#allocation2 + $0x348] sm:$0xff]  ;;  %v677_v52 = vld [vmem:[#allocation2 + $0x810] sm:$0xff] }
 0x22d   : > { %v1369_v63 = vpop.f32.mrf.mxu0  ;;  %v1609_v1 = vpop.f32.mrf.mxu1  ;;  %v917_v54 = vld [vmem:[#allocation2 + $0x1b8] sm:$0xff] }
 0x22e   : > { %2648 = vst [vmem:[#allocation2 + $0x7d8] sm:$0xff] %v2328_v58  ;;  %2888 = vst [vmem:[#allocation2 + $0x6a0] sm:$0xff] %v2568_v62  ;;  %v2329_v5 = vadd.f32 %v1369_v63, %v662_v57  ;;  %v2569_v8 = vadd.f32 %v1609_v1, %v902_v36  ;;  %v681_v62 = vld [vmem:[#allocation2 + $0x278] sm:$0xff] }
 0x22f   : > { %v1371_v10 = vpop.f32.mrf.mxu0  ;;  %v1611_v12 = vpop.f32.mrf.mxu1 }
 0x230   : > { %2649 = vst [vmem:[#allocation2 + $0x778] sm:$0xff] %v2329_v5  ;;  %2889 = vst [vmem:[#allocation2 + $0x578] sm:$0xff] %v2569_v8  ;;  %v2333_v16 = vadd.f32 %v1371_v10, %v666_v2  ;;  %v2573_v18 = vadd.f32 %v1611_v12, %v906_v48  ;;  %v682_v5 = vld [vmem:[#allocation2 + $0x3b0] sm:$0xff]  ;;  %v922_v8 = vld [vmem:[#allocation2 + $0x160] sm:$0xff] }
 0x231   : > { %v1373_v21 = vpop.f32.mrf.mxu0  ;;  %v1613_v23 = vpop.f32.mrf.mxu1 }
 0x232   : > { %2653 = vst [vmem:[#allocation2 + $0x370] sm:$0xff] %v2333_v16  ;;  %2893 = vst [vmem:[#allocation2 + $0x700] sm:$0xff] %v2573_v18  ;;  %v2334_v30 = vadd.f32 %v1373_v21, %v667_v11  ;;  %v2574_v32 = vadd.f32 %v1613_v23, %v907_v15  ;;  %v686_v16 = vld [vmem:[#allocation2 + $0x558] sm:$0xff]  ;;  %v926_v18 = vld [vmem:[#allocation2 + $0x550] sm:$0xff] }
 0x233   : > { %v1377_v33 = vpop.f32.mrf.mxu0  ;;  %v1617_v35 = vpop.f32.mrf.mxu1  ;;  %1889 = vmatmul.mubr.bf16.gmra.mxu1 %v8572_v9  ;;  %7074 = vmatmul.mubr.bf16.gmra.mxu0 %v8474_v27 }
 0x234   : > { %2654 = vst [vmem:[#allocation2 + $0x838] sm:$0xff] %v2334_v30  ;;  %2894 = vst [vmem:[#allocation2 + $0x8e8] sm:$0xff] %v2574_v32  ;;  %v2338_v40 = vadd.f32 %v1377_v33, %v671_v26  ;;  %v2578_v41 = vadd.f32 %v1617_v35, %v911_v19  ;;  %1898 = vmatprep.mubr.bf16.mxu1 %v7755_v3  ;;  %7077 = vmatprep.mubr.bf16.mxu0 %v8484_v31  ;;  %v921_v31 = vld [vmem:[#allocation2 + $0x710] sm:$0xff] }
 0x235   : > { %v1379_v43 = vpop.f32.mrf.mxu0  ;;  %v1619_v44 = vpop.f32.mrf.mxu1  ;;  %v687_v19 = vld [vmem:[#allocation2 + $0x5d0] sm:$0xff] }
 0x236   : > { %2658 = vst [vmem:[#allocation2 + $0x548] sm:$0xff] %v2338_v40  ;;  %2898 = vst [vmem:[#allocation2 + $0x348] sm:$0xff] %v2578_v41  ;;  %v2339_v24 = vadd.f32 %v1379_v43, %v672_v38  ;;  %v2579_v6 = vadd.f32 %v1619_v44, %v912_v60  ;;  %v927_v30 = vld [vmem:[#allocation2 + $0x90] sm:$0xff]  ;;  %v691_v60 = vld [vmem:[#allocation2 + $0x798] sm:$0xff] }
 0x237   : > { %v1381_v51 = vpop.f32.mrf.mxu0  ;;  %v1621_v27 = vpop.f32.mrf.mxu1 }
 0x238   : > { %2659 = vst [vmem:[#allocation2 + $0x70] sm:$0xff] %v2339_v24  ;;  %2899 = vst [vmem:[#allocation2 + $0x168] sm:$0xff] %v2579_v6  ;;  %v2343_v55 = vadd.f32 %v1381_v51, %v676_v46  ;;  %v2583_v57 = vadd.f32 %v1621_v27, %v916_v47  ;;  %v692_v46 = vld [vmem:[#allocation2 + $0x538] sm:$0xff]  ;;  %v932_v47 = vld [vmem:[#allocation2 + $0x230] sm:$0xff] }
 0x239   : > { %v1383_v36 = vpop.f32.mrf.mxu0  ;;  %v1623_v58 = vpop.f32.mrf.mxu1 }
 0x23a   : > { %2663 = vst [vmem:[#allocation2 + $0x9d0] sm:$0xff] %v2343_v55  ;;  %2903 = vst [vmem:[#allocation2 + $0x400] sm:$0xff] %v2583_v57  ;;  %v2344_v63 = vadd.f32 %v1383_v36, %v677_v52  ;;  %v2584_v1 = vadd.f32 %v1623_v58, %v917_v54  ;;  %v696_v52 = vld [vmem:[#allocation2 + $0x7b8] sm:$0xff]  ;;  %v936_v54 = vld [vmem:[#allocation2 + $0x4e0] sm:$0xff] }
 0x23b   : > { %v1387_v2 = vpop.f32.mrf.mxu0  ;;  %v1627_v48 = vpop.f32.mrf.mxu1  ;;  %1899 = vmatmul.mubr.bf16.gmra.mxu1 %v8580_v14  ;;  %7078 = vmatmul.mubr.bf16.gmra.mxu0 %v8492_v34  ;;  %v697_v58 = vld [vmem:[#allocation2 + $0x358] sm:$0xff] }
 0x23c   : > { %2664 = vst [vmem:[#allocation2 + $0x810] sm:$0xff] %v2344_v63  ;;  %2904 = vst [vmem:[#allocation2 + $0x1b8] sm:$0xff] %v2584_v1  ;;  %v2348_v10 = vadd.f32 %v1387_v2, %v681_v62  ;;  %v2588_v12 = vadd.f32 %v1627_v48, %v921_v31  ;;  %1908 = vmatprep.mubr.bf16.mxu1 %v7755_v3  ;;  %7081 = vmatprep.mubr.bf16.mxu0 %v8500_v39  ;;  %v931_v39 = vld [vmem:[#allocation2 + $0x368] sm:$0xff]  ;;  %v701_v48 = vld [vmem:[#allocation2 + $0x5b0] sm:$0xff] }
 0x23d   : > { %v1389_v11 = vpop.f32.mrf.mxu0  ;;  %v1629_v15 = vpop.f32.mrf.mxu1  ;;  %v937_v62 = vld [vmem:[#allocation2 + $0x188] sm:$0xff] }
 0x23e   : > { %2668 = vst [vmem:[#allocation2 + $0x278] sm:$0xff] %v2348_v10  ;;  %2908 = vst [vmem:[#allocation2 + $0x710] sm:$0xff] %v2588_v12  ;;  %v2349_v21 = vadd.f32 %v1389_v11, %v682_v5  ;;  %v2589_v23 = vadd.f32 %v1629_v15, %v922_v8  ;;  %v702_v11 = vld [vmem:[#allocation2 + $0x240] sm:$0xff] }
 0x23f   : > { %v1391_v26 = vpop.f32.mrf.mxu0  ;;  %v1631_v34 = vpop.f32.mrf.mxu1  ;;  %v942_v15 = vld [vmem:[#allocation2 + $0x360] sm:$0xff] }
 0x240   : > { %2669 = vst [vmem:[#allocation2 + $0x3b0] sm:$0xff] %v2349_v21  ;;  %2909 = vst [vmem:[#allocation2 + $0x160] sm:$0xff] %v2589_v23  ;;  %v2353_v32 = vadd.f32 %v1391_v26, %v686_v16  ;;  %v2593_v33 = vadd.f32 %v1631_v34, %v926_v18  ;;  %v706_v26 = vld [vmem:[#allocation2 + $0xf8] sm:$0xff]  ;;  %v946_v34 = vld [vmem:[#allocation2 + $0x268] sm:$0xff] }
 0x241   : > { %v1393_v35 = vpop.f32.mrf.mxu0  ;;  %v1633_v38 = vpop.f32.mrf.mxu1 }
 0x242   : > { %2673 = vst [vmem:[#allocation2 + $0x558] sm:$0xff] %v2353_v32  ;;  %2913 = vst [vmem:[#allocation2 + $0x550] sm:$0xff] %v2593_v33  ;;  %v2354_v40 = vadd.f32 %v1393_v35, %v687_v19  ;;  %v2594_v41 = vadd.f32 %v1633_v38, %v927_v30  ;;  %v707_v33 = vld [vmem:[#allocation2 + $0x888] sm:$0xff]  ;;  %v947_v35 = vld [vmem:[#allocation2 + $0x850] sm:$0xff] }
 0x243   : > { %v1397_v43 = vpop.f32.mrf.mxu0  ;;  %v1637_v44 = vpop.f32.mrf.mxu1  ;;  %1909 = vmatmul.mubr.bf16.gmra.mxu1 %v8588_v17  ;;  %7082 = vmatmul.mubr.bf16.gmra.mxu0 %v8508_v42 }
 0x244   : > { %2674 = vst [vmem:[#allocation2 + $0x5d0] sm:$0xff] %v2354_v40  ;;  %2914 = vst [vmem:[#allocation2 + $0x90] sm:$0xff] %v2594_v41  ;;  %v2358_v24 = vadd.f32 %v1397_v43, %v691_v60  ;;  %v2598_v6 = vadd.f32 %v1637_v44, %v931_v39  ;;  %1918 = vmatprep.mubr.bf16.mxu1 %v7755_v3  ;;  %7085 = vmatprep.mubr.bf16.mxu0 %v8516_v45  ;;  %v941_v45 = vld [vmem:[#allocation2 + $0x590] sm:$0xff]  ;;  %v711_v41 = vld [vmem:[#allocation2 + $0x780] sm:$0xff] }
 0x245   : > { %v1399_v51 = vpop.f32.mrf.mxu0  ;;  %v1639_v27 = vpop.f32.mrf.mxu1 }
 0x246   : > { %2678 = vst [vmem:[#allocation2 + $0x798] sm:$0xff] %v2358_v24  ;;  %2918 = vst [vmem:[#allocation2 + $0x368] sm:$0xff] %v2598_v6  ;;  %v2359_v55 = vadd.f32 %v1399_v51, %v692_v46  ;;  %v2599_v57 = vadd.f32 %v1639_v27, %v932_v47  ;;  %v712_v24 = vld [vmem:[#allocation2 + $0x8b0] sm:$0xff]  ;;  %v952_v6 = vld [vmem:[#allocation2 + $0x260] sm:$0xff] }
 0x247   : > { %v1401_v36 = vpop.f32.mrf.mxu0  ;;  %v1641_v42 = vpop.f32.mrf.mxu1 }
 0x248   : > { %2679 = vst [vmem:[#allocation2 + $0x538] sm:$0xff] %v2359_v55  ;;  %2919 = vst [vmem:[#allocation2 + $0x230] sm:$0xff] %v2599_v57  ;;  %v2363_v31 = vadd.f32 %v1401_v36, %v696_v52  ;;  %v2603_v63 = vadd.f32 %v1641_v42, %v936_v54  ;;  %v716_v55 = vld [vmem:[#allocation2 + $0x598] sm:$0xff] }
 0x249   : > { %v1403_v1 = vpop.f32.mrf.mxu0  ;;  %v1643_v2 = vpop.f32.mrf.mxu1  ;;  %v956_v57 = vld [vmem:[#allocation2 + $0x958] sm:$0xff] }
 0x24a   : > { %2683 = vst [vmem:[#allocation2 + $0x7b8] sm:$0xff] %v2363_v31  ;;  %2923 = vst [vmem:[#allocation2 + $0x4e0] sm:$0xff] %v2603_v63  ;;  %v2364_v5 = vadd.f32 %v1403_v1, %v697_v58  ;;  %v2604_v8 = vadd.f32 %v1643_v2, %v937_v62  ;;  %v717_v62 = vld [vmem:[#allocation2 + $0x310] sm:$0xff]  ;;  %v957_v31 = vld [vmem:[#allocation2 + $0x68] sm:$0xff] }
 0x24b   : > { %v1407_v10 = vpop.f32.mrf.mxu0  ;;  %v1647_v12 = vpop.f32.mrf.mxu1  ;;  %1919 = vmatmul.mubr.bf16.gmra.mxu1 %v8596_v22  ;;  %7086 = vmatmul.mubr.bf16.gmra.mxu0 %v8524_v50 }
 0x24c   : > { %2684 = vst [vmem:[#allocation2 + $0x358] sm:$0xff] %v2364_v5  ;;  %2924 = vst [vmem:[#allocation2 + $0x188] sm:$0xff] %v2604_v8  ;;  %v2368_v16 = vadd.f32 %v1407_v10, %v701_v48  ;;  %v2608_v18 = vadd.f32 %v1647_v12, %v941_v45  ;;  %1928 = vmatprep.mubr.bf16.mxu1 %v7755_v3  ;;  %7089 = vmatprep.mubr.bf16.mxu0 %v8532_v53  ;;  %v951_v53 = vld [vmem:[#allocation2 + $0x290] sm:$0xff]  ;;  %v721_v45 = vld [vmem:[#allocation2 + $0x908] sm:$0xff] }
 0x24d   : > { %v1409_v21 = vpop.f32.mrf.mxu0  ;;  %v1649_v23 = vpop.f32.mrf.mxu1 }
 0x24e   : > { %2688 = vst [vmem:[#allocation2 + $0x5b0] sm:$0xff] %v2368_v16  ;;  %2928 = vst [vmem:[#allocation2 + $0x590] sm:$0xff] %v2608_v18  ;;  %v2369_v19 = vadd.f32 %v1409_v21, %v702_v11  ;;  %v2609_v30 = vadd.f32 %v1649_v23, %v942_v15  ;;  %v722_v11 = vld [vmem:[#allocation2 + $0x900] sm:$0xff]  ;;  %v644_v15 = vld [vmem:[#allocation2 + $0x758] sm:$0xff] }
 0x24f   : > { %v1411_v32 = vpop.f32.mrf.mxu0  ;;  %v1651_v50 = vpop.f32.mrf.mxu1 }
 0x250   : > { %2689 = vst [vmem:[#allocation2 + $0x240] sm:$0xff] %v2369_v19  ;;  %2929 = vst [vmem:[#allocation2 + $0x360] sm:$0xff] %v2609_v30  ;;  %v2373_v38 = vadd.f32 %v1411_v32, %v706_v26  ;;  %v2613_v60 = vadd.f32 %v1651_v50, %v946_v34  ;;  %v726_v26 = vld [vmem:[#allocation2 + $0x2c0] sm:$0xff]  ;;  %v648_v34 = vld [vmem:[#allocation2 + $0x4d0] sm:$0xff] }
 0x251   : > { %v1413_v39 = vpop.f32.mrf.mxu0  ;;  %v1653_v40 = vpop.f32.mrf.mxu1  ;;  %v727_v50 = vld [vmem:[#allocation2] sm:$0xff] }
 0x252   : > { %2693 = vst [vmem:[#allocation2 + $0xf8] sm:$0xff] %v2373_v38  ;;  %2933 = vst [vmem:[#allocation2 + $0x268] sm:$0xff] %v2613_v60  ;;  %v2374_v43 = vadd.f32 %v1413_v39, %v707_v33  ;;  %v2614_v44 = vadd.f32 %v1653_v40, %v947_v35  ;;  %v649_v33 = vld [vmem:[#allocation2 + $0x6e8] sm:$0xff] }
 0x253   : > { %v1417_v46 = vpop.f32.mrf.mxu0  ;;  %v1657_v47 = vpop.f32.mrf.mxu1  ;;  %1929 = vmatmul.mubr.bf16.gmra.mxu1 %v8604_v29  ;;  %7090 = vmatmul.mubr.bf16.gmra.mxu0 %v8540_v56  ;;  %v731_v40 = vld [vmem:[#allocation2 + $0x848] sm:$0xff] }
 0x254   : > { %2694 = vst [vmem:[#allocation2 + $0x888] sm:$0xff] %v2374_v43  ;;  %2934 = vst [vmem:[#allocation2 + $0x850] sm:$0xff] %v2614_v44  ;;  %v2378_v51 = vadd.f32 %v1417_v46, %v711_v41  ;;  %v2618_v27 = vadd.f32 %v1657_v47, %v951_v53  ;;  %1938 = vmatprep.mubr.bf16.mxu1 %v7755_v3  ;;  %7093 = vmatprep.mubr.bf16.mxu0 %v8548_v59  ;;  %v643_v59 = vld [vmem:[#allocation2 + $0x7f8] sm:$0xff]  ;;  %v732_v46 = vld [vmem:[#allocation2 + $0x530] sm:$0xff] }
 0x255   : > { %v1419_v52 = vpop.f32.mrf.mxu0  ;;  %v1659_v54 = vpop.f32.mrf.mxu1  ;;  %v654_v47 = vld [vmem:[#allocation2 + $0x7f0] sm:$0xff] }
 0x256   : > { %2698 = vst [vmem:[#allocation2 + $0x780] sm:$0xff] %v2378_v51  ;;  %2938 = vst [vmem:[#allocation2 + $0x290] sm:$0xff] %v2618_v27  ;;  %v2379_v36 = vadd.f32 %v1419_v52, %v712_v24  ;;  %v2619_v42 = vadd.f32 %v1659_v54, %v952_v6  ;;  %v736_v52 = vld [vmem:[#allocation2 + $0x7e8] sm:$0xff]  ;;  %v658_v54 = vld [vmem:[#allocation2 + $0x8e0] sm:$0xff] }
 0x257   : > { %v1421_v58 = vpop.f32.mrf.mxu0  ;;  %v1661_v56 = vpop.f32.mrf.mxu1 }
 0x258   : > { %2699 = vst [vmem:[#allocation2 + $0x8b0] sm:$0xff] %v2379_v36  ;;  %2939 = vst [vmem:[#allocation2 + $0x260] sm:$0xff] %v2619_v42  ;;  %v2383_v63 = vadd.f32 %v1421_v58, %v716_v55  ;;  %v2623_v1 = vadd.f32 %v1661_v56, %v956_v57  ;;  %v737_v42 = vld [vmem:[#allocation2 + $0x9c0] sm:$0xff] }
 0x259   : > { %v1423_v2 = vpop.f32.mrf.mxu0  ;;  %v1663_v48 = vpop.f32.mrf.mxu1  ;;  %v659_v58 = vld [vmem:[#allocation2 + $0x960] sm:$0xff] }
 0x25a   : > { %2703 = vst [vmem:[#allocation2 + $0x598] sm:$0xff] %v2383_v63  ;;  %2943 = vst [vmem:[#allocation2 + $0x958] sm:$0xff] %v2623_v1  ;;  %v2384_v5 = vadd.f32 %v1423_v2, %v717_v62  ;;  %v2624_v8 = vadd.f32 %v1663_v48, %v957_v31  ;;  %v741_v1 = vld [vmem:[#allocation2 + $0x520] sm:$0xff] }
 0x25b   : > { %v1427_v10 = vpop.f32.mrf.mxu0  ;;  %v1700_v12 = vpop.f32.mrf.mxu1  ;;  %1939 = vmatmul.mubr.bf16.gmra.mxu1 %v8370_v25  ;;  %7094 = vmatmul.mubr.bf16.gmra.mxu0 %v8556_v0 }
 0x25c   : > { %2704 = vst [vmem:[#allocation2 + $0x310] sm:$0xff] %v2384_v5  ;;  %2944 = vst [vmem:[#allocation2 + $0x68] sm:$0xff] %v2624_v8  ;;  %v2388_v16 = vadd.f32 %v1427_v10, %v721_v45  ;;  %v2310_v18 = vadd.f32 %v1700_v12, %v643_v59  ;;  %1948 = vmatprep.mubr.bf16.mxu1 %v7755_v3  ;;  %7097 = vmatprep.mubr.bf16.mxu0 %v8564_v4  ;;  %v653_v4 = vld [vmem:[#allocation2 + $0x708] sm:$0xff]  ;;  %v742_v5 = vld [vmem:[#allocation2 + $0x170] sm:$0xff] }
 0x25d   : > { %v1429_v21 = vpop.f32.mrf.mxu0  ;;  %v1702_v23 = vpop.f32.mrf.mxu1  ;;  %v664_v8 = vld [vmem:[#allocation2 + $0x378] sm:$0xff] }
 0x25e   : > { %2708 = vst [vmem:[#allocation2 + $0x908] sm:$0xff] %v2388_v16  ;;  %2630 = vst [vmem:[#allocation2 + $0x7f8] sm:$0xff] %v2310_v18  ;;  %v2389_v19 = vadd.f32 %v1429_v21, %v722_v11  ;;  %v2311_v30 = vadd.f32 %v1702_v23, %v644_v15  ;;  %v746_v16 = vld [vmem:[#allocation2 + $0x258] sm:$0xff]  ;;  %v668_v18 = vld [vmem:[#allocation2 + $0x800] sm:$0xff] }
 0x25f   : > { %v1431_v32 = vpop.f32.mrf.mxu0  ;;  %v1704_v0 = vpop.f32.mrf.mxu1 }
 0x260   : > { %2709 = vst [vmem:[#allocation2 + $0x900] sm:$0xff] %v2389_v19  ;;  %2631 = vst [vmem:[#allocation2 + $0x758] sm:$0xff] %v2311_v30  ;;  %v2393_v35 = vadd.f32 %v1431_v32, %v726_v26  ;;  %v2315_v38 = vadd.f32 %v1704_v0, %v648_v34  ;;  %v747_v34 = vld [vmem:[#allocation2 + $0x1d8] sm:$0xff]  ;;  %v669_v19 = vld [vmem:[#allocation2 + $0x270] sm:$0xff] }
 0x261   : > { %v1433_v60 = vpop.f32.mrf.mxu0  ;;  %v1706_v39 = vpop.f32.mrf.mxu1 }
 0x262   : > { %2713 = vst [vmem:[#allocation2 + $0x2c0] sm:$0xff] %v2393_v35  ;;  %2635 = vst [vmem:[#allocation2 + $0x4d0] sm:$0xff] %v2315_v38  ;;  %v2394_v41 = vadd.f32 %v1433_v60, %v727_v50  ;;  %v2316_v53 = vadd.f32 %v1706_v39, %v649_v33  ;;  %v751_v33 = vld [vmem:[#allocation2 + $0x248] sm:$0xff] }
 0x263   : > { %v1437_v43 = vpop.f32.mrf.mxu0  ;;  %v1710_v44 = vpop.f32.mrf.mxu1  ;;  %1949 = vmatmul.mubr.bf16.gmra.mxu1 %v8388_v37  ;;  %7098 = vmatmul.mubr.bf16.gmra.mxu0 %v8572_v9 }
 0x264   : > { %2714 = vst [vmem:[#allocation2] sm:$0xff] %v2394_v41  ;;  %2636 = vst [vmem:[#allocation2 + $0x6e8] sm:$0xff] %v2316_v53  ;;  %v2398_v24 = vadd.f32 %v1437_v43, %v731_v40  ;;  %v2320_v6 = vadd.f32 %v1710_v44, %v653_v4  ;;  %1958 = vmatprep.mubr.bf16.mxu1 %v7755_v3  ;;  %7101 = vmatprep.mubr.bf16.mxu0 %v8580_v14  ;;  %v663_v14 = vld [vmem:[#allocation2 + $0x488] sm:$0xff]  ;;  %v674_v4 = vld [vmem:[#allocation2 + $0x6f8] sm:$0xff] }
 0x265   : > { %v1439_v51 = vpop.f32.mrf.mxu0  ;;  %v1712_v27 = vpop.f32.mrf.mxu1  ;;  %v752_v40 = vld [vmem:[#allocation2 + $0x828] sm:$0xff] }
 0x266   : > { %2718 = vst [vmem:[#allocation2 + $0x848] sm:$0xff] %v2398_v24  ;;  %2640 = vst [vmem:[#allocation2 + $0x708] sm:$0xff] %v2320_v6  ;;  %v2399_v55 = vadd.f32 %v1439_v51, %v732_v46  ;;  %v2321_v57 = vadd.f32 %v1712_v27, %v654_v47  ;;  %v756_v46 = vld [vmem:[#allocation2 + $0x8a8] sm:$0xff]  ;;  %v678_v47 = vld [vmem:[#allocation2 + $0x910] sm:$0xff] }
 0x267   : > { %v1441_v36 = vpop.f32.mrf.mxu0  ;;  %v1714_v9 = vpop.f32.mrf.mxu1  ;;  %v757_v27 = vld [vmem:[#allocation2 + $0x6c8] sm:$0xff] }
 0x268   : > { %2719 = vst [vmem:[#allocation2 + $0x530] sm:$0xff] %v2399_v55  ;;  %2641 = vst [vmem:[#allocation2 + $0x7f0] sm:$0xff] %v2321_v57  ;;  %v2403_v56 = vadd.f32 %v1441_v36, %v736_v52  ;;  %v2325_v62 = vadd.f32 %v1714_v9, %v658_v54  ;;  %v679_v52 = vld [vmem:[#allocation2 + $0x738] sm:$0xff]  ;;  %v761_v9 = vld [vmem:[#allocation2 + $0x410] sm:$0xff] }
 0x269   : > { %v1443_v31 = vpop.f32.mrf.mxu0  ;;  %v1716_v63 = vpop.f32.mrf.mxu1 }
 0x26a   : > { %2723 = vst [vmem:[#allocation2 + $0x7e8] sm:$0xff] %v2403_v56  ;;  %2645 = vst [vmem:[#allocation2 + $0x8e0] sm:$0xff] %v2325_v62  ;;  %v2404_v2 = vadd.f32 %v1443_v31, %v737_v42  ;;  %v2326_v48 = vadd.f32 %v1716_v63, %v659_v58  ;;  %v762_v31 = vld [vmem:[#allocation2 + $0x150] sm:$0xff] }
 0x26b   : > { %v1447_v45 = vpop.f32.mrf.mxu0  ;;  %v1720_v59 = vpop.f32.mrf.mxu1  ;;  %1959 = vmatmul.mubr.bf16.gmra.mxu1 %v8406_v49  ;;  %7102 = vmatmul.mubr.bf16.gmra.mxu0 %v8588_v17  ;;  %v684_v63 = vld [vmem:[#allocation2 + $0x490] sm:$0xff] }
 0x26c   : > { %2724 = vst [vmem:[#allocation2 + $0x9c0] sm:$0xff] %v2404_v2  ;;  %2646 = vst [vmem:[#allocation2 + $0x960] sm:$0xff] %v2326_v48  ;;  %v2408_v10 = vadd.f32 %v1447_v45, %v741_v1  ;;  %v2330_v12 = vadd.f32 %v1720_v59, %v663_v14  ;;  %1968 = vmatprep.mubr.bf16.mxu1 %v7755_v3  ;;  %7105 = vmatprep.mubr.bf16.mxu0 %v8596_v22  ;;  %v673_v22 = vld [vmem:[#allocation2 + $0x78] sm:$0xff]  ;;  %v766_v45 = vld [vmem:[#allocation2 + $0x770] sm:$0xff] }
 0x26d   : > { %v1449_v11 = vpop.f32.mrf.mxu0  ;;  %v1722_v15 = vpop.f32.mrf.mxu1  ;;  %v688_v59 = vld [vmem:[#allocation2 + $0x228] sm:$0xff] }
 0x26e   : > { %2728 = vst [vmem:[#allocation2 + $0x520] sm:$0xff] %v2408_v10  ;;  %2650 = vst [vmem:[#allocation2 + $0x488] sm:$0xff] %v2330_v12  ;;  %v2409_v21 = vadd.f32 %v1449_v11, %v742_v5  ;;  %v2331_v23 = vadd.f32 %v1722_v15, %v664_v8  ;;  %v767_v12 = vld [vmem:[#allocation2 + $0x608] sm:$0xff]  ;;  %v689_v11 = vld [vmem:[#allocation2 + $0x930] sm:$0xff] }
 0x26f   : > { %v1451_v26 = vpop.f32.mrf.mxu0  ;;  %v1724_v17 = vpop.f32.mrf.mxu1 }
 0x270   : > { %2729 = vst [vmem:[#allocation2 + $0x170] sm:$0xff] %v2409_v21  ;;  %2651 = vst [vmem:[#allocation2 + $0x378] sm:$0xff] %v2331_v23  ;;  %v2413_v30 = vadd.f32 %v1451_v26, %v746_v16  ;;  %v2335_v32 = vadd.f32 %v1724_v17, %v668_v18  ;;  %v771_v23 = vld [vmem:[#allocation2 + $0x1e0] sm:$0xff] }
 0x271   : > { %v1453_v0 = vpop.f32.mrf.mxu0  ;;  %v1726_v50 = vpop.f32.mrf.mxu1 }
 0x272   : > { %2733 = vst [vmem:[#allocation2 + $0x258] sm:$0xff] %v2413_v30  ;;  %2655 = vst [vmem:[#allocation2 + $0x800] sm:$0xff] %v2335_v32  ;;  %v2414_v35 = vadd.f32 %v1453_v0, %v747_v34  ;;  %v2336_v38 = vadd.f32 %v1726_v50, %v669_v19  ;;  %v772_v30 = vld [vmem:[#allocation2 + $0x4c0] sm:$0xff]  ;;  %v694_v32 = vld [vmem:[#allocation2 + $0x890] sm:$0xff] }
 0x273   : > { %v1457_v60 = vpop.f32.mrf.mxu0  ;;  %v1730_v39 = vpop.f32.mrf.mxu1  ;;  %1969 = vmatmul.mubr.bf16.gmra.mxu1 %v8424_v61  ;;  %7106 = vmatmul.mubr.bf16.gmra.mxu0 %v8604_v29 }
 0x274   : > { %2734 = vst [vmem:[#allocation2 + $0x1d8] sm:$0xff] %v2414_v35  ;;  %2656 = vst [vmem:[#allocation2 + $0x270] sm:$0xff] %v2336_v38  ;;  %v2418_v41 = vadd.f32 %v1457_v60, %v751_v33  ;;  %v2340_v53 = vadd.f32 %v1730_v39, %v673_v22  ;;  %1978 = vmatprep.mubr.bf16.mxu1 %v7755_v3  ;;  %7109 = vmatprep.mubr.bf16.mxu0 %v8370_v25  ;;  %v683_v25 = vld [vmem:[#allocation2 + $0x80] sm:$0xff]  ;;  %v776_v35 = vld [vmem:[#allocation2 + $0x318] sm:$0xff] }
 0x275   : > { %v1459_v43 = vpop.f32.mrf.mxu0  ;;  %v1732_v44 = vpop.f32.mrf.mxu1  ;;  %v698_v38 = vld [vmem:[#allocation2 + $0x7b0] sm:$0xff] }
 0x276   : > { %2738 = vst [vmem:[#allocation2 + $0x248] sm:$0xff] %v2418_v41  ;;  %2660 = vst [vmem:[#allocation2 + $0x78] sm:$0xff] %v2340_v53  ;;  %v2419_v24 = vadd.f32 %v1459_v43, %v752_v40  ;;  %v2341_v6 = vadd.f32 %v1732_v44, %v674_v4  ;;  %v777_v4 = vld [vmem:[#allocation2 + $0x6d8] sm:$0xff] }
 0x277   : > { %v1461_v51 = vpop.f32.mrf.mxu0  ;;  %v1734_v29 = vpop.f32.mrf.mxu1  ;;  %v699_v41 = vld [vmem:[#allocation2 + $0x5d8] sm:$0xff] }
 0x278   : > { %2739 = vst [vmem:[#allocation2 + $0x828] sm:$0xff] %v2419_v24  ;;  %2661 = vst [vmem:[#allocation2 + $0x6f8] sm:$0xff] %v2341_v6  ;;  %v2423_v54 = vadd.f32 %v1461_v51, %v756_v46  ;;  %v2345_v55 = vadd.f32 %v1734_v29, %v678_v47  ;;  %v781_v47 = vld [vmem:[#allocation2 + $0x6e0] sm:$0xff] }
 0x279   : > { %v1463_v57 = vpop.f32.mrf.mxu0  ;;  %v1736_v36 = vpop.f32.mrf.mxu1 }
 0x27a   : > { %2743 = vst [vmem:[#allocation2 + $0x8a8] sm:$0xff] %v2423_v54  ;;  %2665 = vst [vmem:[#allocation2 + $0x910] sm:$0xff] %v2345_v55  ;;  %v2424_v42 = vadd.f32 %v1463_v57, %v757_v27  ;;  %v2346_v58 = vadd.f32 %v1736_v36, %v679_v52  ;;  %v782_v27 = vld [vmem:[#allocation2 + $0x130] sm:$0xff]  ;;  %v704_v52 = vld [vmem:[#allocation2 + $0x9a0] sm:$0xff] }
 0x27b   : > { %v1467_v56 = vpop.f32.mrf.mxu0  ;;  %v1740_v62 = vpop.f32.mrf.mxu1  ;;  %1979 = vmatmul.mubr.bf16.gmra.mxu1 %v8439_v7  ;;  %7110 = vmatmul.mubr.bf16.gmra.mxu0 %v8388_v37 }
 0x27c   : > { %2744 = vst [vmem:[#allocation2 + $0x6c8] sm:$0xff] %v2424_v42  ;;  %2666 = vst [vmem:[#allocation2 + $0x738] sm:$0xff] %v2346_v58  ;;  %v2428_v1 = vadd.f32 %v1467_v56, %v761_v9  ;;  %v2350_v14 = vadd.f32 %v1740_v62, %v683_v25  ;;  %1988 = vmatprep.mubr.bf16.mxu1 %v7755_v3  ;;  %7113 = vmatprep.mubr.bf16.mxu0 %v8406_v49  ;;  %v693_v49 = vld [vmem:[#allocation2 + $0x678] sm:$0xff]  ;;  %v786_v9 = vld [vmem:[#allocation2 + $0x5e8] sm:$0xff] }
 0x27d   : > { %v1469_v2 = vpop.f32.mrf.mxu0  ;;  %v1742_v48 = vpop.f32.mrf.mxu1  ;;  %v708_v25 = vld [vmem:[#allocation2 + $0x2e0] sm:$0xff] }
 0x27e   : > { %2748 = vst [vmem:[#allocation2 + $0x410] sm:$0xff] %v2428_v1  ;;  %2670 = vst [vmem:[#allocation2 + $0x80] sm:$0xff] %v2350_v14  ;;  %v2429_v5 = vadd.f32 %v1469_v2, %v762_v31  ;;  %v2351_v8 = vadd.f32 %v1742_v48, %v684_v63  ;;  %v787_v62 = vld [vmem:[#allocation2 + $0x8c0] sm:$0xff]  ;;  %v709_v31 = vld [vmem:[#allocation2 + $0x2d8] sm:$0xff] }
 0x27f   : > { %v1471_v10 = vpop.f32.mrf.mxu0  ;;  %v1744_v37 = vpop.f32.mrf.mxu1  ;;  %v791_v2 = vld [vmem:[#allocation2 + $0x788] sm:$0xff] }
 0x280   : > { %2749 = vst [vmem:[#allocation2 + $0x150] sm:$0xff] %v2429_v5  ;;  %2671 = vst [vmem:[#allocation2 + $0x490] sm:$0xff] %v2351_v8  ;;  %v2433_v15 = vadd.f32 %v1471_v10, %v766_v45  ;;  %v2355_v16 = vadd.f32 %v1744_v37, %v688_v59  ;;  %v792_v8 = vld [vmem:[#allocation2 + $0x860] sm:$0xff] }
 0x281   : > { %v1473_v18 = vpop.f32.mrf.mxu0  ;;  %v1746_v21 = vpop.f32.mrf.mxu1  ;;  %v714_v10 = vld [vmem:[#allocation2 + $0x920] sm:$0xff] }
 0x282   : > { %2753 = vst [vmem:[#allocation2 + $0x770] sm:$0xff] %v2433_v15  ;;  %2675 = vst [vmem:[#allocation2 + $0x228] sm:$0xff] %v2355_v16  ;;  %v2434_v26 = vadd.f32 %v1473_v18, %v767_v12  ;;  %v2356_v17 = vadd.f32 %v1746_v21, %v689_v11  ;;  %v796_v16 = vld [vmem:[#allocation2 + $0xb0] sm:$0xff] }
 0x283   : > { %v1477_v34 = vpop.f32.mrf.mxu0  ;;  %v1750_v19 = vpop.f32.mrf.mxu1  ;;  %1989 = vmatmul.mubr.bf16.gmra.mxu1 %v8451_v13  ;;  %7114 = vmatmul.mubr.bf16.gmra.mxu0 %v8424_v61  ;;  %v718_v18 = vld [vmem:[#allocation2 + $0x730] sm:$0xff] }
 0x284   : > { %2754 = vst [vmem:[#allocation2 + $0x608] sm:$0xff] %v2434_v26  ;;  %2676 = vst [vmem:[#allocation2 + $0x930] sm:$0xff] %v2356_v17  ;;  %v2438_v0 = vadd.f32 %v1477_v34, %v771_v23  ;;  %v2360_v50 = vadd.f32 %v1750_v19, %v693_v49  ;;  %1998 = vmatprep.mubr.bf16.mxu1 %v7755_v3  ;;  %7117 = vmatprep.mubr.bf16.mxu0 %v8439_v7  ;;  %v703_v7 = vld [vmem:[#allocation2 + $0x918] sm:$0xff]  ;;  %v797_v17 = vld [vmem:[#allocation2 + $0x4a8] sm:$0xff] }
 0x285   : > { %v1479_v33 = vpop.f32.mrf.mxu0  ;;  %v1752_v22 = vpop.f32.mrf.mxu1  ;;  %v719_v34 = vld [vmem:[#allocation2 + $0x388] sm:$0xff] }
 0x286   : > { %2758 = vst [vmem:[#allocation2 + $0x1e0] sm:$0xff] %v2438_v0  ;;  %2680 = vst [vmem:[#allocation2 + $0x678] sm:$0xff] %v2360_v50  ;;  %v2439_v60 = vadd.f32 %v1479_v33, %v772_v30  ;;  %v2361_v39 = vadd.f32 %v1752_v22, %v694_v32  ;;  %v801_v0 = vld [vmem:[#allocation2 + $0x1a0] sm:$0xff]  ;;  %v723_v50 = vld [vmem:[#allocation2 + $0xa8] sm:$0xff] }
 0x287   : > { %v1481_v40 = vpop.f32.mrf.mxu0  ;;  %v1754_v61 = vpop.f32.mrf.mxu1 }
 0x288   : > { %2759 = vst [vmem:[#allocation2 + $0x4c0] sm:$0xff] %v2439_v60  ;;  %2681 = vst [vmem:[#allocation2 + $0x890] sm:$0xff] %v2361_v39  ;;  %v2443_v53 = vadd.f32 %v1481_v40, %v776_v35  ;;  %v2365_v43 = vadd.f32 %v1754_v61, %v698_v38  ;;  %v802_v60 = vld [vmem:[#allocation2 + $0xf0] sm:$0xff]  ;;  %v724_v39 = vld [vmem:[#allocation2 + $0x28] sm:$0xff] }
 0x289   : > { %v1483_v44 = vpop.f32.mrf.mxu0  ;;  %v1756_v46 = vpop.f32.mrf.mxu1 }
 0x28a   : > { %2763 = vst [vmem:[#allocation2 + $0x318] sm:$0xff] %v2443_v53  ;;  %2685 = vst [vmem:[#allocation2 + $0x7b0] sm:$0xff] %v2365_v43  ;;  %v2444_v24 = vadd.f32 %v1483_v44, %v777_v4  ;;  %v2366_v6 = vadd.f32 %v1756_v46, %v699_v41  ;;  %v806_v53 = vld [vmem:[#allocation2 + $0x640] sm:$0xff]  ;;  %v728_v43 = vld [vmem:[#allocation2 + $0x868] sm:$0xff] }
 0x28b   : > { %v1487_v51 = vpop.f32.mrf.mxu0  ;;  %v1760_v29 = vpop.f32.mrf.mxu1  ;;  %1999 = vmatmul.mubr.bf16.gmra.mxu1 %v8464_v20  ;;  %7118 = vmatmul.mubr.bf16.gmra.mxu0 %v8451_v13 }
 0x28c   : > { %2764 = vst [vmem:[#allocation2 + $0x6d8] sm:$0xff] %v2444_v24  ;;  %2686 = vst [vmem:[#allocation2 + $0x5d8] sm:$0xff] %v2366_v6  ;;  %v2448_v54 = vadd.f32 %v1487_v51, %v781_v47  ;;  %v2370_v55 = vadd.f32 %v1760_v29, %v703_v7  ;;  %2008 = vmatprep.mubr.bf16.mxu1 %v7755_v3  ;;  %7121 = vmatprep.mubr.bf16.mxu0 %v8464_v20  ;;  %v713_v20 = vld [vmem:[#allocation2 + $0x8a0] sm:$0xff]  ;;  %v807_v24 = vld [vmem:[#allocation2 + $0x2c8] sm:$0xff] }
 0x28d   : > { %v1489_v57 = vpop.f32.mrf.mxu0  ;;  %v1762_v36 = vpop.f32.mrf.mxu1  ;;  %v729_v6 = vld [vmem:[#allocation2 + $0x878] sm:$0xff] }
 0x28e   : > { %2768 = vst [vmem:[#allocation2 + $0x6e0] sm:$0xff] %v2448_v54  ;;  %2690 = vst [vmem:[#allocation2 + $0x918] sm:$0xff] %v2370_v55  ;;  %v2449_v42 = vadd.f32 %v1489_v57, %v782_v27  ;;  %v2371_v58 = vadd.f32 %v1762_v36, %v704_v52  ;;  %v811_v54 = vld [vmem:[#allocation2 + $0x4f0] sm:$0xff] }
 0x28f   : > { %v1491_v56 = vpop.f32.mrf.mxu0  ;;  %v1764_v13 = vpop.f32.mrf.mxu1  ;;  %v733_v55 = vld [vmem:[#allocation2 + $0x5f0] sm:$0xff] }
 0x290   : > { %2769 = vst [vmem:[#allocation2 + $0x130] sm:$0xff] %v2449_v42  ;;  %2691 = vst [vmem:[#allocation2 + $0x9a0] sm:$0xff] %v2371_v58  ;;  %v2453_v63 = vadd.f32 %v1491_v56, %v786_v9  ;;  %v2375_v1 = vadd.f32 %v1764_v13, %v708_v25  ;;  %v812_v42 = vld [vmem:[#allocation2 + $0x10] sm:$0xff]  ;;  %v734_v58 = vld [vmem:[#allocation2 + $0x440] sm:$0xff] }
 0x291   : > { %v1493_v14 = vpop.f32.mrf.mxu0  ;;  %v1766_v3 = vpop.f32.mrf.mxu1 }
 0x292   : > { %2773 = vst [vmem:[#allocation2 + $0x5e8] sm:$0xff] %v2453_v63  ;;  %2695 = vst [vmem:[#allocation2 + $0x2e0] sm:$0xff] %v2375_v1  ;;  %v2454_v48 = vadd.f32 %v1493_v14, %v787_v62  ;;  %v2376_v45 = vadd.f32 %v1766_v3, %v709_v31  ;;  %v816_v63 = vld [vmem:[#allocation2 + $0x3f0] sm:$0xff]  ;;  %v738_v1 = vld [vmem:[#allocation2 + $0x9c8] sm:$0xff] }
 0x293   : > { %v1497_v59 = vpop.f32.mrf.mxu0  ;;  %v1770_v5 = vpop.f32.mrf.mxu1  ;;  %2009 = vmatmul.mubr.bf16.gmra.mxu1 %v8476_v28  ;;  %7122 = vmatmul.mubr.bf16.gmra.mxu0 %v8476_v28 }
 0x294   : > { %2774 = vst [vmem:[#allocation2 + $0x8c0] sm:$0xff] %v2454_v48  ;;  %2696 = vst [vmem:[#allocation2 + $0x2d8] sm:$0xff] %v2376_v45  ;;  %v2458_v37 = vadd.f32 %v1497_v59, %v791_v2  ;;  %v2380_v12 = vadd.f32 %v1770_v5, %v713_v20  ;;  %v817_v48 = vld [vmem:[#allocation2 + $0x840] sm:$0xff] }
 0x295   : > { %v1499_v11 = vpop.f32.mrf.mxu0  ;;  %v1772_v15 = vpop.f32.mrf.mxu1  ;;  %v739_v45 = vld [vmem:[#allocation2 + $0x720] sm:$0xff] }
 0x296   : > { %2778 = vst [vmem:[#allocation2 + $0x788] sm:$0xff] %v2458_v37  ;;  %2700 = vst [vmem:[#allocation2 + $0x8a0] sm:$0xff] %v2380_v12  ;;  %v2459_v21 = vadd.f32 %v1499_v11, %v792_v8  ;;  %v2381_v23 = vadd.f32 %v1772_v15, %v714_v10  ;;  %v821_v37 = vld [vmem:[#allocation2 + $0x338] sm:$0xff] }
 0x297   : > { %v1501_v49 = vpop.f32.mrf.mxu0  ;;  %v1774_v26 = vpop.f32.mrf.mxu1  ;;  %v743_v12 = vld [vmem:[#allocation2 + $0xb8] sm:$0xff] }
 0x298   : > { %2779 = vst [vmem:[#allocation2 + $0x860] sm:$0xff] %v2459_v21  ;;  %2701 = vst [vmem:[#allocation2 + $0x920] sm:$0xff] %v2381_v23  ;;  %v2463_v28 = vadd.f32 %v1501_v49, %v796_v16  ;;  %v2385_v19 = vadd.f32 %v1774_v26, %v718_v18  ;;  %v822_v21 = vld [vmem:[#allocation2 + $0x858] sm:$0xff]  ;;  %v744_v23 = vld [vmem:[#allocation2 + $0x2d0] sm:$0xff] }
 0x299   : > { %v1503_v30 = vpop.f32.mrf.mxu0  ;;  %v1776_v32 = vpop.f32.mrf.mxu1 }
 0x29a   : > { %2783 = vst [vmem:[#allocation2 + $0xb0] sm:$0xff] %v2463_v28  ;;  %2705 = vst [vmem:[#allocation2 + $0x730] sm:$0xff] %v2385_v19  ;;  %v2464_v33 = vadd.f32 %v1503_v30, %v797_v17  ;;  %v2386_v22 = vadd.f32 %v1776_v32, %v719_v34  ;;  %v826_v28 = vld [vmem:[#allocation2 + $0x220] sm:$0xff]  ;;  %v748_v19 = vld [vmem:[#allocation2 + $0x618] sm:$0xff] }
 0x29b   : > { %v1507_v35 = vpop.f32.mrf.mxu0  ;;  %v1780_v38 = vpop.f32.mrf.mxu1 }
 0x29c   : > { %2784 = vst [vmem:[#allocation2 + $0x4a8] sm:$0xff] %v2464_v33  ;;  %2706 = vst [vmem:[#allocation2 + $0x388] sm:$0xff] %v2386_v22  ;;  %v2468_v40 = vadd.f32 %v1507_v35, %v801_v0  ;;  %v2390_v61 = vadd.f32 %v1780_v38, %v723_v50  ;;  %v827_v33 = vld [vmem:[#allocation2 + $0x648] sm:$0xff]  ;;  %v749_v22 = vld [vmem:[#allocation2 + $0x610] sm:$0xff] }
 0x29d   : > { %v1509_v4 = vpop.f32.mrf.mxu0  ;;  %v1782_v41 = vpop.f32.mrf.mxu1 }
 0x29e   : > { %2788 = vst [vmem:[#allocation2 + $0x1a0] sm:$0xff] %v2468_v40  ;;  %2710 = vst [vmem:[#allocation2 + $0xa8] sm:$0xff] %v2390_v61  ;;  %v2469_v44 = vadd.f32 %v1509_v4, %v802_v60  ;;  %v2391_v46 = vadd.f32 %v1782_v41, %v724_v39  ;;  %v831_v40 = vld [vmem:[#allocation2 + $0xe8] sm:$0xff] }
 0x29f   : > { %v1511_v47 = vpop.f32.mrf.mxu0  ;;  %v1784_v7 = vpop.f32.mrf.mxu1  ;;  %v753_v61 = vld [vmem:[#allocation2 + $0x2e8] sm:$0xff] }
 0x2a0   : > { %2789 = vst [vmem:[#allocation2 + $0xf0] sm:$0xff] %v2469_v44  ;;  %2711 = vst [vmem:[#allocation2 + $0x28] sm:$0xff] %v2391_v46  ;;  %v2473_v51 = vadd.f32 %v1511_v47, %v806_v53  ;;  %v2395_v29 = vadd.f32 %v1784_v7, %v728_v43  ;;  %v832_v44 = vld [vmem:[#allocation2 + $0x238] sm:$0xff]  ;;  %v754_v46 = vld [vmem:[#allocation2 + $0x120] sm:$0xff] }
 0x2a1   : > { %v1513_v27 = vpop.f32.mrf.mxu0  ;;  %v1786_v52 = vpop.f32.mrf.mxu1 }
 0x2a2   : > { %2793 = vst [vmem:[#allocation2 + $0x640] sm:$0xff] %v2473_v51  ;;  %2715 = vst [vmem:[#allocation2 + $0x868] sm:$0xff] %v2395_v29  ;;  %v2474_v57 = vadd.f32 %v1513_v27, %v807_v24  ;;  %v2396_v36 = vadd.f32 %v1786_v52, %v729_v6  ;;  %v836_v51 = vld [vmem:[#allocation2 + $0x680] sm:$0xff]  ;;  %v758_v29 = vld [vmem:[#allocation2 + $0x110] sm:$0xff] }
 0x2a3   : > { %v1517_v9 = vpop.f32.mrf.mxu0  ;;  %v1790_v25 = vpop.f32.mrf.mxu1 }
 0x2a4   : > { %2794 = vst [vmem:[#allocation2 + $0x2c8] sm:$0xff] %v2474_v57  ;;  %2716 = vst [vmem:[#allocation2 + $0x878] sm:$0xff] %v2396_v36  ;;  %v2478_v56 = vadd.f32 %v1517_v9, %v811_v54  ;;  %v2400_v13 = vadd.f32 %v1790_v25, %v733_v55  ;;  %v837_v57 = vld [vmem:[#allocation2 + $0x7a0] sm:$0xff]  ;;  %v759_v36 = vld [vmem:[#allocation2 + $0x1a8] sm:$0xff] }
 0x2a5   : > { %v1519_v62 = vpop.f32.mrf.mxu0  ;;  %v1792_v31 = vpop.f32.mrf.mxu1 }
 0x2a6   : > { %2798 = vst [vmem:[#allocation2 + $0x4f0] sm:$0xff] %v2478_v56  ;;  %2720 = vst [vmem:[#allocation2 + $0x5f0] sm:$0xff] %v2400_v13  ;;  %v2479_v14 = vadd.f32 %v1519_v62, %v812_v42  ;;  %v2401_v3 = vadd.f32 %v1792_v31, %v734_v58  ;;  %v841_v56 = vld [vmem:[#allocation2 + $0x50] sm:$0xff] }
 0x2a7   : > { %v1521_v2 = vpop.f32.mrf.mxu0  ;;  %v1794_v20 = vpop.f32.mrf.mxu1  ;;  %v763_v13 = vld [vmem:[#allocation2 + $0x830] sm:$0xff] }
 0x2a8   : > { %2799 = vst [vmem:[#allocation2 + $0x10] sm:$0xff] %v2479_v14  ;;  %2721 = vst [vmem:[#allocation2 + $0x440] sm:$0xff] %v2401_v3  ;;  %v2483_v59 = vadd.f32 %v1521_v2, %v816_v63  ;;  %v2405_v5 = vadd.f32 %v1794_v20, %v738_v1  ;;  %v842_v14 = vld [vmem:[#allocation2 + $0x5f8] sm:$0xff]  ;;  %v764_v3 = vld [vmem:[#allocation2 + $0x5a0] sm:$0xff] }
 0x2a9   : > { %v1523_v8 = vpop.f32.mrf.mxu0  ;;  %v1796_v10 = vpop.f32.mrf.mxu1 }
 0x2aa   : > { %2803 = vst [vmem:[#allocation2 + $0x3f0] sm:$0xff] %v2483_v59  ;;  %2725 = vst [vmem:[#allocation2 + $0x9c8] sm:$0xff] %v2405_v5  ;;  %v2484_v11 = vadd.f32 %v1523_v8, %v817_v48  ;;  %v2406_v15 = vadd.f32 %v1796_v10, %v739_v45  ;;  %v846_v59 = vld [vmem:[#allocation2 + $0x670] sm:$0xff]  ;;  %v768_v5 = vld [vmem:[#allocation2 + $0x688] sm:$0xff] }
 0x2ab   : > { %v1527_v16 = vpop.f32.mrf.mxu0  ;;  %v1800_v18 = vpop.f32.mrf.mxu1 }
 0x2ac   : > { %2804 = vst [vmem:[#allocation2 + $0x840] sm:$0xff] %v2484_v11  ;;  %2726 = vst [vmem:[#allocation2 + $0x720] sm:$0xff] %v2406_v15  ;;  %v2488_v49 = vadd.f32 %v1527_v16, %v821_v37  ;;  %v2410_v26 = vadd.f32 %v1800_v18, %v743_v12  ;;  %v847_v11 = vld [vmem:[#allocation2 + $0x350] sm:$0xff]  ;;  %v769_v15 = vld [vmem:[#allocation2 + $0x60] sm:$0xff] }
 0x2ad   : > { %v1529_v17 = vpop.f32.mrf.mxu0  ;;  %v1802_v34 = vpop.f32.mrf.mxu1 }
 0x2ae   : > { %2808 = vst [vmem:[#allocation2 + $0x338] sm:$0xff] %v2488_v49  ;;  %2730 = vst [vmem:[#allocation2 + $0xb8] sm:$0xff] %v2410_v26  ;;  %v2489_v30 = vadd.f32 %v1529_v17, %v822_v21  ;;  %v2411_v32 = vadd.f32 %v1802_v34, %v744_v23  ;;  %v851_v49 = vld [vmem:[#allocation2 + $0x408] sm:$0xff]  ;;  %v773_v26 = vld [vmem:[#allocation2 + $0x9e0] sm:$0xff] }
 0x2af   : > { %v1531_v0 = vpop.f32.mrf.mxu0  ;;  %v1804_v50 = vpop.f32.mrf.mxu1 }
 0x2b0   : > { %2809 = vst [vmem:[#allocation2 + $0x858] sm:$0xff] %v2489_v30  ;;  %2731 = vst [vmem:[#allocation2 + $0x2d0] sm:$0xff] %v2411_v32  ;;  %v2493_v35 = vadd.f32 %v1531_v0, %v826_v28  ;;  %v2415_v38 = vadd.f32 %v1804_v50, %v748_v19  ;;  %v852_v30 = vld [vmem:[#allocation2 + $0x3b8] sm:$0xff]  ;;  %v774_v32 = vld [vmem:[#allocation2 + $0x450] sm:$0xff] }
 0x2b1   : > { %v1533_v60 = vpop.f32.mrf.mxu0  ;;  %v1806_v39 = vpop.f32.mrf.mxu1 }
 0x2b2   : > { %2813 = vst [vmem:[#allocation2 + $0x220] sm:$0xff] %v2493_v35  ;;  %2735 = vst [vmem:[#allocation2 + $0x618] sm:$0xff] %v2415_v38  ;;  %v2494_v4 = vadd.f32 %v1533_v60, %v827_v33  ;;  %v2416_v41 = vadd.f32 %v1806_v39, %v749_v22  ;;  %v856_v35 = vld [vmem:[#allocation2 + $0x380] sm:$0xff] }
 0x2b3   : > { %v1537_v53 = vpop.f32.mrf.mxu0  ;;  %v1810_v43 = vpop.f32.mrf.mxu1  ;;  %v778_v38 = vld [vmem:[#allocation2 + $0x4a0] sm:$0xff] }
 0x2b4   : > { %2814 = vst [vmem:[#allocation2 + $0x648] sm:$0xff] %v2494_v4  ;;  %2736 = vst [vmem:[#allocation2 + $0x610] sm:$0xff] %v2416_v41  ;;  %v2498_v47 = vadd.f32 %v1537_v53, %v831_v40  ;;  %v2420_v7 = vadd.f32 %v1810_v43, %v753_v61  ;;  %v857_v4 = vld [vmem:[#allocation2 + $0x768] sm:$0xff]  ;;  %v779_v41 = vld [vmem:[#allocation2 + $0x8d0] sm:$0xff] }
 0x2b5   : > { %v1539_v24 = vpop.f32.mrf.mxu0  ;;  %v1812_v6 = vpop.f32.mrf.mxu1 }
 0x2b6   : > { %2818 = vst [vmem:[#allocation2 + $0xe8] sm:$0xff] %v2498_v47  ;;  %2740 = vst [vmem:[#allocation2 + $0x2e8] sm:$0xff] %v2420_v7  ;;  %v2499_v27 = vadd.f32 %v1539_v24, %v832_v44  ;;  %v2421_v52 = vadd.f32 %v1812_v6, %v754_v46  ;;  %v861_v47 = vld [vmem:[#allocation2 + $0x180] sm:$0xff] }
 0x2b7   : > { %v1541_v54 = vpop.f32.mrf.mxu0  ;;  %v1814_v55 = vpop.f32.mrf.mxu1  ;;  %v783_v7 = vld [vmem:[#allocation2 + $0x660] sm:$0xff] }
 0x2b8   : > { %2819 = vst [vmem:[#allocation2 + $0x238] sm:$0xff] %v2499_v27  ;;  %2741 = vst [vmem:[#allocation2 + $0x120] sm:$0xff] %v2421_v52  ;;  %v2503_v9 = vadd.f32 %v1541_v54, %v836_v51  ;;  %v2425_v25 = vadd.f32 %v1814_v55, %v758_v29  ;;  %v862_v27 = vld [vmem:[#allocation2 + $0xa0] sm:$0xff]  ;;  %v784_v52 = vld [vmem:[#allocation2 + $0x88] sm:$0xff] }
 0x2b9   : > { %v1543_v42 = vpop.f32.mrf.mxu0  ;;  %v1816_v58 = vpop.f32.mrf.mxu1 }
 0x2ba   : > { %2823 = vst [vmem:[#allocation2 + $0x680] sm:$0xff] %v2503_v9  ;;  %2745 = vst [vmem:[#allocation2 + $0x110] sm:$0xff] %v2425_v25  ;;  %v2504_v62 = vadd.f32 %v1543_v42, %v837_v57  ;;  %v2426_v31 = vadd.f32 %v1816_v58, %v759_v36  ;;  %v866_v9 = vld [vmem:[#allocation2 + $0x460] sm:$0xff]  ;;  %v788_v25 = vld [vmem:[#allocation2 + $0x4e8] sm:$0xff] }
 0x2bb   : > { %v1547_v63 = vpop.f32.mrf.mxu0  ;;  %v1820_v1 = vpop.f32.mrf.mxu1 }
 0x2bc   : > { %2824 = vst [vmem:[#allocation2 + $0x7a0] sm:$0xff] %v2504_v62  ;;  %2746 = vst [vmem:[#allocation2 + $0x1a8] sm:$0xff] %v2426_v31  ;;  %v2508_v2 = vadd.f32 %v1547_v63, %v841_v56  ;;  %v2430_v20 = vadd.f32 %v1820_v1, %v763_v13  ;;  %v867_v62 = vld [vmem:[#allocation2 + $0x210] sm:$0xff]  ;;  %v789_v31 = vld [vmem:[#allocation2 + $0x3c8] sm:$0xff] }
 0x2bd   : > { %v1549_v48 = vpop.f32.mrf.mxu0  ;;  %v1822_v45 = vpop.f32.mrf.mxu1 }
 0x2be   : > { %2828 = vst [vmem:[#allocation2 + $0x50] sm:$0xff] %v2508_v2  ;;  %2750 = vst [vmem:[#allocation2 + $0x830] sm:$0xff] %v2430_v20  ;;  %v2509_v8 = vadd.f32 %v1549_v48, %v842_v14  ;;  %v2431_v10 = vadd.f32 %v1822_v45, %v764_v3  ;;  %v871_v2 = vld [vmem:[#allocation2 + $0x1e8] sm:$0xff]  ;;  %v793_v20 = vld [vmem:[#allocation2 + $0x480] sm:$0xff] }
 0x2bf   : > { %v1551_v37 = vpop.f32.mrf.mxu0  ;;  %v1824_v12 = vpop.f32.mrf.mxu1 }
 0x2c0   : > { %2829 = vst [vmem:[#allocation2 + $0x5f8] sm:$0xff] %v2509_v8  ;;  %2751 = vst [vmem:[#allocation2 + $0x5a0] sm:$0xff] %v2431_v10  ;;  %v2513_v16 = vadd.f32 %v1551_v37, %v846_v59  ;;  %v2435_v18 = vadd.f32 %v1824_v12, %v768_v5  ;;  %v872_v8 = vld [vmem:[#allocation2 + $0x5a8] sm:$0xff]  ;;  %v794_v10 = vld [vmem:[#allocation2 + $0x978] sm:$0xff] }
 0x2c1   : > { %v1553_v21 = vpop.f32.mrf.mxu0  ;;  %v1826_v23 = vpop.f32.mrf.mxu1 }
 0x2c2   : > { %2833 = vst [vmem:[#allocation2 + $0x670] sm:$0xff] %v2513_v16  ;;  %2755 = vst [vmem:[#allocation2 + $0x688] sm:$0xff] %v2435_v18  ;;  %v2514_v17 = vadd.f32 %v1553_v21, %v847_v11  ;;  %v2436_v34 = vadd.f32 %v1826_v23, %v769_v15  ;;  %v876_v16 = vld [vmem:[#allocation2 + $0x728] sm:$0xff]  ;;  %v798_v18 = vld [vmem:[#allocation2 + $0x420] sm:$0xff] }
 0x2c3   : > { %v1557_v28 = vpop.f32.mrf.mxu0  ;;  %v1830_v19 = vpop.f32.mrf.mxu1 }
 0x2c4   : > { %2834 = vst [vmem:[#allocation2 + $0x350] sm:$0xff] %v2514_v17  ;;  %2756 = vst [vmem:[#allocation2 + $0x60] sm:$0xff] %v2436_v34  ;;  %v2518_v0 = vadd.f32 %v1557_v28, %v851_v49  ;;  %v2440_v50 = vadd.f32 %v1830_v19, %v773_v26  ;;  %v877_v17 = vld [vmem:[#allocation2 + $0x7d0] sm:$0xff]  ;;  %v799_v34 = vld [vmem:[#allocation2 + $0x588] sm:$0xff] }
 0x2c5   : > { %v1559_v33 = vpop.f32.mrf.mxu0  ;;  %v1832_v22 = vpop.f32.mrf.mxu1 }
 0x2c6   : > { %2838 = vst [vmem:[#allocation2 + $0x408] sm:$0xff] %v2518_v0  ;;  %2760 = vst [vmem:[#allocation2 + $0x9e0] sm:$0xff] %v2440_v50  ;;  %v2519_v60 = vadd.f32 %v1559_v33, %v852_v30  ;;  %v2441_v39 = vadd.f32 %v1832_v22, %v774_v32  ;;  %v803_v0 = vld [vmem:[#allocation2 + $0x7e0] sm:$0xff]  ;;  %v655_v50 = vld [vmem:[#allocation2 + $0x570] sm:$0xff] }
 0x2c7   : > { %v1561_v40 = vpop.f32.mrf.mxu0  ;;  %v1834_v61 = vpop.f32.mrf.mxu1 }
 0x2c8   : > { %2839 = vst [vmem:[#allocation2 + $0x3b8] sm:$0xff] %v2519_v60  ;;  %2761 = vst [vmem:[#allocation2 + $0x450] sm:$0xff] %v2441_v39  ;;  %v2523_v53 = vadd.f32 %v1561_v40, %v856_v35  ;;  %v2445_v43 = vadd.f32 %v1834_v61, %v778_v38  ;;  %v804_v60 = vld [vmem:[#allocation2 + $0x2b0] sm:$0xff]  ;;  %v645_v39 = vld [vmem:[#allocation2 + $0x320] sm:$0xff] }
 0x2c9   : > { %v1563_v44 = vpop.f32.mrf.mxu0  ;;  %v1836_v46 = vpop.f32.mrf.mxu1 }
 0x2ca   : > { %2843 = vst [vmem:[#allocation2 + $0x380] sm:$0xff] %v2523_v53  ;;  %2765 = vst [vmem:[#allocation2 + $0x4a0] sm:$0xff] %v2445_v43  ;;  %v2524_v24 = vadd.f32 %v1563_v44, %v857_v4  ;;  %v2446_v6 = vadd.f32 %v1836_v46, %v779_v41  ;;  %v808_v53 = vld [vmem:[#allocation2 + $0x468] sm:$0xff]  ;;  %v660_v43 = vld [vmem:[#allocation2 + $0x898] sm:$0xff] }
 0x2cb   : > { %v1567_v51 = vpop.f32.mrf.mxu0  ;;  %v1840_v29 = vpop.f32.mrf.mxu1 }
 0x2cc   : > { %2844 = vst [vmem:[#allocation2 + $0x768] sm:$0xff] %v2524_v24  ;;  %2766 = vst [vmem:[#allocation2 + $0x8d0] sm:$0xff] %v2446_v6  ;;  %v2528_v54 = vadd.f32 %v1567_v51, %v861_v47  ;;  %v2450_v55 = vadd.f32 %v1840_v29, %v783_v7  ;;  %v809_v24 = vld [vmem:[#allocation2 + $0x148] sm:$0xff] }
 0x2cd   : > { %v1569_v57 = vpop.f32.mrf.mxu0  ;;  %v1842_v36 = vpop.f32.mrf.mxu1  ;;  %v650_v6 = vld [vmem:[#allocation2 + $0x6a8] sm:$0xff] }
 0x2ce   : > { %2848 = vst [vmem:[#allocation2 + $0x180] sm:$0xff] %v2528_v54  ;;  %2770 = vst [vmem:[#allocation2 + $0x660] sm:$0xff] %v2450_v55  ;;  %v2529_v42 = vadd.f32 %v1569_v57, %v862_v27  ;;  %v2451_v58 = vadd.f32 %v1842_v36, %v784_v52  ;;  %v813_v54 = vld [vmem:[#allocation2 + $0x508] sm:$0xff]  ;;  %v675_v55 = vld [vmem:[#allocation2 + $0x5c0] sm:$0xff] }
 0x2cf   : > { %v1571_v56 = vpop.f32.mrf.mxu0  ;;  %v1844_v13 = vpop.f32.mrf.mxu1 }
 0x2d0   : > { %2849 = vst [vmem:[#allocation2 + $0xa0] sm:$0xff] %v2529_v42  ;;  %2771 = vst [vmem:[#allocation2 + $0x88] sm:$0xff] %v2451_v58  ;;  %v2533_v63 = vadd.f32 %v1571_v56, %v866_v9  ;;  %v2455_v1 = vadd.f32 %v1844_v13, %v788_v25  ;;  %v814_v42 = vld [vmem:[#allocation2 + $0x5b8] sm:$0xff] }
 0x2d1   : > { %v1573_v14 = vpop.f32.mrf.mxu0  ;;  %v1846_v3 = vpop.f32.mrf.mxu1  ;;  %v665_v58 = vld [vmem:[#allocation2 + $0x98] sm:$0xff] }
 0x2d2   : > { %2853 = vst [vmem:[#allocation2 + $0x460] sm:$0xff] %v2533_v63  ;;  %2775 = vst [vmem:[#allocation2 + $0x4e8] sm:$0xff] %v2455_v1  ;;  %v2534_v48 = vadd.f32 %v1573_v14, %v867_v62  ;;  %v2456_v45 = vadd.f32 %v1846_v3, %v789_v31  ;;  %v818_v63 = vld [vmem:[#allocation2 + $0x818] sm:$0xff]  ;;  %v680_v1 = vld [vmem:[#allocation2 + $0x620] sm:$0xff] }
 0x2d3   : > { %v1577_v59 = vpop.f32.mrf.mxu0  ;;  %v1850_v5 = vpop.f32.mrf.mxu1 }
 0x2d4   : > { %2854 = vst [vmem:[#allocation2 + $0x210] sm:$0xff] %v2534_v48  ;;  %2776 = vst [vmem:[#allocation2 + $0x3c8] sm:$0xff] %v2456_v45  ;;  %v2538_v37 = vadd.f32 %v1577_v59, %v871_v2  ;;  %v2460_v12 = vadd.f32 %v1850_v5, %v793_v20  ;;  %v819_v48 = vld [vmem:[#allocation2 + $0xc8] sm:$0xff]  ;;  %v670_v45 = vld [vmem:[#allocation2 + $0x650] sm:$0xff] }
 0x2d5   : > { %v1579_v11 = vpop.f32.mrf.mxu0  ;;  %v1852_v15 = vpop.f32.mrf.mxu1 }
 0x2d6   : > { %2858 = vst [vmem:[#allocation2 + $0x1e8] sm:$0xff] %v2538_v37  ;;  %2780 = vst [vmem:[#allocation2 + $0x480] sm:$0xff] %v2460_v12  ;;  %v2539_v21 = vadd.f32 %v1579_v11, %v872_v8  ;;  %v2461_v23 = vadd.f32 %v1852_v15, %v794_v10  ;;  %v823_v37 = vld [vmem:[#allocation2 + $0x4b0] sm:$0xff]  ;;  %v695_v12 = vld [vmem:[#allocation2 + $0x7c8] sm:$0xff] }
 0x2d7   : > { %v1581_v49 = vpop.f32.mrf.mxu0  ;;  %v1854_v26 = vpop.f32.mrf.mxu1 }
 0x2d8   : > { %2859 = vst [vmem:[#allocation2 + $0x5a8] sm:$0xff] %v2539_v21  ;;  %2781 = vst [vmem:[#allocation2 + $0x978] sm:$0xff] %v2461_v23  ;;  %v2543_v28 = vadd.f32 %v1581_v49, %v876_v16  ;;  %v2465_v19 = vadd.f32 %v1854_v26, %v798_v18  ;;  %v824_v21 = vld [vmem:[#allocation2 + $0x6b0] sm:$0xff]  ;;  %v685_v23 = vld [vmem:[#allocation2 + $0x600] sm:$0xff] }
 0x2d9   : > { %v1583_v30 = vpop.f32.mrf.mxu0  ;;  %v1856_v32 = vpop.f32.mrf.mxu1 }
 0x2da   : > { %2863 = vst [vmem:[#allocation2 + $0x728] sm:$0xff] %v2543_v28  ;;  %2785 = vst [vmem:[#allocation2 + $0x420] sm:$0xff] %v2465_v19  ;;  %v2544_v33 = vadd.f32 %v1583_v30, %v877_v17  ;;  %v2466_v22 = vadd.f32 %v1856_v32, %v799_v34  ;;  %v828_v28 = vld [vmem:[#allocation2 + $0x128] sm:$0xff]  ;;  %v700_v19 = vld [vmem:[#allocation2 + $0x2f8] sm:$0xff] }
 0x2db   : > { %v1860_v35 = vpop.f32.mrf.mxu1  ;;  %v7063_v38 = vpop.f32.mrf.mxu0 }
 0x2dc   : > { %2864 = vst [vmem:[#allocation2 + $0x7d0] sm:$0xff] %v2544_v33  ;;  %2786 = vst [vmem:[#allocation2 + $0x588] sm:$0xff] %v2466_v22  ;;  %v2470_v40 = vadd.f32 %v1860_v35, %v803_v0  ;;  %v2322_v61 = vadd.f32 %v7063_v38, %v655_v50  ;;  %v829_v33 = vld [vmem:[#allocation2 + $0x668] sm:$0xff]  ;;  %v690_v22 = vld [vmem:[#allocation2 + $0x690] sm:$0xff] }
 0x2dd   : > { %v1862_v4 = vpop.f32.mrf.mxu1  ;;  %v2053_v41 = vpop.f32.mrf.mxu0 }
 0x2de   : > { %2790 = vst [vmem:[#allocation2 + $0x7e0] sm:$0xff] %v2470_v40  ;;  %2642 = vst [vmem:[#allocation2 + $0x570] sm:$0xff] %v2322_v61  ;;  %v2471_v44 = vadd.f32 %v1862_v4, %v804_v60  ;;  %v2312_v46 = vadd.f32 %v2053_v41, %v645_v39  ;;  %v833_v40 = vld [vmem:[#allocation2 + $0x870] sm:$0xff]  ;;  %v715_v61 = vld [vmem:[#allocation2 + $0x3e8] sm:$0xff] }
 0x2df   : > { %v1864_v47 = vpop.f32.mrf.mxu1  ;;  %v7064_v7 = vpop.f32.mrf.mxu0 }
 0x2e0   : > { %2791 = vst [vmem:[#allocation2 + $0x2b0] sm:$0xff] %v2471_v44  ;;  %2632 = vst [vmem:[#allocation2 + $0x320] sm:$0xff] %v2312_v46  ;;  %v2475_v51 = vadd.f32 %v1864_v47, %v808_v53  ;;  %v2327_v29 = vadd.f32 %v7064_v7, %v660_v43  ;;  %v834_v44 = vld [vmem:[#allocation2 + $0x760] sm:$0xff]  ;;  %v705_v46 = vld [vmem:[#allocation2 + $0x950] sm:$0xff] }
 0x2e1   : > { %v1866_v27 = vpop.f32.mrf.mxu1  ;;  %v2056_v52 = vpop.f32.mrf.mxu0 }
 0x2e2   : > { %2795 = vst [vmem:[#allocation2 + $0x468] sm:$0xff] %v2475_v51  ;;  %2647 = vst [vmem:[#allocation2 + $0x898] sm:$0xff] %v2327_v29  ;;  %v2476_v57 = vadd.f32 %v1866_v27, %v809_v24  ;;  %v2317_v36 = vadd.f32 %v2056_v52, %v650_v6  ;;  %v838_v51 = vld [vmem:[#allocation2 + $0x9e8] sm:$0xff]  ;;  %v720_v29 = vld [vmem:[#allocation2 + $0x9d8] sm:$0xff] }
 0x2e3   : > { %v1870_v9 = vpop.f32.mrf.mxu1  ;;  %v7067_v25 = vpop.f32.mrf.mxu0 }
 0x2e4   : > { %2796 = vst [vmem:[#allocation2 + $0x148] sm:$0xff] %v2476_v57  ;;  %2637 = vst [vmem:[#allocation2 + $0x6a8] sm:$0xff] %v2317_v36  ;;  %v2480_v56 = vadd.f32 %v1870_v9, %v813_v54  ;;  %v2342_v13 = vadd.f32 %v7067_v25, %v675_v55  ;;  %v839_v57 = vld [vmem:[#allocation2 + $0x510] sm:$0xff]  ;;  %v710_v36 = vld [vmem:[#allocation2 + $0x628] sm:$0xff] }
 0x2e5   : > { %v1872_v62 = vpop.f32.mrf.mxu1  ;;  %v2069_v31 = vpop.f32.mrf.mxu0 }
 0x2e6   : > { %2800 = vst [vmem:[#allocation2 + $0x508] sm:$0xff] %v2480_v56  ;;  %2662 = vst [vmem:[#allocation2 + $0x5c0] sm:$0xff] %v2342_v13  ;;  %v2481_v14 = vadd.f32 %v1872_v62, %v814_v42  ;;  %v2332_v3 = vadd.f32 %v2069_v31, %v665_v58  ;;  %v843_v56 = vld [vmem:[#allocation2 + $0x2a8] sm:$0xff]  ;;  %v735_v13 = vld [vmem:[#allocation2 + $0x880] sm:$0xff] }
 0x2e7   : > { %v1874_v2 = vpop.f32.mrf.mxu1  ;;  %v7068_v20 = vpop.f32.mrf.mxu0 }
 0x2e8   : > { %2801 = vst [vmem:[#allocation2 + $0x5b8] sm:$0xff] %v2481_v14  ;;  %2652 = vst [vmem:[#allocation2 + $0x98] sm:$0xff] %v2332_v3  ;;  %v2485_v59 = vadd.f32 %v1874_v2, %v818_v63  ;;  %v2347_v5 = vadd.f32 %v7068_v20, %v680_v1  ;;  %v844_v14 = vld [vmem:[#allocation2 + $0x498] sm:$0xff]  ;;  %v725_v3 = vld [vmem:[#allocation2 + $0x2a0] sm:$0xff] }
 0x2e9   : > { %v1876_v8 = vpop.f32.mrf.mxu1  ;;  %v2072_v10 = vpop.f32.mrf.mxu0 }
 0x2ea   : > { %2805 = vst [vmem:[#allocation2 + $0x818] sm:$0xff] %v2485_v59  ;;  %2667 = vst [vmem:[#allocation2 + $0x620] sm:$0xff] %v2347_v5  ;;  %v2486_v11 = vadd.f32 %v1876_v8, %v819_v48  ;;  %v2337_v15 = vadd.f32 %v2072_v10, %v670_v45  ;;  %v848_v59 = vld [vmem:[#allocation2 + $0x748] sm:$0xff]  ;;  %v740_v5 = vld [vmem:[#allocation2 + $0x1b0] sm:$0xff] }
 0x2eb   : > { %v1880_v16 = vpop.f32.mrf.mxu1  ;;  %v7071_v18 = vpop.f32.mrf.mxu0 }
 0x2ec   : > { %2806 = vst [vmem:[#allocation2 + $0xc8] sm:$0xff] %v2486_v11  ;;  %2657 = vst [vmem:[#allocation2 + $0x650] sm:$0xff] %v2337_v15  ;;  %v2490_v49 = vadd.f32 %v1880_v16, %v823_v37  ;;  %v2362_v26 = vadd.f32 %v7071_v18, %v695_v12  ;;  %v849_v11 = vld [vmem:[#allocation2 + $0x118] sm:$0xff] }
 0x2ed   : > { %v1882_v17 = vpop.f32.mrf.mxu1  ;;  %v2085_v34 = vpop.f32.mrf.mxu0  ;;  %v730_v15 = vld [vmem:[#allocation2 + $0x9f8] sm:$0xff] }
 0x2ee   : > { %2810 = vst [vmem:[#allocation2 + $0x4b0] sm:$0xff] %v2490_v49  ;;  %2682 = vst [vmem:[#allocation2 + $0x7c8] sm:$0xff] %v2362_v26  ;;  %v2491_v30 = vadd.f32 %v1882_v17, %v824_v21  ;;  %v2352_v32 = vadd.f32 %v2085_v34, %v685_v23  ;;  %v853_v49 = vld [vmem:[#allocation2 + $0x298] sm:$0xff]  ;;  %v755_v26 = vld [vmem:[#allocation2 + $0x1c8] sm:$0xff] }
 0x2ef   : > { %v1884_v0 = vpop.f32.mrf.mxu1  ;;  %v7072_v50 = vpop.f32.mrf.mxu0 }
 0x2f0   : > { %2811 = vst [vmem:[#allocation2 + $0x6b0] sm:$0xff] %v2491_v30  ;;  %2672 = vst [vmem:[#allocation2 + $0x600] sm:$0xff] %v2352_v32  ;;  %v2495_v35 = vadd.f32 %v1884_v0, %v828_v28  ;;  %v2367_v38 = vadd.f32 %v7072_v50, %v700_v19  ;;  %v854_v30 = vld [vmem:[#allocation2 + $0x58] sm:$0xff] }
 0x2f1   : > { %v1886_v60 = vpop.f32.mrf.mxu1  ;;  %v2088_v39 = vpop.f32.mrf.mxu0  ;;  %v745_v32 = vld [vmem:[#allocation2 + $0x9b8] sm:$0xff] }
 0x2f2   : > { %2815 = vst [vmem:[#allocation2 + $0x128] sm:$0xff] %v2495_v35  ;;  %2687 = vst [vmem:[#allocation2 + $0x2f8] sm:$0xff] %v2367_v38  ;;  %v2496_v4 = vadd.f32 %v1886_v60, %v829_v33  ;;  %v2357_v41 = vadd.f32 %v2088_v39, %v690_v22  ;;  %v858_v35 = vld [vmem:[#allocation2 + $0x980] sm:$0xff] }
 0x2f3   : > { %v1890_v53 = vpop.f32.mrf.mxu1  ;;  %v7075_v43 = vpop.f32.mrf.mxu0  ;;  %v760_v38 = vld [vmem:[#allocation2 + $0x3a0] sm:$0xff] }
 0x2f4   : > { %2816 = vst [vmem:[#allocation2 + $0x668] sm:$0xff] %v2496_v4  ;;  %2677 = vst [vmem:[#allocation2 + $0x690] sm:$0xff] %v2357_v41  ;;  %v2500_v47 = vadd.f32 %v1890_v53, %v833_v40  ;;  %v2382_v7 = vadd.f32 %v7075_v43, %v715_v61  ;;  %v859_v4 = vld [vmem:[#allocation2 + $0xc0] sm:$0xff] }
 0x2f5   : > { %v1892_v24 = vpop.f32.mrf.mxu1  ;;  %v2101_v6 = vpop.f32.mrf.mxu0  ;;  %v750_v41 = vld [vmem:[#allocation2 + $0x1c0] sm:$0xff] }
 0x2f6   : > { %2820 = vst [vmem:[#allocation2 + $0x870] sm:$0xff] %v2500_v47  ;;  %2702 = vst [vmem:[#allocation2 + $0x3e8] sm:$0xff] %v2382_v7  ;;  %v2501_v27 = vadd.f32 %v1892_v24, %v834_v44  ;;  %v2372_v52 = vadd.f32 %v2101_v6, %v705_v46  ;;  %v863_v47 = vld [vmem:[#allocation2 + $0x568] sm:$0xff] }
 0x2f7   : > { %v1894_v54 = vpop.f32.mrf.mxu1  ;;  %v7076_v55 = vpop.f32.mrf.mxu0  ;;  %v775_v7 = vld [vmem:[#allocation2 + $0x968] sm:$0xff] }
 0x2f8   : > { %2821 = vst [vmem:[#allocation2 + $0x760] sm:$0xff] %v2501_v27  ;;  %2692 = vst [vmem:[#allocation2 + $0x950] sm:$0xff] %v2372_v52  ;;  %v2505_v9 = vadd.f32 %v1894_v54, %v838_v51  ;;  %v2387_v25 = vadd.f32 %v7076_v55, %v720_v29  ;;  %v864_v27 = vld [vmem:[#allocation2 + $0x820] sm:$0xff]  ;;  %v765_v52 = vld [vmem:[#allocation2 + $0x4d8] sm:$0xff] }
 0x2f9   : > { %v1896_v42 = vpop.f32.mrf.mxu1  ;;  %v2104_v58 = vpop.f32.mrf.mxu0 }
 0x2fa   : > { %2825 = vst [vmem:[#allocation2 + $0x9e8] sm:$0xff] %v2505_v9  ;;  %2707 = vst [vmem:[#allocation2 + $0x9d8] sm:$0xff] %v2387_v25  ;;  %v2506_v62 = vadd.f32 %v1896_v42, %v839_v57  ;;  %v2377_v31 = vadd.f32 %v2104_v58, %v710_v36  ;;  %v868_v9 = vld [vmem:[#allocation2 + $0x458] sm:$0xff] }
 0x2fb   : > { %v1900_v63 = vpop.f32.mrf.mxu1  ;;  %v7079_v1 = vpop.f32.mrf.mxu0  ;;  %v780_v25 = vld [vmem:[#allocation2 + $0x38] sm:$0xff] }
 0x2fc   : > { %2826 = vst [vmem:[#allocation2 + $0x510] sm:$0xff] %v2506_v62  ;;  %2697 = vst [vmem:[#allocation2 + $0x628] sm:$0xff] %v2377_v31  ;;  %v2510_v2 = vadd.f32 %v1900_v63, %v843_v56  ;;  %v2402_v20 = vadd.f32 %v7079_v1, %v735_v13  ;;  %v869_v62 = vld [vmem:[#allocation2 + $0x398] sm:$0xff] }
 0x2fd   : > { %v1902_v48 = vpop.f32.mrf.mxu1  ;;  %v2117_v45 = vpop.f32.mrf.mxu0  ;;  %v770_v31 = vld [vmem:[#allocation2 + $0x3f8] sm:$0xff] }
 0x2fe   : > { %2830 = vst [vmem:[#allocation2 + $0x2a8] sm:$0xff] %v2510_v2  ;;  %2722 = vst [vmem:[#allocation2 + $0x880] sm:$0xff] %v2402_v20  ;;  %v2511_v8 = vadd.f32 %v1902_v48, %v844_v14  ;;  %v2392_v10 = vadd.f32 %v2117_v45, %v725_v3  ;;  %v873_v2 = vld [vmem:[#allocation2 + $0x3e0] sm:$0xff] }
 0x2ff   : > { %v1904_v37 = vpop.f32.mrf.mxu1  ;;  %v7080_v12 = vpop.f32.mrf.mxu0  ;;  %v795_v20 = vld [vmem:[#allocation2 + $0xe0] sm:$0xff] }
 0x300   : > { %2831 = vst [vmem:[#allocation2 + $0x498] sm:$0xff] %v2511_v8  ;;  %2712 = vst [vmem:[#allocation2 + $0x2a0] sm:$0xff] %v2392_v10  ;;  %v2515_v16 = vadd.f32 %v1904_v37, %v848_v59  ;;  %v2407_v18 = vadd.f32 %v7080_v12, %v740_v5  ;;  %v874_v8 = vld [vmem:[#allocation2 + $0x288] sm:$0xff]  ;;  %v785_v10 = vld [vmem:[#allocation2 + $0x518] sm:$0xff] }
 0x301   : > { %v1906_v21 = vpop.f32.mrf.mxu1  ;;  %v2120_v23 = vpop.f32.mrf.mxu0 }
 0x302   : > { %2835 = vst [vmem:[#allocation2 + $0x748] sm:$0xff] %v2515_v16  ;;  %2727 = vst [vmem:[#allocation2 + $0x1b0] sm:$0xff] %v2407_v18  ;;  %v2516_v17 = vadd.f32 %v1906_v21, %v849_v11  ;;  %v2397_v34 = vadd.f32 %v2120_v23, %v730_v15  ;;  %v878_v16 = vld [vmem:[#allocation2 + $0x4f8] sm:$0xff]  ;;  %v800_v18 = vld [vmem:[#allocation2 + $0x8f0] sm:$0xff] }
 0x303   : > { %v1910_v28 = vpop.f32.mrf.mxu1  ;;  %v7083_v19 = vpop.f32.mrf.mxu0 }
 0x304   : > { %2836 = vst [vmem:[#allocation2 + $0x118] sm:$0xff] %v2516_v17  ;;  %2717 = vst [vmem:[#allocation2 + $0x9f8] sm:$0xff] %v2397_v34  ;;  %v2520_v0 = vadd.f32 %v1910_v28, %v853_v49  ;;  %v2422_v50 = vadd.f32 %v7083_v19, %v755_v26  ;;  %v879_v17 = vld [vmem:[#allocation2 + $0x5c8] sm:$0xff]  ;;  %v790_v34 = vld [vmem:[#allocation2 + $0x158] sm:$0xff] }
 0x305   : > { %v1912_v33 = vpop.f32.mrf.mxu1  ;;  %v2133_v22 = vpop.f32.mrf.mxu0 }
 0x306   : > { %2840 = vst [vmem:[#allocation2 + $0x298] sm:$0xff] %v2520_v0  ;;  %2742 = vst [vmem:[#allocation2 + $0x1c8] sm:$0xff] %v2422_v50  ;;  %v2521_v60 = vadd.f32 %v1912_v33, %v854_v30  ;;  %v2412_v39 = vadd.f32 %v2133_v22, %v745_v32  ;;  %v883_v0 = vld [vmem:[#allocation2 + $0x250] sm:$0xff]  ;;  %v815_v50 = vld [vmem:[#allocation2 + $0x948] sm:$0xff] }
 0x307   : > { %v1914_v40 = vpop.f32.mrf.mxu1  ;;  %v7084_v61 = vpop.f32.mrf.mxu0 }
 0x308   : > { %2841 = vst [vmem:[#allocation2 + $0x58] sm:$0xff] %v2521_v60  ;;  %2732 = vst [vmem:[#allocation2 + $0x9b8] sm:$0xff] %v2412_v39  ;;  %v2525_v53 = vadd.f32 %v1914_v40, %v858_v35  ;;  %v2427_v43 = vadd.f32 %v7084_v61, %v760_v38  ;;  %v884_v60 = vld [vmem:[#allocation2 + $0x9f0] sm:$0xff]  ;;  %v805_v39 = vld [vmem:[#allocation2 + $0x20] sm:$0xff] }
 0x309   : > { %v1916_v44 = vpop.f32.mrf.mxu1  ;;  %v2136_v46 = vpop.f32.mrf.mxu0 }
 0x30a   : > { %2845 = vst [vmem:[#allocation2 + $0x980] sm:$0xff] %v2525_v53  ;;  %2747 = vst [vmem:[#allocation2 + $0x3a0] sm:$0xff] %v2427_v43  ;;  %v2526_v24 = vadd.f32 %v1916_v44, %v859_v4  ;;  %v2417_v6 = vadd.f32 %v2136_v46, %v750_v41  ;;  %v888_v53 = vld [vmem:[#allocation2 + $0x100] sm:$0xff]  ;;  %v820_v43 = vld [vmem:[#allocation2 + $0x190] sm:$0xff] }
 0x30b   : > { %v1920_v51 = vpop.f32.mrf.mxu1  ;;  %v7087_v29 = vpop.f32.mrf.mxu0 }
 0x30c   : > { %2846 = vst [vmem:[#allocation2 + $0xc0] sm:$0xff] %v2526_v24  ;;  %2737 = vst [vmem:[#allocation2 + $0x1c0] sm:$0xff] %v2417_v6  ;;  %v2530_v54 = vadd.f32 %v1920_v51, %v863_v47  ;;  %v2442_v55 = vadd.f32 %v7087_v29, %v775_v7  ;;  %v889_v24 = vld [vmem:[#allocation2 + $0xd0] sm:$0xff]  ;;  %v810_v6 = vld [vmem:[#allocation2 + $0x428] sm:$0xff] }
 0x30d   : > { %v1922_v57 = vpop.f32.mrf.mxu1  ;;  %v2149_v36 = vpop.f32.mrf.mxu0 }
 0x30e   : > { %2850 = vst [vmem:[#allocation2 + $0x568] sm:$0xff] %v2530_v54  ;;  %2762 = vst [vmem:[#allocation2 + $0x968] sm:$0xff] %v2442_v55  ;;  %v2531_v42 = vadd.f32 %v1922_v57, %v864_v27  ;;  %v2432_v58 = vadd.f32 %v2149_v36, %v765_v52  ;;  %v893_v54 = vld [vmem:[#allocation2 + $0x7a8] sm:$0xff]  ;;  %v835_v55 = vld [vmem:[#allocation2 + $0x990] sm:$0xff] }
 0x30f   : > { %v1924_v56 = vpop.f32.mrf.mxu1  ;;  %v7088_v13 = vpop.f32.mrf.mxu0 }
 0x310   : > { %2851 = vst [vmem:[#allocation2 + $0x820] sm:$0xff] %v2531_v42  ;;  %2752 = vst [vmem:[#allocation2 + $0x4d8] sm:$0xff] %v2432_v58  ;;  %v2535_v63 = vadd.f32 %v1924_v56, %v868_v9  ;;  %v2447_v1 = vadd.f32 %v7088_v13, %v780_v25  ;;  %v894_v42 = vld [vmem:[#allocation2 + $0x198] sm:$0xff]  ;;  %v825_v58 = vld [vmem:[#allocation2 + $0x3c0] sm:$0xff] }
 0x311   : > { %v1926_v14 = vpop.f32.mrf.mxu1  ;;  %v2152_v3 = vpop.f32.mrf.mxu0 }
 0x312   : > { %2855 = vst [vmem:[#allocation2 + $0x458] sm:$0xff] %v2535_v63  ;;  %2767 = vst [vmem:[#allocation2 + $0x38] sm:$0xff] %v2447_v1  ;;  %v2536_v48 = vadd.f32 %v1926_v14, %v869_v62  ;;  %v2437_v45 = vadd.f32 %v2152_v3, %v770_v31  ;;  %v898_v63 = vld [vmem:[#allocation2 + $0x40] sm:$0xff]  ;;  %v840_v1 = vld [vmem:[#allocation2 + $0xd8] sm:$0xff] }
 0x313   : > { %v1930_v59 = vpop.f32.mrf.mxu1  ;;  %v7091_v5 = vpop.f32.mrf.mxu0 }
 0x314   : > { %2856 = vst [vmem:[#allocation2 + $0x398] sm:$0xff] %v2536_v48  ;;  %2757 = vst [vmem:[#allocation2 + $0x3f8] sm:$0xff] %v2437_v45  ;;  %v2540_v37 = vadd.f32 %v1930_v59, %v873_v2  ;;  %v2462_v12 = vadd.f32 %v7091_v5, %v795_v20  ;;  %v899_v48 = vld [vmem:[#allocation2 + $0x1f0] sm:$0xff]  ;;  %v830_v45 = vld [vmem:[#allocation2 + $0x448] sm:$0xff] }
 0x315   : > { %v1932_v11 = vpop.f32.mrf.mxu1  ;;  %v2165_v15 = vpop.f32.mrf.mxu0 }
 0x316   : > { %2860 = vst [vmem:[#allocation2 + $0x3e0] sm:$0xff] %v2540_v37  ;;  %2782 = vst [vmem:[#allocation2 + $0xe0] sm:$0xff] %v2462_v12  ;;  %v2541_v21 = vadd.f32 %v1932_v11, %v874_v8  ;;  %v2452_v23 = vadd.f32 %v2165_v15, %v785_v10  ;;  %v903_v37 = vld [vmem:[#allocation2 + $0x698] sm:$0xff]  ;;  %v855_v12 = vld [vmem:[#allocation2 + $0x940] sm:$0xff] }
 0x317   : > { %v1934_v49 = vpop.f32.mrf.mxu1  ;;  %v7092_v26 = vpop.f32.mrf.mxu0 }
 0x318   : > { %2861 = vst [vmem:[#allocation2 + $0x288] sm:$0xff] %v2541_v21  ;;  %2772 = vst [vmem:[#allocation2 + $0x518] sm:$0xff] %v2452_v23  ;;  %v2545_v28 = vadd.f32 %v1934_v49, %v878_v16  ;;  %v2467_v19 = vadd.f32 %v7092_v26, %v800_v18  ;;  %v904_v21 = vld [vmem:[#allocation2 + $0x478] sm:$0xff]  ;;  %v845_v23 = vld [vmem:[#allocation2 + $0x390] sm:$0xff] }
 0x319   : > { %v1936_v30 = vpop.f32.mrf.mxu1  ;;  %v2168_v32 = vpop.f32.mrf.mxu0 }
 0x31a   : > { %2865 = vst [vmem:[#allocation2 + $0x4f8] sm:$0xff] %v2545_v28  ;;  %2787 = vst [vmem:[#allocation2 + $0x8f0] sm:$0xff] %v2467_v19  ;;  %v2546_v33 = vadd.f32 %v1936_v30, %v879_v17  ;;  %v2457_v22 = vadd.f32 %v2168_v32, %v790_v34  ;;  %v908_v28 = vld [vmem:[#allocation2 + $0x658] sm:$0xff]  ;;  %v860_v19 = vld [vmem:[#allocation2 + $0x5e0] sm:$0xff] }
 0x31b   : > { %v1940_v35 = vpop.f32.mrf.mxu1  ;;  %v7095_v38 = vpop.f32.mrf.mxu0 }
 0x31c   : > { %2866 = vst [vmem:[#allocation2 + $0x5c8] sm:$0xff] %v2546_v33  ;;  %2777 = vst [vmem:[#allocation2 + $0x158] sm:$0xff] %v2457_v22  ;;  %v2550_v40 = vadd.f32 %v1940_v35, %v883_v0  ;;  %v2482_v61 = vadd.f32 %v7095_v38, %v815_v50  ;;  %v909_v33 = vld [vmem:[#allocation2 + $0x178] sm:$0xff]  ;;  %v850_v22 = vld [vmem:[#allocation2 + $0x740] sm:$0xff] }
 0x31d   : > { %v1942_v4 = vpop.f32.mrf.mxu1  ;;  %v2181_v41 = vpop.f32.mrf.mxu0 }
 0x31e   : > { %2870 = vst [vmem:[#allocation2 + $0x250] sm:$0xff] %v2550_v40  ;;  %2802 = vst [vmem:[#allocation2 + $0x948] sm:$0xff] %v2482_v61  ;;  %v2551_v44 = vadd.f32 %v1942_v4, %v884_v60  ;;  %v2472_v46 = vadd.f32 %v2181_v41, %v805_v39  ;;  %v913_v40 = vld [vmem:[#allocation2 + $0x6b8] sm:$0xff]  ;;  %v875_v61 = vld [vmem:[#allocation2 + $0x340] sm:$0xff] }
 0x31f   : > { %v1944_v47 = vpop.f32.mrf.mxu1  ;;  %v7096_v7 = vpop.f32.mrf.mxu0 }
 0x320   : > { %2871 = vst [vmem:[#allocation2 + $0x9f0] sm:$0xff] %v2551_v44  ;;  %2792 = vst [vmem:[#allocation2 + $0x20] sm:$0xff] %v2472_v46  ;;  %v2555_v51 = vadd.f32 %v1944_v47, %v888_v53  ;;  %v2487_v29 = vadd.f32 %v7096_v7, %v820_v43  ;;  %v914_v44 = vld [vmem:[#allocation2 + $0x560] sm:$0xff]  ;;  %v865_v46 = vld [vmem:[#allocation2 + $0x998] sm:$0xff] }
 0x321   : > { %v1946_v27 = vpop.f32.mrf.mxu1  ;;  %v2184_v52 = vpop.f32.mrf.mxu0 }
 0x322   : > { %2875 = vst [vmem:[#allocation2 + $0x100] sm:$0xff] %v2555_v51  ;;  %2807 = vst [vmem:[#allocation2 + $0x190] sm:$0xff] %v2487_v29  ;;  %v2556_v57 = vadd.f32 %v1946_v27, %v889_v24  ;;  %v2477_v36 = vadd.f32 %v2184_v52, %v810_v6  ;;  %v918_v51 = vld [vmem:[#allocation2 + $0x2f0] sm:$0xff]  ;;  %v880_v29 = vld [vmem:[#allocation2 + $0x140] sm:$0xff] }
 0x323   : > { %v1950_v9 = vpop.f32.mrf.mxu1  ;;  %v7099_v25 = vpop.f32.mrf.mxu0 }
 0x324   : > { %2876 = vst [vmem:[#allocation2 + $0xd0] sm:$0xff] %v2556_v57  ;;  %2797 = vst [vmem:[#allocation2 + $0x428] sm:$0xff] %v2477_v36  ;;  %v2560_v56 = vadd.f32 %v1950_v9, %v893_v54  ;;  %v2502_v13 = vadd.f32 %v7099_v25, %v835_v55  ;;  %v919_v57 = vld [vmem:[#allocation2 + $0x30] sm:$0xff]  ;;  %v870_v36 = vld [vmem:[#allocation2 + $0x6c0] sm:$0xff] }
 0x325   : > { %v1952_v62 = vpop.f32.mrf.mxu1  ;;  %v2197_v31 = vpop.f32.mrf.mxu0 }
 0x326   : > { %2880 = vst [vmem:[#allocation2 + $0x7a8] sm:$0xff] %v2560_v56  ;;  %2822 = vst [vmem:[#allocation2 + $0x990] sm:$0xff] %v2502_v13  ;;  %v2561_v14 = vadd.f32 %v1952_v62, %v894_v42  ;;  %v2492_v3 = vadd.f32 %v2197_v31, %v825_v58  ;;  %v923_v56 = vld [vmem:[#allocation2 + $0x280] sm:$0xff]  ;;  %v895_v13 = vld [vmem:[#allocation2 + $0x630] sm:$0xff] }
 0x327   : > { %v1954_v2 = vpop.f32.mrf.mxu1  ;;  %v7100_v20 = vpop.f32.mrf.mxu0 }
 0x328   : > { %2881 = vst [vmem:[#allocation2 + $0x198] sm:$0xff] %v2561_v14  ;;  %2812 = vst [vmem:[#allocation2 + $0x3c0] sm:$0xff] %v2492_v3  ;;  %v2565_v59 = vadd.f32 %v1954_v2, %v898_v63  ;;  %v2507_v5 = vadd.f32 %v7100_v20, %v840_v1  ;;  %v924_v14 = vld [vmem:[#allocation2 + $0x500] sm:$0xff]  ;;  %v885_v3 = vld [vmem:[#allocation2 + $0x8c8] sm:$0xff] }
 0x329   : > { %v1956_v8 = vpop.f32.mrf.mxu1  ;;  %v2200_v10 = vpop.f32.mrf.mxu0 }
 0x32a   : > { %2885 = vst [vmem:[#allocation2 + $0x40] sm:$0xff] %v2565_v59  ;;  %2827 = vst [vmem:[#allocation2 + $0xd8] sm:$0xff] %v2507_v5  ;;  %v2566_v11 = vadd.f32 %v1956_v8, %v899_v48  ;;  %v2497_v15 = vadd.f32 %v2200_v10, %v830_v45  ;;  %v928_v59 = vld [vmem:[#allocation2 + $0x6f0] sm:$0xff]  ;;  %v900_v5 = vld [vmem:[#allocation2 + $0x308] sm:$0xff] }
 0x32b   : > { %v1960_v16 = vpop.f32.mrf.mxu1  ;;  %v7103_v18 = vpop.f32.mrf.mxu0 }
 0x32c   : > { %2886 = vst [vmem:[#allocation2 + $0x1f0] sm:$0xff] %v2566_v11  ;;  %2817 = vst [vmem:[#allocation2 + $0x448] sm:$0xff] %v2497_v15  ;;  %v2570_v49 = vadd.f32 %v1960_v16, %v903_v37  ;;  %v2522_v26 = vadd.f32 %v7103_v18, %v855_v12  ;;  %v929_v11 = vld [vmem:[#allocation2 + $0x718] sm:$0xff] }
 0x32d   : > { %v1962_v17 = vpop.f32.mrf.mxu1  ;;  %v2213_v34 = vpop.f32.mrf.mxu0  ;;  %v890_v15 = vld [vmem:[#allocation2 + $0x418] sm:$0xff] }
 0x32e   : > { %2890 = vst [vmem:[#allocation2 + $0x698] sm:$0xff] %v2570_v49  ;;  %2842 = vst [vmem:[#allocation2 + $0x940] sm:$0xff] %v2522_v26  ;;  %v2571_v30 = vadd.f32 %v1962_v17, %v904_v21  ;;  %v2512_v32 = vadd.f32 %v2213_v34, %v845_v23  ;;  %v933_v49 = vld [vmem:[#allocation2 + $0x108] sm:$0xff]  ;;  %v915_v26 = vld [vmem:[#allocation2 + $0x1d0] sm:$0xff] }
 0x32f   : > { %v1964_v0 = vpop.f32.mrf.mxu1  ;;  %v7104_v50 = vpop.f32.mrf.mxu0 }
 0x330   : > { %2891 = vst [vmem:[#allocation2 + $0x478] sm:$0xff] %v2571_v30  ;;  %2832 = vst [vmem:[#allocation2 + $0x390] sm:$0xff] %v2512_v32  ;;  %v2575_v35 = vadd.f32 %v1964_v0, %v908_v28  ;;  %v2527_v38 = vadd.f32 %v7104_v50, %v860_v19  ;;  %v934_v30 = vld [vmem:[#allocation2 + $0x18] sm:$0xff]  ;;  %v905_v32 = vld [vmem:[#allocation2 + $0x9a8] sm:$0xff] }
 0x331   : > { %v1966_v60 = vpop.f32.mrf.mxu1  ;;  %v2216_v39 = vpop.f32.mrf.mxu0 }
 0x332   : > { %2895 = vst [vmem:[#allocation2 + $0x658] sm:$0xff] %v2575_v35  ;;  %2847 = vst [vmem:[#allocation2 + $0x5e0] sm:$0xff] %v2527_v38  ;;  %v2576_v4 = vadd.f32 %v1966_v60, %v909_v33  ;;  %v2517_v41 = vadd.f32 %v2216_v39, %v850_v22  ;;  %v938_v35 = vld [vmem:[#allocation2 + $0x2b8] sm:$0xff]  ;;  %v920_v38 = vld [vmem:[#allocation2 + $0x8] sm:$0xff] }
 0x333   : > { %v1970_v53 = vpop.f32.mrf.mxu1  ;;  %v7107_v43 = vpop.f32.mrf.mxu0 }
 0x334   : > { %2896 = vst [vmem:[#allocation2 + $0x178] sm:$0xff] %v2576_v4  ;;  %2837 = vst [vmem:[#allocation2 + $0x740] sm:$0xff] %v2517_v41  ;;  %v2580_v47 = vadd.f32 %v1970_v53, %v913_v40  ;;  %v2542_v7 = vadd.f32 %v7107_v43, %v875_v61  ;;  %v939_v4 = vld [vmem:[#allocation2 + $0x6d0] sm:$0xff] }
 0x335   : > { %v1972_v24 = vpop.f32.mrf.mxu1  ;;  %v2229_v6 = vpop.f32.mrf.mxu0  ;;  %v910_v41 = vld [vmem:[#allocation2 + $0x970] sm:$0xff] }
 0x336   : > { %2900 = vst [vmem:[#allocation2 + $0x6b8] sm:$0xff] %v2580_v47  ;;  %2862 = vst [vmem:[#allocation2 + $0x340] sm:$0xff] %v2542_v7  ;;  %v2581_v27 = vadd.f32 %v1972_v24, %v914_v44  ;;  %v2532_v52 = vadd.f32 %v2229_v6, %v865_v46  ;;  %v943_v47 = vld [vmem:[#allocation2 + $0x200] sm:$0xff] }
 0x337   : > { %v1974_v54 = vpop.f32.mrf.mxu1  ;;  %v7108_v55 = vpop.f32.mrf.mxu0  ;;  %v935_v7 = vld [vmem:[#allocation2 + $0x7c0] sm:$0xff] }
 0x338   : > { %2901 = vst [vmem:[#allocation2 + $0x560] sm:$0xff] %v2581_v27  ;;  %2852 = vst [vmem:[#allocation2 + $0x998] sm:$0xff] %v2532_v52  ;;  %v2585_v9 = vadd.f32 %v1974_v54, %v918_v51  ;;  %v2547_v25 = vadd.f32 %v7108_v55, %v880_v29  ;;  %v944_v27 = vld [vmem:[#allocation2 + $0x540] sm:$0xff]  ;;  %v925_v52 = vld [vmem:[#allocation2 + $0x218] sm:$0xff] }
 0x339   : > { %v1976_v42 = vpop.f32.mrf.mxu1  ;;  %v2232_v58 = vpop.f32.mrf.mxu0 }
 0x33a   : > { %2905 = vst [vmem:[#allocation2 + $0x2f0] sm:$0xff] %v2585_v9  ;;  %2867 = vst [vmem:[#allocation2 + $0x140] sm:$0xff] %v2547_v25  ;;  %v2586_v62 = vadd.f32 %v1976_v42, %v919_v57  ;;  %v2537_v31 = vadd.f32 %v2232_v58, %v870_v36  ;;  %v948_v9 = vld [vmem:[#allocation2 + $0x48] sm:$0xff]  ;;  %v940_v25 = vld [vmem:[#allocation2 + $0x638] sm:$0xff] }
 0x33b   : > { %v1980_v63 = vpop.f32.mrf.mxu1  ;;  %v7111_v1 = vpop.f32.mrf.mxu0 }
 0x33c   : > { %2906 = vst [vmem:[#allocation2 + $0x30] sm:$0xff] %v2586_v62  ;;  %2857 = vst [vmem:[#allocation2 + $0x6c0] sm:$0xff] %v2537_v31  ;;  %v2590_v2 = vadd.f32 %v1980_v63, %v923_v56  ;;  %v2562_v20 = vadd.f32 %v7111_v1, %v895_v13  ;;  %v949_v62 = vld [vmem:[#allocation2 + $0x138] sm:$0xff]  ;;  %v930_v31 = vld [vmem:[#allocation2 + $0x928] sm:$0xff] }
 0x33d   : > { %v1982_v48 = vpop.f32.mrf.mxu1  ;;  %v2245_v45 = vpop.f32.mrf.mxu0 }
 0x33e   : > { %2910 = vst [vmem:[#allocation2 + $0x280] sm:$0xff] %v2590_v2  ;;  %2882 = vst [vmem:[#allocation2 + $0x630] sm:$0xff] %v2562_v20  ;;  %v2591_v8 = vadd.f32 %v1982_v48, %v924_v14  ;;  %v2552_v10 = vadd.f32 %v2245_v45, %v885_v3  ;;  %v953_v2 = vld [vmem:[#allocation2 + $0x470] sm:$0xff] }
 0x33f   : > { %v1984_v37 = vpop.f32.mrf.mxu1  ;;  %v7112_v12 = vpop.f32.mrf.mxu0  ;;  %v955_v20 = vld [vmem:[#allocation2 + $0x330] sm:$0xff] }
 0x340   : > { %2911 = vst [vmem:[#allocation2 + $0x500] sm:$0xff] %v2591_v8  ;;  %2872 = vst [vmem:[#allocation2 + $0x8c8] sm:$0xff] %v2552_v10  ;;  %v2595_v16 = vadd.f32 %v1984_v37, %v928_v59  ;;  %v2567_v18 = vadd.f32 %v7112_v12, %v900_v5  ;;  %v954_v8 = vld [vmem:[#allocation2 + $0x528] sm:$0xff]  ;;  %v945_v10 = vld [vmem:[#allocation2 + $0x3d0] sm:$0xff] }
 0x341   : > { %v1986_v21 = vpop.f32.mrf.mxu1  ;;  %v2248_v23 = vpop.f32.mrf.mxu0 }
 0x342   : > { %2915 = vst [vmem:[#allocation2 + $0x6f0] sm:$0xff] %v2595_v16  ;;  %2887 = vst [vmem:[#allocation2 + $0x308] sm:$0xff] %v2567_v18  ;;  %v2596_v17 = vadd.f32 %v1986_v21, %v929_v11  ;;  %v2557_v34 = vadd.f32 %v2248_v23, %v890_v15  ;;  %v958_v16 = vld [vmem:[#allocation2 + $0x328] sm:$0xff]  ;;  %v960_v18 = vld [vmem:[#allocation2 + $0x790] sm:$0xff] }
 0x343   : > { %v1990_v28 = vpop.f32.mrf.mxu1  ;;  %v7115_v19 = vpop.f32.mrf.mxu0 }
 0x344   : > { %2916 = vst [vmem:[#allocation2 + $0x718] sm:$0xff] %v2596_v17  ;;  %2877 = vst [vmem:[#allocation2 + $0x418] sm:$0xff] %v2557_v34  ;;  %v2600_v0 = vadd.f32 %v1990_v28, %v933_v49  ;;  %v2582_v50 = vadd.f32 %v7115_v19, %v915_v26  ;;  %v959_v17 = vld [vmem:[#allocation2 + $0x4b8] sm:$0xff] }
 0x345   : > { %v1992_v33 = vpop.f32.mrf.mxu1  ;;  %v2261_v22 = vpop.f32.mrf.mxu0  ;;  %v950_v34 = vld [vmem:[#allocation2 + $0x8b8] sm:$0xff] }
 0x346   : > { %2920 = vst [vmem:[#allocation2 + $0x108] sm:$0xff] %v2600_v0  ;;  %2902 = vst [vmem:[#allocation2 + $0x1d0] sm:$0xff] %v2582_v50  ;;  %v2601_v60 = vadd.f32 %v1992_v33, %v934_v30  ;;  %v2572_v39 = vadd.f32 %v2261_v22, %v905_v32 }
 0x347   : > { %v1994_v40 = vpop.f32.mrf.mxu1  ;;  %v7116_v61 = vpop.f32.mrf.mxu0 }
 0x348   : > { %2921 = vst [vmem:[#allocation2 + $0x18] sm:$0xff] %v2601_v60  ;;  %2892 = vst [vmem:[#allocation2 + $0x9a8] sm:$0xff] %v2572_v39  ;;  %v2605_v53 = vadd.f32 %v1994_v40, %v938_v35  ;;  %v2587_v43 = vadd.f32 %v7116_v61, %v920_v38 }
 0x349   : > { %v1996_v44 = vpop.f32.mrf.mxu1  ;;  %v2264_v46 = vpop.f32.mrf.mxu0 }
 0x34a   : > { %2925 = vst [vmem:[#allocation2 + $0x2b8] sm:$0xff] %v2605_v53  ;;  %2907 = vst [vmem:[#allocation2 + $0x8] sm:$0xff] %v2587_v43  ;;  %v2606_v24 = vadd.f32 %v1996_v44, %v939_v4  ;;  %v2577_v6 = vadd.f32 %v2264_v46, %v910_v41 }
 0x34b   : > { %v2000_v51 = vpop.f32.mrf.mxu1  ;;  %v7119_v29 = vpop.f32.mrf.mxu0 }
 0x34c   : > { %2926 = vst [vmem:[#allocation2 + $0x6d0] sm:$0xff] %v2606_v24  ;;  %2897 = vst [vmem:[#allocation2 + $0x970] sm:$0xff] %v2577_v6  ;;  %v2610_v54 = vadd.f32 %v2000_v51, %v943_v47  ;;  %v2602_v55 = vadd.f32 %v7119_v29, %v935_v7 }
 0x34d   : > { %v2002_v57 = vpop.f32.mrf.mxu1  ;;  %v2277_v36 = vpop.f32.mrf.mxu0 }
 0x34e   : > { %2930 = vst [vmem:[#allocation2 + $0x200] sm:$0xff] %v2610_v54  ;;  %2922 = vst [vmem:[#allocation2 + $0x7c0] sm:$0xff] %v2602_v55  ;;  %v2611_v42 = vadd.f32 %v2002_v57, %v944_v27  ;;  %v2592_v58 = vadd.f32 %v2277_v36, %v925_v52 }
 0x34f   : > { %v2004_v56 = vpop.f32.mrf.mxu1  ;;  %v7120_v13 = vpop.f32.mrf.mxu0 }
 0x350   : > { %2931 = vst [vmem:[#allocation2 + $0x540] sm:$0xff] %v2611_v42  ;;  %2912 = vst [vmem:[#allocation2 + $0x218] sm:$0xff] %v2592_v58  ;;  %v2615_v63 = vadd.f32 %v2004_v56, %v948_v9  ;;  %v2607_v1 = vadd.f32 %v7120_v13, %v940_v25 }
 0x351   : > { %v2006_v14 = vpop.f32.mrf.mxu1  ;;  %v2280_v3 = vpop.f32.mrf.mxu0 }
 0x352   : > { %2935 = vst [vmem:[#allocation2 + $0x48] sm:$0xff] %v2615_v63  ;;  %2927 = vst [vmem:[#allocation2 + $0x638] sm:$0xff] %v2607_v1  ;;  %v2616_v48 = vadd.f32 %v2006_v14, %v949_v62  ;;  %v2597_v45 = vadd.f32 %v2280_v3, %v930_v31 }
 0x353   : > { %v2010_v59 = vpop.f32.mrf.mxu1  ;;  %v7123_v5 = vpop.f32.mrf.mxu0 }
 0x354   : > { %2936 = vst [vmem:[#allocation2 + $0x138] sm:$0xff] %v2616_v48  ;;  %2917 = vst [vmem:[#allocation2 + $0x928] sm:$0xff] %v2597_v45  ;;  %v2620_v37 = vadd.f32 %v2010_v59, %v953_v2  ;;  %v2622_v12 = vadd.f32 %v7123_v5, %v955_v20 }
 0x355   : > { %v2012_v11 = vpop.f32.mrf.mxu1  ;;  %v2293_v15 = vpop.f32.mrf.mxu0 }
 0x356   : > { %2940 = vst [vmem:[#allocation2 + $0x470] sm:$0xff] %v2620_v37  ;;  %2942 = vst [vmem:[#allocation2 + $0x330] sm:$0xff] %v2622_v12  ;;  %v2621_v21 = vadd.f32 %v2012_v11, %v954_v8  ;;  %v2612_v23 = vadd.f32 %v2293_v15, %v945_v10 }
 0x357   : > { %v2014_v49 = vpop.f32.mrf.mxu1  ;;  %v7124_v26 = vpop.f32.mrf.mxu0 }
 0x358   : > { %2941 = vst [vmem:[#allocation2 + $0x528] sm:$0xff] %v2621_v21  ;;  %2932 = vst [vmem:[#allocation2 + $0x3d0] sm:$0xff] %v2612_v23  ;;  %v2625_v28 = vadd.f32 %v2014_v49, %v958_v16  ;;  %v2627_v19 = vadd.f32 %v7124_v26, %v960_v18  ;;  %2951 = sbr.rel (%p6611_p9) target bundleno = 1389 (0x56d), region = 60 }
 0x359   : > { %v2016_v30 = vpop.f32.mrf.mxu1  ;;  %v2296_v32 = vpop.f32.mrf.mxu0 }
 0x35a   : > { %2945 = vst [vmem:[#allocation2 + $0x328] sm:$0xff] %v2625_v28  ;;  %2947 = vst [vmem:[#allocation2 + $0x790] sm:$0xff] %v2627_v19  ;;  %v2626_v0 = vadd.f32 %v2016_v30, %v959_v17  ;;  %v2617_v50 = vadd.f32 %v2296_v32, %v950_v34 }
 0x35c   : > { %2946 = vst [vmem:[#allocation2 + $0x4b8] sm:$0xff] %v2626_v0  ;;  %2937 = vst [vmem:[#allocation2 + $0x8b8] sm:$0xff] %v2617_v50 }
 0x35d   : > { %v3274_v33 = vlaneseq  ;;  %v3272_v35 = vld [vmem:[#allocation8] sm:$0x1f]  ;;  %v2962_v38 = vld [vmem:[#allocation2 + $0x750] sm:$0xff]  ;;  %v2964_v41 = vld [vmem:[#allocation2 + $0x708] sm:$0xff] }
 0x35e   : > { %v2963_v4 = vld [vmem:[#allocation2 + $0x300] sm:$0xff]  ;;  %v2965_v53 = vld [vmem:[#allocation2 + $0x7f0] sm:$0xff]  ;;  %v2952_v51 = vld [vmem:[#allocation2 + $0x4c8] sm:$0xff] }
 0x35f   : > { %v8673_v22 = vshrl.u32 %v3274_v33, 7  ;;  %v2966_v44 = vld [vmem:[#allocation2 + $0x570] sm:$0xff]  ;;  %v4836_v6 = vld [vmem:[#allocation9] sm:$0x1f]  ;;  %v2954_v36 = vld [vmem:[#allocation2 + $0x7f8] sm:$0xff] }
 0x360   : > { %v2953_v57 = vld [vmem:[#allocation2 + $0x808] sm:$0xff]  ;;  %v2955_v9 = vld [vmem:[#allocation2 + $0x758] sm:$0xff]  ;;  %v2956_v58 = vld [vmem:[#allocation2 + $0x320] sm:$0xff] }
 0x361   : > { %v3276_v60 = vsub.s32 0, %v8673_v22  ;;  %v11721_v39 = vsub.s32 1, %v8673_v22  ;;  %v11720_v40 = vsub.s32 2, %v8673_v22  ;;  %v11719_v61 = vsub.s32 3, %v8673_v22  ;;  %v2967_v13 = vld [vmem:[#allocation2 + $0x580] sm:$0xff]  ;;  %v2968_v14 = vld [vmem:[#allocation2 + $0x3a8] sm:$0xff] }
 0x362   : > { %v11718_v43 = vsub.s32 4, %v8673_v22  ;;  %v2969_v45 = vld [vmem:[#allocation2 + $0x8e0] sm:$0xff]  ;;  %v2971_v37 = vld [vmem:[#allocation2 + $0x898] sm:$0xff]  ;;  %v2959_v0 = vld [vmem:[#allocation2 + $0x4d0] sm:$0xff] }
 0x363   : > { %v8680_v46 = vrot.slane %v3272_v35, %v3276_v60  ;;  %v8684_v47 = vrot.slane %v3272_v35, %v11721_v39  ;;  %v8688_v7 = vrot.slane %v3272_v35, %v11720_v40  ;;  %v8692_v24 = vrot.slane %v3272_v35, %v11719_v61  ;;  %v2970_v59 = vld [vmem:[#allocation2 + $0x960] sm:$0xff]  ;;  %v2957_v21 = vld [vmem:[#allocation2 + $0x438] sm:$0xff]  ;;  %v2960_v50 = vld [vmem:[#allocation2 + $0x6e8] sm:$0xff] }
 0x364   : > { %v8696_v29 = vrot.slane %v3272_v35, %v11718_v43  ;;  %v8713_v42 = vrot.slane %v4836_v6, %v3276_v60  ;;  %v2958_v34 = vld [vmem:[#allocation2 + $0x8f8] sm:$0xff]  ;;  %v2961_v33 = vld [vmem:[#allocation2 + $0x6a8] sm:$0xff] }
 0x365   : > { %v8699_v27 = vadd.f32 %v8680_v46, %v2962_v38  ;;  %v8702_v52 = vadd.f32 %v8684_v47, %v2963_v4  ;;  %v8705_v54 = vadd.f32 %v8688_v7, %v2964_v41  ;;  %v8708_v55 = vadd.f32 %v8692_v24, %v2965_v53  ;;  %v2984_v43 = vld [vmem:[#allocation2 + $0x78] sm:$0xff] }
 0x366   : > { %v8711_v25 = vadd.f32 %v8696_v29, %v2966_v44  ;;  %v8716_v56 = vadd.f32 %v8680_v46, %v2952_v51  ;;  %v8729_v2 = vadd.f32 %v8684_v47, %v2953_v57  ;;  %v8732_v20 = vadd.f32 %v8688_v7, %v2954_v36  ;;  %v2977_v51 = vld [vmem:[#allocation2 + $0x370] sm:$0xff] }
 0x367   : > { %v3629_v62 = vmul.f32 %v8699_v27, %v8699_v27  ;;  %v3630_v31 = vmul.f32 %v8702_v52, %v8702_v52  ;;  %v3631_v63 = vmul.f32 %v8705_v54, %v8705_v54  ;;  %v3632_v1 = vmul.f32 %v8708_v55, %v8708_v55 }
 0x368   : > { %v3633_v3 = vmul.f32 %v8711_v25, %v8711_v25  ;;  %v8735_v48 = vadd.f32 %v8692_v24, %v2955_v9  ;;  %v8738_v8 = vadd.f32 %v8696_v29, %v2956_v58  ;;  %v3619_v10 = vmul.f32 %v8716_v56, %v8716_v56 }
 0x369   : > { %v3951_v5 = vadd.f32 %v3630_v31, %v3629_v62  ;;  %v8743_v12 = vadd.f32 %v8680_v46, %v2967_v13  ;;  %v3620_v11 = vmul.f32 %v8729_v2, %v8729_v2  ;;  %v3621_v15 = vmul.f32 %v8732_v20, %v8732_v20  ;;  %v2978_v13 = vld [vmem:[#allocation2 + $0x838] sm:$0xff] }
 0x36a   : > { %v3622_v16 = vmul.f32 %v8735_v48, %v8735_v48  ;;  %v8752_v18 = vadd.f32 %v8684_v47, %v2968_v14  ;;  %v3623_v49 = vmul.f32 %v8738_v8, %v8738_v8  ;;  %v8757_v26 = vadd.f32 %v8688_v7, %v2969_v45  ;;  %v2979_v14 = vld [vmem:[#allocation2 + $0x800] sm:$0xff]  ;;  %v2981_v45 = vld [vmem:[#allocation2 + $0x650] sm:$0xff] }
 0x36b   : > { %v3952_v23 = vadd.f32 %v3951_v5, %v3631_v63  ;;  %v8760_v17 = vadd.f32 %v8692_v24, %v2970_v59  ;;  %v3939_v28 = vadd.f32 %v3620_v11, %v3619_v10  ;;  %v8763_v19 = vadd.f32 %v8696_v29, %v2971_v37  ;;  %v2972_v11 = vld [vmem:[#allocation2 + $0x7d8] sm:$0xff] }
 0x36c   : > { %v3634_v30 = vmul.f32 %v8743_v12, %v8743_v12  ;;  %v3635_v32 = vmul.f32 %v8752_v18, %v8752_v18  ;;  %v3636_v38 = vmul.f32 %v8757_v26, %v8757_v26  ;;  %v8774_v4 = vadd.f32 %v8680_v46, %v2957_v21 }
 0x36d   : > { %v3953_v35 = vadd.f32 %v3952_v23, %v3632_v1  ;;  %v3637_v60 = vmul.f32 %v8760_v17, %v8760_v17  ;;  %v3940_v41 = vadd.f32 %v3939_v28, %v3621_v15  ;;  %v3638_v53 = vmul.f32 %v8763_v19, %v8763_v19 }
 0x36e   : > { %v3957_v44 = vadd.f32 %v3635_v32, %v3634_v30  ;;  %v8779_v6 = vadd.f32 %v8684_v47, %v2958_v34  ;;  %v8782_v36 = vadd.f32 %v8688_v7, %v2959_v0  ;;  %v8785_v9 = vadd.f32 %v8692_v24, %v2960_v50  ;;  %v2973_v34 = vld [vmem:[#allocation2 + $0x778] sm:$0xff]  ;;  %v2974_v50 = vld [vmem:[#allocation2 + $0x488] sm:$0xff] }
 0x36f   : > { %v3954_v57 = vadd.f32 %v3953_v35, %v3633_v3  ;;  %v8788_v58 = vadd.f32 %v8696_v29, %v2961_v33  ;;  %v3941_v62 = vadd.f32 %v3940_v41, %v3622_v16  ;;  %v3624_v63 = vmul.f32 %v8774_v4, %v8774_v4  ;;  %v2980_v3 = vld [vmem:[#allocation2 + $0x270] sm:$0xff] }
 0x370   : > { %12056 = vst [vmem:[#allocation29_spill] sm:$0xff] %v8779_v6  ;;  %12057 = vst [vmem:[#allocation30_spill] sm:$0xff] %v8782_v36  ;;  %v3958_v31 = vadd.f32 %v3957_v44, %v3636_v38  ;;  %v3625_v1 = vmul.f32 %v8779_v6, %v8779_v6  ;;  %v3626_v59 = vmul.f32 %v8782_v36, %v8782_v36  ;;  %v2987_v44 = vld [vmem:[#allocation2 + $0x9d0] sm:$0xff]  ;;  %v3269_v36 = vld [vmem:[#allocation2 + $0x328] sm:$0xff] }
 0x371   : > { %12058 = vst [vmem:[#allocation31_spill] sm:$0xff] %v8785_v9  ;;  %12059 = vst [vmem:[#allocation32_spill] sm:$0xff] %v8788_v58  ;;  %3955 = vadd.xlane.f32.xlu1 %v3954_v57  ;;  %v3627_v5 = vmul.f32 %v8785_v9, %v8785_v9  ;;  %v3628_v10 = vmul.f32 %v8788_v58, %v8788_v58  ;;  %v8801_v37 = vadd.f32 %v8680_v46, %v2977_v51  ;;  %v3253_v9 = vld [vmem:[#allocation2 + $0x360] sm:$0xff] }
 0x372   : > { %v3942_v15 = vadd.f32 %v3941_v62, %v3623_v49  ;;  %v3959_v16 = vadd.f32 %v3958_v31, %v3637_v60  ;;  %v3945_v21 = vadd.f32 %v3625_v1, %v3624_v63  ;;  %v8804_v23 = vadd.f32 %v8684_v47, %v2978_v13  ;;  %v2975_v49 = vld [vmem:[#allocation2 + $0x378] sm:$0xff] }
 0x373   : > { %12060 = vst [vmem:[#allocation33_spill] sm:$0xff] %v8801_v37  ;;  %v8807_v28 = vadd.f32 %v8688_v7, %v2979_v14  ;;  %v8810_v30 = vadd.f32 %v8692_v24, %v2980_v3  ;;  %v8813_v32 = vadd.f32 %v8696_v29, %v2981_v45  ;;  %v3644_v0 = vmul.f32 %v8801_v37, %v8801_v37  ;;  %v2976_v60 = vld [vmem:[#allocation2 + $0x98] sm:$0xff]  ;;  %v2988_v14 = vld [vmem:[#allocation2 + $0x810] sm:$0xff] }
 0x374   : > { %12061 = vst [vmem:[#allocation34_spill] sm:$0xff] %v8804_v23  ;;  %3943 = vadd.xlane.f32.xlu0 %v3942_v15  ;;  %v3960_v33 = vadd.f32 %v3959_v16, %v3638_v53  ;;  %v3946_v35 = vadd.f32 %v3945_v21, %v3626_v59  ;;  %v3645_v38 = vmul.f32 %v8804_v23, %v8804_v23  ;;  %v2989_v3 = vld [vmem:[#allocation2 + $0x910] sm:$0xff]  ;;  %v2990_v15 = vld [vmem:[#allocation2 + $0x738] sm:$0xff] }
 0x375   : > { %12062 = vst [vmem:[#allocation35_spill] sm:$0xff] %v8807_v28  ;;  %12063 = vst [vmem:[#allocation36_spill] sm:$0xff] %v8810_v30  ;;  %v8820_v41 = vadd.f32 %v8680_v46, %v2972_v11  ;;  %v3646_v51 = vmul.f32 %v8807_v28, %v8807_v28  ;;  %v3647_v57 = vmul.f32 %v8810_v30, %v8810_v30  ;;  %v3233_v30 = vld [vmem:[#allocation2 + $0x160] sm:$0xff]  ;;  %v3249_v28 = vld [vmem:[#allocation2 + $0x2b8] sm:$0xff] }
 0x376   : > { %12064 = vst [vmem:[#allocation37_spill] sm:$0xff] %v8813_v32  ;;  %v3648_v13 = vmul.f32 %v8813_v32, %v8813_v32  ;;  %v8829_v53 = vadd.f32 %v8684_v47, %v2973_v34  ;;  %3961 = vadd.xlane.f32.xlu1 %v3960_v33  ;;  %v3947_v62 = vadd.f32 %v3946_v35, %v3627_v5  ;;  %v2991_v5 = vld [vmem:[#allocation2 + $0x620] sm:$0xff]  ;;  %v3239_v32 = vld [vmem:[#allocation2 + $0x6f0] sm:$0xff] }
 0x377   : > { %12065 = vst [vmem:[#allocation38_spill] sm:$0xff] %v8820_v41  ;;  %v3969_v31 = vadd.f32 %v3645_v38, %v3644_v0  ;;  %v8832_v63 = vadd.f32 %v8688_v7, %v2974_v50  ;;  %v8835_v1 = vadd.f32 %v8692_v24, %v2975_v49  ;;  %v8838_v45 = vadd.f32 %v8696_v29, %v2976_v60  ;;  %v2982_v49 = vld [vmem:[#allocation2 + $0x548] sm:$0xff]  ;;  %v3252_v37 = vld [vmem:[#allocation2 + $0x590] sm:$0xff] }
 0x378   : > { %12066 = vst [vmem:[#allocation39_spill] sm:$0xff] %v8829_v53  ;;  %v3639_v59 = vmul.f32 %v8820_v41, %v8820_v41  ;;  %v3640_v11 = vmul.f32 %v8829_v53, %v8829_v53  ;;  %v8845_v16 = vadd.f32 %v8680_v46, %v2987_v44  ;;  %v3948_v21 = vadd.f32 %v3947_v62, %v3628_v10  ;;  %v2983_v44 = vld [vmem:[#allocation2 + $0x70] sm:$0xff] }
 0x379   : > { %12067 = vst [vmem:[#allocation40_spill] sm:$0xff] %v8832_v63  ;;  %12068 = vst [vmem:[#allocation41_spill] sm:$0xff] %v8835_v1  ;;  %v3970_v34 = vadd.f32 %v3969_v31, %v3646_v51  ;;  %v3641_v0 = vmul.f32 %v8832_v63, %v8832_v63  ;;  %v3642_v50 = vmul.f32 %v8835_v1, %v8835_v1  ;;  %v3228_v63 = vld [vmem:[#allocation2 + $0x1b8] sm:$0xff]  ;;  %v3229_v53 = vld [vmem:[#allocation2 + $0x2f0] sm:$0xff] }
 0x37a   : > { %12069 = vst [vmem:[#allocation42_spill] sm:$0xff] %v8838_v45  ;;  %12070 = vst [vmem:[#allocation43_spill] sm:$0xff] %v8845_v16  ;;  %v3643_v33 = vmul.f32 %v8838_v45, %v8838_v45  ;;  %v3963_v35 = vadd.f32 %v3640_v11, %v3639_v59  ;;  %v8854_v38 = vadd.f32 %v8684_v47, %v2988_v14  ;;  %3949 = vadd.xlane.f32.xlu0 %v3948_v21  ;;  %v2985_v59 = vld [vmem:[#allocation2 + $0x6f8] sm:$0xff]  ;;  %v2986_v21 = vld [vmem:[#allocation2 + $0x5c0] sm:$0xff] }
 0x37b   : > { %v8857_v60 = vadd.f32 %v8688_v7, %v2989_v3  ;;  %v3971_v10 = vadd.f32 %v3970_v34, %v3647_v57  ;;  %v8860_v51 = vadd.f32 %v8692_v24, %v2990_v15  ;;  %v8863_v62 = vadd.f32 %v8696_v29, %v2991_v5  ;;  %v2997_v15 = vld [vmem:[#allocation2 + $0x558] sm:$0xff] }
 0x37c   : > { %12071 = vst [vmem:[#allocation44_spill] sm:$0xff] %v8854_v38  ;;  %v3654_v31 = vmul.f32 %v8845_v16, %v8845_v16  ;;  %v3964_v11 = vadd.f32 %v3963_v35, %v3641_v0  ;;  %v3655_v14 = vmul.f32 %v8854_v38, %v8854_v38  ;;  %v8872_v57 = vadd.f32 %v8680_v46, %v2982_v49  ;;  %v2998_v49 = vld [vmem:[#allocation2 + $0x5d0] sm:$0xff]  ;;  %v2999_v38 = vld [vmem:[#allocation2 + $0x228] sm:$0xff] }
 0x37d   : > { %12072 = vst [vmem:[#allocation45_spill] sm:$0xff] %v8857_v60  ;;  %12073 = vst [vmem:[#allocation46_spill] sm:$0xff] %v8860_v51  ;;  %v3656_v3 = vmul.f32 %v8857_v60, %v8857_v60  ;;  %v3972_v34 = vadd.f32 %v3971_v10, %v3648_v13  ;;  %v3657_v5 = vmul.f32 %v8860_v51, %v8860_v51 }
 0x37e   : > { %12074 = vst [vmem:[#allocation47_spill] sm:$0xff] %v8863_v62  ;;  %12075 = vst [vmem:[#allocation48_spill] sm:$0xff] %v8872_v57  ;;  %v3658_v61 = vmul.f32 %v8863_v62, %v8863_v62  ;;  %v8879_v0 = vadd.f32 %v8684_v47, %v2983_v44  ;;  %v3965_v35 = vadd.f32 %v3964_v11, %v3642_v50  ;;  %v3000_v50 = vld [vmem:[#allocation2 + $0x930] sm:$0xff] }
 0x37f   : > { %v3981_v40 = vadd.f32 %v3655_v14, %v3654_v31  ;;  %v8882_v39 = vadd.f32 %v8688_v7, %v2984_v43  ;;  %v8885_v60 = vadd.f32 %v8692_v24, %v2985_v59  ;;  %3973 = vadd.xlane.f32.xlu1 %v3972_v34  ;;  %v8888_v13 = vadd.f32 %v8696_v29, %v2986_v21  ;;  %v3001_v31 = vld [vmem:[#allocation2 + $0x690] sm:$0xff]  ;;  %v2992_v34 = vld [vmem:[#allocation2 + $0x278] sm:$0xff] }
 0x380   : > { %12076 = vst [vmem:[#allocation49_spill] sm:$0xff] %v8879_v0  ;;  %v3649_v10 = vmul.f32 %v8872_v57, %v8872_v57  ;;  %v3650_v44 = vmul.f32 %v8879_v0, %v8879_v0  ;;  %v8895_v43 = vadd.f32 %v8680_v46, %v2997_v15  ;;  %v3966_v11 = vadd.f32 %v3965_v35, %v3643_v33  ;;  %v2993_v15 = vld [vmem:[#allocation2 + $0x3b0] sm:$0xff] }
 0x381   : > { %12077 = vst [vmem:[#allocation50_spill] sm:$0xff] %v8882_v39  ;;  %12078 = vst [vmem:[#allocation51_spill] sm:$0xff] %v8885_v60  ;;  %v3982_v59 = vadd.f32 %v3981_v40, %v3656_v3  ;;  %v3651_v14 = vmul.f32 %v8882_v39, %v8882_v39  ;;  %v3652_v21 = vmul.f32 %v8885_v60, %v8885_v60  ;;  %v3009_v39 = vld [vmem:[#allocation2 + $0x7b0] sm:$0xff] }
 0x382   : > { %12079 = vst [vmem:[#allocation52_spill] sm:$0xff] %v8888_v13  ;;  %12080 = vst [vmem:[#allocation53_spill] sm:$0xff] %v8895_v43  ;;  %v3653_v57 = vmul.f32 %v8888_v13, %v8888_v13  ;;  %v3975_v62 = vadd.f32 %v3650_v44, %v3649_v10  ;;  %v8904_v0 = vadd.f32 %v8684_v47, %v2998_v49  ;;  %3967 = vadd.xlane.f32.xlu0 %v3966_v11  ;;  %v2994_v13 = vld [vmem:[#allocation2 + $0x80] sm:$0xff]  ;;  %v2995_v10 = vld [vmem:[#allocation2 + $0x490] sm:$0xff] }
 0x383   : > { %v8907_v51 = vadd.f32 %v8688_v7, %v2999_v38  ;;  %v3983_v40 = vadd.f32 %v3982_v59, %v3657_v5  ;;  %v8910_v33 = vadd.f32 %v8692_v24, %v3000_v50  ;;  %v8913_v3 = vadd.f32 %v8696_v29, %v3001_v31  ;;  %v2996_v11 = vld [vmem:[#allocation2 + $0x600] sm:$0xff]  ;;  %v3007_v50 = vld [vmem:[#allocation2 + $0x7b8] sm:$0xff] }
 0x384   : > { %12081 = vst [vmem:[#allocation54_spill] sm:$0xff] %v8904_v0  ;;  %v3664_v35 = vmul.f32 %v8895_v43, %v8895_v43  ;;  %v3976_v44 = vadd.f32 %v3975_v62, %v3651_v14  ;;  %v3665_v49 = vmul.f32 %v8904_v0, %v8904_v0  ;;  %v8922_v5 = vadd.f32 %v8680_v46, %v2992_v34  ;;  %v3008_v34 = vld [vmem:[#allocation2 + $0x358] sm:$0xff] }
 0x385   : > { %12082 = vst [vmem:[#allocation55_spill] sm:$0xff] %v8907_v51  ;;  %12083 = vst [vmem:[#allocation56_spill] sm:$0xff] %v8910_v33  ;;  %v3666_v38 = vmul.f32 %v8907_v51, %v8907_v51  ;;  %v3984_v59 = vadd.f32 %v3983_v40, %v3658_v61  ;;  %v3667_v31 = vmul.f32 %v8910_v33, %v8910_v33 }
 0x386   : > { %12084 = vst [vmem:[#allocation57_spill] sm:$0xff] %v8913_v3  ;;  %12085 = vst [vmem:[#allocation58_spill] sm:$0xff] %v8922_v5  ;;  %v3668_v43 = vmul.f32 %v8913_v3, %v8913_v3  ;;  %v8929_v62 = vadd.f32 %v8684_v47, %v2993_v15  ;;  %v3977_v14 = vadd.f32 %v3976_v44, %v3652_v21  ;;  %v3010_v21 = vld [vmem:[#allocation2 + $0x5d8] sm:$0xff] }
 0x387   : > { %v3993_v0 = vadd.f32 %v3665_v49, %v3664_v35  ;;  %v8932_v60 = vadd.f32 %v8688_v7, %v2994_v13  ;;  %v8935_v51 = vadd.f32 %v8692_v24, %v2995_v10  ;;  %3985 = vadd.xlane.f32.xlu1 %v3984_v59  ;;  %v8938_v61 = vadd.f32 %v8696_v29, %v2996_v11  ;;  %v3011_v35 = vld [vmem:[#allocation2 + $0x2f8] sm:$0xff] }
 0x388   : > { %12086 = vst [vmem:[#allocation59_spill] sm:$0xff] %v8929_v62  ;;  %v3659_v40 = vmul.f32 %v8922_v5, %v8922_v5  ;;  %v3660_v15 = vmul.f32 %v8929_v62, %v8929_v62  ;;  %v8945_v13 = vadd.f32 %v8680_v46, %v3007_v50  ;;  %v3978_v44 = vadd.f32 %v3977_v14, %v3653_v57  ;;  %v3002_v59 = vld [vmem:[#allocation2 + $0x798] sm:$0xff] }
 0x389   : > { %12087 = vst [vmem:[#allocation60_spill] sm:$0xff] %v8932_v60  ;;  %12088 = vst [vmem:[#allocation61_spill] sm:$0xff] %v8935_v51  ;;  %v3994_v10 = vadd.f32 %v3993_v0, %v3666_v38  ;;  %v3661_v49 = vmul.f32 %v8932_v60, %v8932_v60  ;;  %v3662_v11 = vmul.f32 %v8935_v51, %v8935_v51  ;;  %v3003_v50 = vld [vmem:[#allocation2 + $0x538] sm:$0xff]  ;;  %v3019_v60 = vld [vmem:[#allocation2 + $0x2e0] sm:$0xff] }
 0x38a   : > { %12089 = vst [vmem:[#allocation62_spill] sm:$0xff] %v8938_v61  ;;  %12090 = vst [vmem:[#allocation63_spill] sm:$0xff] %v8945_v13  ;;  %v3663_v5 = vmul.f32 %v8938_v61, %v8938_v61  ;;  %v3987_v3 = vadd.f32 %v3660_v15, %v3659_v40  ;;  %v8954_v62 = vadd.f32 %v8684_v47, %v3008_v34  ;;  %3979 = vadd.xlane.f32.xlu0 %v3978_v44  ;;  %v3004_v61 = vld [vmem:[#allocation2 + $0x678] sm:$0xff]  ;;  %v3005_v40 = vld [vmem:[#allocation2 + $0x890] sm:$0xff] }
 0x38b   : > { %v8957_v33 = vadd.f32 %v8688_v7, %v3009_v39  ;;  %v3995_v57 = vadd.f32 %v3994_v10, %v3667_v31  ;;  %v8960_v0 = vadd.f32 %v8692_v24, %v3010_v21  ;;  %v8963_v38 = vadd.f32 %v8696_v29, %v3011_v35  ;;  %v3006_v44 = vld [vmem:[#allocation2 + $0x7c8] sm:$0xff]  ;;  %v3017_v21 = vld [vmem:[#allocation2 + $0xf8] sm:$0xff] }
 0x38c   : > { %12091 = vst [vmem:[#allocation64_spill] sm:$0xff] %v8954_v62  ;;  %v3674_v14 = vmul.f32 %v8945_v13, %v8945_v13  ;;  %v3988_v15 = vadd.f32 %v3987_v3, %v3661_v49  ;;  %v3675_v34 = vmul.f32 %v8954_v62, %v8954_v62  ;;  %v8972_v31 = vadd.f32 %v8680_v46, %v3002_v59  ;;  %v3018_v59 = vld [vmem:[#allocation2 + $0x888] sm:$0xff] }
 0x38d   : > { %12092 = vst [vmem:[#allocation65_spill] sm:$0xff] %v8957_v33  ;;  %12093 = vst [vmem:[#allocation66_spill] sm:$0xff] %v8960_v0  ;;  %v3676_v39 = vmul.f32 %v8957_v33, %v8957_v33  ;;  %v3996_v10 = vadd.f32 %v3995_v57, %v3668_v43  ;;  %v3677_v35 = vmul.f32 %v8960_v0, %v8960_v0 }
 0x38e   : > { %12094 = vst [vmem:[#allocation67_spill] sm:$0xff] %v8963_v38  ;;  %12095 = vst [vmem:[#allocation68_spill] sm:$0xff] %v8972_v31  ;;  %v3678_v13 = vmul.f32 %v8963_v38, %v8963_v38  ;;  %v8979_v3 = vadd.f32 %v8684_v47, %v3003_v50  ;;  %v3989_v49 = vadd.f32 %v3988_v15, %v3662_v11  ;;  %v3020_v11 = vld [vmem:[#allocation2 + $0x2d8] sm:$0xff] }
 0x38f   : > { %v4005_v62 = vadd.f32 %v3675_v34, %v3674_v14  ;;  %v8982_v51 = vadd.f32 %v8688_v7, %v3004_v61  ;;  %v8985_v33 = vadd.f32 %v8692_v24, %v3005_v40  ;;  %3997 = vadd.xlane.f32.xlu1 %v3996_v10  ;;  %v8988_v43 = vadd.f32 %v8696_v29, %v3006_v44  ;;  %v3021_v14 = vld [vmem:[#allocation2 + $0x628] sm:$0xff]  ;;  %v3012_v10 = vld [vmem:[#allocation2 + $0x5b0] sm:$0xff] }
 0x390   : > { %12096 = vst [vmem:[#allocation69_spill] sm:$0xff] %v8979_v3  ;;  %v3669_v57 = vmul.f32 %v8972_v31, %v8972_v31  ;;  %v3670_v50 = vmul.f32 %v8979_v3, %v8979_v3  ;;  %v8995_v61 = vadd.f32 %v8680_v46, %v3017_v21  ;;  %v3990_v15 = vadd.f32 %v3989_v49, %v3663_v5  ;;  %v3013_v21 = vld [vmem:[#allocation2 + $0x240] sm:$0xff] }
 0x391   : > { %12097 = vst [vmem:[#allocation70_spill] sm:$0xff] %v8982_v51  ;;  %12098 = vst [vmem:[#allocation71_spill] sm:$0xff] %v8985_v33  ;;  %v4006_v40 = vadd.f32 %v4005_v62, %v3676_v39  ;;  %v3671_v34 = vmul.f32 %v8982_v51, %v8982_v51  ;;  %v3672_v44 = vmul.f32 %v8985_v33, %v8985_v33  ;;  %v3029_v51 = vld [vmem:[#allocation2 + $0x730] sm:$0xff] }
 0x392   : > { %12099 = vst [vmem:[#allocation72_spill] sm:$0xff] %v8988_v43  ;;  %12100 = vst [vmem:[#allocation73_spill] sm:$0xff] %v8995_v61  ;;  %v3673_v31 = vmul.f32 %v8988_v43, %v8988_v43  ;;  %v3999_v38 = vadd.f32 %v3670_v50, %v3669_v57  ;;  %v9004_v3 = vadd.f32 %v8684_v47, %v3018_v59  ;;  %3991 = vadd.xlane.f32.xlu0 %v3990_v15  ;;  %v3014_v43 = vld [vmem:[#allocation2 + $0x918] sm:$0xff]  ;;  %v3015_v57 = vld [vmem:[#allocation2 + $0x9a0] sm:$0xff] }
 0x393   : > { %v9007_v0 = vadd.f32 %v8688_v7, %v3019_v60  ;;  %v4007_v5 = vadd.f32 %v4006_v40, %v3677_v35  ;;  %v9010_v62 = vadd.f32 %v8692_v24, %v3020_v11  ;;  %v9013_v39 = vadd.f32 %v8696_v29, %v3021_v14  ;;  %v3016_v15 = vld [vmem:[#allocation2 + $0x950] sm:$0xff]  ;;  %v3027_v11 = vld [vmem:[#allocation2 + $0x598] sm:$0xff] }
 0x394   : > { %12101 = vst [vmem:[#allocation74_spill] sm:$0xff] %v9004_v3  ;;  %v3684_v49 = vmul.f32 %v8995_v61, %v8995_v61  ;;  %v4000_v50 = vadd.f32 %v3999_v38, %v3671_v34  ;;  %v3685_v59 = vmul.f32 %v9004_v3, %v9004_v3  ;;  %v9022_v35 = vadd.f32 %v8680_v46, %v3012_v10  ;;  %v3028_v10 = vld [vmem:[#allocation2 + $0x310] sm:$0xff] }
 0x395   : > { %12102 = vst [vmem:[#allocation75_spill] sm:$0xff] %v9007_v0  ;;  %12103 = vst [vmem:[#allocation76_spill] sm:$0xff] %v9010_v62  ;;  %v3686_v60 = vmul.f32 %v9007_v0, %v9007_v0  ;;  %v4008_v40 = vadd.f32 %v4007_v5, %v3678_v13  ;;  %v3687_v14 = vmul.f32 %v9010_v62, %v9010_v62 }
 0x396   : > { %12104 = vst [vmem:[#allocation77_spill] sm:$0xff] %v9013_v39  ;;  %12105 = vst [vmem:[#allocation78_spill] sm:$0xff] %v9022_v35  ;;  %v3688_v61 = vmul.f32 %v9013_v39, %v9013_v39  ;;  %v9029_v38 = vadd.f32 %v8684_v47, %v3013_v21  ;;  %v4001_v34 = vadd.f32 %v4000_v50, %v3672_v44  ;;  %v3030_v44 = vld [vmem:[#allocation2 + $0x388] sm:$0xff] }
 0x397   : > { %v4017_v3 = vadd.f32 %v3685_v59, %v3684_v49  ;;  %v9032_v33 = vadd.f32 %v8688_v7, %v3014_v43  ;;  %v9035_v0 = vadd.f32 %v8692_v24, %v3015_v57  ;;  %4009 = vadd.xlane.f32.xlu1 %v4008_v40  ;;  %v9038_v13 = vadd.f32 %v8696_v29, %v3016_v15  ;;  %v3031_v49 = vld [vmem:[#allocation2 + $0x9d8] sm:$0xff]  ;;  %v3022_v40 = vld [vmem:[#allocation2 + $0x780] sm:$0xff] }
 0x398   : > { %12106 = vst [vmem:[#allocation79_spill] sm:$0xff] %v9029_v38  ;;  %v3679_v5 = vmul.f32 %v9022_v35, %v9022_v35  ;;  %v3680_v21 = vmul.f32 %v9029_v38, %v9029_v38  ;;  %v9045_v43 = vadd.f32 %v8680_v46, %v3027_v11  ;;  %v4002_v50 = vadd.f32 %v4001_v34, %v3673_v31  ;;  %v3023_v11 = vld [vmem:[#allocation2 + $0x8b0] sm:$0xff] }
 0x399   : > { %12107 = vst [vmem:[#allocation80_spill] sm:$0xff] %v9032_v33  ;;  %12108 = vst [vmem:[#allocation81_spill] sm:$0xff] %v9035_v0  ;;  %v4018_v57 = vadd.f32 %v4017_v3, %v3686_v60  ;;  %v3681_v59 = vmul.f32 %v9032_v33, %v9032_v33  ;;  %v3682_v15 = vmul.f32 %v9035_v0, %v9035_v0  ;;  %v3039_v33 = vld [vmem:[#allocation2 + $0x868] sm:$0xff] }
 0x39a   : > { %12109 = vst [vmem:[#allocation82_spill] sm:$0xff] %v9038_v13  ;;  %12110 = vst [vmem:[#allocation83_spill] sm:$0xff] %v9045_v43  ;;  %v3683_v35 = vmul.f32 %v9038_v13, %v9038_v13  ;;  %v4011_v39 = vadd.f32 %v3680_v21, %v3679_v5  ;;  %v9054_v38 = vadd.f32 %v8684_v47, %v3028_v10  ;;  %4003 = vadd.xlane.f32.xlu0 %v4002_v50  ;;  %v3024_v13 = vld [vmem:[#allocation2 + $0x8a0] sm:$0xff]  ;;  %v3026_v50 = vld [vmem:[#allocation2 + $0x3e8] sm:$0xff] }
 0x39b   : > { %v9057_v62 = vadd.f32 %v8688_v7, %v3029_v51  ;;  %v4019_v31 = vadd.f32 %v4018_v57, %v3687_v14  ;;  %v9060_v3 = vadd.f32 %v8692_v24, %v3030_v44  ;;  %v9063_v60 = vadd.f32 %v8696_v29, %v3031_v49  ;;  %v3025_v5 = vld [vmem:[#allocation2 + $0x920] sm:$0xff] }
 0x39c   : > { %12111 = vst [vmem:[#allocation84_spill] sm:$0xff] %v9054_v38  ;;  %v3694_v34 = vmul.f32 %v9045_v43, %v9045_v43  ;;  %v4012_v21 = vadd.f32 %v4011_v39, %v3681_v59  ;;  %v3695_v10 = vmul.f32 %v9054_v38, %v9054_v38  ;;  %v9072_v14 = vadd.f32 %v8680_v46, %v3022_v40  ;;  %v3037_v44 = vld [vmem:[#allocation2 + $0x2c0] sm:$0xff] }
 0x39d   : > { %12112 = vst [vmem:[#allocation85_spill] sm:$0xff] %v9057_v62  ;;  %12113 = vst [vmem:[#allocation86_spill] sm:$0xff] %v9060_v3  ;;  %v3696_v51 = vmul.f32 %v9057_v62, %v9057_v62  ;;  %v4020_v57 = vadd.f32 %v4019_v31, %v3688_v61  ;;  %v3697_v49 = vmul.f32 %v9060_v3, %v9060_v3  ;;  %v3038_v40 = vld [vmem:[#allocation2] sm:$0xff] }
 0x39e   : > { %12114 = vst [vmem:[#allocation87_spill] sm:$0xff] %v9063_v60  ;;  %12115 = vst [vmem:[#allocation88_spill] sm:$0xff] %v9072_v14  ;;  %v3698_v43 = vmul.f32 %v9063_v60, %v9063_v60  ;;  %v9079_v39 = vadd.f32 %v8684_v47, %v3023_v11  ;;  %v4013_v59 = vadd.f32 %v4012_v21, %v3682_v15  ;;  %v3040_v15 = vld [vmem:[#allocation2 + $0x878] sm:$0xff] }
 0x39f   : > { %v4029_v38 = vadd.f32 %v3695_v10, %v3694_v34  ;;  %v9082_v0 = vadd.f32 %v8688_v7, %v3024_v13  ;;  %v9085_v62 = vadd.f32 %v8692_v24, %v3025_v5  ;;  %4021 = vadd.xlane.f32.xlu1 %v4020_v57  ;;  %v9088_v61 = vadd.f32 %v8696_v29, %v3026_v50  ;;  %v3041_v34 = vld [vmem:[#allocation2 + $0x9f8] sm:$0xff]  ;;  %v3032_v57 = vld [vmem:[#allocation2 + $0x908] sm:$0xff] }
 0x3a0   : > { %12116 = vst [vmem:[#allocation89_spill] sm:$0xff] %v9079_v39  ;;  %v3689_v31 = vmul.f32 %v9072_v14, %v9072_v14  ;;  %v3690_v11 = vmul.f32 %v9079_v39, %v9079_v39  ;;  %v9095_v13 = vadd.f32 %v8680_v46, %v3037_v44  ;;  %v4014_v21 = vadd.f32 %v4013_v59, %v3683_v35  ;;  %v3033_v44 = vld [vmem:[#allocation2 + $0x900] sm:$0xff] }
 0x3a1   : > { %12117 = vst [vmem:[#allocation90_spill] sm:$0xff] %v9082_v0  ;;  %12118 = vst [vmem:[#allocation91_spill] sm:$0xff] %v9085_v62  ;;  %v4030_v5 = vadd.f32 %v4029_v38, %v3696_v51  ;;  %v3691_v10 = vmul.f32 %v9082_v0, %v9082_v0  ;;  %v3692_v50 = vmul.f32 %v9085_v62, %v9085_v62  ;;  %v3049_v0 = vld [vmem:[#allocation2 + $0x9c8] sm:$0xff] }
 0x3a2   : > { %12119 = vst [vmem:[#allocation92_spill] sm:$0xff] %v9088_v61  ;;  %12120 = vst [vmem:[#allocation93_spill] sm:$0xff] %v9095_v13  ;;  %v3693_v14 = vmul.f32 %v9088_v61, %v9088_v61  ;;  %v4023_v60 = vadd.f32 %v3690_v11, %v3689_v31  ;;  %v9104_v39 = vadd.f32 %v8684_v47, %v3038_v40  ;;  %4015 = vadd.xlane.f32.xlu0 %v4014_v21  ;;  %v3034_v61 = vld [vmem:[#allocation2 + $0xa8] sm:$0xff]  ;;  %v3036_v21 = vld [vmem:[#allocation2 + $0x2a0] sm:$0xff] }
 0x3a3   : > { %v9107_v3 = vadd.f32 %v8688_v7, %v3039_v33  ;;  %v4031_v35 = vadd.f32 %v4030_v5, %v3697_v49  ;;  %v9110_v38 = vadd.f32 %v8692_v24, %v3040_v15  ;;  %v9113_v51 = vadd.f32 %v8696_v29, %v3041_v34  ;;  %v3035_v31 = vld [vmem:[#allocation2 + $0x28] sm:$0xff] }
 0x3a4   : > { %12121 = vst [vmem:[#allocation94_spill] sm:$0xff] %v9104_v39  ;;  %v3704_v59 = vmul.f32 %v9095_v13, %v9095_v13  ;;  %v4024_v11 = vadd.f32 %v4023_v60, %v3691_v10  ;;  %v3705_v40 = vmul.f32 %v9104_v39, %v9104_v39  ;;  %v9122_v49 = vadd.f32 %v8680_v46, %v3032_v57  ;;  %v3047_v15 = vld [vmem:[#allocation2 + $0x7e8] sm:$0xff]  ;;  %v3048_v57 = vld [vmem:[#allocation2 + $0x9c0] sm:$0xff] }
 0x3a5   : > { %12122 = vst [vmem:[#allocation95_spill] sm:$0xff] %v9107_v3  ;;  %12123 = vst [vmem:[#allocation96_spill] sm:$0xff] %v9110_v38  ;;  %v3706_v33 = vmul.f32 %v9107_v3, %v9107_v3  ;;  %v4032_v5 = vadd.f32 %v4031_v35, %v3698_v43  ;;  %v3707_v34 = vmul.f32 %v9110_v38, %v9110_v38 }
 0x3a6   : > { %12124 = vst [vmem:[#allocation97_spill] sm:$0xff] %v9113_v51  ;;  %12125 = vst [vmem:[#allocation98_spill] sm:$0xff] %v9122_v49  ;;  %v3708_v13 = vmul.f32 %v9113_v51, %v9113_v51  ;;  %v9129_v60 = vadd.f32 %v8684_v47, %v3033_v44  ;;  %v4025_v10 = vadd.f32 %v4024_v11, %v3692_v50  ;;  %v3050_v50 = vld [vmem:[#allocation2 + $0x720] sm:$0xff] }
 0x3a7   : > { %v4041_v39 = vadd.f32 %v3705_v40, %v3704_v59  ;;  %v9132_v62 = vadd.f32 %v8688_v7, %v3034_v61  ;;  %v9135_v3 = vadd.f32 %v8692_v24, %v3035_v31  ;;  %4033 = vadd.xlane.f32.xlu1 %v4032_v5  ;;  %v9138_v43 = vadd.f32 %v8696_v29, %v3036_v21  ;;  %v3051_v59 = vld [vmem:[#allocation2 + $0x1b0] sm:$0xff]  ;;  %v3042_v5 = vld [vmem:[#allocation2 + $0x848] sm:$0xff] }
 0x3a8   : > { %12126 = vst [vmem:[#allocation99_spill] sm:$0xff] %v9129_v60  ;;  %v3699_v35 = vmul.f32 %v9122_v49, %v9122_v49  ;;  %v3700_v44 = vmul.f32 %v9129_v60, %v9129_v60  ;;  %v9145_v61 = vadd.f32 %v8680_v46, %v3047_v15  ;;  %v4026_v11 = vadd.f32 %v4025_v10, %v3693_v14  ;;  %v3043_v15 = vld [vmem:[#allocation2 + $0x530] sm:$0xff] }
 0x3a9   : > { %12127 = vst [vmem:[#allocation100_spill] sm:$0xff] %v9132_v62  ;;  %12128 = vst [vmem:[#allocation101_spill] sm:$0xff] %v9135_v3  ;;  %v4042_v31 = vadd.f32 %v4041_v39, %v3706_v33  ;;  %v3701_v40 = vmul.f32 %v9132_v62, %v9132_v62  ;;  %v3702_v21 = vmul.f32 %v9135_v3, %v9135_v3  ;;  %v3059_v62 = vld [vmem:[#allocation2 + $0x618] sm:$0xff] }
 0x3aa   : > { %12129 = vst [vmem:[#allocation102_spill] sm:$0xff] %v9138_v43  ;;  %12130 = vst [vmem:[#allocation103_spill] sm:$0xff] %v9145_v61  ;;  %v3703_v49 = vmul.f32 %v9138_v43, %v9138_v43  ;;  %v4035_v51 = vadd.f32 %v3700_v44, %v3699_v35  ;;  %v9154_v60 = vadd.f32 %v8684_v47, %v3048_v57  ;;  %4027 = vadd.xlane.f32.xlu0 %v4026_v11  ;;  %v3044_v43 = vld [vmem:[#allocation2 + $0x5f0] sm:$0xff]  ;;  %v3045_v35 = vld [vmem:[#allocation2 + $0x440] sm:$0xff] }
 0x3ab   : > { %v9157_v38 = vadd.f32 %v8688_v7, %v3049_v0  ;;  %v4043_v14 = vadd.f32 %v4042_v31, %v3707_v34  ;;  %v9160_v39 = vadd.f32 %v8692_v24, %v3050_v50  ;;  %v9163_v33 = vadd.f32 %v8696_v29, %v3051_v59  ;;  %v3046_v11 = vld [vmem:[#allocation2 + $0x880] sm:$0xff]  ;;  %v3057_v50 = vld [vmem:[#allocation2 + $0x258] sm:$0xff] }
 0x3ac   : > { %12131 = vst [vmem:[#allocation104_spill] sm:$0xff] %v9154_v60  ;;  %v3714_v10 = vmul.f32 %v9145_v61, %v9145_v61  ;;  %v4036_v44 = vadd.f32 %v4035_v51, %v3701_v40  ;;  %v3715_v57 = vmul.f32 %v9154_v60, %v9154_v60  ;;  %v9172_v34 = vadd.f32 %v8680_v46, %v3042_v5  ;;  %v3058_v5 = vld [vmem:[#allocation2 + $0x1d8] sm:$0xff] }
 0x3ad   : > { %12132 = vst [vmem:[#allocation105_spill] sm:$0xff] %v9157_v38  ;;  %12133 = vst [vmem:[#allocation106_spill] sm:$0xff] %v9160_v39  ;;  %v3716_v0 = vmul.f32 %v9157_v38, %v9157_v38  ;;  %v4044_v31 = vadd.f32 %v4043_v14, %v3708_v13  ;;  %v3717_v59 = vmul.f32 %v9160_v39, %v9160_v39 }
 0x3ae   : > { %12134 = vst [vmem:[#allocation107_spill] sm:$0xff] %v9163_v33  ;;  %12135 = vst [vmem:[#allocation108_spill] sm:$0xff] %v9172_v34  ;;  %v3718_v61 = vmul.f32 %v9163_v33, %v9163_v33  ;;  %v9179_v51 = vadd.f32 %v8684_v47, %v3043_v15  ;;  %v4037_v40 = vadd.f32 %v4036_v44, %v3702_v21  ;;  %v3060_v21 = vld [vmem:[#allocation2 + $0x610] sm:$0xff] }
 0x3af   : > { %v4053_v60 = vadd.f32 %v3715_v57, %v3714_v10  ;;  %v9182_v3 = vadd.f32 %v8688_v7, %v3044_v43  ;;  %v9185_v38 = vadd.f32 %v8692_v24, %v3045_v35  ;;  %4045 = vadd.xlane.f32.xlu1 %v4044_v31  ;;  %v9188_v13 = vadd.f32 %v8696_v29, %v3046_v11  ;;  %v3061_v10 = vld [vmem:[#allocation2 + $0x1c0] sm:$0xff] }
 0x3b0   : > { %12136 = vst [vmem:[#allocation109_spill] sm:$0xff] %v9179_v51  ;;  %v3709_v14 = vmul.f32 %v9172_v34, %v9172_v34  ;;  %v3710_v15 = vmul.f32 %v9179_v51, %v9179_v51  ;;  %v9195_v43 = vadd.f32 %v8680_v46, %v3057_v50  ;;  %v4038_v44 = vadd.f32 %v4037_v40, %v3703_v49  ;;  %v3052_v31 = vld [vmem:[#allocation2 + $0x520] sm:$0xff]  ;;  %v3053_v50 = vld [vmem:[#allocation2 + $0x170] sm:$0xff] }
 0x3b1   : > { %12137 = vst [vmem:[#allocation110_spill] sm:$0xff] %v9182_v3  ;;  %12138 = vst [vmem:[#allocation111_spill] sm:$0xff] %v9185_v38  ;;  %v4054_v35 = vadd.f32 %v4053_v60, %v3716_v0  ;;  %v3711_v57 = vmul.f32 %v9182_v3, %v9182_v3  ;;  %v3712_v11 = vmul.f32 %v9185_v38, %v9185_v38  ;;  %v3069_v3 = vld [vmem:[#allocation2 + $0x110] sm:$0xff] }
 0x3b2   : > { %12139 = vst [vmem:[#allocation112_spill] sm:$0xff] %v9188_v13  ;;  %12140 = vst [vmem:[#allocation113_spill] sm:$0xff] %v9195_v43  ;;  %v3713_v34 = vmul.f32 %v9188_v13, %v9188_v13  ;;  %v4047_v33 = vadd.f32 %v3710_v15, %v3709_v14  ;;  %v9204_v51 = vadd.f32 %v8684_v47, %v3058_v5  ;;  %4039 = vadd.xlane.f32.xlu0 %v4038_v44  ;;  %v3054_v13 = vld [vmem:[#allocation2 + $0xb8] sm:$0xff]  ;;  %v3055_v14 = vld [vmem:[#allocation2 + $0x2d0] sm:$0xff] }
 0x3b3   : > { %v9207_v39 = vadd.f32 %v8688_v7, %v3059_v62  ;;  %v4055_v49 = vadd.f32 %v4054_v35, %v3717_v59  ;;  %v9210_v60 = vadd.f32 %v8692_v24, %v3060_v21  ;;  %v9213_v0 = vadd.f32 %v8696_v29, %v3061_v10  ;;  %v3056_v44 = vld [vmem:[#allocation2 + $0x9b8] sm:$0xff]  ;;  %v3067_v21 = vld [vmem:[#allocation2 + $0x8a8] sm:$0xff] }
 0x3b4   : > { %12141 = vst [vmem:[#allocation114_spill] sm:$0xff] %v9204_v51  ;;  %v3724_v40 = vmul.f32 %v9195_v43, %v9195_v43  ;;  %v4048_v15 = vadd.f32 %v4047_v33, %v3711_v57  ;;  %v3725_v5 = vmul.f32 %v9204_v51, %v9204_v51  ;;  %v9222_v59 = vadd.f32 %v8680_v46, %v3052_v31  ;;  %v3068_v31 = vld [vmem:[#allocation2 + $0x6c8] sm:$0xff] }
 0x3b5   : > { %12142 = vst [vmem:[#allocation115_spill] sm:$0xff] %v9207_v39  ;;  %12143 = vst [vmem:[#allocation116_spill] sm:$0xff] %v9210_v60  ;;  %v3726_v62 = vmul.f32 %v9207_v39, %v9207_v39  ;;  %v4056_v35 = vadd.f32 %v4055_v49, %v3718_v61  ;;  %v3727_v10 = vmul.f32 %v9210_v60, %v9210_v60 }
 0x3b6   : > { %12144 = vst [vmem:[#allocation117_spill] sm:$0xff] %v9213_v0  ;;  %12145 = vst [vmem:[#allocation118_spill] sm:$0xff] %v9222_v59  ;;  %v3728_v43 = vmul.f32 %v9213_v0, %v9213_v0  ;;  %v9229_v33 = vadd.f32 %v8684_v47, %v3053_v50  ;;  %v4049_v57 = vadd.f32 %v4048_v15, %v3712_v11  ;;  %v3070_v11 = vld [vmem:[#allocation2 + $0x1a8] sm:$0xff] }
 0x3b7   : > { %v4065_v51 = vadd.f32 %v3725_v5, %v3724_v40  ;;  %v9232_v38 = vadd.f32 %v8688_v7, %v3054_v13  ;;  %v9235_v39 = vadd.f32 %v8692_v24, %v3055_v14  ;;  %4057 = vadd.xlane.f32.xlu1 %v4056_v35  ;;  %v9238_v61 = vadd.f32 %v8696_v29, %v3056_v44  ;;  %v3071_v40 = vld [vmem:[#allocation2 + $0x3a0] sm:$0xff]  ;;  %v3062_v35 = vld [vmem:[#allocation2 + $0x248] sm:$0xff] }
 0x3b8   : > { %12146 = vst [vmem:[#allocation119_spill] sm:$0xff] %v9229_v33  ;;  %v3719_v49 = vmul.f32 %v9222_v59, %v9222_v59  ;;  %v3720_v50 = vmul.f32 %v9229_v33, %v9229_v33  ;;  %v9245_v13 = vadd.f32 %v8680_v46, %v3067_v21  ;;  %v4050_v15 = vadd.f32 %v4049_v57, %v3713_v34  ;;  %v3063_v21 = vld [vmem:[#allocation2 + $0x828] sm:$0xff] }
 0x3b9   : > { %12147 = vst [vmem:[#allocation120_spill] sm:$0xff] %v9232_v38  ;;  %12148 = vst [vmem:[#allocation121_spill] sm:$0xff] %v9235_v39  ;;  %v4066_v14 = vadd.f32 %v4065_v51, %v3726_v62  ;;  %v3721_v5 = vmul.f32 %v9232_v38, %v9232_v38  ;;  %v3722_v44 = vmul.f32 %v9235_v39, %v9235_v39  ;;  %v3079_v38 = vld [vmem:[#allocation2 + $0x688] sm:$0xff] }
 0x3ba   : > { %12149 = vst [vmem:[#allocation122_spill] sm:$0xff] %v9238_v61  ;;  %12150 = vst [vmem:[#allocation123_spill] sm:$0xff] %v9245_v13  ;;  %v3723_v59 = vmul.f32 %v9238_v61, %v9238_v61  ;;  %v4059_v0 = vadd.f32 %v3720_v50, %v3719_v49  ;;  %v9254_v33 = vadd.f32 %v8684_v47, %v3068_v31  ;;  %4051 = vadd.xlane.f32.xlu0 %v4050_v15  ;;  %v3064_v61 = vld [vmem:[#allocation2 + $0x2e8] sm:$0xff]  ;;  %v3065_v49 = vld [vmem:[#allocation2 + $0x120] sm:$0xff] }
 0x3bb   : > { %v9257_v60 = vadd.f32 %v8688_v7, %v3069_v3  ;;  %v4067_v34 = vadd.f32 %v4066_v14, %v3727_v10  ;;  %v9260_v51 = vadd.f32 %v8692_v24, %v3070_v11  ;;  %v9263_v62 = vadd.f32 %v8696_v29, %v3071_v40  ;;  %v3066_v15 = vld [vmem:[#allocation2 + $0x1c8] sm:$0xff]  ;;  %v3077_v11 = vld [vmem:[#allocation2 + $0x770] sm:$0xff] }
 0x3bc   : > { %12151 = vst [vmem:[#allocation124_spill] sm:$0xff] %v9254_v33  ;;  %v3734_v57 = vmul.f32 %v9245_v13, %v9245_v13  ;;  %v4060_v50 = vadd.f32 %v4059_v0, %v3721_v5  ;;  %v3735_v31 = vmul.f32 %v9254_v33, %v9254_v33  ;;  %v9272_v10 = vadd.f32 %v8680_v46, %v3062_v35  ;;  %v3078_v35 = vld [vmem:[#allocation2 + $0x608] sm:$0xff] }
 0x3bd   : > { %12152 = vst [vmem:[#allocation125_spill] sm:$0xff] %v9257_v60  ;;  %12153 = vst [vmem:[#allocation126_spill] sm:$0xff] %v9260_v51  ;;  %v3736_v3 = vmul.f32 %v9257_v60, %v9257_v60  ;;  %v4068_v14 = vadd.f32 %v4067_v34, %v3728_v43  ;;  %v3737_v40 = vmul.f32 %v9260_v51, %v9260_v51 }
 0x3be   : > { %12154 = vst [vmem:[#allocation127_spill] sm:$0xff] %v9263_v62  ;;  %12155 = vst [vmem:[#allocation128_spill] sm:$0xff] %v9272_v10  ;;  %v3738_v13 = vmul.f32 %v9263_v62, %v9263_v62  ;;  %v9279_v0 = vadd.f32 %v8684_v47, %v3063_v21  ;;  %v4061_v5 = vadd.f32 %v4060_v50, %v3722_v44  ;;  %v3080_v44 = vld [vmem:[#allocation2 + $0x60] sm:$0xff] }
 0x3bf   : > { %v4077_v33 = vadd.f32 %v3735_v31, %v3734_v57  ;;  %v9282_v39 = vadd.f32 %v8688_v7, %v3064_v61  ;;  %v9285_v60 = vadd.f32 %v8692_v24, %v3065_v49  ;;  %4069 = vadd.xlane.f32.xlu1 %v4068_v14  ;;  %v9288_v43 = vadd.f32 %v8696_v29, %v3066_v15  ;;  %v3081_v57 = vld [vmem:[#allocation2 + $0x3f8] sm:$0xff]  ;;  %v3072_v14 = vld [vmem:[#allocation2 + $0x410] sm:$0xff] }
 0x3c0   : > { %12156 = vst [vmem:[#allocation129_spill] sm:$0xff] %v9279_v0  ;;  %v3729_v34 = vmul.f32 %v9272_v10, %v9272_v10  ;;  %v3730_v21 = vmul.f32 %v9279_v0, %v9279_v0  ;;  %v9295_v61 = vadd.f32 %v8680_v46, %v3077_v11  ;;  %v4062_v50 = vadd.f32 %v4061_v5, %v3723_v59  ;;  %v3073_v11 = vld [vmem:[#allocation2 + $0x150] sm:$0xff] }
 0x3c1   : > { %12157 = vst [vmem:[#allocation130_spill] sm:$0xff] %v9282_v39  ;;  %12158 = vst [vmem:[#allocation131_spill] sm:$0xff] %v9285_v60  ;;  %v4078_v49 = vadd.f32 %v4077_v33, %v3736_v3  ;;  %v3731_v31 = vmul.f32 %v9282_v39, %v9282_v39  ;;  %v3732_v15 = vmul.f32 %v9285_v60, %v9285_v60  ;;  %v3089_v39 = vld [vmem:[#allocation2 + $0x4a0] sm:$0xff] }
 0x3c2   : > { %12159 = vst [vmem:[#allocation132_spill] sm:$0xff] %v9288_v43  ;;  %12160 = vst [vmem:[#allocation133_spill] sm:$0xff] %v9295_v61  ;;  %v3733_v10 = vmul.f32 %v9288_v43, %v9288_v43  ;;  %v4071_v62 = vadd.f32 %v3730_v21, %v3729_v34  ;;  %v9304_v0 = vadd.f32 %v8684_v47, %v3078_v35  ;;  %4063 = vadd.xlane.f32.xlu0 %v4062_v50  ;;  %v3074_v43 = vld [vmem:[#allocation2 + $0x830] sm:$0xff]  ;;  %v3075_v34 = vld [vmem:[#allocation2 + $0x5a0] sm:$0xff] }
 0x3c3   : > { %v9307_v51 = vadd.f32 %v8688_v7, %v3079_v38  ;;  %v4079_v59 = vadd.f32 %v4078_v49, %v3737_v40  ;;  %v9310_v33 = vadd.f32 %v8692_v24, %v3080_v44  ;;  %v9313_v3 = vadd.f32 %v8696_v29, %v3081_v57  ;;  %v3076_v50 = vld [vmem:[#allocation2 + $0x4d8] sm:$0xff] }
 0x3c4   : > { %12161 = vst [vmem:[#allocation134_spill] sm:$0xff] %v9304_v0  ;;  %v3744_v5 = vmul.f32 %v9295_v61, %v9295_v61  ;;  %v4072_v21 = vadd.f32 %v4071_v62, %v3731_v31  ;;  %v3745_v35 = vmul.f32 %v9304_v0, %v9304_v0  ;;  %v9322_v40 = vadd.f32 %v8680_v46, %v3072_v14  ;;  %v3087_v44 = vld [vmem:[#allocation2 + $0x318] sm:$0xff] }
 0x3c5   : > { %12162 = vst [vmem:[#allocation135_spill] sm:$0xff] %v9307_v51  ;;  %12163 = vst [vmem:[#allocation136_spill] sm:$0xff] %v9310_v33  ;;  %v3746_v38 = vmul.f32 %v9307_v51, %v9307_v51  ;;  %v4080_v49 = vadd.f32 %v4079_v59, %v3738_v13  ;;  %v3747_v57 = vmul.f32 %v9310_v33, %v9310_v33  ;;  %v3088_v14 = vld [vmem:[#allocation2 + $0x6d8] sm:$0xff] }
 0x3c6   : > { %12164 = vst [vmem:[#allocation137_spill] sm:$0xff] %v9313_v3  ;;  %12165 = vst [vmem:[#allocation138_spill] sm:$0xff] %v9322_v40  ;;  %v3748_v61 = vmul.f32 %v9313_v3, %v9313_v3  ;;  %v9329_v62 = vadd.f32 %v8684_v47, %v3073_v11  ;;  %v4073_v31 = vadd.f32 %v4072_v21, %v3732_v15  ;;  %v3090_v15 = vld [vmem:[#allocation2 + $0x8d0] sm:$0xff] }
 0x3c7   : > { %v4089_v0 = vadd.f32 %v3745_v35, %v3744_v5  ;;  %v9332_v60 = vadd.f32 %v8688_v7, %v3074_v43  ;;  %v9335_v51 = vadd.f32 %v8692_v24, %v3075_v34  ;;  %4081 = vadd.xlane.f32.xlu1 %v4080_v49  ;;  %v9338_v13 = vadd.f32 %v8696_v29, %v3076_v50  ;;  %v3091_v5 = vld [vmem:[#allocation2 + $0x38] sm:$0xff]  ;;  %v3082_v49 = vld [vmem:[#allocation2 + $0x1e0] sm:$0xff] }
 0x3c8   : > { %12166 = vst [vmem:[#allocation139_spill] sm:$0xff] %v9329_v62  ;;  %v3739_v59 = vmul.f32 %v9322_v40, %v9322_v40  ;;  %v3740_v11 = vmul.f32 %v9329_v62, %v9329_v62  ;;  %v9345_v43 = vadd.f32 %v8680_v46, %v3087_v44  ;;  %v4074_v21 = vadd.f32 %v4073_v31, %v3733_v10  ;;  %v3083_v44 = vld [vmem:[#allocation2 + $0x4c0] sm:$0xff] }
 0x3c9   : > { %12167 = vst [vmem:[#allocation140_spill] sm:$0xff] %v9332_v60  ;;  %12168 = vst [vmem:[#allocation141_spill] sm:$0xff] %v9335_v51  ;;  %v4090_v34 = vadd.f32 %v4089_v0, %v3746_v38  ;;  %v3741_v35 = vmul.f32 %v9332_v60, %v9332_v60  ;;  %v3742_v50 = vmul.f32 %v9335_v51, %v9335_v51  ;;  %v3099_v60 = vld [vmem:[#allocation2 + $0x4e8] sm:$0xff] }
 0x3ca   : > { %12169 = vst [vmem:[#allocation142_spill] sm:$0xff] %v9338_v13  ;;  %12170 = vst [vmem:[#allocation143_spill] sm:$0xff] %v9345_v43  ;;  %v3743_v40 = vmul.f32 %v9338_v13, %v9338_v13  ;;  %v4083_v3 = vadd.f32 %v3740_v11, %v3739_v59  ;;  %v9354_v62 = vadd.f32 %v8684_v47, %v3088_v14  ;;  %4075 = vadd.xlane.f32.xlu0 %v4074_v21  ;;  %v3084_v13 = vld [vmem:[#allocation2 + $0x9e0] sm:$0xff]  ;;  %v3085_v59 = vld [vmem:[#allocation2 + $0x450] sm:$0xff] }
 0x3cb   : > { %v9357_v33 = vadd.f32 %v8688_v7, %v3089_v39  ;;  %v4091_v10 = vadd.f32 %v4090_v34, %v3747_v57  ;;  %v9360_v0 = vadd.f32 %v8692_v24, %v3090_v15  ;;  %v9363_v38 = vadd.f32 %v8696_v29, %v3091_v5  ;;  %v3086_v21 = vld [vmem:[#allocation2 + $0x968] sm:$0xff] }
 0x3cc   : > { %12171 = vst [vmem:[#allocation144_spill] sm:$0xff] %v9354_v62  ;;  %v3754_v31 = vmul.f32 %v9345_v43, %v9345_v43  ;;  %v4084_v11 = vadd.f32 %v4083_v3, %v3741_v35  ;;  %v3755_v14 = vmul.f32 %v9354_v62, %v9354_v62  ;;  %v9372_v57 = vadd.f32 %v8680_v46, %v3082_v49  ;;  %v3097_v15 = vld [vmem:[#allocation2 + $0x5e8] sm:$0xff]  ;;  %v3098_v49 = vld [vmem:[#allocation2 + $0x8c0] sm:$0xff] }
 0x3cd   : > { %12172 = vst [vmem:[#allocation145_spill] sm:$0xff] %v9357_v33  ;;  %12173 = vst [vmem:[#allocation146_spill] sm:$0xff] %v9360_v0  ;;  %v3756_v39 = vmul.f32 %v9357_v33, %v9357_v33  ;;  %v4092_v34 = vadd.f32 %v4091_v10, %v3748_v61  ;;  %v3757_v5 = vmul.f32 %v9360_v0, %v9360_v0 }
 0x3ce   : > { %12174 = vst [vmem:[#allocation147_spill] sm:$0xff] %v9363_v38  ;;  %12175 = vst [vmem:[#allocation148_spill] sm:$0xff] %v9372_v57  ;;  %v3758_v43 = vmul.f32 %v9363_v38, %v9363_v38  ;;  %v9379_v3 = vadd.f32 %v8684_v47, %v3083_v44  ;;  %v4085_v35 = vadd.f32 %v4084_v11, %v3742_v50  ;;  %v3100_v50 = vld [vmem:[#allocation2 + $0x3c8] sm:$0xff] }
 0x3cf   : > { %v4101_v62 = vadd.f32 %v3755_v14, %v3754_v31  ;;  %v9382_v51 = vadd.f32 %v8688_v7, %v3084_v13  ;;  %v9385_v33 = vadd.f32 %v8692_v24, %v3085_v59  ;;  %4093 = vadd.xlane.f32.xlu1 %v4092_v34  ;;  %v9388_v61 = vadd.f32 %v8696_v29, %v3086_v21  ;;  %v3101_v31 = vld [vmem:[#allocation2 + $0x158] sm:$0xff]  ;;  %v3092_v34 = vld [vmem:[#allocation2 + $0x6e0] sm:$0xff] }
 0x3d0   : > { %12176 = vst [vmem:[#allocation149_spill] sm:$0xff] %v9379_v3  ;;  %v3749_v10 = vmul.f32 %v9372_v57, %v9372_v57  ;;  %v3750_v44 = vmul.f32 %v9379_v3, %v9379_v3  ;;  %v9395_v13 = vadd.f32 %v8680_v46, %v3097_v15  ;;  %v4086_v11 = vadd.f32 %v4085_v35, %v3743_v40  ;;  %v3093_v15 = vld [vmem:[#allocation2 + $0x130] sm:$0xff] }
 0x3d1   : > { %12177 = vst [vmem:[#allocation150_spill] sm:$0xff] %v9382_v51  ;;  %12178 = vst [vmem:[#allocation151_spill] sm:$0xff] %v9385_v33  ;;  %v4102_v59 = vadd.f32 %v4101_v62, %v3756_v39  ;;  %v3751_v14 = vmul.f32 %v9382_v51, %v9382_v51  ;;  %v3752_v21 = vmul.f32 %v9385_v33, %v9385_v33  ;;  %v3109_v51 = vld [vmem:[#allocation2 + $0x420] sm:$0xff] }
 0x3d2   : > { %12179 = vst [vmem:[#allocation152_spill] sm:$0xff] %v9388_v61  ;;  %12180 = vst [vmem:[#allocation153_spill] sm:$0xff] %v9395_v13  ;;  %v3753_v57 = vmul.f32 %v9388_v61, %v9388_v61  ;;  %v4095_v38 = vadd.f32 %v3750_v44, %v3749_v10  ;;  %v9404_v3 = vadd.f32 %v8684_v47, %v3098_v49  ;;  %4087 = vadd.xlane.f32.xlu0 %v4086_v11  ;;  %v3094_v61 = vld [vmem:[#allocation2 + $0x660] sm:$0xff]  ;;  %v3095_v10 = vld [vmem:[#allocation2 + $0x88] sm:$0xff] }
 0x3d3   : > { %v9407_v0 = vadd.f32 %v8688_v7, %v3099_v60  ;;  %v4103_v40 = vadd.f32 %v4102_v59, %v3757_v5  ;;  %v9410_v62 = vadd.f32 %v8692_v24, %v3100_v50  ;;  %v9413_v39 = vadd.f32 %v8696_v29, %v3101_v31  ;;  %v3096_v11 = vld [vmem:[#allocation2 + $0x518] sm:$0xff]  ;;  %v3107_v50 = vld [vmem:[#allocation2 + $0xb0] sm:$0xff] }
 0x3d4   : > { %12181 = vst [vmem:[#allocation154_spill] sm:$0xff] %v9404_v3  ;;  %v3764_v35 = vmul.f32 %v9395_v13, %v9395_v13  ;;  %v4096_v44 = vadd.f32 %v4095_v38, %v3751_v14  ;;  %v3765_v49 = vmul.f32 %v9404_v3, %v9404_v3  ;;  %v9422_v5 = vadd.f32 %v8680_v46, %v3092_v34  ;;  %v3108_v34 = vld [vmem:[#allocation2 + $0x4a8] sm:$0xff] }
 0x3d5   : > { %12182 = vst [vmem:[#allocation155_spill] sm:$0xff] %v9407_v0  ;;  %12183 = vst [vmem:[#allocation156_spill] sm:$0xff] %v9410_v62  ;;  %v3766_v60 = vmul.f32 %v9407_v0, %v9407_v0  ;;  %v4104_v59 = vadd.f32 %v4103_v40, %v3758_v43  ;;  %v3767_v31 = vmul.f32 %v9410_v62, %v9410_v62 }
 0x3d6   : > { %12184 = vst [vmem:[#allocation157_spill] sm:$0xff] %v9413_v39  ;;  %12185 = vst [vmem:[#allocation158_spill] sm:$0xff] %v9422_v5  ;;  %v3768_v13 = vmul.f32 %v9413_v39, %v9413_v39  ;;  %v9429_v38 = vadd.f32 %v8684_v47, %v3093_v15  ;;  %v4097_v14 = vadd.f32 %v4096_v44, %v3752_v21  ;;  %v3110_v21 = vld [vmem:[#allocation2 + $0x588] sm:$0xff] }
 0x3d7   : > { %v4113_v3 = vadd.f32 %v3765_v49, %v3764_v35  ;;  %v9432_v33 = vadd.f32 %v8688_v7, %v3094_v61  ;;  %v9435_v0 = vadd.f32 %v8692_v24, %v3095_v10  ;;  %4105 = vadd.xlane.f32.xlu1 %v4104_v59  ;;  %v9438_v43 = vadd.f32 %v8696_v29, %v3096_v11  ;;  %v3111_v35 = vld [vmem:[#allocation2 + $0x8f0] sm:$0xff]  ;;  %v3102_v59 = vld [vmem:[#allocation2 + $0x788] sm:$0xff] }
 0x3d8   : > { %12186 = vst [vmem:[#allocation159_spill] sm:$0xff] %v9429_v38  ;;  %v3759_v40 = vmul.f32 %v9422_v5, %v9422_v5  ;;  %v3760_v15 = vmul.f32 %v9429_v38, %v9429_v38  ;;  %v9445_v61 = vadd.f32 %v8680_v46, %v3107_v50  ;;  %v4098_v44 = vadd.f32 %v4097_v14, %v3753_v57  ;;  %v3103_v50 = vld [vmem:[#allocation2 + $0x860] sm:$0xff] }
 0x3d9   : > { %12187 = vst [vmem:[#allocation160_spill] sm:$0xff] %v9432_v33  ;;  %12188 = vst [vmem:[#allocation161_spill] sm:$0xff] %v9435_v0  ;;  %v4114_v10 = vadd.f32 %v4113_v3, %v3766_v60  ;;  %v3761_v49 = vmul.f32 %v9432_v33, %v9432_v33  ;;  %v3762_v11 = vmul.f32 %v9435_v0, %v9435_v0  ;;  %v3119_v33 = vld [vmem:[#allocation2 + $0x468] sm:$0xff] }
 0x3da   : > { %12189 = vst [vmem:[#allocation162_spill] sm:$0xff] %v9438_v43  ;;  %12190 = vst [vmem:[#allocation163_spill] sm:$0xff] %v9445_v61  ;;  %v3763_v5 = vmul.f32 %v9438_v43, %v9438_v43  ;;  %v4107_v39 = vadd.f32 %v3760_v15, %v3759_v40  ;;  %v9454_v38 = vadd.f32 %v8684_v47, %v3108_v34  ;;  %4099 = vadd.xlane.f32.xlu0 %v4098_v44  ;;  %v3104_v43 = vld [vmem:[#allocation2 + $0x480] sm:$0xff]  ;;  %v3105_v40 = vld [vmem:[#allocation2 + $0x978] sm:$0xff] }
 0x3db   : > { %v9457_v62 = vadd.f32 %v8688_v7, %v3109_v51  ;;  %v4115_v57 = vadd.f32 %v4114_v10, %v3767_v31  ;;  %v9460_v3 = vadd.f32 %v8692_v24, %v3110_v21  ;;  %v9463_v60 = vadd.f32 %v8696_v29, %v3111_v35  ;;  %v3106_v44 = vld [vmem:[#allocation2 + $0xe0] sm:$0xff] }
 0x3dc   : > { %12191 = vst [vmem:[#allocation164_spill] sm:$0xff] %v9454_v38  ;;  %v3774_v14 = vmul.f32 %v9445_v61, %v9445_v61  ;;  %v4108_v15 = vadd.f32 %v4107_v39, %v3761_v49  ;;  %v3775_v34 = vmul.f32 %v9454_v38, %v9454_v38  ;;  %v9472_v31 = vadd.f32 %v8680_v46, %v3102_v59  ;;  %v3117_v21 = vld [vmem:[#allocation2 + $0x640] sm:$0xff]  ;;  %v3118_v59 = vld [vmem:[#allocation2 + $0x2c8] sm:$0xff] }
 0x3dd   : > { %12192 = vst [vmem:[#allocation165_spill] sm:$0xff] %v9457_v62  ;;  %12193 = vst [vmem:[#allocation166_spill] sm:$0xff] %v9460_v3  ;;  %v3776_v51 = vmul.f32 %v9457_v62, %v9457_v62  ;;  %v4116_v10 = vadd.f32 %v4115_v57, %v3768_v13  ;;  %v3777_v35 = vmul.f32 %v9460_v3, %v9460_v3 }
 0x3de   : > { %12194 = vst [vmem:[#allocation167_spill] sm:$0xff] %v9463_v60  ;;  %12195 = vst [vmem:[#allocation168_spill] sm:$0xff] %v9472_v31  ;;  %v3778_v61 = vmul.f32 %v9463_v60, %v9463_v60  ;;  %v9479_v39 = vadd.f32 %v8684_v47, %v3103_v50  ;;  %v4109_v49 = vadd.f32 %v4108_v15, %v3762_v11  ;;  %v3120_v11 = vld [vmem:[#allocation2 + $0x148] sm:$0xff] }
 0x3df   : > { %v4125_v38 = vadd.f32 %v3775_v34, %v3774_v14  ;;  %v9482_v0 = vadd.f32 %v8688_v7, %v3104_v43  ;;  %v9485_v62 = vadd.f32 %v8692_v24, %v3105_v40  ;;  %4117 = vadd.xlane.f32.xlu1 %v4116_v10  ;;  %v9488_v13 = vadd.f32 %v8696_v29, %v3106_v44  ;;  %v3121_v14 = vld [vmem:[#allocation2 + $0x428] sm:$0xff]  ;;  %v3112_v10 = vld [vmem:[#allocation2 + $0x1a0] sm:$0xff] }
 0x3e0   : > { %12196 = vst [vmem:[#allocation169_spill] sm:$0xff] %v9479_v39  ;;  %v3769_v57 = vmul.f32 %v9472_v31, %v9472_v31  ;;  %v3770_v50 = vmul.f32 %v9479_v39, %v9479_v39  ;;  %v9495_v43 = vadd.f32 %v8680_v46, %v3117_v21  ;;  %v4110_v15 = vadd.f32 %v4109_v49, %v3763_v5  ;;  %v3113_v21 = vld [vmem:[#allocation2 + $0xf0] sm:$0xff] }
 0x3e1   : > { %12197 = vst [vmem:[#allocation170_spill] sm:$0xff] %v9482_v0  ;;  %12198 = vst [vmem:[#allocation171_spill] sm:$0xff] %v9485_v62  ;;  %v4126_v40 = vadd.f32 %v4125_v38, %v3776_v51  ;;  %v3771_v34 = vmul.f32 %v9482_v0, %v9482_v0  ;;  %v3772_v44 = vmul.f32 %v9485_v62, %v9485_v62  ;;  %v3129_v0 = vld [vmem:[#allocation2 + $0x818] sm:$0xff] }
 0x3e2   : > { %12199 = vst [vmem:[#allocation172_spill] sm:$0xff] %v9488_v13  ;;  %12200 = vst [vmem:[#allocation173_spill] sm:$0xff] %v9495_v43  ;;  %v3773_v31 = vmul.f32 %v9488_v13, %v9488_v13  ;;  %v4119_v60 = vadd.f32 %v3770_v50, %v3769_v57  ;;  %v9504_v39 = vadd.f32 %v8684_v47, %v3118_v59  ;;  %4111 = vadd.xlane.f32.xlu0 %v4110_v15  ;;  %v3114_v13 = vld [vmem:[#allocation2 + $0x7e0] sm:$0xff]  ;;  %v3115_v57 = vld [vmem:[#allocation2 + $0x2b0] sm:$0xff] }
 0x3e3   : > { %v9507_v3 = vadd.f32 %v8688_v7, %v3119_v33  ;;  %v4127_v5 = vadd.f32 %v4126_v40, %v3777_v35  ;;  %v9510_v38 = vadd.f32 %v8692_v24, %v3120_v11  ;;  %v9513_v51 = vadd.f32 %v8696_v29, %v3121_v14  ;;  %v3116_v15 = vld [vmem:[#allocation2 + $0x20] sm:$0xff]  ;;  %v3127_v11 = vld [vmem:[#allocation2 + $0x3f0] sm:$0xff] }
 0x3e4   : > { %12201 = vst [vmem:[#allocation174_spill] sm:$0xff] %v9504_v39  ;;  %v3784_v49 = vmul.f32 %v9495_v43, %v9495_v43  ;;  %v4120_v50 = vadd.f32 %v4119_v60, %v3771_v34  ;;  %v3785_v59 = vmul.f32 %v9504_v39, %v9504_v39  ;;  %v9522_v35 = vadd.f32 %v8680_v46, %v3112_v10  ;;  %v3128_v10 = vld [vmem:[#allocation2 + $0x840] sm:$0xff] }
 0x3e5   : > { %12202 = vst [vmem:[#allocation175_spill] sm:$0xff] %v9507_v3  ;;  %12203 = vst [vmem:[#allocation176_spill] sm:$0xff] %v9510_v38  ;;  %v3786_v33 = vmul.f32 %v9507_v3, %v9507_v3  ;;  %v4128_v40 = vadd.f32 %v4127_v5, %v3778_v61  ;;  %v3787_v14 = vmul.f32 %v9510_v38, %v9510_v38 }
 0x3e6   : > { %12204 = vst [vmem:[#allocation177_spill] sm:$0xff] %v9513_v51  ;;  %12205 = vst [vmem:[#allocation178_spill] sm:$0xff] %v9522_v35  ;;  %v3788_v43 = vmul.f32 %v9513_v51, %v9513_v51  ;;  %v9529_v60 = vadd.f32 %v8684_v47, %v3113_v21  ;;  %v4121_v34 = vadd.f32 %v4120_v50, %v3772_v44  ;;  %v3130_v44 = vld [vmem:[#allocation2 + $0xc8] sm:$0xff] }
 0x3e7   : > { %v4137_v39 = vadd.f32 %v3785_v59, %v3784_v49  ;;  %v9532_v62 = vadd.f32 %v8688_v7, %v3114_v13  ;;  %v9535_v3 = vadd.f32 %v8692_v24, %v3115_v57  ;;  %4129 = vadd.xlane.f32.xlu1 %v4128_v40  ;;  %v9538_v61 = vadd.f32 %v8696_v29, %v3116_v15  ;;  %v3131_v49 = vld [vmem:[#allocation2 + $0x190] sm:$0xff] }
 0x3e8   : > { %12206 = vst [vmem:[#allocation179_spill] sm:$0xff] %v9529_v60  ;;  %v3779_v5 = vmul.f32 %v9522_v35, %v9522_v35  ;;  %v3780_v21 = vmul.f32 %v9529_v60, %v9529_v60  ;;  %v9545_v13 = vadd.f32 %v8680_v46, %v3127_v11  ;;  %v4122_v50 = vadd.f32 %v4121_v34, %v3773_v31  ;;  %v3122_v40 = vld [vmem:[#allocation2 + $0x4f0] sm:$0xff] }
 0x3e9   : > { %12207 = vst [vmem:[#allocation180_spill] sm:$0xff] %v9532_v62  ;;  %12208 = vst [vmem:[#allocation181_spill] sm:$0xff] %v9535_v3  ;;  %v4138_v57 = vadd.f32 %v4137_v39, %v3786_v33  ;;  %v3781_v59 = vmul.f32 %v9532_v62, %v9532_v62  ;;  %v3782_v15 = vmul.f32 %v9535_v3, %v9535_v3  ;;  %v3123_v11 = vld [vmem:[#allocation2 + $0x10] sm:$0xff]  ;;  %v3139_v62 = vld [vmem:[#allocation2 + $0x128] sm:$0xff] }
 0x3ea   : > { %12209 = vst [vmem:[#allocation182_spill] sm:$0xff] %v9538_v61  ;;  %12210 = vst [vmem:[#allocation183_spill] sm:$0xff] %v9545_v13  ;;  %v3783_v35 = vmul.f32 %v9538_v61, %v9538_v61  ;;  %v4131_v51 = vadd.f32 %v3780_v21, %v3779_v5  ;;  %v9554_v60 = vadd.f32 %v8684_v47, %v3128_v10  ;;  %4123 = vadd.xlane.f32.xlu0 %v4122_v50  ;;  %v3124_v61 = vld [vmem:[#allocation2 + $0x508] sm:$0xff]  ;;  %v3125_v5 = vld [vmem:[#allocation2 + $0x5b8] sm:$0xff] }
 0x3eb   : > { %v9557_v38 = vadd.f32 %v8688_v7, %v3129_v0  ;;  %v4139_v31 = vadd.f32 %v4138_v57, %v3787_v14  ;;  %v9560_v39 = vadd.f32 %v8692_v24, %v3130_v44  ;;  %v9563_v33 = vadd.f32 %v8696_v29, %v3131_v49  ;;  %v3126_v50 = vld [vmem:[#allocation2 + $0x948] sm:$0xff]  ;;  %v3137_v44 = vld [vmem:[#allocation2 + $0x220] sm:$0xff] }
 0x3ec   : > { %12211 = vst [vmem:[#allocation184_spill] sm:$0xff] %v9554_v60  ;;  %v3794_v34 = vmul.f32 %v9545_v13, %v9545_v13  ;;  %v4132_v21 = vadd.f32 %v4131_v51, %v3781_v59  ;;  %v3795_v10 = vmul.f32 %v9554_v60, %v9554_v60  ;;  %v9572_v14 = vadd.f32 %v8680_v46, %v3122_v40  ;;  %v3138_v40 = vld [vmem:[#allocation2 + $0x648] sm:$0xff] }
 0x3ed   : > { %12212 = vst [vmem:[#allocation185_spill] sm:$0xff] %v9557_v38  ;;  %12213 = vst [vmem:[#allocation186_spill] sm:$0xff] %v9560_v39  ;;  %v3796_v0 = vmul.f32 %v9557_v38, %v9557_v38  ;;  %v4140_v57 = vadd.f32 %v4139_v31, %v3788_v43  ;;  %v3797_v49 = vmul.f32 %v9560_v39, %v9560_v39 }
 0x3ee   : > { %12214 = vst [vmem:[#allocation187_spill] sm:$0xff] %v9563_v33  ;;  %12215 = vst [vmem:[#allocation188_spill] sm:$0xff] %v9572_v14  ;;  %v3798_v13 = vmul.f32 %v9563_v33, %v9563_v33  ;;  %v9579_v51 = vadd.f32 %v8684_v47, %v3123_v11  ;;  %v4133_v59 = vadd.f32 %v4132_v21, %v3782_v15  ;;  %v3140_v15 = vld [vmem:[#allocation2 + $0x668] sm:$0xff] }
 0x3ef   : > { %v4149_v60 = vadd.f32 %v3795_v10, %v3794_v34  ;;  %v9582_v3 = vadd.f32 %v8688_v7, %v3124_v61  ;;  %v9585_v38 = vadd.f32 %v8692_v24, %v3125_v5  ;;  %4141 = vadd.xlane.f32.xlu1 %v4140_v57  ;;  %v9588_v43 = vadd.f32 %v8696_v29, %v3126_v50  ;;  %v3141_v34 = vld [vmem:[#allocation2 + $0x448] sm:$0xff]  ;;  %v3132_v57 = vld [vmem:[#allocation2 + $0x338] sm:$0xff] }
 0x3f0   : > { %12216 = vst [vmem:[#allocation189_spill] sm:$0xff] %v9579_v51  ;;  %v3789_v31 = vmul.f32 %v9572_v14, %v9572_v14  ;;  %v3790_v11 = vmul.f32 %v9579_v51, %v9579_v51  ;;  %v9595_v61 = vadd.f32 %v8680_v46, %v3137_v44  ;;  %v4134_v21 = vadd.f32 %v4133_v59, %v3783_v35  ;;  %v3133_v44 = vld [vmem:[#allocation2 + $0x858] sm:$0xff] }
 0x3f1   : > { %12217 = vst [vmem:[#allocation190_spill] sm:$0xff] %v9582_v3  ;;  %12218 = vst [vmem:[#allocation191_spill] sm:$0xff] %v9585_v38  ;;  %v4150_v5 = vadd.f32 %v4149_v60, %v3796_v0  ;;  %v3791_v10 = vmul.f32 %v9582_v3, %v9582_v3  ;;  %v3792_v50 = vmul.f32 %v9585_v38, %v9585_v38  ;;  %v3149_v3 = vld [vmem:[#allocation2 + $0x9e8] sm:$0xff] }
 0x3f2   : > { %12219 = vst [vmem:[#allocation192_spill] sm:$0xff] %v9588_v43  ;;  %12220 = vst [vmem:[#allocation193_spill] sm:$0xff] %v9595_v61  ;;  %v3793_v14 = vmul.f32 %v9588_v43, %v9588_v43  ;;  %v4143_v33 = vadd.f32 %v3790_v11, %v3789_v31  ;;  %v9604_v51 = vadd.f32 %v8684_v47, %v3138_v40  ;;  %4135 = vadd.xlane.f32.xlu0 %v4134_v21  ;;  %v3134_v43 = vld [vmem:[#allocation2 + $0x4b0] sm:$0xff]  ;;  %v3136_v21 = vld [vmem:[#allocation2 + $0x3c0] sm:$0xff] }
 0x3f3   : > { %v9607_v39 = vadd.f32 %v8688_v7, %v3139_v62  ;;  %v4151_v35 = vadd.f32 %v4150_v5, %v3797_v49  ;;  %v9610_v60 = vadd.f32 %v8692_v24, %v3140_v15  ;;  %v9613_v0 = vadd.f32 %v8696_v29, %v3141_v34  ;;  %v3135_v31 = vld [vmem:[#allocation2 + $0x6b0] sm:$0xff]  ;;  %v3147_v15 = vld [vmem:[#allocation2 + $0x680] sm:$0xff] }
 0x3f4   : > { %12221 = vst [vmem:[#allocation194_spill] sm:$0xff] %v9604_v51  ;;  %v3804_v59 = vmul.f32 %v9595_v61, %v9595_v61  ;;  %v4144_v11 = vadd.f32 %v4143_v33, %v3791_v10  ;;  %v3805_v40 = vmul.f32 %v9604_v51, %v9604_v51  ;;  %v9622_v49 = vadd.f32 %v8680_v46, %v3132_v57  ;;  %v3148_v57 = vld [vmem:[#allocation2 + $0x7a0] sm:$0xff] }
 0x3f5   : > { %12222 = vst [vmem:[#allocation195_spill] sm:$0xff] %v9607_v39  ;;  %12223 = vst [vmem:[#allocation196_spill] sm:$0xff] %v9610_v60  ;;  %v3806_v62 = vmul.f32 %v9607_v39, %v9607_v39  ;;  %v4152_v5 = vadd.f32 %v4151_v35, %v3798_v13  ;;  %v3807_v34 = vmul.f32 %v9610_v60, %v9610_v60 }
 0x3f6   : > { %12224 = vst [vmem:[#allocation197_spill] sm:$0xff] %v9613_v0  ;;  %12225 = vst [vmem:[#allocation198_spill] sm:$0xff] %v9622_v49  ;;  %v3808_v61 = vmul.f32 %v9613_v0, %v9613_v0  ;;  %v9629_v33 = vadd.f32 %v8684_v47, %v3133_v44  ;;  %v4145_v10 = vadd.f32 %v4144_v11, %v3792_v50  ;;  %v3150_v50 = vld [vmem:[#allocation2 + $0x510] sm:$0xff] }
 0x3f7   : > { %v4161_v51 = vadd.f32 %v3805_v40, %v3804_v59  ;;  %v9632_v38 = vadd.f32 %v8688_v7, %v3134_v43  ;;  %v9635_v39 = vadd.f32 %v8692_v24, %v3135_v31  ;;  %4153 = vadd.xlane.f32.xlu1 %v4152_v5  ;;  %v9638_v13 = vadd.f32 %v8696_v29, %v3136_v21  ;;  %v3151_v59 = vld [vmem:[#allocation2 + $0xd8] sm:$0xff]  ;;  %v3142_v5 = vld [vmem:[#allocation2 + $0xe8] sm:$0xff] }
 0x3f8   : > { %12226 = vst [vmem:[#allocation199_spill] sm:$0xff] %v9629_v33  ;;  %v3799_v35 = vmul.f32 %v9622_v49, %v9622_v49  ;;  %v3800_v44 = vmul.f32 %v9629_v33, %v9629_v33  ;;  %v9645_v43 = vadd.f32 %v8680_v46, %v3147_v15  ;;  %v4146_v11 = vadd.f32 %v4145_v10, %v3793_v14  ;;  %v3143_v15 = vld [vmem:[#allocation2 + $0x238] sm:$0xff] }
 0x3f9   : > { %12227 = vst [vmem:[#allocation200_spill] sm:$0xff] %v9632_v38  ;;  %12228 = vst [vmem:[#allocation201_spill] sm:$0xff] %v9635_v39  ;;  %v4162_v31 = vadd.f32 %v4161_v51, %v3806_v62  ;;  %v3801_v40 = vmul.f32 %v9632_v38, %v9632_v38  ;;  %v3802_v21 = vmul.f32 %v9635_v39, %v9635_v39  ;;  %v3159_v38 = vld [vmem:[#allocation2 + $0x748] sm:$0xff] }
 0x3fa   : > { %12229 = vst [vmem:[#allocation202_spill] sm:$0xff] %v9638_v13  ;;  %12230 = vst [vmem:[#allocation203_spill] sm:$0xff] %v9645_v43  ;;  %v3803_v49 = vmul.f32 %v9638_v13, %v9638_v13  ;;  %v4155_v0 = vadd.f32 %v3800_v44, %v3799_v35  ;;  %v9654_v33 = vadd.f32 %v8684_v47, %v3148_v57  ;;  %4147 = vadd.xlane.f32.xlu0 %v4146_v11  ;;  %v3144_v13 = vld [vmem:[#allocation2 + $0x870] sm:$0xff]  ;;  %v3145_v35 = vld [vmem:[#allocation2 + $0x760] sm:$0xff] }
 0x3fb   : > { %v9657_v60 = vadd.f32 %v8688_v7, %v3149_v3  ;;  %v4163_v14 = vadd.f32 %v4162_v31, %v3807_v34  ;;  %v9660_v51 = vadd.f32 %v8692_v24, %v3150_v50  ;;  %v9663_v62 = vadd.f32 %v8696_v29, %v3151_v59  ;;  %v3146_v11 = vld [vmem:[#allocation2 + $0x990] sm:$0xff] }
 0x3fc   : > { %12231 = vst [vmem:[#allocation204_spill] sm:$0xff] %v9654_v33  ;;  %v3814_v10 = vmul.f32 %v9645_v43, %v9645_v43  ;;  %v4156_v44 = vadd.f32 %v4155_v0, %v3801_v40  ;;  %v3815_v57 = vmul.f32 %v9654_v33, %v9654_v33  ;;  %v9672_v34 = vadd.f32 %v8680_v46, %v3142_v5  ;;  %v3157_v50 = vld [vmem:[#allocation2 + $0x670] sm:$0xff] }
 0x3fd   : > { %12232 = vst [vmem:[#allocation205_spill] sm:$0xff] %v9657_v60  ;;  %12233 = vst [vmem:[#allocation206_spill] sm:$0xff] %v9660_v51  ;;  %v3816_v3 = vmul.f32 %v9657_v60, %v9657_v60  ;;  %v4164_v31 = vadd.f32 %v4163_v14, %v3808_v61  ;;  %v3817_v59 = vmul.f32 %v9660_v51, %v9660_v51  ;;  %v3158_v5 = vld [vmem:[#allocation2 + $0x350] sm:$0xff] }
 0x3fe   : > { %12234 = vst [vmem:[#allocation207_spill] sm:$0xff] %v9663_v62  ;;  %12235 = vst [vmem:[#allocation208_spill] sm:$0xff] %v9672_v34  ;;  %v3818_v43 = vmul.f32 %v9663_v62, %v9663_v62  ;;  %v9679_v0 = vadd.f32 %v8684_v47, %v3143_v15  ;;  %v4157_v40 = vadd.f32 %v4156_v44, %v3802_v21  ;;  %v3160_v21 = vld [vmem:[#allocation2 + $0x118] sm:$0xff] }
 0x3ff   : > { %v4173_v33 = vadd.f32 %v3815_v57, %v3814_v10  ;;  %v9682_v39 = vadd.f32 %v8688_v7, %v3144_v13  ;;  %v9685_v60 = vadd.f32 %v8692_v24, %v3145_v35  ;;  %4165 = vadd.xlane.f32.xlu1 %v4164_v31  ;;  %v9688_v61 = vadd.f32 %v8696_v29, %v3146_v11  ;;  %v3161_v10 = vld [vmem:[#allocation2 + $0x740] sm:$0xff]  ;;  %v3152_v31 = vld [vmem:[#allocation2 + $0x50] sm:$0xff] }
 0x400   : > { %12236 = vst [vmem:[#allocation209_spill] sm:$0xff] %v9679_v0  ;;  %v3809_v14 = vmul.f32 %v9672_v34, %v9672_v34  ;;  %v3810_v15 = vmul.f32 %v9679_v0, %v9679_v0  ;;  %v9695_v13 = vadd.f32 %v8680_v46, %v3157_v50  ;;  %v4158_v44 = vadd.f32 %v4157_v40, %v3803_v49  ;;  %v3153_v50 = vld [vmem:[#allocation2 + $0x5f8] sm:$0xff] }
 0x401   : > { %12237 = vst [vmem:[#allocation210_spill] sm:$0xff] %v9682_v39  ;;  %12238 = vst [vmem:[#allocation211_spill] sm:$0xff] %v9685_v60  ;;  %v4174_v35 = vadd.f32 %v4173_v33, %v3816_v3  ;;  %v3811_v57 = vmul.f32 %v9682_v39, %v9682_v39  ;;  %v3812_v11 = vmul.f32 %v9685_v60, %v9685_v60  ;;  %v3169_v39 = vld [vmem:[#allocation2 + $0x980] sm:$0xff] }
 0x402   : > { %12239 = vst [vmem:[#allocation212_spill] sm:$0xff] %v9688_v61  ;;  %12240 = vst [vmem:[#allocation213_spill] sm:$0xff] %v9695_v13  ;;  %v3813_v34 = vmul.f32 %v9688_v61, %v9688_v61  ;;  %v4167_v62 = vadd.f32 %v3810_v15, %v3809_v14  ;;  %v9704_v0 = vadd.f32 %v8684_v47, %v3158_v5  ;;  %4159 = vadd.xlane.f32.xlu0 %v4158_v44  ;;  %v3154_v61 = vld [vmem:[#allocation2 + $0x2a8] sm:$0xff]  ;;  %v3155_v14 = vld [vmem:[#allocation2 + $0x498] sm:$0xff] }
 0x403   : > { %v9707_v51 = vadd.f32 %v8688_v7, %v3159_v38  ;;  %v4175_v49 = vadd.f32 %v4174_v35, %v3817_v59  ;;  %v9710_v33 = vadd.f32 %v8692_v24, %v3160_v21  ;;  %v9713_v3 = vadd.f32 %v8696_v29, %v3161_v10  ;;  %v3156_v44 = vld [vmem:[#allocation2 + $0x390] sm:$0xff]  ;;  %v3167_v21 = vld [vmem:[#allocation2 + $0x380] sm:$0xff] }
 0x404   : > { %12241 = vst [vmem:[#allocation214_spill] sm:$0xff] %v9704_v0  ;;  %v3824_v40 = vmul.f32 %v9695_v13, %v9695_v13  ;;  %v4168_v15 = vadd.f32 %v4167_v62, %v3811_v57  ;;  %v3825_v5 = vmul.f32 %v9704_v0, %v9704_v0  ;;  %v9722_v59 = vadd.f32 %v8680_v46, %v3152_v31  ;;  %v3168_v31 = vld [vmem:[#allocation2 + $0x768] sm:$0xff] }
 0x405   : > { %12242 = vst [vmem:[#allocation215_spill] sm:$0xff] %v9707_v51  ;;  %12243 = vst [vmem:[#allocation216_spill] sm:$0xff] %v9710_v33  ;;  %v3826_v38 = vmul.f32 %v9707_v51, %v9707_v51  ;;  %v4176_v35 = vadd.f32 %v4175_v49, %v3818_v43  ;;  %v3827_v10 = vmul.f32 %v9710_v33, %v9710_v33 }
 0x406   : > { %12244 = vst [vmem:[#allocation217_spill] sm:$0xff] %v9713_v3  ;;  %12245 = vst [vmem:[#allocation218_spill] sm:$0xff] %v9722_v59  ;;  %v3828_v13 = vmul.f32 %v9713_v3, %v9713_v3  ;;  %v9729_v62 = vadd.f32 %v8684_v47, %v3153_v50  ;;  %v4169_v57 = vadd.f32 %v4168_v15, %v3812_v11  ;;  %v3170_v11 = vld [vmem:[#allocation2 + $0xc0] sm:$0xff] }
 0x407   : > { %v4185_v0 = vadd.f32 %v3825_v5, %v3824_v40  ;;  %v9732_v60 = vadd.f32 %v8688_v7, %v3154_v61  ;;  %v9735_v51 = vadd.f32 %v8692_v24, %v3155_v14  ;;  %4177 = vadd.xlane.f32.xlu1 %v4176_v35  ;;  %v9738_v43 = vadd.f32 %v8696_v29, %v3156_v44  ;;  %v3171_v40 = vld [vmem:[#allocation2 + $0x5e0] sm:$0xff]  ;;  %v3162_v35 = vld [vmem:[#allocation2 + $0x408] sm:$0xff] }
 0x408   : > { %12246 = vst [vmem:[#allocation219_spill] sm:$0xff] %v9729_v62  ;;  %v3819_v49 = vmul.f32 %v9722_v59, %v9722_v59  ;;  %v3820_v50 = vmul.f32 %v9729_v62, %v9729_v62  ;;  %v9745_v61 = vadd.f32 %v8680_v46, %v3167_v21  ;;  %v4170_v15 = vadd.f32 %v4169_v57, %v3813_v34  ;;  %v3163_v21 = vld [vmem:[#allocation2 + $0x3b8] sm:$0xff] }
 0x409   : > { %12247 = vst [vmem:[#allocation220_spill] sm:$0xff] %v9732_v60  ;;  %12248 = vst [vmem:[#allocation221_spill] sm:$0xff] %v9735_v51  ;;  %v4186_v14 = vadd.f32 %v4185_v0, %v3826_v38  ;;  %v3821_v5 = vmul.f32 %v9732_v60, %v9732_v60  ;;  %v3822_v44 = vmul.f32 %v9735_v51, %v9735_v51  ;;  %v3179_v60 = vld [vmem:[#allocation2 + $0x458] sm:$0xff] }
 0x40a   : > { %12249 = vst [vmem:[#allocation222_spill] sm:$0xff] %v9738_v43  ;;  %12250 = vst [vmem:[#allocation223_spill] sm:$0xff] %v9745_v61  ;;  %v3823_v59 = vmul.f32 %v9738_v43, %v9738_v43  ;;  %v4179_v3 = vadd.f32 %v3820_v50, %v3819_v49  ;;  %v9754_v62 = vadd.f32 %v8684_v47, %v3168_v31  ;;  %4171 = vadd.xlane.f32.xlu0 %v4170_v15  ;;  %v3164_v43 = vld [vmem:[#allocation2 + $0x298] sm:$0xff]  ;;  %v3166_v15 = vld [vmem:[#allocation2 + $0x940] sm:$0xff] }
 0x40b   : > { %v9757_v33 = vadd.f32 %v8688_v7, %v3169_v39  ;;  %v4187_v34 = vadd.f32 %v4186_v14, %v3827_v10  ;;  %v9760_v0 = vadd.f32 %v8692_v24, %v3170_v11  ;;  %v9763_v38 = vadd.f32 %v8696_v29, %v3171_v40  ;;  %v3165_v49 = vld [vmem:[#allocation2 + $0x58] sm:$0xff]  ;;  %v3177_v11 = vld [vmem:[#allocation2 + $0x460] sm:$0xff] }
 0x40c   : > { %12251 = vst [vmem:[#allocation224_spill] sm:$0xff] %v9754_v62  ;;  %v3834_v57 = vmul.f32 %v9745_v61, %v9745_v61  ;;  %v4180_v50 = vadd.f32 %v4179_v3, %v3821_v5  ;;  %v3835_v31 = vmul.f32 %v9754_v62, %v9754_v62  ;;  %v9772_v10 = vadd.f32 %v8680_v46, %v3162_v35  ;;  %v3178_v35 = vld [vmem:[#allocation2 + $0x210] sm:$0xff] }
 0x40d   : > { %12252 = vst [vmem:[#allocation225_spill] sm:$0xff] %v9757_v33  ;;  %12253 = vst [vmem:[#allocation226_spill] sm:$0xff] %v9760_v0  ;;  %v3836_v39 = vmul.f32 %v9757_v33, %v9757_v33  ;;  %v4188_v14 = vadd.f32 %v4187_v34, %v3828_v13  ;;  %v3837_v40 = vmul.f32 %v9760_v0, %v9760_v0 }
 0x40e   : > { %12254 = vst [vmem:[#allocation227_spill] sm:$0xff] %v9763_v38  ;;  %12255 = vst [vmem:[#allocation228_spill] sm:$0xff] %v9772_v10  ;;  %v3838_v61 = vmul.f32 %v9763_v38, %v9763_v38  ;;  %v9779_v3 = vadd.f32 %v8684_v47, %v3163_v21  ;;  %v4181_v5 = vadd.f32 %v4180_v50, %v3822_v44  ;;  %v3180_v44 = vld [vmem:[#allocation2 + $0x398] sm:$0xff] }
 0x40f   : > { %v4197_v62 = vadd.f32 %v3835_v31, %v3834_v57  ;;  %v9782_v51 = vadd.f32 %v8688_v7, %v3164_v43  ;;  %v9785_v33 = vadd.f32 %v8692_v24, %v3165_v49  ;;  %4189 = vadd.xlane.f32.xlu1 %v4188_v14  ;;  %v9788_v13 = vadd.f32 %v8696_v29, %v3166_v15  ;;  %v3181_v57 = vld [vmem:[#allocation2 + $0x6c0] sm:$0xff] }
 0x410   : > { %12256 = vst [vmem:[#allocation229_spill] sm:$0xff] %v9779_v3  ;;  %v3829_v34 = vmul.f32 %v9772_v10, %v9772_v10  ;;  %v3830_v21 = vmul.f32 %v9779_v3, %v9779_v3  ;;  %v9795_v43 = vadd.f32 %v8680_v46, %v3177_v11  ;;  %v4182_v50 = vadd.f32 %v4181_v5, %v3823_v59  ;;  %v3172_v14 = vld [vmem:[#allocation2 + $0x180] sm:$0xff] }
 0x411   : > { %12257 = vst [vmem:[#allocation230_spill] sm:$0xff] %v9782_v51  ;;  %12258 = vst [vmem:[#allocation231_spill] sm:$0xff] %v9785_v33  ;;  %v4198_v49 = vadd.f32 %v4197_v62, %v3836_v39  ;;  %v3831_v31 = vmul.f32 %v9782_v51, %v9782_v51  ;;  %v3832_v15 = vmul.f32 %v9785_v33, %v9785_v33  ;;  %v3173_v11 = vld [vmem:[#allocation2 + $0xa0] sm:$0xff]  ;;  %v3189_v51 = vld [vmem:[#allocation2 + $0x4f8] sm:$0xff] }
 0x412   : > { %12259 = vst [vmem:[#allocation232_spill] sm:$0xff] %v9788_v13  ;;  %12260 = vst [vmem:[#allocation233_spill] sm:$0xff] %v9795_v43  ;;  %v3833_v10 = vmul.f32 %v9788_v13, %v9788_v13  ;;  %v4191_v38 = vadd.f32 %v3830_v21, %v3829_v34  ;;  %v9804_v3 = vadd.f32 %v8684_v47, %v3178_v35  ;;  %4183 = vadd.xlane.f32.xlu0 %v4182_v50  ;;  %v3174_v13 = vld [vmem:[#allocation2 + $0x568] sm:$0xff]  ;;  %v3175_v34 = vld [vmem:[#allocation2 + $0x820] sm:$0xff] }
 0x413   : > { %v9807_v0 = vadd.f32 %v8688_v7, %v3179_v60  ;;  %v4199_v59 = vadd.f32 %v4198_v49, %v3837_v40  ;;  %v9810_v62 = vadd.f32 %v8692_v24, %v3180_v44  ;;  %v9813_v39 = vadd.f32 %v8696_v29, %v3181_v57  ;;  %v3176_v50 = vld [vmem:[#allocation2 + $0x998] sm:$0xff]  ;;  %v3187_v44 = vld [vmem:[#allocation2 + $0x728] sm:$0xff] }
 0x414   : > { %12261 = vst [vmem:[#allocation234_spill] sm:$0xff] %v9804_v3  ;;  %v3844_v5 = vmul.f32 %v9795_v43, %v9795_v43  ;;  %v4192_v21 = vadd.f32 %v4191_v38, %v3831_v31  ;;  %v3845_v35 = vmul.f32 %v9804_v3, %v9804_v3  ;;  %v9822_v40 = vadd.f32 %v8680_v46, %v3172_v14  ;;  %v3188_v14 = vld [vmem:[#allocation2 + $0x7d0] sm:$0xff] }
 0x415   : > { %12262 = vst [vmem:[#allocation235_spill] sm:$0xff] %v9807_v0  ;;  %12263 = vst [vmem:[#allocation236_spill] sm:$0xff] %v9810_v62  ;;  %v3846_v60 = vmul.f32 %v9807_v0, %v9807_v0  ;;  %v4200_v49 = vadd.f32 %v4199_v59, %v3838_v61  ;;  %v3847_v57 = vmul.f32 %v9810_v62, %v9810_v62 }
 0x416   : > { %12264 = vst [vmem:[#allocation237_spill] sm:$0xff] %v9813_v39  ;;  %12265 = vst [vmem:[#allocation238_spill] sm:$0xff] %v9822_v40  ;;  %v3848_v43 = vmul.f32 %v9813_v39, %v9813_v39  ;;  %v9829_v38 = vadd.f32 %v8684_v47, %v3173_v11  ;;  %v4193_v31 = vadd.f32 %v4192_v21, %v3832_v15  ;;  %v3190_v15 = vld [vmem:[#allocation2 + $0x5c8] sm:$0xff] }
 0x417   : > { %v4209_v3 = vadd.f32 %v3845_v35, %v3844_v5  ;;  %v9832_v33 = vadd.f32 %v8688_v7, %v3174_v13  ;;  %v9835_v0 = vadd.f32 %v8692_v24, %v3175_v34  ;;  %4201 = vadd.xlane.f32.xlu1 %v4200_v49  ;;  %v9838_v61 = vadd.f32 %v8696_v29, %v3176_v50  ;;  %v3191_v5 = vld [vmem:[#allocation2 + $0x140] sm:$0xff]  ;;  %v3182_v49 = vld [vmem:[#allocation2 + $0x1e8] sm:$0xff] }
 0x418   : > { %12266 = vst [vmem:[#allocation239_spill] sm:$0xff] %v9829_v38  ;;  %v3839_v59 = vmul.f32 %v9822_v40, %v9822_v40  ;;  %v3840_v11 = vmul.f32 %v9829_v38, %v9829_v38  ;;  %v9845_v13 = vadd.f32 %v8680_v46, %v3187_v44  ;;  %v4194_v21 = vadd.f32 %v4193_v31, %v3833_v10  ;;  %v3183_v44 = vld [vmem:[#allocation2 + $0x5a8] sm:$0xff] }
 0x419   : > { %12267 = vst [vmem:[#allocation240_spill] sm:$0xff] %v9832_v33  ;;  %12268 = vst [vmem:[#allocation241_spill] sm:$0xff] %v9835_v0  ;;  %v4210_v34 = vadd.f32 %v4209_v3, %v3846_v60  ;;  %v3841_v35 = vmul.f32 %v9832_v33, %v9832_v33  ;;  %v3842_v50 = vmul.f32 %v9835_v0, %v9835_v0  ;;  %v3199_v33 = vld [vmem:[#allocation2 + $0x100] sm:$0xff] }
 0x41a   : > { %12269 = vst [vmem:[#allocation242_spill] sm:$0xff] %v9838_v61  ;;  %12270 = vst [vmem:[#allocation243_spill] sm:$0xff] %v9845_v13  ;;  %v3843_v40 = vmul.f32 %v9838_v61, %v9838_v61  ;;  %v4203_v39 = vadd.f32 %v3840_v11, %v3839_v59  ;;  %v9854_v38 = vadd.f32 %v8684_v47, %v3188_v14  ;;  %4195 = vadd.xlane.f32.xlu0 %v4194_v21  ;;  %v3184_v61 = vld [vmem:[#allocation2 + $0x3e0] sm:$0xff]  ;;  %v3185_v59 = vld [vmem:[#allocation2 + $0x288] sm:$0xff] }
 0x41b   : > { %v9857_v62 = vadd.f32 %v8688_v7, %v3189_v51  ;;  %v4211_v10 = vadd.f32 %v4210_v34, %v3847_v57  ;;  %v9860_v3 = vadd.f32 %v8692_v24, %v3190_v15  ;;  %v9863_v60 = vadd.f32 %v8696_v29, %v3191_v5  ;;  %v3186_v21 = vld [vmem:[#allocation2 + $0x340] sm:$0xff]  ;;  %v3197_v15 = vld [vmem:[#allocation2 + $0x3d8] sm:$0xff] }
 0x41c   : > { %12271 = vst [vmem:[#allocation244_spill] sm:$0xff] %v9854_v38  ;;  %v3854_v31 = vmul.f32 %v9845_v13, %v9845_v13  ;;  %v4204_v11 = vadd.f32 %v4203_v39, %v3841_v35  ;;  %v3855_v14 = vmul.f32 %v9854_v38, %v9854_v38  ;;  %v9872_v57 = vadd.f32 %v8680_v46, %v3182_v49  ;;  %v3198_v49 = vld [vmem:[#allocation2 + $0x938] sm:$0xff] }
 0x41d   : > { %12272 = vst [vmem:[#allocation245_spill] sm:$0xff] %v9857_v62  ;;  %12273 = vst [vmem:[#allocation246_spill] sm:$0xff] %v9860_v3  ;;  %v3856_v51 = vmul.f32 %v9857_v62, %v9857_v62  ;;  %v4212_v34 = vadd.f32 %v4211_v10, %v3848_v43  ;;  %v3857_v5 = vmul.f32 %v9860_v3, %v9860_v3 }
 0x41e   : > { %12274 = vst [vmem:[#allocation247_spill] sm:$0xff] %v9863_v60  ;;  %12275 = vst [vmem:[#allocation248_spill] sm:$0xff] %v9872_v57  ;;  %v3858_v13 = vmul.f32 %v9863_v60, %v9863_v60  ;;  %v9879_v39 = vadd.f32 %v8684_v47, %v3183_v44  ;;  %v4205_v35 = vadd.f32 %v4204_v11, %v3842_v50  ;;  %v3200_v50 = vld [vmem:[#allocation2 + $0xd0] sm:$0xff] }
 0x41f   : > { %v4221_v38 = vadd.f32 %v3855_v14, %v3854_v31  ;;  %v9882_v0 = vadd.f32 %v8688_v7, %v3184_v61  ;;  %v9885_v62 = vadd.f32 %v8692_v24, %v3185_v59  ;;  %4213 = vadd.xlane.f32.xlu1 %v4212_v34  ;;  %v9888_v43 = vadd.f32 %v8696_v29, %v3186_v21  ;;  %v3201_v31 = vld [vmem:[#allocation2 + $0x418] sm:$0xff] }
 0x420   : > { %12276 = vst [vmem:[#allocation249_spill] sm:$0xff] %v9879_v39  ;;  %v3849_v10 = vmul.f32 %v9872_v57, %v9872_v57  ;;  %v3850_v44 = vmul.f32 %v9879_v39, %v9879_v39  ;;  %v9895_v61 = vadd.f32 %v8680_v46, %v3197_v15  ;;  %v4206_v11 = vadd.f32 %v4205_v35, %v3843_v40  ;;  %v3192_v34 = vld [vmem:[#allocation2 + $0x1f8] sm:$0xff]  ;;  %v3193_v15 = vld [vmem:[#allocation2 + $0x430] sm:$0xff] }
 0x421   : > { %12277 = vst [vmem:[#allocation250_spill] sm:$0xff] %v9882_v0  ;;  %12278 = vst [vmem:[#allocation251_spill] sm:$0xff] %v9885_v62  ;;  %v4222_v59 = vadd.f32 %v4221_v38, %v3856_v51  ;;  %v3851_v14 = vmul.f32 %v9882_v0, %v9882_v0  ;;  %v3852_v21 = vmul.f32 %v9885_v62, %v9885_v62  ;;  %v3209_v0 = vld [vmem:[#allocation2 + $0x40] sm:$0xff] }
 0x422   : > { %12279 = vst [vmem:[#allocation252_spill] sm:$0xff] %v9888_v43  ;;  %12280 = vst [vmem:[#allocation253_spill] sm:$0xff] %v9895_v61  ;;  %v3853_v57 = vmul.f32 %v9888_v43, %v9888_v43  ;;  %v4215_v60 = vadd.f32 %v3850_v44, %v3849_v10  ;;  %v9904_v39 = vadd.f32 %v8684_v47, %v3198_v49  ;;  %4207 = vadd.xlane.f32.xlu0 %v4206_v11  ;;  %v3194_v43 = vld [vmem:[#allocation2 + $0x250] sm:$0xff]  ;;  %v3196_v11 = vld [vmem:[#allocation2 + $0x8c8] sm:$0xff] }
 0x423   : > { %v9907_v3 = vadd.f32 %v8688_v7, %v3199_v33  ;;  %v4223_v40 = vadd.f32 %v4222_v59, %v3857_v5  ;;  %v9910_v38 = vadd.f32 %v8692_v24, %v3200_v50  ;;  %v9913_v51 = vadd.f32 %v8696_v29, %v3201_v31  ;;  %v3195_v10 = vld [vmem:[#allocation2 + $0x9f0] sm:$0xff]  ;;  %v3207_v50 = vld [vmem:[#allocation2 + $0x208] sm:$0xff] }
 0x424   : > { %12281 = vst [vmem:[#allocation254_spill] sm:$0xff] %v9904_v39  ;;  %v3864_v35 = vmul.f32 %v9895_v61, %v9895_v61  ;;  %v4216_v44 = vadd.f32 %v4215_v60, %v3851_v14  ;;  %v3865_v49 = vmul.f32 %v9904_v39, %v9904_v39  ;;  %v9922_v5 = vadd.f32 %v8680_v46, %v3192_v34  ;;  %v3208_v34 = vld [vmem:[#allocation2 + $0x8d8] sm:$0xff] }
 0x425   : > { %12282 = vst [vmem:[#allocation255_spill] sm:$0xff] %v9907_v3  ;;  %12283 = vst [vmem:[#allocation256_spill] sm:$0xff] %v9910_v38  ;;  %v3866_v33 = vmul.f32 %v9907_v3, %v9907_v3  ;;  %v4224_v59 = vadd.f32 %v4223_v40, %v3858_v13  ;;  %v3867_v31 = vmul.f32 %v9910_v38, %v9910_v38  ;;  %v9937_v13 = vpop.xlane.xlu1 %3955 }
 0x426   : > { %12284 = vst [vmem:[#allocation257_spill] sm:$0xff] %v9913_v51  ;;  %12285 = vst [vmem:[#allocation258_spill] sm:$0xff] %v9922_v5  ;;  %v3868_v61 = vmul.f32 %v9913_v51, %v9913_v51  ;;  %v9929_v60 = vadd.f32 %v8684_v47, %v3193_v15  ;;  %v4217_v14 = vadd.f32 %v4216_v44, %v3852_v21 }
 0x427   : > { %v4233_v39 = vadd.f32 %v3865_v49, %v3864_v35  ;;  %v9932_v62 = vadd.f32 %v8688_v7, %v3194_v43  ;;  %v9935_v3 = vadd.f32 %v8692_v24, %v3195_v10  ;;  %4225 = vadd.xlane.f32.xlu1 %v4224_v59  ;;  %v9940_v40 = vadd.f32 %v8696_v29, %v3196_v11  ;;  %v3210_v35 = vld [vmem:[#allocation2 + $0x1f0] sm:$0xff]  ;;  %v3211_v43 = vld [vmem:[#allocation2 + $0x308] sm:$0xff] }
 0x428   : > { %12286 = vst [vmem:[#allocation259_spill] sm:$0xff] %v9929_v60  ;;  %v3859_v15 = vmul.f32 %v9922_v5, %v9922_v5  ;;  %v3860_v21 = vmul.f32 %v9929_v60, %v9929_v60  ;;  %v9947_v44 = vadd.f32 %v8680_v46, %v3207_v50  ;;  %v4218_v10 = vadd.f32 %v4217_v14, %v3853_v57  ;;  %v3202_v59 = vld [vmem:[#allocation2 + $0x988] sm:$0xff]  ;;  %v3203_v50 = vld [vmem:[#allocation2 + $0x9b0] sm:$0xff] }
 0x429   : > { %12287 = vst [vmem:[#allocation260_spill] sm:$0xff] %v9932_v62  ;;  %12288 = vst [vmem:[#allocation261_spill] sm:$0xff] %v9935_v3  ;;  %v4234_v49 = vadd.f32 %v4233_v39, %v3866_v33  ;;  %v3861_v51 = vmul.f32 %v9932_v62, %v9932_v62  ;;  %v3862_v11 = vmul.f32 %v9935_v3, %v9935_v3 }
 0x42a   : > { %12289 = vst [vmem:[#allocation262_spill] sm:$0xff] %v9940_v40  ;;  %12290 = vst [vmem:[#allocation263_spill] sm:$0xff] %v9947_v44  ;;  %v3863_v5 = vmul.f32 %v9940_v40, %v9940_v40  ;;  %v4227_v38 = vadd.f32 %v3860_v21, %v3859_v15  ;;  %v9956_v60 = vadd.f32 %v8684_v47, %v3208_v34  ;;  %4219 = vadd.xlane.f32.xlu0 %v4218_v10  ;;  %v3204_v40 = vld [vmem:[#allocation2 + $0x7a8] sm:$0xff]  ;;  %v3205_v15 = vld [vmem:[#allocation2 + $0x198] sm:$0xff]  ;;  %v9969_v21 = vpop.xlane.xlu0 %3943 }
 0x42b   : > { %v9959_v16 = vadd.f32 %v8688_v7, %v3209_v0  ;;  %v4235_v57 = vadd.f32 %v4234_v49, %v3867_v31  ;;  %v9962_v39 = vadd.f32 %v8692_v24, %v3210_v35  ;;  %v9965_v33 = vadd.f32 %v8696_v29, %v3211_v43  ;;  %v3206_v10 = vld [vmem:[#allocation2 + $0x630] sm:$0xff]  ;;  %v3217_v43 = vld [vmem:[#allocation2 + $0x700] sm:$0xff] }
 0x42c   : > { %12291 = vst [vmem:[#allocation264_spill] sm:$0xff] %v9956_v60  ;;  %v3874_v14 = vmul.f32 %v9947_v44, %v9947_v44  ;;  %v4228_v34 = vadd.f32 %v4227_v38, %v3861_v51  ;;  %v3875_v0 = vmul.f32 %v9956_v60, %v9956_v60  ;;  %v9976_v35 = vadd.f32 %v8680_v46, %v3202_v59  ;;  %v9985_v51 = vpop.xlane.xlu1 %3961 }
 0x42d   : > { %12292 = vst [vmem:[#allocation265_spill] sm:$0xff] %v9959_v16  ;;  %12293 = vst [vmem:[#allocation266_spill] sm:$0xff] %v9962_v39  ;;  %v3876_v31 = vmul.f32 %v9959_v16, %v9959_v16  ;;  %v4236_v49 = vadd.f32 %v4235_v57, %v3868_v61  ;;  %v3877_v44 = vmul.f32 %v9962_v39, %v9962_v39  ;;  %v3218_v61 = vld [vmem:[#allocation2 + $0x8e8] sm:$0xff]  ;;  %v3219_v57 = vld [vmem:[#allocation2 + $0x658] sm:$0xff] }
 0x42e   : > { %12294 = vst [vmem:[#allocation267_spill] sm:$0xff] %v9965_v33  ;;  %12295 = vst [vmem:[#allocation268_spill] sm:$0xff] %v9976_v35  ;;  %v3878_v3 = vmul.f32 %v9965_v33, %v9965_v33  ;;  %v9983_v38 = vadd.f32 %v8684_v47, %v3203_v50  ;;  %v4229_v60 = vadd.f32 %v4228_v34, %v3862_v11  ;;  %v3220_v11 = vld [vmem:[#allocation2 + $0x178] sm:$0xff] }
 0x42f   : > { %v4245_v62 = vadd.f32 %v3875_v0, %v3874_v14  ;;  %v9988_v16 = vadd.f32 %v8688_v7, %v3204_v40  ;;  %v9991_v59 = vadd.f32 %v8692_v24, %v3205_v15  ;;  %4237 = vadd.xlane.f32.xlu1 %v4236_v49  ;;  %v9994_v39 = vadd.f32 %v8696_v29, %v3206_v10  ;;  %v3221_v14 = vld [vmem:[#allocation2 + $0x970] sm:$0xff]  ;;  %v3212_v49 = vld [vmem:[#allocation2 + $0x6a0] sm:$0xff] }
 0x430   : > { %12296 = vst [vmem:[#allocation269_spill] sm:$0xff] %v9983_v38  ;;  %v3869_v50 = vmul.f32 %v9976_v35, %v9976_v35  ;;  %v3870_v33 = vmul.f32 %v9983_v38, %v9983_v38  ;;  %v10001_v40 = vadd.f32 %v8680_v46, %v3217_v43  ;;  %v4230_v34 = vadd.f32 %v4229_v60, %v3863_v5  ;;  %v3213_v43 = vld [vmem:[#allocation2 + $0x578] sm:$0xff]  ;;  %v10015_v5 = vpop.xlane.xlu0 %3949 }
 0x431   : > { %12297 = vst [vmem:[#allocation270_spill] sm:$0xff] %v9988_v16  ;;  %12298 = vst [vmem:[#allocation271_spill] sm:$0xff] %v9991_v59  ;;  %v4246_v15 = vadd.f32 %v4245_v62, %v3876_v31  ;;  %v3871_v0 = vmul.f32 %v9988_v16, %v9988_v16  ;;  %v3872_v10 = vmul.f32 %v9991_v59, %v9991_v59 }
 0x432   : > { %12299 = vst [vmem:[#allocation272_spill] sm:$0xff] %v9994_v39  ;;  %12300 = vst [vmem:[#allocation273_spill] sm:$0xff] %v10001_v40  ;;  %v3873_v35 = vmul.f32 %v9994_v39, %v9994_v39  ;;  %v4239_v45 = vadd.f32 %v3870_v33, %v3869_v50  ;;  %v10010_v38 = vadd.f32 %v8684_v47, %v3218_v61  ;;  %4231 = vadd.xlane.f32.xlu0 %v4230_v34  ;;  %v3214_v50 = vld [vmem:[#allocation2 + $0x698] sm:$0xff]  ;;  %v3216_v34 = vld [vmem:[#allocation2 + $0x9a8] sm:$0xff] }
 0x433   : > { %v10013_v1 = vadd.f32 %v8688_v7, %v3219_v57  ;;  %v4247_v62 = vadd.f32 %v4246_v15, %v3877_v44  ;;  %v10018_v60 = vadd.f32 %v8692_v24, %v3220_v11  ;;  %v10021_v31 = vadd.f32 %v8696_v29, %v3221_v14  ;;  %v3215_v61 = vld [vmem:[#allocation2 + $0x478] sm:$0xff]  ;;  %v3227_v11 = vld [vmem:[#allocation2 + $0x400] sm:$0xff]  ;;  %v10032_v15 = vpop.xlane.xlu1 %3973 }
 0x434   : > { %12301 = vst [vmem:[#allocation274_spill] sm:$0xff] %v10010_v38  ;;  %v3884_v33 = vmul.f32 %v10001_v40, %v10001_v40  ;;  %v4240_v39 = vadd.f32 %v4239_v45, %v3871_v0  ;;  %v3885_v57 = vmul.f32 %v10010_v38, %v10010_v38  ;;  %v10030_v44 = vadd.f32 %v8680_v46, %v3212_v49 }
 0x435   : > { %12302 = vst [vmem:[#allocation275_spill] sm:$0xff] %v10013_v1  ;;  %12303 = vst [vmem:[#allocation276_spill] sm:$0xff] %v10018_v60  ;;  %v3886_v59 = vmul.f32 %v10013_v1, %v10013_v1  ;;  %v4248_v14 = vadd.f32 %v4247_v62, %v3878_v3  ;;  %v3887_v40 = vmul.f32 %v10018_v60, %v10018_v60 }
 0x436   : > { %12304 = vst [vmem:[#allocation277_spill] sm:$0xff] %v10021_v31  ;;  %12305 = vst [vmem:[#allocation278_spill] sm:$0xff] %v10030_v44  ;;  %v3888_v45 = vmul.f32 %v10021_v31, %v10021_v31  ;;  %v10039_v0 = vadd.f32 %v8684_v47, %v3213_v43  ;;  %v4241_v38 = vadd.f32 %v4240_v39, %v3872_v10  ;;  %v3230_v39 = vld [vmem:[#allocation2 + $0x30] sm:$0xff]  ;;  %v3231_v10 = vld [vmem:[#allocation2 + $0x8] sm:$0xff]  ;;  %v10061_v31 = vpop.xlane.xlu0 %3967 }
 0x437   : > { %v4257_v16 = vadd.f32 %v3885_v57, %v3884_v33  ;;  %v10042_v1 = vadd.f32 %v8688_v7, %v3214_v50  ;;  %v10045_v49 = vadd.f32 %v8692_v24, %v3215_v61  ;;  %4249 = vadd.xlane.f32.xlu1 %v4248_v14  ;;  %v10048_v3 = vadd.f32 %v8696_v29, %v3216_v34  ;;  %v3222_v14 = vld [vmem:[#allocation2 + $0x348] sm:$0xff] }
 0x438   : > { %12306 = vst [vmem:[#allocation279_spill] sm:$0xff] %v10039_v0  ;;  %v3879_v62 = vmul.f32 %v10030_v44, %v10030_v44  ;;  %v3880_v43 = vmul.f32 %v10039_v0, %v10039_v0  ;;  %v10055_v33 = vadd.f32 %v8680_v46, %v3227_v11  ;;  %v4242_v50 = vadd.f32 %v4241_v38, %v3873_v35 }
 0x439   : > { %12307 = vst [vmem:[#allocation280_spill] sm:$0xff] %v10042_v1  ;;  %12308 = vst [vmem:[#allocation281_spill] sm:$0xff] %v10045_v49  ;;  %v4258_v61 = vadd.f32 %v4257_v16, %v3886_v59  ;;  %v3881_v57 = vmul.f32 %v10042_v1, %v10042_v1  ;;  %v3882_v34 = vmul.f32 %v10045_v49, %v10045_v49  ;;  %v3223_v16 = vld [vmem:[#allocation2 + $0x168] sm:$0xff] }
 0x43a   : > { %12309 = vst [vmem:[#allocation282_spill] sm:$0xff] %v10048_v3  ;;  %12310 = vst [vmem:[#allocation283_spill] sm:$0xff] %v10055_v33  ;;  %v3883_v44 = vmul.f32 %v10048_v3, %v10048_v3  ;;  %v4251_v0 = vadd.f32 %v3880_v43, %v3879_v62  ;;  %v10066_v60 = vadd.f32 %v8684_v47, %v3228_v63  ;;  %4243 = vadd.xlane.f32.xlu0 %v4242_v50  ;;  %v3224_v3 = vld [vmem:[#allocation2 + $0x6b8] sm:$0xff]  ;;  %v3225_v62 = vld [vmem:[#allocation2 + $0x560] sm:$0xff]  ;;  %v10079_v43 = vpop.xlane.xlu1 %3985 }
 0x43b   : > { %v10069_v11 = vadd.f32 %v8688_v7, %v3229_v53  ;;  %v4259_v35 = vadd.f32 %v4258_v61, %v3887_v40  ;;  %v10072_v38 = vadd.f32 %v8692_v24, %v3230_v39  ;;  %v10075_v59 = vadd.f32 %v8696_v29, %v3231_v10  ;;  %v3226_v50 = vld [vmem:[#allocation2 + $0x1d0] sm:$0xff] }
 0x43c   : > { %12311 = vst [vmem:[#allocation284_spill] sm:$0xff] %v10066_v60  ;;  %v3894_v49 = vmul.f32 %v10055_v33, %v10055_v33  ;;  %v4252_v63 = vadd.f32 %v4251_v0, %v3881_v57  ;;  %v3895_v53 = vmul.f32 %v10066_v60, %v10066_v60  ;;  %v10086_v39 = vadd.f32 %v8680_v46, %v3222_v14  ;;  %v3237_v10 = vld [vmem:[#allocation2 + $0x550] sm:$0xff] }
 0x43d   : > { %12312 = vst [vmem:[#allocation285_spill] sm:$0xff] %v10069_v11  ;;  %12313 = vst [vmem:[#allocation286_spill] sm:$0xff] %v10072_v38  ;;  %v3896_v40 = vmul.f32 %v10069_v11, %v10069_v11  ;;  %v4260_v61 = vadd.f32 %v4259_v35, %v3888_v45  ;;  %v3897_v33 = vmul.f32 %v10072_v38, %v10072_v38  ;;  %v3238_v14 = vld [vmem:[#allocation2 + $0x90] sm:$0xff] }
 0x43e   : > { %12314 = vst [vmem:[#allocation287_spill] sm:$0xff] %v10075_v59  ;;  %12315 = vst [vmem:[#allocation288_spill] sm:$0xff] %v10086_v39  ;;  %v3898_v1 = vmul.f32 %v10075_v59, %v10075_v59  ;;  %v10093_v0 = vadd.f32 %v8684_v47, %v3223_v16  ;;  %v4253_v57 = vadd.f32 %v4252_v63, %v3882_v34  ;;  %v3240_v34 = vld [vmem:[#allocation2 + $0x718] sm:$0xff]  ;;  %v10111_v63 = vpop.xlane.xlu0 %3979  ;;  %v3232_v59 = vld [vmem:[#allocation2 + $0x710] sm:$0xff] }
 0x43f   : > { %v4269_v60 = vadd.f32 %v3895_v53, %v3894_v49  ;;  %v10096_v41 = vadd.f32 %v8688_v7, %v3224_v3  ;;  %v10099_v11 = vadd.f32 %v8692_v24, %v3225_v62  ;;  %4261 = vadd.xlane.f32.xlu1 %v4260_v61  ;;  %v10102_v45 = vadd.f32 %v8696_v29, %v3226_v50  ;;  %v3241_v49 = vld [vmem:[#allocation2 + $0x928] sm:$0xff] }
 0x440   : > { %12316 = vst [vmem:[#allocation289_spill] sm:$0xff] %v10093_v0  ;;  %v3889_v35 = vmul.f32 %v10086_v39, %v10086_v39  ;;  %v3890_v16 = vmul.f32 %v10093_v0, %v10093_v0  ;;  %v10109_v3 = vadd.f32 %v8680_v46, %v3237_v10  ;;  %v4254_v62 = vadd.f32 %v4253_v57, %v3883_v44  ;;  %v10125_v44 = vpop.xlane.xlu1 %3997 }
 0x441   : > { %12317 = vst [vmem:[#allocation290_spill] sm:$0xff] %v10096_v41  ;;  %12318 = vst [vmem:[#allocation291_spill] sm:$0xff] %v10099_v11  ;;  %v4270_v53 = vadd.f32 %v4269_v60, %v3896_v40  ;;  %v3891_v61 = vmul.f32 %v10096_v41, %v10096_v41  ;;  %v3892_v50 = vmul.f32 %v10099_v11, %v10099_v11 }
 0x442   : > { %12319 = vst [vmem:[#allocation292_spill] sm:$0xff] %v10102_v45  ;;  %12320 = vst [vmem:[#allocation293_spill] sm:$0xff] %v10109_v3  ;;  %v3893_v39 = vmul.f32 %v10102_v45, %v10102_v45  ;;  %v4263_v0 = vadd.f32 %v3890_v16, %v3889_v35  ;;  %v10120_v38 = vadd.f32 %v8684_v47, %v3238_v14  ;;  %4255 = vadd.xlane.f32.xlu0 %v4254_v62  ;;  %v3234_v16 = vld [vmem:[#allocation2 + $0x280] sm:$0xff]  ;;  %v3236_v62 = vld [vmem:[#allocation2 + $0x218] sm:$0xff] }
 0x443   : > { %v10123_v10 = vadd.f32 %v8688_v7, %v3239_v32  ;;  %v4271_v60 = vadd.f32 %v4270_v53, %v3897_v33  ;;  %v10128_v40 = vadd.f32 %v8692_v24, %v3240_v34  ;;  %v10131_v57 = vadd.f32 %v8696_v29, %v3241_v49  ;;  %v3235_v14 = vld [vmem:[#allocation2 + $0x500] sm:$0xff] }
 0x444   : > { %12321 = vst [vmem:[#allocation294_spill] sm:$0xff] %v10120_v38  ;;  %v3904_v35 = vmul.f32 %v10109_v3, %v10109_v3  ;;  %v4264_v45 = vadd.f32 %v4263_v0, %v3891_v61  ;;  %v3905_v32 = vmul.f32 %v10120_v38, %v10120_v38  ;;  %v10140_v33 = vadd.f32 %v8680_v46, %v3232_v59  ;;  %v3247_v34 = vld [vmem:[#allocation2 + $0x4e0] sm:$0xff]  ;;  %v3248_v59 = vld [vmem:[#allocation2 + $0x188] sm:$0xff] }
 0x445   : > { %12322 = vst [vmem:[#allocation295_spill] sm:$0xff] %v10123_v10  ;;  %12323 = vst [vmem:[#allocation296_spill] sm:$0xff] %v10128_v40  ;;  %v3906_v11 = vmul.f32 %v10123_v10, %v10123_v10  ;;  %v4272_v53 = vadd.f32 %v4271_v60, %v3898_v1  ;;  %v3907_v49 = vmul.f32 %v10128_v40, %v10128_v40  ;;  %v10155_v1 = vpop.xlane.xlu0 %3991  ;;  %v10171_v40 = vpop.xlane.xlu1 %4009 }
 0x446   : > { %12324 = vst [vmem:[#allocation297_spill] sm:$0xff] %v10131_v57  ;;  %12325 = vst [vmem:[#allocation298_spill] sm:$0xff] %v10140_v33  ;;  %v3908_v3 = vmul.f32 %v10131_v57, %v10131_v57  ;;  %v10147_v0 = vadd.f32 %v8684_v47, %v3233_v30  ;;  %v4265_v61 = vadd.f32 %v4264_v45, %v3892_v50  ;;  %v3250_v50 = vld [vmem:[#allocation2 + $0x6d0] sm:$0xff] }
 0x447   : > { %v4281_v38 = vadd.f32 %v3905_v32, %v3904_v35  ;;  %v10150_v41 = vadd.f32 %v8688_v7, %v3234_v16  ;;  %v10153_v10 = vadd.f32 %v8692_v24, %v3235_v14  ;;  %4273 = vadd.xlane.f32.xlu1 %v4272_v53  ;;  %v10158_v60 = vadd.f32 %v8696_v29, %v3236_v62  ;;  %v3251_v35 = vld [vmem:[#allocation2 + $0x638] sm:$0xff]  ;;  %v3242_v53 = vld [vmem:[#allocation2 + $0x368] sm:$0xff] }
 0x448   : > { %12326 = vst [vmem:[#allocation299_spill] sm:$0xff] %v10147_v0  ;;  %v3899_v30 = vmul.f32 %v10140_v33, %v10140_v33  ;;  %v3900_v45 = vmul.f32 %v10147_v0, %v10147_v0  ;;  %v10165_v16 = vadd.f32 %v8680_v46, %v3247_v34  ;;  %v4266_v14 = vadd.f32 %v4265_v61, %v3893_v39 }
 0x449   : > { %12327 = vst [vmem:[#allocation300_spill] sm:$0xff] %v10150_v41  ;;  %12328 = vst [vmem:[#allocation301_spill] sm:$0xff] %v10153_v10  ;;  %v4282_v32 = vadd.f32 %v4281_v38, %v3906_v11  ;;  %v3901_v57 = vmul.f32 %v10150_v41, %v10150_v41  ;;  %v3902_v62 = vmul.f32 %v10153_v10, %v10153_v10  ;;  %v3243_v11 = vld [vmem:[#allocation2 + $0x230] sm:$0xff] }
 0x44a   : > { %12329 = vst [vmem:[#allocation302_spill] sm:$0xff] %v10158_v60  ;;  %12330 = vst [vmem:[#allocation303_spill] sm:$0xff] %v10165_v16  ;;  %v3903_v33 = vmul.f32 %v10158_v60, %v10158_v60  ;;  %v4275_v0 = vadd.f32 %v3900_v45, %v3899_v30  ;;  %v10176_v23 = vadd.f32 %v8684_v47, %v3248_v59  ;;  %4267 = vadd.xlane.f32.xlu0 %v4266_v14  ;;  %v3244_v60 = vld [vmem:[#allocation2 + $0x108] sm:$0xff]  ;;  %v3245_v30 = vld [vmem:[#allocation2 + $0x18] sm:$0xff] }
 0x44b   : > { %v10179_v34 = vadd.f32 %v8688_v7, %v3249_v28  ;;  %v4283_v38 = vadd.f32 %v4282_v32, %v3907_v49  ;;  %v10182_v39 = vadd.f32 %v8692_v24, %v3250_v50  ;;  %v10185_v61 = vadd.f32 %v8696_v29, %v3251_v35  ;;  %v3246_v14 = vld [vmem:[#allocation2 + $0x7c0] sm:$0xff]  ;;  %v3257_v50 = vld [vmem:[#allocation2 + $0x268] sm:$0xff] }
 0x44c   : > { %12331 = vst [vmem:[#allocation304_spill] sm:$0xff] %v10176_v23  ;;  %v3914_v10 = vmul.f32 %v10165_v16, %v10165_v16  ;;  %v4276_v45 = vadd.f32 %v4275_v0, %v3901_v57  ;;  %v3915_v59 = vmul.f32 %v10176_v23, %v10176_v23  ;;  %v10194_v49 = vadd.f32 %v8680_v46, %v3242_v53  ;;  %v10203_v0 = vpop.xlane.xlu0 %4003 }
 0x44d   : > { %12332 = vst [vmem:[#allocation305_spill] sm:$0xff] %v10179_v34  ;;  %12333 = vst [vmem:[#allocation306_spill] sm:$0xff] %v10182_v39  ;;  %v3916_v28 = vmul.f32 %v10179_v34, %v10179_v34  ;;  %v4284_v32 = vadd.f32 %v4283_v38, %v3908_v3  ;;  %v3917_v35 = vmul.f32 %v10182_v39, %v10182_v39  ;;  %v3258_v3 = vld [vmem:[#allocation2 + $0x850] sm:$0xff]  ;;  %v3259_v38 = vld [vmem:[#allocation2 + $0x48] sm:$0xff] }
 0x44e   : > { %12334 = vst [vmem:[#allocation307_spill] sm:$0xff] %v10185_v61  ;;  %12335 = vst [vmem:[#allocation308_spill] sm:$0xff] %v10194_v49  ;;  %v3918_v16 = vmul.f32 %v10185_v61, %v10185_v61  ;;  %v10201_v57 = vadd.f32 %v8684_v47, %v3243_v11  ;;  %v4277_v23 = vadd.f32 %v4276_v45, %v3902_v62  ;;  %v3260_v62 = vld [vmem:[#allocation2 + $0x138] sm:$0xff]  ;;  %v10221_v45 = vpop.xlane.xlu1 %4021 }
 0x44f   : > { %v4293_v41 = vadd.f32 %v3915_v59, %v3914_v10  ;;  %v10206_v34 = vadd.f32 %v8688_v7, %v3244_v60  ;;  %v10209_v53 = vadd.f32 %v8692_v24, %v3245_v30  ;;  %4285 = vadd.xlane.f32.xlu1 %v4284_v32  ;;  %v10212_v39 = vadd.f32 %v8696_v29, %v3246_v14  ;;  %v3261_v10 = vld [vmem:[#allocation2 + $0x8b8] sm:$0xff] }
 0x450   : > { %12336 = vst [vmem:[#allocation309_spill] sm:$0xff] %v10201_v57  ;;  %v3909_v11 = vmul.f32 %v10194_v49, %v10194_v49  ;;  %v3910_v61 = vmul.f32 %v10201_v57, %v10201_v57  ;;  %v10219_v60 = vadd.f32 %v8680_v46, %v3257_v50  ;;  %v4278_v30 = vadd.f32 %v4277_v23, %v3903_v33 }
 0x451   : > { %12337 = vst [vmem:[#allocation310_spill] sm:$0xff] %v10206_v34  ;;  %12338 = vst [vmem:[#allocation311_spill] sm:$0xff] %v10209_v53  ;;  %v4294_v59 = vadd.f32 %v4293_v41, %v3916_v28  ;;  %v3911_v32 = vmul.f32 %v10206_v34, %v10206_v34  ;;  %v3912_v14 = vmul.f32 %v10209_v53, %v10209_v53  ;;  %v3268_v34 = vld [vmem:[#allocation2 + $0x68] sm:$0xff] }
 0x452   : > { %12339 = vst [vmem:[#allocation312_spill] sm:$0xff] %v10212_v39  ;;  %12340 = vst [vmem:[#allocation313_spill] sm:$0xff] %v10219_v60  ;;  %v3913_v49 = vmul.f32 %v10212_v39, %v10212_v39  ;;  %v4287_v57 = vadd.f32 %v3910_v61, %v3909_v11  ;;  %v10230_v58 = vadd.f32 %v8684_v47, %v3258_v3  ;;  %4279 = vadd.xlane.f32.xlu0 %v4278_v30  ;;  %v3254_v39 = vld [vmem:[#allocation2 + $0x200] sm:$0xff]  ;;  %v3256_v30 = vld [vmem:[#allocation2 + $0x3d0] sm:$0xff] }
 0x453   : > { %v10233_v50 = vadd.f32 %v8688_v7, %v3259_v38  ;;  %v4295_v23 = vadd.f32 %v4294_v59, %v3917_v35  ;;  %v10236_v41 = vadd.f32 %v8692_v24, %v3260_v62  ;;  %v10239_v33 = vadd.f32 %v8696_v29, %v3261_v10  ;;  %v3255_v61 = vld [vmem:[#allocation2 + $0x540] sm:$0xff]  ;;  %v3267_v62 = vld [vmem:[#allocation2 + $0x958] sm:$0xff]  ;;  %v10250_v59 = vpop.xlane.xlu0 %4015 }
 0x454   : > { %12341 = vst [vmem:[#allocation314_spill] sm:$0xff] %v10230_v58  ;;  %v3924_v28 = vmul.f32 %v10219_v60, %v10219_v60  ;;  %v4288_v11 = vadd.f32 %v4287_v57, %v3911_v32  ;;  %v3925_v3 = vmul.f32 %v10230_v58, %v10230_v58  ;;  %v10248_v35 = vadd.f32 %v8680_v46, %v3252_v37 }
 0x455   : > { %12342 = vst [vmem:[#allocation315_spill] sm:$0xff] %v10233_v50  ;;  %12343 = vst [vmem:[#allocation316_spill] sm:$0xff] %v10236_v41  ;;  %v3926_v38 = vmul.f32 %v10233_v50, %v10233_v50  ;;  %v4296_v10 = vadd.f32 %v4295_v23, %v3918_v16  ;;  %v3927_v60 = vmul.f32 %v10236_v41, %v10236_v41  ;;  %v10265_v16 = vpop.xlane.xlu1 %4033 }
 0x456   : > { %12344 = vst [vmem:[#allocation317_spill] sm:$0xff] %v10239_v33  ;;  %12345 = vst [vmem:[#allocation318_spill] sm:$0xff] %v10248_v35  ;;  %v3928_v57 = vmul.f32 %v10239_v33, %v10239_v33  ;;  %v10257_v32 = vadd.f32 %v8684_v47, %v3253_v9  ;;  %v4289_v58 = vadd.f32 %v4288_v11, %v3912_v14 }
 0x457   : > { %v4305_v53 = vadd.f32 %v3925_v3, %v3924_v28  ;;  %v10260_v50 = vadd.f32 %v8688_v7, %v3254_v39  ;;  %v10263_v37 = vadd.f32 %v8692_v24, %v3255_v61  ;;  %4297 = vadd.xlane.f32.xlu1 %v4296_v10  ;;  %v10268_v23 = vadd.f32 %v8696_v29, %v3256_v30  ;;  %v3270_v28 = vld [vmem:[#allocation2 + $0x4b8] sm:$0xff]  ;;  %v3271_v39 = vld [vmem:[#allocation2 + $0x790] sm:$0xff] }
 0x458   : > { %12346 = vst [vmem:[#allocation319_spill] sm:$0xff] %v10257_v32  ;;  %v3919_v9 = vmul.f32 %v10248_v35, %v10248_v35  ;;  %v3920_v14 = vmul.f32 %v10257_v32, %v10257_v32  ;;  %v10275_v11 = vadd.f32 %v8680_v46, %v3267_v62  ;;  %v4290_v61 = vadd.f32 %v4289_v58, %v3913_v49  ;;  %v3262_v10 = vld [vmem:[#allocation2 + $0x290] sm:$0xff]  ;;  %v3263_v62 = vld [vmem:[#allocation2 + $0x260] sm:$0xff] }
 0x459   : > { %12347 = vst [vmem:[#allocation320_spill] sm:$0xff] %v10263_v37  ;;  %12348 = vst [vmem:[#allocation321_spill] sm:$0xff] %v10268_v23  ;;  %v4306_v3 = vadd.f32 %v4305_v53, %v3926_v38  ;;  %v3921_v33 = vmul.f32 %v10260_v50, %v10260_v50  ;;  %v3922_v30 = vmul.f32 %v10263_v37, %v10263_v37 }
 0x45a   : > { %12349 = vst [vmem:[#allocation322_spill] sm:$0xff] %v10275_v11  ;;  %v3923_v35 = vmul.f32 %v10268_v23, %v10268_v23  ;;  %v4299_v41 = vadd.f32 %v3920_v14, %v3919_v9  ;;  %v10284_v32 = vadd.f32 %v8684_v47, %v3268_v34  ;;  %v10287_v6 = vadd.f32 %v8688_v7, %v3269_v36  ;;  %v3264_v23 = vld [vmem:[#allocation2 + $0x470] sm:$0xff]  ;;  %v3265_v9 = vld [vmem:[#allocation2 + $0x528] sm:$0xff]  ;;  %v10297_v14 = vpop.xlane.xlu0 %4027 }
 0x45b   : > { %4291 = vadd.xlane.f32.xlu0 %v4290_v61  ;;  %v4307_v58 = vadd.f32 %v4306_v3, %v3927_v60  ;;  %v10290_v49 = vadd.f32 %v8692_v24, %v3270_v28  ;;  %v10293_v53 = vadd.f32 %v8696_v29, %v3271_v39  ;;  %v3934_v38 = vmul.f32 %v10275_v11, %v10275_v11  ;;  %v3266_v61 = vld [vmem:[#allocation2 + $0x330] sm:$0xff] }
 0x45c   : > { %12350 = vst [vmem:[#allocation323_spill] sm:$0xff] %v10284_v32  ;;  %12351 = vst [vmem:[#allocation324_spill] sm:$0xff] %v10287_v6  ;;  %v4300_v34 = vadd.f32 %v4299_v41, %v3921_v33  ;;  %v3935_v36 = vmul.f32 %v10284_v32, %v10284_v32  ;;  %v3936_v60 = vmul.f32 %v10287_v6, %v10287_v6  ;;  %v10313_v41 = vpop.xlane.xlu1 %4045 }
 0x45d   : > { %v10304_v28 = vadd.f32 %v8680_v46, %v3262_v10  ;;  %v4308_v39 = vadd.f32 %v4307_v58, %v3928_v57  ;;  %v3937_v3 = vmul.f32 %v10290_v49, %v10290_v49  ;;  %v3938_v11 = vmul.f32 %v10293_v53, %v10293_v53 }
 0x45e   : > { %v10311_v37 = vadd.f32 %v8684_v47, %v3263_v62  ;;  %v4301_v33 = vadd.f32 %v4300_v34, %v3922_v30  ;;  %v4317_v32 = vadd.f32 %v3935_v36, %v3934_v38  ;;  %v10316_v6 = vadd.f32 %v8688_v7, %v3264_v23  ;;  %v4040_v34 = vpop.xlane.xlu0 %4039 }
 0x45f   : > { %v10319_v46 = vadd.f32 %v8692_v24, %v3265_v9  ;;  %4309 = vadd.xlane.f32.xlu1 %v4308_v39  ;;  %v10322_v57 = vadd.f32 %v8696_v29, %v3266_v61  ;;  %v3929_v10 = vmul.f32 %v10304_v28, %v10304_v28  ;;  %v4326_v62 = vmul.f32 0.0015625, %v9937_v13 }
 0x460   : > { %v3930_v47 = vmul.f32 %v10311_v37, %v10311_v37  ;;  %v4302_v30 = vadd.f32 %v4301_v33, %v3923_v35  ;;  %v4318_v58 = vadd.f32 %v4317_v32, %v3936_v60  ;;  %v3931_v7 = vmul.f32 %v10316_v6, %v10316_v6  ;;  %v4058_v33 = vpop.xlane.xlu1 %4057 }
 0x461   : > { %12352 = vst [vmem:[#allocation325_spill] sm:$0xff] %v10322_v57  ;;  %v3932_v24 = vmul.f32 %v10319_v46, %v10319_v46  ;;  %v3933_v29 = vmul.f32 %v10322_v57, %v10322_v57  ;;  %v4390_v38 = vadd.f32 1e-06, %v4326_v62  ;;  %v4324_v9 = vmul.f32 0.0015625, %v9969_v21 }
 0x462   : > { %v4311_v23 = vadd.f32 %v3930_v47, %v3929_v10  ;;  %4303 = vadd.xlane.f32.xlu0 %v4302_v30  ;;  %v4319_v36 = vadd.f32 %v4318_v58, %v3937_v3  ;;  %v4327_v13 = vmul.f32 0.0015625, %v9985_v51  ;;  %v4325_v35 = vmul.f32 0.0015625, %v10015_v5 }
 0x463   : > { %v4329_v32 = vmul.f32 0.0015625, %v10032_v15  ;;  %7354 = vrsqrt.f32 %v4390_v38  ;;  %v4388_v61 = vadd.f32 1e-06, %v4324_v9  ;;  %v4328_v39 = vmul.f32 0.0015625, %v10061_v31 }
 0x464   : > { %v4312_v60 = vadd.f32 %v4311_v23, %v3931_v7  ;;  %v4320_v57 = vadd.f32 %v4319_v36, %v3938_v11  ;;  %v4391_v10 = vadd.f32 1e-06, %v4327_v13  ;;  %v4389_v47 = vadd.f32 1e-06, %v4325_v35  ;;  %v4052_v7 = vpop.xlane.xlu0 %4051  ;;  %v7482_v23 = vld [vmem:[#allocation9] sm:$0x1f] }
 0x465   : > { %v4393_v62 = vadd.f32 1e-06, %v4329_v32  ;;  %7356 = vrsqrt.f32 %v4388_v61  ;;  %v4392_v30 = vadd.f32 1e-06, %v4328_v39  ;;  %v4331_v3 = vmul.f32 0.0015625, %v10079_v43 }
 0x466   : > { %v4313_v21 = vadd.f32 %v4312_v60, %v3932_v24  ;;  %4321 = vadd.xlane.f32.xlu1 %v4320_v57  ;;  %7358 = vrsqrt.f32 %v4391_v10  ;;  %v4330_v51 = vmul.f32 0.0015625, %v10111_v63  ;;  %v4333_v5 = vmul.f32 0.0015625, %v10125_v44 }
 0x467   : > { %v4332_v15 = vmul.f32 0.0015625, %v10155_v1  ;;  %7360 = vrsqrt.f32 %v4389_v47  ;;  %v4395_v31 = vadd.f32 1e-06, %v4331_v3  ;;  %v4335_v11 = vmul.f32 0.0015625, %v10171_v40 }
 0x468   : > { %v4314_v58 = vadd.f32 %v4313_v21, %v3933_v29  ;;  %v12353_v24 = vsub.s32 1, %v8673_v22  ;;  %7362 = vrsqrt.f32 %v4393_v62  ;;  %v4394_v43 = vadd.f32 1e-06, %v4330_v51  ;;  %v4070_v29 = vpop.xlane.xlu1 %4069 }
 0x469   : > { %v4397_v57 = vadd.f32 1e-06, %v4333_v5  ;;  %7364 = vrsqrt.f32 %v4392_v30  ;;  %v4396_v63 = vadd.f32 1e-06, %v4332_v15  ;;  %v4334_v44 = vmul.f32 0.0015625, %v10203_v0 }
 0x46a   : > { %v10347_v38 = vrot.slane %v7482_v23, %v12353_v24  ;;  %4315 = vadd.xlane.f32.xlu0 %v4314_v58  ;;  %v4337_v1 = vmul.f32 0.0015625, %v10221_v45  ;;  %7366 = vrsqrt.f32 %v4395_v31  ;;  %v4399_v9 = vadd.f32 1e-06, %v4335_v11 }
 0x46b   : > { %v4336_v40 = vmul.f32 0.0015625, %v10250_v59  ;;  %v4339_v36 = vmul.f32 0.0015625, %v10265_v16  ;;  %7368 = vrsqrt.f32 %v4394_v43  ;;  %v4398_v13 = vadd.f32 1e-06, %v4334_v44 }
 0x46c   : > { %v4338_v35 = vmul.f32 0.0015625, %v10297_v14  ;;  %v4341_v32 = vmul.f32 0.0015625, %v10313_v41  ;;  %v12354_v60 = vsub.s32 2, %v8673_v22  ;;  %v12355_v0 = vsub.s32 3, %v8673_v22  ;;  %v4064_v14 = vpop.xlane.xlu0 %4063  ;;  %v4082_v5 = vpop.xlane.xlu1 %4081 }
 0x46d   : > { %7370 = vrsqrt.f32 %v4397_v57  ;;  %v4401_v39 = vadd.f32 1e-06, %v4337_v1  ;;  %v12356_v59 = vsub.s32 4, %v8673_v22  ;;  %v4340_v16 = vmul.f32 0.0015625, %v4040_v34 }
 0x46e   : > { %v10357_v61 = vrot.slane %v7482_v23, %v12354_v60  ;;  %v10361_v45 = vrot.slane %v7482_v23, %v12355_v0  ;;  %7372 = vrsqrt.f32 %v4396_v63  ;;  %v4343_v47 = vmul.f32 0.0015625, %v4058_v33 }
 0x46f   : > { %v10365_v10 = vrot.slane %v7482_v23, %v12356_v59  ;;  %7374 = vrsqrt.f32 %v4399_v9  ;;  %v4400_v41 = vadd.f32 1e-06, %v4336_v40  ;;  %v10367_v62 = vadd.f32 1e-06, %v4339_v36 }
 0x470   : > { %v4342_v21 = vmul.f32 0.0015625, %v4052_v7  ;;  %7376 = vrsqrt.f32 %v4398_v13  ;;  %v10369_v30 = vadd.f32 1e-06, %v4338_v35  ;;  %v10371_v3 = vadd.f32 1e-06, %v4341_v32  ;;  %v7355_v22 = vpop.eup %7354 }
 0x471   : > { %v10373_v51 = vmul.f32 0.0015625, %v4070_v29  ;;  %7378 = vrsqrt.f32 %v4401_v39  ;;  %v10375_v15 = vadd.f32 1e-06, %v4340_v16  ;;  %v10377_v34 = vadd.f32 1e-06, %v4343_v47 }
 0x472   : > { %v10379_v33 = vmul.f32 0.0015625, %v4064_v14  ;;  %v4526_v58 = vmul.f32 %v7355_v22, %v8699_v27  ;;  %v4527_v31 = vmul.f32 %v7355_v22, %v8702_v52  ;;  %v4528_v11 = vmul.f32 %v7355_v22, %v8705_v54  ;;  %v7357_v23 = vpop.eup %7356 }
 0x473   : > { %v4529_v7 = vmul.f32 %v7355_v22, %v8708_v55  ;;  %v4530_v24 = vmul.f32 %v7355_v22, %v8711_v25  ;;  %7380 = vrsqrt.f32 %v4400_v41  ;;  %v10386_v43 = vadd.f32 1e-06, %v4342_v21  ;;  %v7359_v63 = vpop.eup %7358 }
 0x474   : > { %v10388_v57 = vmul.f32 0.0015625, %v4082_v5  ;;  %v4873_v44 = vmul.f32 %v8713_v42, %v4526_v58  ;;  %v4874_v1 = vmul.f32 %v10347_v38, %v4527_v31  ;;  %v4875_v27 = vmul.f32 %v10357_v61, %v4528_v11  ;;  %v7361_v54 = vpop.eup %7360 }
 0x475   : > { %v4876_v52 = vmul.f32 %v10361_v45, %v4529_v7  ;;  %v4877_v55 = vmul.f32 %v10365_v10, %v4530_v24  ;;  %v4516_v25 = vmul.f32 %v7357_v23, %v8716_v56  ;;  %v4517_v29 = vmul.f32 %v7357_v23, %v8729_v2  ;;  %v7363_v40 = vpop.eup %7362 }
 0x476   : > { %v4518_v9 = vmul.f32 %v7357_v23, %v8732_v20  ;;  %v6819_v36 = vpack.c.bf16 %v4874_v1, %v4873_v44  ;;  %v4519_v35 = vmul.f32 %v7357_v23, %v8735_v48  ;;  %v4520_v32 = vmul.f32 %v7357_v23, %v8738_v8  ;;  %v10400_v60 = vpop.eup %7364  ;;  %v12358_v1 = vld [vmem:[#allocation30_spill] sm:$0xff] }
 0x477   : > { %v6820_v13 = vpack.c.bf16 %v4876_v52, %v4875_v27  ;;  %v6821_v0 = vpack.c.bf16 %v4877_v55, %v4877_v55  ;;  %v4863_v39 = vmul.f32 %v8713_v42, %v4516_v25  ;;  %v4864_v59 = vmul.f32 %v10347_v38, %v4517_v29  ;;  %v10405_v2 = vpop.eup %7366  ;;  %v12359_v52 = vld [vmem:[#allocation31_spill] sm:$0xff] }
 0x478   : > { %v4865_v56 = vmul.f32 %v10357_v61, %v4518_v9  ;;  %6213 = vst [vmem:[%s8021_s7 + $0x28] sm:$0xff] %v6819_v36  ;;  %v4866_v20 = vmul.f32 %v10361_v45, %v4519_v35  ;;  %v4867_v48 = vmul.f32 %v10365_v10, %v4520_v32  ;;  %v4531_v8 = vmul.f32 %v7359_v63, %v8743_v12  ;;  %v10413_v47 = vpop.eup %7368  ;;  %v12360_v36 = vld [vmem:[#allocation32_spill] sm:$0xff] }
 0x479   : > { %6214 = vst [vmem:[%s8021_s7 + $0x30] sm:$0xff] %v6820_v13  ;;  %v4532_v16 = vmul.f32 %v7359_v63, %v8752_v18  ;;  %6215 = vst [vmem:[%s8021_s7 + $0x38] sm:$0xf] %v6821_v0  ;;  %v6813_v14 = vpack.c.bf16 %v4864_v59, %v4863_v39  ;;  %v4533_v41 = vmul.f32 %v7359_v63, %v8757_v26  ;;  %v12361_v59 = vld [vmem:[#allocation33_spill] sm:$0xff]  ;;  %7382 = vrsqrt.f32 %v10367_v62 }
 0x47a   : > { %v4534_v21 = vmul.f32 %v7359_v63, %v8760_v17  ;;  %v4535_v5 = vmul.f32 %v7359_v63, %v8763_v19  ;;  %v10419_v22 = vpop.eup %7370  ;;  %v6814_v58 = vpack.c.bf16 %v4866_v20, %v4865_v56  ;;  %v6815_v31 = vpack.c.bf16 %v4867_v48, %v4867_v48  ;;  %v12357_v63 = vld [vmem:[#allocation29_spill] sm:$0xff] }
 0x47b   : > { %v4878_v12 = vmul.f32 %v8713_v42, %v4531_v8  ;;  %v4879_v18 = vmul.f32 %v10347_v38, %v4532_v16  ;;  %v10423_v11 = vpop.eup %7372  ;;  %6207 = vst [vmem:[%s8021_s7] sm:$0xff] %v6813_v14  ;;  %v4880_v7 = vmul.f32 %v10357_v61, %v4533_v41  ;;  %v4521_v19 = vmul.f32 %v7361_v54, %v8774_v4  ;;  %v12363_v8 = vld [vmem:[#allocation35_spill] sm:$0xff]  ;;  %v12364_v14 = vld [vmem:[#allocation36_spill] sm:$0xff] }
 0x47c   : > { %v4881_v26 = vmul.f32 %v10361_v45, %v4534_v21  ;;  %v4882_v17 = vmul.f32 %v10365_v10, %v4535_v5  ;;  %v10430_v23 = vpop.eup %7374  ;;  %6208 = vst [vmem:[%s8021_s7 + $0x8] sm:$0xff] %v6814_v58  ;;  %6209 = vst [vmem:[%s8021_s7 + $0x10] sm:$0xf] %v6815_v31  ;;  %v4522_v44 = vmul.f32 %v7361_v54, %v12357_v63  ;;  %v10454_v21 = vpop.xlane.xlu0 %4075  ;;  %7384 = vrsqrt.f32 %v10369_v30 }
 0x47d   : > { %v6822_v24 = vpack.c.bf16 %v4879_v18, %v4878_v12  ;;  %v4523_v27 = vmul.f32 %v7361_v54, %v12358_v1  ;;  %v4524_v55 = vmul.f32 %v7361_v54, %v12359_v52  ;;  %v10437_v25 = vpop.eup %7376  ;;  %v4525_v13 = vmul.f32 %v7361_v54, %v12360_v36  ;;  %v12362_v54 = vld [vmem:[#allocation34_spill] sm:$0xff]  ;;  %v12365_v12 = vld [vmem:[#allocation37_spill] sm:$0xff]  ;;  %v12368_v52 = vld [vmem:[#allocation40_spill] sm:$0xff] }
 0x47e   : > { %v6823_v29 = vpack.c.bf16 %v4881_v26, %v4880_v7  ;;  %v6824_v9 = vpack.c.bf16 %v4882_v17, %v4882_v17  ;;  %v4868_v4 = vmul.f32 %v8713_v42, %v4521_v19  ;;  %v10441_v35 = vpop.eup %7378  ;;  %v4869_v32 = vmul.f32 %v10347_v38, %v4522_v44  ;;  %v12366_v44 = vld [vmem:[#allocation38_spill] sm:$0xff]  ;;  %v12369_v36 = vld [vmem:[#allocation41_spill] sm:$0xff] }
 0x47f   : > { %6216 = vst [vmem:[%s8021_s7 + $0x3c] sm:$0xff] %v6822_v24  ;;  %v4870_v0 = vmul.f32 %v10357_v61, %v4523_v27  ;;  %v4871_v39 = vmul.f32 %v10361_v45, %v4524_v55  ;;  %v4541_v56 = vmul.f32 %v7363_v40, %v12361_v59  ;;  %v4872_v20 = vmul.f32 %v10365_v10, %v4525_v13  ;;  %v12367_v27 = vld [vmem:[#allocation39_spill] sm:$0xff] }
 0x480   : > { %6217 = vst [vmem:[%s8021_s7 + $0x44] sm:$0xff] %v6823_v29  ;;  %6218 = vst [vmem:[%s8021_s7 + $0x4c] sm:$0xf] %v6824_v9  ;;  %v4542_v48 = vmul.f32 %v7363_v40, %v12362_v54  ;;  %v4543_v16 = vmul.f32 %v7363_v40, %v12363_v8  ;;  %v4544_v41 = vmul.f32 %v7363_v40, %v12364_v14  ;;  %v10456_v5 = vpop.eup %7380  ;;  %v10488_v14 = vpop.xlane.xlu1 %4093  ;;  %7386 = vrsqrt.f32 %v10371_v3 }
 0x481   : > { %v6816_v58 = vpack.c.bf16 %v4869_v32, %v4868_v4  ;;  %v6817_v31 = vpack.c.bf16 %v4871_v39, %v4870_v0  ;;  %v4545_v18 = vmul.f32 %v7363_v40, %v12365_v12  ;;  %v4888_v7 = vmul.f32 %v8713_v42, %v4541_v56  ;;  %v12370_v4 = vld [vmem:[#allocation42_spill] sm:$0xff] }
 0x482   : > { %v6818_v26 = vpack.c.bf16 %v4872_v20, %v4872_v20  ;;  %v4889_v17 = vmul.f32 %v10347_v38, %v4542_v48  ;;  %v4890_v19 = vmul.f32 %v10357_v61, %v4543_v16  ;;  %v4891_v24 = vmul.f32 %v10361_v45, %v4544_v41  ;;  %v12371_v48 = vld [vmem:[#allocation43_spill] sm:$0xff]  ;;  %v12372_v16 = vld [vmem:[#allocation44_spill] sm:$0xff]  ;;  %v10490_v41 = vpop.xlane.xlu0 %4087 }
 0x483   : > { %6210 = vst [vmem:[%s8021_s7 + $0x14] sm:$0xff] %v6816_v58  ;;  %6211 = vst [vmem:[%s8021_s7 + $0x1c] sm:$0xff] %v6817_v31  ;;  %v4892_v63 = vmul.f32 %v10365_v10, %v4545_v18  ;;  %v4536_v1 = vmul.f32 %v10400_v60, %v12366_v44  ;;  %v4537_v40 = vmul.f32 %v10400_v60, %v12367_v27  ;;  %v12373_v31 = vld [vmem:[#allocation45_spill] sm:$0xff]  ;;  %v12374_v18 = vld [vmem:[#allocation46_spill] sm:$0xff]  ;;  %7388 = vrsqrt.f32 %v10375_v15 }
 0x484   : > { %v4538_v55 = vmul.f32 %v10400_v60, %v12368_v52  ;;  %6212 = vst [vmem:[%s8021_s7 + $0x24] sm:$0xf] %v6818_v26  ;;  %v6828_v29 = vpack.c.bf16 %v4889_v17, %v4888_v7  ;;  %v6829_v9 = vpack.c.bf16 %v4891_v24, %v4890_v19  ;;  %v4539_v13 = vmul.f32 %v10400_v60, %v12369_v36  ;;  %v12375_v26 = vld [vmem:[#allocation47_spill] sm:$0xff]  ;;  %v12376_v52 = vld [vmem:[#allocation48_spill] sm:$0xff]  ;;  %v12378_v36 = vld [vmem:[#allocation50_spill] sm:$0xff] }
 0x485   : > { %v4540_v32 = vmul.f32 %v10400_v60, %v12370_v4  ;;  %v6830_v0 = vpack.c.bf16 %v4892_v63, %v4892_v63  ;;  %v4883_v39 = vmul.f32 %v8713_v42, %v4536_v1  ;;  %v4884_v59 = vmul.f32 %v10347_v38, %v4537_v40  ;;  %v12379_v4 = vld [vmem:[#allocation51_spill] sm:$0xff] }
 0x486   : > { %v4885_v56 = vmul.f32 %v10357_v61, %v4538_v55  ;;  %6222 = vst [vmem:[%s8021_s7 + $0x64] sm:$0xff] %v6828_v29  ;;  %6223 = vst [vmem:[%s8021_s7 + $0x6c] sm:$0xff] %v6829_v9  ;;  %v4886_v20 = vmul.f32 %v10361_v45, %v4539_v13  ;;  %v4551_v8 = vmul.f32 %v10405_v2, %v12371_v48  ;;  %v12377_v29 = vld [vmem:[#allocation49_spill] sm:$0xff]  ;;  %v4408_v62 = vadd.f32 1e-06, %v10379_v33 }
 0x487   : > { %v4887_v54 = vmul.f32 %v10365_v10, %v4540_v32  ;;  %v4552_v60 = vmul.f32 %v10405_v2, %v12372_v16  ;;  %6224 = vst [vmem:[%s8021_s7 + $0x74] sm:$0xf] %v6830_v0  ;;  %v6825_v58 = vpack.c.bf16 %v4884_v59, %v4883_v39  ;;  %v4553_v12 = vmul.f32 %v10405_v2, %v12373_v31  ;;  %v12380_v59 = vld [vmem:[#allocation52_spill] sm:$0xff]  ;;  %v12381_v16 = vld [vmem:[#allocation53_spill] sm:$0xff]  ;;  %v10526_v31 = vpop.xlane.xlu0 %4099 }
 0x488   : > { %v4554_v7 = vmul.f32 %v10405_v2, %v12374_v18  ;;  %v4555_v17 = vmul.f32 %v10405_v2, %v12375_v26  ;;  %v6826_v19 = vpack.c.bf16 %v4886_v20, %v4885_v56  ;;  %v4898_v63 = vmul.f32 %v8713_v42, %v4551_v8 }
 0x489   : > { %v6827_v24 = vpack.c.bf16 %v4887_v54, %v4887_v54  ;;  %v4899_v44 = vmul.f32 %v10347_v38, %v4552_v60  ;;  %6219 = vst [vmem:[%s8021_s7 + $0x50] sm:$0xff] %v6825_v58  ;;  %v4900_v1 = vmul.f32 %v10357_v61, %v4553_v12  ;;  %v4546_v55 = vmul.f32 %v10413_v47, %v12376_v52  ;;  %v10524_v58 = vpop.xlane.xlu1 %4105  ;;  %v12382_v12 = vld [vmem:[#allocation54_spill] sm:$0xff] }
 0x48a   : > { %v4901_v27 = vmul.f32 %v10361_v45, %v4554_v7  ;;  %v4902_v40 = vmul.f32 %v10365_v10, %v4555_v17  ;;  %6220 = vst [vmem:[%s8021_s7 + $0x58] sm:$0xff] %v6826_v19  ;;  %v4547_v9 = vmul.f32 %v10413_v47, %v12377_v29  ;;  %v4548_v13 = vmul.f32 %v10413_v47, %v12378_v36  ;;  %v12383_v7 = vld [vmem:[#allocation55_spill] sm:$0xff]  ;;  %v12384_v17 = vld [vmem:[#allocation56_spill] sm:$0xff] }
 0x48b   : > { %6221 = vst [vmem:[%s8021_s7 + $0x60] sm:$0xf] %v6827_v24  ;;  %v6834_v2 = vpack.c.bf16 %v4899_v44, %v4898_v63  ;;  %v4549_v32 = vmul.f32 %v10413_v47, %v12379_v4  ;;  %v4550_v56 = vmul.f32 %v10413_v47, %v12380_v59  ;;  %v4893_v20 = vmul.f32 %v8713_v42, %v4546_v55  ;;  %v12385_v44 = vld [vmem:[#allocation57_spill] sm:$0xff]  ;;  %v12388_v4 = vld [vmem:[#allocation60_spill] sm:$0xff] }
 0x48c   : > { %v6835_v0 = vpack.c.bf16 %v4901_v27, %v4900_v1  ;;  %v6836_v39 = vpack.c.bf16 %v4902_v40, %v4902_v40  ;;  %v4894_v54 = vmul.f32 %v10347_v38, %v4547_v9  ;;  %v4895_v48 = vmul.f32 %v10357_v61, %v4548_v13  ;;  %v12386_v9 = vld [vmem:[#allocation58_spill] sm:$0xff]  ;;  %v12387_v13 = vld [vmem:[#allocation59_spill] sm:$0xff]  ;;  %v12389_v59 = vld [vmem:[#allocation61_spill] sm:$0xff] }
 0x48d   : > { %6228 = vst [vmem:[%s8021_s7 + $0x8c] sm:$0xff] %v6834_v2  ;;  %v4896_v8 = vmul.f32 %v10361_v45, %v4549_v32  ;;  %v4561_v60 = vmul.f32 %v10419_v22, %v12381_v16  ;;  %v4897_v47 = vmul.f32 %v10365_v10, %v4550_v56  ;;  %v4562_v18 = vmul.f32 %v10419_v22, %v12382_v12  ;;  %v10562_v12 = vpop.xlane.xlu0 %4111 }
 0x48e   : > { %6229 = vst [vmem:[%s8021_s7 + $0x94] sm:$0xff] %v6835_v0  ;;  %6230 = vst [vmem:[%s8021_s7 + $0x9c] sm:$0xf] %v6836_v39  ;;  %v4563_v26 = vmul.f32 %v10419_v22, %v12383_v7  ;;  %v4564_v19 = vmul.f32 %v10419_v22, %v12384_v17  ;;  %v6831_v24 = vpack.c.bf16 %v4894_v54, %v4893_v20  ;;  %v12390_v20 = vld [vmem:[#allocation62_spill] sm:$0xff]  ;;  %v12392_v17 = vld [vmem:[#allocation64_spill] sm:$0xff]  ;;  %7390 = vrsqrt.f32 %v10377_v34 }
 0x48f   : > { %v6832_v63 = vpack.c.bf16 %v4896_v8, %v4895_v48  ;;  %v4565_v1 = vmul.f32 %v10419_v22, %v12385_v44  ;;  %v4908_v27 = vmul.f32 %v8713_v42, %v4561_v60  ;;  %v6833_v40 = vpack.c.bf16 %v4897_v47, %v4897_v47  ;;  %v10560_v47 = vpop.xlane.xlu1 %4117 }
 0x490   : > { %v4909_v52 = vmul.f32 %v10347_v38, %v4562_v18  ;;  %v4910_v55 = vmul.f32 %v10357_v61, %v4563_v26  ;;  %v4911_v2 = vmul.f32 %v10361_v45, %v4564_v19  ;;  %6225 = vst [vmem:[%s8021_s7 + $0x78] sm:$0xff] %v6831_v24  ;;  %v4556_v36 = vmul.f32 %v10423_v11, %v12386_v9  ;;  %v12391_v26 = vld [vmem:[#allocation63_spill] sm:$0xff] }
 0x491   : > { %6226 = vst [vmem:[%s8021_s7 + $0x80] sm:$0xff] %v6832_v63  ;;  %v4912_v29 = vmul.f32 %v10365_v10, %v4565_v1  ;;  %v4557_v22 = vmul.f32 %v10423_v11, %v12387_v13  ;;  %v4558_v32 = vmul.f32 %v10423_v11, %v12388_v4  ;;  %6227 = vst [vmem:[%s8021_s7 + $0x88] sm:$0xf] %v6833_v40  ;;  %v12393_v63 = vld [vmem:[#allocation65_spill] sm:$0xff]  ;;  %v12394_v1 = vld [vmem:[#allocation66_spill] sm:$0xff]  ;;  %7392 = vrsqrt.f32 %v10386_v43 }
 0x492   : > { %v6840_v0 = vpack.c.bf16 %v4909_v52, %v4908_v27  ;;  %v6841_v39 = vpack.c.bf16 %v4911_v2, %v4910_v55  ;;  %v4559_v56 = vmul.f32 %v10423_v11, %v12389_v59  ;;  %v4560_v54 = vmul.f32 %v10423_v11, %v12390_v20  ;;  %v12395_v40 = vld [vmem:[#allocation67_spill] sm:$0xff]  ;;  %v12396_v4 = vld [vmem:[#allocation68_spill] sm:$0xff]  ;;  %v12398_v59 = vld [vmem:[#allocation70_spill] sm:$0xff] }
 0x493   : > { %v6842_v48 = vpack.c.bf16 %v4912_v29, %v4912_v29  ;;  %v4903_v8 = vmul.f32 %v8713_v42, %v4556_v36  ;;  %v4904_v16 = vmul.f32 %v10347_v38, %v4557_v22  ;;  %v4905_v60 = vmul.f32 %v10357_v61, %v4558_v32  ;;  %v12399_v20 = vld [vmem:[#allocation71_spill] sm:$0xff] }
 0x494   : > { %6234 = vst [vmem:[%s8021_s7 + $0xb4] sm:$0xff] %v6840_v0  ;;  %6235 = vst [vmem:[%s8021_s7 + $0xbc] sm:$0xff] %v6841_v39  ;;  %v4906_v18 = vmul.f32 %v10361_v45, %v4559_v56  ;;  %v4907_v7 = vmul.f32 %v10365_v10, %v4560_v54  ;;  %v4571_v11 = vmul.f32 %v10430_v23, %v12391_v26  ;;  %v12397_v0 = vld [vmem:[#allocation69_spill] sm:$0xff]  ;;  %v10600_v26 = vpop.xlane.xlu0 %4123  ;;  %v4411_v30 = vadd.f32 1e-06, %v10388_v57 }
 0x495   : > { %v4572_v19 = vmul.f32 %v10430_v23, %v12392_v17  ;;  %6236 = vst [vmem:[%s8021_s7 + $0xc4] sm:$0xf] %v6842_v48  ;;  %v6837_v24 = vpack.c.bf16 %v4904_v16, %v4903_v8  ;;  %v4573_v44 = vmul.f32 %v10430_v23, %v12393_v63  ;;  %v4574_v27 = vmul.f32 %v10430_v23, %v12394_v1  ;;  %v12400_v16 = vld [vmem:[#allocation72_spill] sm:$0xff] }
 0x496   : > { %v4575_v52 = vmul.f32 %v10430_v23, %v12395_v40  ;;  %v6838_v55 = vpack.c.bf16 %v4906_v18, %v4905_v60  ;;  %v6839_v2 = vpack.c.bf16 %v4907_v7, %v4907_v7  ;;  %v4918_v29 = vmul.f32 %v8713_v42, %v4571_v11  ;;  %v10598_v7 = vpop.xlane.xlu1 %4129 }
 0x497   : > { %v4919_v9 = vmul.f32 %v10347_v38, %v4572_v19  ;;  %6231 = vst [vmem:[%s8021_s7 + $0xa0] sm:$0xff] %v6837_v24  ;;  %v4920_v36 = vmul.f32 %v10357_v61, %v4573_v44  ;;  %v4921_v13 = vmul.f32 %v10361_v45, %v4574_v27  ;;  %v4566_v32 = vmul.f32 %v10437_v25, %v12396_v4  ;;  %v12401_v24 = vld [vmem:[#allocation73_spill] sm:$0xff]  ;;  %v12402_v44 = vld [vmem:[#allocation74_spill] sm:$0xff]  ;;  %v12403_v27 = vld [vmem:[#allocation75_spill] sm:$0xff] }
 0x498   : > { %v4922_v22 = vmul.f32 %v10365_v10, %v4575_v52  ;;  %6232 = vst [vmem:[%s8021_s7 + $0xa8] sm:$0xff] %v6838_v55  ;;  %6233 = vst [vmem:[%s8021_s7 + $0xb0] sm:$0xf] %v6839_v2  ;;  %v4567_v39 = vmul.f32 %v10437_v25, %v12397_v0  ;;  %v4568_v56 = vmul.f32 %v10437_v25, %v12398_v59  ;;  %v12404_v52 = vld [vmem:[#allocation76_spill] sm:$0xff]  ;;  %v4353_v33 = vmul.f32 0.0015625, %v10560_v47 }
 0x499   : > { %v6846_v23 = vpack.c.bf16 %v4919_v9, %v4918_v29  ;;  %v4569_v54 = vmul.f32 %v10437_v25, %v12399_v20  ;;  %v6847_v48 = vpack.c.bf16 %v4921_v13, %v4920_v36  ;;  %v4570_v60 = vmul.f32 %v10437_v25, %v12400_v16  ;;  %v12405_v9 = vld [vmem:[#allocation77_spill] sm:$0xff]  ;;  %v12408_v20 = vld [vmem:[#allocation80_spill] sm:$0xff] }
 0x49a   : > { %v6848_v8 = vpack.c.bf16 %v4922_v22, %v4922_v22  ;;  %v4913_v18 = vmul.f32 %v8713_v42, %v4566_v32  ;;  %v4914_v11 = vmul.f32 %v10347_v38, %v4567_v39  ;;  %v4915_v17 = vmul.f32 %v10357_v61, %v4568_v56  ;;  %v12406_v39 = vld [vmem:[#allocation78_spill] sm:$0xff]  ;;  %v12407_v56 = vld [vmem:[#allocation79_spill] sm:$0xff]  ;;  %v12409_v16 = vld [vmem:[#allocation81_spill] sm:$0xff] }
 0x49b   : > { %6240 = vst [vmem:[%s8021_s7 + $0xdc] sm:$0xff] %v6846_v23  ;;  %v4916_v19 = vmul.f32 %v10361_v45, %v4569_v54  ;;  %v4581_v63 = vmul.f32 %v10441_v35, %v12401_v24  ;;  %6241 = vst [vmem:[%s8021_s7 + $0xe4] sm:$0xff] %v6847_v48  ;;  %v4917_v25 = vmul.f32 %v10365_v10, %v4570_v60  ;;  %v4355_v34 = vmul.f32 0.0015625, %v10598_v7 }
 0x49c   : > { %6242 = vst [vmem:[%s8021_s7 + $0xec] sm:$0xf] %v6848_v8  ;;  %v4582_v1 = vmul.f32 %v10441_v35, %v12402_v44  ;;  %v4583_v40 = vmul.f32 %v10441_v35, %v12403_v27  ;;  %v4584_v55 = vmul.f32 %v10441_v35, %v12404_v52  ;;  %v6843_v2 = vpack.c.bf16 %v4914_v11, %v4913_v18  ;;  %v12410_v18 = vld [vmem:[#allocation82_spill] sm:$0xff] }
 0x49d   : > { %v6844_v29 = vpack.c.bf16 %v4916_v19, %v4915_v17  ;;  %v4585_v36 = vmul.f32 %v10441_v35, %v12405_v9  ;;  %v4928_v13 = vmul.f32 %v8713_v42, %v4581_v63  ;;  %v6845_v22 = vpack.c.bf16 %v4917_v25, %v4917_v25  ;;  %v4142_v17 = vpop.xlane.xlu1 %4141  ;;  %v4136_v19 = vpop.xlane.xlu0 %4135 }
 0x49e   : > { %v4929_v4 = vmul.f32 %v10347_v38, %v4582_v1  ;;  %v4930_v32 = vmul.f32 %v10357_v61, %v4583_v40  ;;  %v4931_v23 = vmul.f32 %v10361_v45, %v4584_v55  ;;  %6237 = vst [vmem:[%s8021_s7 + $0xc8] sm:$0xff] %v6843_v2  ;;  %v4576_v59 = vmul.f32 %v10456_v5, %v12406_v39 }
 0x49f   : > { %6238 = vst [vmem:[%s8021_s7 + $0xd0] sm:$0xff] %v6844_v29  ;;  %v4932_v0 = vmul.f32 %v10365_v10, %v4585_v36  ;;  %v4577_v35 = vmul.f32 %v10456_v5, %v12407_v56  ;;  %v4578_v54 = vmul.f32 %v10456_v5, %v12408_v20  ;;  %6239 = vst [vmem:[%s8021_s7 + $0xd8] sm:$0xf] %v6845_v22  ;;  %v4346_v52 = vmul.f32 0.0015625, %v10454_v21 }
 0x4a0   : > { %v6852_v48 = vpack.c.bf16 %v4929_v4, %v4928_v13  ;;  %v6853_v8 = vpack.c.bf16 %v4931_v23, %v4930_v32  ;;  %v4579_v60 = vmul.f32 %v10456_v5, %v12409_v16  ;;  %v4580_v11 = vmul.f32 %v10456_v5, %v12410_v18  ;;  %v12412_v16 = vld [vmem:[#allocation84_spill] sm:$0xff]  ;;  %v12413_v18 = vld [vmem:[#allocation85_spill] sm:$0xff] }
 0x4a1   : > { %v6854_v24 = vpack.c.bf16 %v4932_v0, %v4932_v0  ;;  %v4923_v63 = vmul.f32 %v8713_v42, %v4576_v59  ;;  %v4924_v25 = vmul.f32 %v10347_v38, %v4577_v35  ;;  %v4925_v44 = vmul.f32 %v10357_v61, %v4578_v54  ;;  %v4154_v21 = vpop.xlane.xlu1 %4153  ;;  %v7383_v59 = vpop.eup %7382 }
 0x4a2   : > { %6246 = vst [vmem:[%s8021_s7 + $0x104] sm:$0xff] %v6852_v48  ;;  %6247 = vst [vmem:[%s8021_s7 + $0x10c] sm:$0xff] %v6853_v8  ;;  %v4926_v1 = vmul.f32 %v10361_v45, %v4579_v60  ;;  %v4927_v27 = vmul.f32 %v10365_v10, %v4580_v11  ;;  %v4409_v5 = vadd.f32 1e-06, %v10373_v51  ;;  %v4349_v55 = vmul.f32 0.0015625, %v10488_v14  ;;  %v4148_v14 = vpop.xlane.xlu0 %4147  ;;  %v7385_v54 = vpop.eup %7384 }
 0x4a3   : > { %6248 = vst [vmem:[%s8021_s7 + $0x114] sm:$0xf] %v6854_v24  ;;  %v6849_v40 = vpack.c.bf16 %v4924_v25, %v4923_v63  ;;  %v4348_v9 = vmul.f32 0.0015625, %v10490_v41  ;;  %v4351_v51 = vmul.f32 0.0015625, %v10524_v58  ;;  %v4592_v60 = vmul.f32 %v7383_v59, %v12412_v16  ;;  %v7387_v24 = vpop.eup %7386 }
 0x4a4   : > { %v6850_v2 = vpack.c.bf16 %v4926_v1, %v4925_v44  ;;  %v6851_v29 = vpack.c.bf16 %v4927_v27, %v4927_v27  ;;  %v4410_v3 = vadd.f32 1e-06, %v4346_v52  ;;  %v4350_v41 = vmul.f32 0.0015625, %v10526_v31  ;;  %v12411_v48 = vld [vmem:[#allocation83_spill] sm:$0xff]  ;;  %v12416_v44 = vld [vmem:[#allocation88_spill] sm:$0xff] }
 0x4a5   : > { %6243 = vst [vmem:[%s8021_s7 + $0xf0] sm:$0xff] %v6849_v40  ;;  %7394 = vrsqrt.f32 %v4409_v5  ;;  %v4413_v36 = vadd.f32 1e-06, %v4349_v55  ;;  %v4412_v15 = vadd.f32 1e-06, %v4348_v9  ;;  %v4166_v32 = vpop.xlane.xlu1 %4165  ;;  %v4591_v8 = vmul.f32 %v7383_v59, %v12411_v48  ;;  %v12415_v63 = vld [vmem:[#allocation87_spill] sm:$0xff]  ;;  %v7389_v55 = vpop.eup %7388 }
 0x4a6   : > { %6244 = vst [vmem:[%s8021_s7 + $0xf8] sm:$0xff] %v6850_v2  ;;  %6245 = vst [vmem:[%s8021_s7 + $0x100] sm:$0xf] %v6851_v29  ;;  %7396 = vrsqrt.f32 %v4408_v62  ;;  %v4352_v13 = vmul.f32 0.0015625, %v10562_v12  ;;  %v4160_v23 = vpop.xlane.xlu0 %4159  ;;  %v4593_v11 = vmul.f32 %v7383_v59, %v12413_v18  ;;  %v4595_v25 = vmul.f32 %v7383_v59, %v12415_v63  ;;  %v12417_v27 = vld [vmem:[#allocation89_spill] sm:$0xff] }
 0x4a7   : > { %v4354_v57 = vmul.f32 0.0015625, %v10600_v26  ;;  %7398 = vrsqrt.f32 %v4411_v30  ;;  %v4415_v58 = vadd.f32 1e-06, %v4351_v51  ;;  %v4357_v22 = vmul.f32 0.0015625, %v4142_v17  ;;  %v7391_v30 = vpop.eup %7390 }
 0x4a8   : > { %7400 = vrsqrt.f32 %v4410_v3  ;;  %v4414_v43 = vadd.f32 1e-06, %v4350_v41  ;;  %v4356_v4 = vmul.f32 0.0015625, %v4136_v19  ;;  %v10666_v31 = vadd.f32 1e-06, %v4353_v33 }
 0x4a9   : > { %7402 = vrsqrt.f32 %v4413_v36  ;;  %v10668_v47 = vadd.f32 1e-06, %v4352_v13  ;;  %v10670_v0 = vadd.f32 1e-06, %v4355_v34  ;;  %v10672_v12 = vadd.f32 1e-06, %v4354_v57 }
 0x4aa   : > { %7404 = vrsqrt.f32 %v4412_v15  ;;  %v10674_v7 = vadd.f32 1e-06, %v4357_v22  ;;  %v10676_v26 = vmul.f32 0.0015625, %v4154_v21  ;;  %v10678_v39 = vmul.f32 0.0015625, %v4148_v14  ;;  %v10702_v15 = vpop.eup %7392 }
 0x4ab   : > { %7406 = vrsqrt.f32 %v4415_v58  ;;  %v10680_v56 = vadd.f32 1e-06, %v4356_v4  ;;  %v10682_v35 = vmul.f32 0.0015625, %v4166_v32  ;;  %v10684_v20 = vmul.f32 0.0015625, %v4160_v23 }
 0x4ac   : > { %7408 = vrsqrt.f32 %v4414_v43  ;;  %v12414_v17 = vld [vmem:[#allocation86_spill] sm:$0xff]  ;;  %v4586_v1 = vmul.f32 %v7385_v54, %v12416_v44  ;;  %v4587_v5 = vmul.f32 %v7385_v54, %v12417_v27  ;;  %v4938_v2 = vmul.f32 %v8713_v42, %v4591_v8  ;;  %v12419_v21 = vld [vmem:[#allocation91_spill] sm:$0xff]  ;;  %v12420_v3 = vld [vmem:[#allocation92_spill] sm:$0xff] }
 0x4ad   : > { %v4594_v19 = vmul.f32 %v7383_v59, %v12414_v17  ;;  %v12418_v40 = vld [vmem:[#allocation90_spill] sm:$0xff]  ;;  %v4939_v29 = vmul.f32 %v10347_v38, %v4592_v60  ;;  %v4940_v9 = vmul.f32 %v10357_v61, %v4593_v11  ;;  %v4942_v51 = vmul.f32 %v10365_v10, %v4595_v25  ;;  %v12421_v32 = vld [vmem:[#allocation93_spill] sm:$0xff]  ;;  %v12423_v16 = vld [vmem:[#allocation95_spill] sm:$0xff] }
 0x4ae   : > { %v4588_v52 = vmul.f32 %v7385_v54, %v12418_v40  ;;  %v4589_v14 = vmul.f32 %v7385_v54, %v12419_v21  ;;  %v4590_v41 = vmul.f32 %v7385_v54, %v12420_v3  ;;  %v4933_v36 = vmul.f32 %v8713_v42, %v4586_v1  ;;  %v12422_v48 = vld [vmem:[#allocation94_spill] sm:$0xff]  ;;  %v12424_v18 = vld [vmem:[#allocation96_spill] sm:$0xff]  ;;  %v12425_v25 = vld [vmem:[#allocation97_spill] sm:$0xff] }
 0x4af   : > { %v4941_v62 = vmul.f32 %v10361_v45, %v4594_v19  ;;  %v6858_v33 = vpack.c.bf16 %v4939_v29, %v4938_v2  ;;  %v4934_v34 = vmul.f32 %v10347_v38, %v4587_v5  ;;  %v6860_v22 = vpack.c.bf16 %v4942_v51, %v4942_v51  ;;  %v12426_v2 = vld [vmem:[#allocation98_spill] sm:$0xff]  ;;  %v12428_v21 = vld [vmem:[#allocation100_spill] sm:$0xff]  ;;  %v12429_v3 = vld [vmem:[#allocation101_spill] sm:$0xff] }
 0x4b0   : > { %v4935_v57 = vmul.f32 %v10357_v61, %v4588_v52  ;;  %v4936_v43 = vmul.f32 %v10361_v45, %v4589_v14  ;;  %v4937_v4 = vmul.f32 %v10365_v10, %v4590_v41  ;;  %v4601_v23 = vmul.f32 %v7387_v24, %v12421_v32 }
 0x4b1   : > { %v6859_v13 = vpack.c.bf16 %v4941_v62, %v4940_v9  ;;  %6252 = vst [vmem:[%s8021_s7 + $0x12c] sm:$0xff] %v6858_v33  ;;  %v6855_v54 = vpack.c.bf16 %v4934_v34, %v4933_v36  ;;  %v4602_v8 = vmul.f32 %v7387_v24, %v12422_v48  ;;  %v4603_v60 = vmul.f32 %v7387_v24, %v12423_v16  ;;  %v12427_v62 = vld [vmem:[#allocation99_spill] sm:$0xff]  ;;  %v12430_v34 = vld [vmem:[#allocation102_spill] sm:$0xff] }
 0x4b2   : > { %v10706_v58 = vpop.eup %7394  ;;  %v4604_v11 = vmul.f32 %v7387_v24, %v12424_v18  ;;  %6254 = vst [vmem:[%s8021_s7 + $0x13c] sm:$0xf] %v6860_v22  ;;  %v6856_v19 = vpack.c.bf16 %v4936_v43, %v4935_v57  ;;  %v6857_v63 = vpack.c.bf16 %v4937_v4, %v4937_v4  ;;  %v4605_v44 = vmul.f32 %v7387_v24, %v12425_v25 }
 0x4b3   : > { %v10711_v59 = vpop.eup %7396  ;;  %6253 = vst [vmem:[%s8021_s7 + $0x134] sm:$0xff] %v6859_v13  ;;  %v4948_v1 = vmul.f32 %v8713_v42, %v4601_v23  ;;  %6249 = vst [vmem:[%s8021_s7 + $0x118] sm:$0xff] %v6855_v54  ;;  %v4949_v5 = vmul.f32 %v10347_v38, %v4602_v8  ;;  %v4950_v40 = vmul.f32 %v10357_v61, %v4603_v60  ;;  %v12432_v60 = vld [vmem:[#allocation104_spill] sm:$0xff]  ;;  %7410 = vrsqrt.f32 %v10666_v31 }
 0x4b4   : > { %v10718_v17 = vpop.eup %7398  ;;  %v4951_v52 = vmul.f32 %v10361_v45, %v4604_v11  ;;  %v4596_v29 = vmul.f32 %v7389_v55, %v12426_v2  ;;  %6250 = vst [vmem:[%s8021_s7 + $0x120] sm:$0xff] %v6856_v19  ;;  %6251 = vst [vmem:[%s8021_s7 + $0x128] sm:$0xf] %v6857_v63  ;;  %v4952_v24 = vmul.f32 %v10365_v10, %v4605_v44  ;;  %v12433_v11 = vld [vmem:[#allocation105_spill] sm:$0xff]  ;;  %v12434_v44 = vld [vmem:[#allocation106_spill] sm:$0xff]  ;;  %7412 = vrsqrt.f32 %v10668_v47 }
 0x4b5   : > { %v10723_v27 = vpop.eup %7400  ;;  %v4597_v51 = vmul.f32 %v7389_v55, %v12427_v62  ;;  %v4598_v14 = vmul.f32 %v7389_v55, %v12428_v21  ;;  %v4599_v41 = vmul.f32 %v7389_v55, %v12429_v3  ;;  %v6864_v33 = vpack.c.bf16 %v4949_v5, %v4948_v1  ;;  %v12435_v5 = vld [vmem:[#allocation107_spill] sm:$0xff]  ;;  %v12436_v21 = vld [vmem:[#allocation108_spill] sm:$0xff]  ;;  %v12437_v3 = vld [vmem:[#allocation109_spill] sm:$0xff] }
 0x4b6   : > { %v10730_v9 = vpop.eup %7402  ;;  %v6865_v13 = vpack.c.bf16 %v4951_v52, %v4950_v40  ;;  %v4600_v57 = vmul.f32 %v7389_v55, %v12430_v34  ;;  %v4943_v22 = vmul.f32 %v8713_v42, %v4596_v29  ;;  %v6866_v4 = vpack.c.bf16 %v4952_v24, %v4952_v24  ;;  %v12431_v55 = vld [vmem:[#allocation103_spill] sm:$0xff] }
 0x4b7   : > { %v10738_v36 = vpop.eup %7404  ;;  %v4944_v32 = vmul.f32 %v10347_v38, %v4597_v51  ;;  %v4945_v23 = vmul.f32 %v10357_v61, %v4598_v14  ;;  %v4946_v54 = vmul.f32 %v10361_v45, %v4599_v41  ;;  %6258 = vst [vmem:[%s8021_s7 + $0x154] sm:$0xff] %v6864_v33  ;;  %v4611_v16 = vmul.f32 %v7391_v30, %v12431_v55  ;;  %v12438_v33 = vld [vmem:[#allocation110_spill] sm:$0xff]  ;;  %v12439_v34 = vld [vmem:[#allocation111_spill] sm:$0xff] }
 0x4b8   : > { %v10742_v43 = vpop.eup %7406  ;;  %6259 = vst [vmem:[%s8021_s7 + $0x15c] sm:$0xff] %v6865_v13  ;;  %v4947_v8 = vmul.f32 %v10365_v10, %v4600_v57  ;;  %v4612_v18 = vmul.f32 %v7391_v30, %v12432_v60  ;;  %v4613_v19 = vmul.f32 %v7391_v30, %v12433_v11  ;;  %6260 = vst [vmem:[%s8021_s7 + $0x164] sm:$0xf] %v6866_v4  ;;  %7414 = vrsqrt.f32 %v10670_v0 }
 0x4b9   : > { %v10747_v48 = vpop.eup %7408  ;;  %v6861_v63 = vpack.c.bf16 %v4944_v32, %v4943_v22  ;;  %v6862_v25 = vpack.c.bf16 %v4946_v54, %v4945_v23  ;;  %v4614_v1 = vmul.f32 %v7391_v30, %v12434_v44  ;;  %v4615_v40 = vmul.f32 %v7391_v30, %v12435_v5  ;;  %v12440_v22 = vld [vmem:[#allocation112_spill] sm:$0xff]  ;;  %v12443_v44 = vld [vmem:[#allocation115_spill] sm:$0xff] }
 0x4ba   : > { %v6863_v52 = vpack.c.bf16 %v4947_v8, %v4947_v8  ;;  %v4958_v2 = vmul.f32 %v8713_v42, %v4611_v16  ;;  %v4959_v29 = vmul.f32 %v10347_v38, %v4612_v18  ;;  %v4960_v24 = vmul.f32 %v10357_v61, %v4613_v19  ;;  %v12441_v18 = vld [vmem:[#allocation113_spill] sm:$0xff]  ;;  %v10784_v19 = vpop.xlane.xlu1 %4177  ;;  %v12444_v5 = vld [vmem:[#allocation116_spill] sm:$0xff] }
 0x4bb   : > { %6255 = vst [vmem:[%s8021_s7 + $0x140] sm:$0xff] %v6861_v63  ;;  %6256 = vst [vmem:[%s8021_s7 + $0x148] sm:$0xff] %v6862_v25  ;;  %v4961_v62 = vmul.f32 %v10361_v45, %v4614_v1  ;;  %v4962_v51 = vmul.f32 %v10365_v10, %v4615_v40  ;;  %v4606_v14 = vmul.f32 %v10702_v15, %v12436_v21  ;;  %v12442_v63 = vld [vmem:[#allocation114_spill] sm:$0xff]  ;;  %7416 = vrsqrt.f32 %v10672_v12 }
 0x4bc   : > { %v4607_v30 = vmul.f32 %v10702_v15, %v12437_v3  ;;  %6257 = vst [vmem:[%s8021_s7 + $0x150] sm:$0xf] %v6863_v52  ;;  %v6870_v41 = vpack.c.bf16 %v4959_v29, %v4958_v2  ;;  %v4608_v13 = vmul.f32 %v10702_v15, %v12438_v33  ;;  %v4609_v57 = vmul.f32 %v10702_v15, %v12439_v34  ;;  %v12445_v29 = vld [vmem:[#allocation117_spill] sm:$0xff]  ;;  %v12446_v3 = vld [vmem:[#allocation118_spill] sm:$0xff]  ;;  %v12447_v33 = vld [vmem:[#allocation119_spill] sm:$0xff] }
 0x4bd   : > { %v4610_v4 = vmul.f32 %v10702_v15, %v12440_v22  ;;  %v6871_v32 = vpack.c.bf16 %v4961_v62, %v4960_v24  ;;  %v6872_v23 = vpack.c.bf16 %v4962_v51, %v4962_v51  ;;  %v4953_v54 = vmul.f32 %v8713_v42, %v4606_v14 }
 0x4be   : > { %v4954_v8 = vmul.f32 %v10347_v38, %v4607_v30  ;;  %6264 = vst [vmem:[%s8021_s7 + $0x17c] sm:$0xff] %v6870_v41  ;;  %v4955_v55 = vmul.f32 %v10357_v61, %v4608_v13  ;;  %v4956_v16 = vmul.f32 %v10361_v45, %v4609_v57  ;;  %v4621_v11 = vmul.f32 %v10706_v58, %v12441_v18  ;;  %v12448_v13 = vld [vmem:[#allocation120_spill] sm:$0xff]  ;;  %v12449_v57 = vld [vmem:[#allocation121_spill] sm:$0xff] }
 0x4bf   : > { %v4957_v60 = vmul.f32 %v10365_v10, %v4610_v4  ;;  %6265 = vst [vmem:[%s8021_s7 + $0x184] sm:$0xff] %v6871_v32  ;;  %6266 = vst [vmem:[%s8021_s7 + $0x18c] sm:$0xf] %v6872_v23  ;;  %v4622_v25 = vmul.f32 %v10706_v58, %v12442_v63  ;;  %v4623_v1 = vmul.f32 %v10706_v58, %v12443_v44  ;;  %v12450_v23 = vld [vmem:[#allocation122_spill] sm:$0xff]  ;;  %v12452_v44 = vld [vmem:[#allocation124_spill] sm:$0xff]  ;;  %7418 = vrsqrt.f32 %v10674_v7 }
 0x4c0   : > { %v6867_v15 = vpack.c.bf16 %v4954_v8, %v4953_v54  ;;  %v4624_v40 = vmul.f32 %v10706_v58, %v12444_v5  ;;  %v6868_v52 = vpack.c.bf16 %v4956_v16, %v4955_v55  ;;  %v4625_v24 = vmul.f32 %v10706_v58, %v12445_v29  ;;  %v12453_v5 = vld [vmem:[#allocation125_spill] sm:$0xff]  ;;  %v12454_v29 = vld [vmem:[#allocation126_spill] sm:$0xff] }
 0x4c1   : > { %v6869_v2 = vpack.c.bf16 %v4957_v60, %v4957_v60  ;;  %v4968_v62 = vmul.f32 %v8713_v42, %v4621_v11  ;;  %v4969_v51 = vmul.f32 %v10347_v38, %v4622_v25  ;;  %v4970_v21 = vmul.f32 %v10357_v61, %v4623_v1  ;;  %v10818_v11 = vpop.xlane.xlu0 %4171 }
 0x4c2   : > { %6261 = vst [vmem:[%s8021_s7 + $0x168] sm:$0xff] %v6867_v15  ;;  %v4971_v14 = vmul.f32 %v10361_v45, %v4624_v40  ;;  %v4616_v30 = vmul.f32 %v10711_v59, %v12446_v3  ;;  %6262 = vst [vmem:[%s8021_s7 + $0x170] sm:$0xff] %v6868_v52  ;;  %v4972_v41 = vmul.f32 %v10365_v10, %v4625_v24  ;;  %v10820_v15 = vpop.xlane.xlu1 %4189  ;;  %v4422_v31 = vadd.f32 1e-06, %v10678_v39 }
 0x4c3   : > { %6263 = vst [vmem:[%s8021_s7 + $0x178] sm:$0xf] %v6869_v2  ;;  %v4617_v58 = vmul.f32 %v10711_v59, %v12447_v33  ;;  %v4618_v34 = vmul.f32 %v10711_v59, %v12448_v13  ;;  %v4619_v22 = vmul.f32 %v10711_v59, %v12449_v57  ;;  %v6876_v4 = vpack.c.bf16 %v4969_v51, %v4968_v62  ;;  %v12455_v62 = vld [vmem:[#allocation127_spill] sm:$0xff] }
 0x4c4   : > { %v6877_v32 = vpack.c.bf16 %v4971_v14, %v4970_v21  ;;  %v4620_v54 = vmul.f32 %v10711_v59, %v12450_v23  ;;  %v4963_v8 = vmul.f32 %v8713_v42, %v4616_v30  ;;  %v6878_v55 = vpack.c.bf16 %v4972_v41, %v4972_v41  ;;  %v12451_v59 = vld [vmem:[#allocation123_spill] sm:$0xff] }
 0x4c5   : > { %v4964_v16 = vmul.f32 %v10347_v38, %v4617_v58  ;;  %v4965_v60 = vmul.f32 %v10357_v61, %v4618_v34  ;;  %v4966_v18 = vmul.f32 %v10361_v45, %v4619_v22  ;;  %6270 = vst [vmem:[%s8021_s7 + $0x1a4] sm:$0xff] %v6876_v4  ;;  %v4631_v25 = vmul.f32 %v10718_v17, %v12451_v59  ;;  %v12456_v58 = vld [vmem:[#allocation128_spill] sm:$0xff]  ;;  %v12457_v34 = vld [vmem:[#allocation129_spill] sm:$0xff]  ;;  %v12458_v22 = vld [vmem:[#allocation130_spill] sm:$0xff] }
 0x4c6   : > { %6271 = vst [vmem:[%s8021_s7 + $0x1ac] sm:$0xff] %v6877_v32  ;;  %v4967_v63 = vmul.f32 %v10365_v10, %v4620_v54  ;;  %v4632_v1 = vmul.f32 %v10718_v17, %v12452_v44  ;;  %v4633_v40 = vmul.f32 %v10718_v17, %v12453_v5  ;;  %6272 = vst [vmem:[%s8021_s7 + $0x1b4] sm:$0xf] %v6878_v55  ;;  %v12459_v32 = vld [vmem:[#allocation131_spill] sm:$0xff]  ;;  %v12460_v54 = vld [vmem:[#allocation132_spill] sm:$0xff]  ;;  %v10858_v59 = vpop.xlane.xlu1 %4201  ;;  %7420 = vrsqrt.f32 %v10680_v56 }
 0x4c7   : > { %v6873_v52 = vpack.c.bf16 %v4964_v16, %v4963_v8  ;;  %v6874_v2 = vpack.c.bf16 %v4966_v18, %v4965_v60  ;;  %v4634_v24 = vmul.f32 %v10718_v17, %v12454_v29  ;;  %v4635_v51 = vmul.f32 %v10718_v17, %v12455_v62  ;;  %v12461_v5 = vld [vmem:[#allocation133_spill] sm:$0xff]  ;;  %v12463_v29 = vld [vmem:[#allocation135_spill] sm:$0xff]  ;;  %v12464_v62 = vld [vmem:[#allocation136_spill] sm:$0xff] }
 0x4c8   : > { %v6875_v21 = vpack.c.bf16 %v4967_v63, %v4967_v63  ;;  %v4978_v14 = vmul.f32 %v8713_v42, %v4631_v25  ;;  %v4979_v3 = vmul.f32 %v10347_v38, %v4632_v1  ;;  %v4980_v30 = vmul.f32 %v10357_v61, %v4633_v40  ;;  %v10856_v63 = vpop.xlane.xlu0 %4183 }
 0x4c9   : > { %6267 = vst [vmem:[%s8021_s7 + $0x190] sm:$0xff] %v6873_v52  ;;  %6268 = vst [vmem:[%s8021_s7 + $0x198] sm:$0xff] %v6874_v2  ;;  %v4981_v41 = vmul.f32 %v10361_v45, %v4634_v24  ;;  %v4982_v33 = vmul.f32 %v10365_v10, %v4635_v51  ;;  %v4626_v13 = vmul.f32 %v10723_v27, %v12456_v58  ;;  %v12462_v52 = vld [vmem:[#allocation134_spill] sm:$0xff]  ;;  %v4425_v47 = vadd.f32 1e-06, %v10682_v35 }
 0x4ca   : > { %v4627_v17 = vmul.f32 %v10723_v27, %v12457_v34  ;;  %6269 = vst [vmem:[%s8021_s7 + $0x1a0] sm:$0xf] %v6875_v21  ;;  %v6882_v57 = vpack.c.bf16 %v4979_v3, %v4978_v14  ;;  %v4628_v4 = vmul.f32 %v10723_v27, %v12458_v22  ;;  %v4629_v23 = vmul.f32 %v10723_v27, %v12459_v32  ;;  %v12465_v3 = vld [vmem:[#allocation137_spill] sm:$0xff]  ;;  %v12466_v34 = vld [vmem:[#allocation138_spill] sm:$0xff]  ;;  %v12467_v22 = vld [vmem:[#allocation139_spill] sm:$0xff] }
 0x4cb   : > { %v4630_v8 = vmul.f32 %v10723_v27, %v12460_v54  ;;  %v6883_v55 = vpack.c.bf16 %v4981_v41, %v4980_v30  ;;  %v6884_v16 = vpack.c.bf16 %v4982_v33, %v4982_v33  ;;  %v4973_v60 = vmul.f32 %v8713_v42, %v4626_v13 }
 0x4cc   : > { %v4974_v18 = vmul.f32 %v10347_v38, %v4627_v17  ;;  %6276 = vst [vmem:[%s8021_s7 + $0x1cc] sm:$0xff] %v6882_v57  ;;  %v4975_v25 = vmul.f32 %v10357_v61, %v4628_v4  ;;  %v4976_v44 = vmul.f32 %v10361_v45, %v4629_v23  ;;  %v4641_v27 = vmul.f32 %v10730_v9, %v12461_v5  ;;  %v12468_v4 = vld [vmem:[#allocation140_spill] sm:$0xff]  ;;  %v12469_v23 = vld [vmem:[#allocation141_spill] sm:$0xff] }
 0x4cd   : > { %v4977_v1 = vmul.f32 %v10365_v10, %v4630_v8  ;;  %6277 = vst [vmem:[%s8021_s7 + $0x1d4] sm:$0xff] %v6883_v55  ;;  %6278 = vst [vmem:[%s8021_s7 + $0x1dc] sm:$0xf] %v6884_v16  ;;  %v4642_v2 = vmul.f32 %v10730_v9, %v12462_v52  ;;  %v4643_v24 = vmul.f32 %v10730_v9, %v12463_v29  ;;  %v12470_v16 = vld [vmem:[#allocation142_spill] sm:$0xff]  ;;  %v12472_v29 = vld [vmem:[#allocation144_spill] sm:$0xff] }
 0x4ce   : > { %v6879_v40 = vpack.c.bf16 %v4974_v18, %v4973_v60  ;;  %v4644_v51 = vmul.f32 %v10730_v9, %v12464_v62  ;;  %v6880_v21 = vpack.c.bf16 %v4976_v44, %v4975_v25  ;;  %v4645_v30 = vmul.f32 %v10730_v9, %v12465_v3  ;;  %v10895_v25 = vpop.xlane.xlu0 %4195  ;;  %v10897_v44 = vpop.xlane.xlu1 %4213  ;;  %v12473_v62 = vld [vmem:[#allocation145_spill] sm:$0xff]  ;;  %v12474_v3 = vld [vmem:[#allocation146_spill] sm:$0xff] }
 0x4cf   : > { %v6881_v14 = vpack.c.bf16 %v4977_v1, %v4977_v1  ;;  %v4988_v41 = vmul.f32 %v8713_v42, %v4641_v27  ;;  %v4989_v33 = vmul.f32 %v10347_v38, %v4642_v2  ;;  %v4990_v58 = vmul.f32 %v10357_v61, %v4643_v24 }
 0x4d0   : > { %6273 = vst [vmem:[%s8021_s7 + $0x1b8] sm:$0xff] %v6879_v40  ;;  %v4991_v13 = vmul.f32 %v10361_v45, %v4644_v51  ;;  %v4636_v17 = vmul.f32 %v10738_v36, %v12466_v34  ;;  %6274 = vst [vmem:[%s8021_s7 + $0x1c0] sm:$0xff] %v6880_v21  ;;  %v4992_v57 = vmul.f32 %v10365_v10, %v4645_v30  ;;  %v4424_v0 = vadd.f32 1e-06, %v10684_v20 }
 0x4d1   : > { %6275 = vst [vmem:[%s8021_s7 + $0x1c8] sm:$0xf] %v6881_v14  ;;  %v4637_v9 = vmul.f32 %v10738_v36, %v12467_v22  ;;  %v4638_v32 = vmul.f32 %v10738_v36, %v12468_v4  ;;  %v4639_v54 = vmul.f32 %v10738_v36, %v12469_v23  ;;  %v6888_v8 = vpack.c.bf16 %v4989_v33, %v4988_v41  ;;  %v12475_v41 = vld [vmem:[#allocation147_spill] sm:$0xff] }
 0x4d2   : > { %v6889_v55 = vpack.c.bf16 %v4991_v13, %v4990_v58  ;;  %v4640_v60 = vmul.f32 %v10738_v36, %v12470_v16  ;;  %v4983_v18 = vmul.f32 %v8713_v42, %v4636_v17  ;;  %v6890_v1 = vpack.c.bf16 %v4992_v57, %v4992_v57  ;;  %v12471_v36 = vld [vmem:[#allocation143_spill] sm:$0xff] }
 0x4d3   : > { %v4984_v5 = vmul.f32 %v10347_v38, %v4637_v9  ;;  %v4985_v27 = vmul.f32 %v10357_v61, %v4638_v32  ;;  %v4986_v40 = vmul.f32 %v10361_v45, %v4639_v54  ;;  %6282 = vst [vmem:[%s8021_s7 + $0x1f4] sm:$0xff] %v6888_v8  ;;  %v4651_v2 = vmul.f32 %v10742_v43, %v12471_v36  ;;  %v12476_v9 = vld [vmem:[#allocation148_spill] sm:$0xff]  ;;  %v12477_v32 = vld [vmem:[#allocation149_spill] sm:$0xff]  ;;  %v12478_v54 = vld [vmem:[#allocation150_spill] sm:$0xff] }
 0x4d4   : > { %6283 = vst [vmem:[%s8021_s7 + $0x1fc] sm:$0xff] %v6889_v55  ;;  %v4987_v52 = vmul.f32 %v10365_v10, %v4640_v60  ;;  %v4652_v24 = vmul.f32 %v10742_v43, %v12472_v29  ;;  %v4653_v51 = vmul.f32 %v10742_v43, %v12473_v62  ;;  %6284 = vst [vmem:[%s8021_s7 + $0x204] sm:$0xf] %v6890_v1  ;;  %v12479_v55 = vld [vmem:[#allocation151_spill] sm:$0xff]  ;;  %v12480_v60 = vld [vmem:[#allocation152_spill] sm:$0xff]  ;;  %v4208_v1 = vpop.xlane.xlu0 %4207 }
 0x4d5   : > { %v6885_v21 = vpack.c.bf16 %v4984_v5, %v4983_v18  ;;  %v6886_v14 = vpack.c.bf16 %v4986_v40, %v4985_v27  ;;  %v4654_v30 = vmul.f32 %v10742_v43, %v12474_v3  ;;  %v4655_v33 = vmul.f32 %v10742_v43, %v12475_v41  ;;  %v4226_v5 = vpop.xlane.xlu1 %4225 }
 0x4d6   : > { %v6887_v58 = vpack.c.bf16 %v4987_v52, %v4987_v52  ;;  %v4998_v13 = vmul.f32 %v8713_v42, %v4651_v2  ;;  %v4999_v34 = vmul.f32 %v10347_v38, %v4652_v24  ;;  %v5000_v17 = vmul.f32 %v10357_v61, %v4653_v51 }
 0x4d7   : > { %6279 = vst [vmem:[%s8021_s7 + $0x1e0] sm:$0xff] %v6885_v21  ;;  %6280 = vst [vmem:[%s8021_s7 + $0x1e8] sm:$0xff] %v6886_v14  ;;  %v5001_v57 = vmul.f32 %v10361_v45, %v4654_v30  ;;  %v5002_v22 = vmul.f32 %v10365_v10, %v4655_v33  ;;  %v4646_v4 = vmul.f32 %v10747_v48, %v12476_v9  ;;  %v4423_v62 = vadd.f32 1e-06, %v10676_v26 }
 0x4d8   : > { %v4647_v43 = vmul.f32 %v10747_v48, %v12477_v32  ;;  %6281 = vst [vmem:[%s8021_s7 + $0x1f0] sm:$0xf] %v6887_v58  ;;  %v6894_v23 = vpack.c.bf16 %v4999_v34, %v4998_v13  ;;  %v4648_v8 = vmul.f32 %v10747_v48, %v12478_v54  ;;  %v4649_v16 = vmul.f32 %v10747_v48, %v12479_v55  ;;  %v4220_v26 = vpop.xlane.xlu0 %4219 }
 0x4d9   : > { %v4650_v18 = vmul.f32 %v10747_v48, %v12480_v60  ;;  %v6895_v27 = vpack.c.bf16 %v5001_v57, %v5000_v17  ;;  %v6896_v40 = vpack.c.bf16 %v5002_v22, %v5002_v22  ;;  %v4993_v52 = vmul.f32 %v8713_v42, %v4646_v4  ;;  %v7411_v22 = vpop.eup %7410 }
 0x4da   : > { %v4994_v36 = vmul.f32 %v10347_v38, %v4647_v43  ;;  %6288 = vst [vmem:[%s8021_s7 + $0x21c] sm:$0xff] %v6894_v23  ;;  %v4995_v2 = vmul.f32 %v10357_v61, %v4648_v8  ;;  %v4996_v29 = vmul.f32 %v10361_v45, %v4649_v16  ;;  %v4363_v51 = vmul.f32 0.0015625, %v10784_v19  ;;  %v4238_v19 = vpop.xlane.xlu1 %4237  ;;  %v7413_v43 = vpop.eup %7412  ;;  %v12481_v23 = vld [vmem:[#allocation153_spill] sm:$0xff]  ;;  %v12482_v8 = vld [vmem:[#allocation154_spill] sm:$0xff]  ;;  %v12483_v16 = vld [vmem:[#allocation155_spill] sm:$0xff] }
 0x4db   : > { %v4997_v24 = vmul.f32 %v10365_v10, %v4650_v18  ;;  %6289 = vst [vmem:[%s8021_s7 + $0x224] sm:$0xff] %v6895_v27  ;;  %6290 = vst [vmem:[%s8021_s7 + $0x22c] sm:$0xf] %v6896_v40  ;;  %v4362_v3 = vmul.f32 0.0015625, %v10818_v11  ;;  %7422 = vrsqrt.f32 %v4423_v62  ;;  %v4661_v54 = vmul.f32 %v7411_v22, %v12481_v23  ;;  %v12484_v18 = vld [vmem:[#allocation156_spill] sm:$0xff] }
 0x4dc   : > { %v6891_v48 = vpack.c.bf16 %v4994_v36, %v4993_v52  ;;  %v6892_v21 = vpack.c.bf16 %v4996_v29, %v4995_v2  ;;  %v4365_v30 = vmul.f32 0.0015625, %v10820_v15  ;;  %v4364_v11 = vmul.f32 0.0015625, %v10856_v63  ;;  %v4232_v20 = vpop.xlane.xlu0 %4231  ;;  %v12485_v27 = vld [vmem:[#allocation157_spill] sm:$0xff]  ;;  %v12486_v52 = vld [vmem:[#allocation158_spill] sm:$0xff] }
 0x4dd   : > { %v6893_v14 = vpack.c.bf16 %v4997_v24, %v4997_v24  ;;  %v4427_v12 = vadd.f32 1e-06, %v4363_v51  ;;  %v4426_v41 = vadd.f32 1e-06, %v4362_v3  ;;  %7424 = vrsqrt.f32 %v4422_v31  ;;  %v12487_v2 = vld [vmem:[#allocation159_spill] sm:$0xff]  ;;  %v12488_v24 = vld [vmem:[#allocation160_spill] sm:$0xff] }
 0x4de   : > { %6285 = vst [vmem:[%s8021_s7 + $0x208] sm:$0xff] %v6891_v48  ;;  %6286 = vst [vmem:[%s8021_s7 + $0x210] sm:$0xff] %v6892_v21  ;;  %v4429_v39 = vadd.f32 1e-06, %v4365_v30  ;;  %v4367_v15 = vmul.f32 0.0015625, %v10858_v59  ;;  %7426 = vrsqrt.f32 %v4425_v47  ;;  %v4250_v63 = vpop.xlane.xlu1 %4249  ;;  %v4662_v55 = vmul.f32 %v7411_v22, %v12482_v8 }
 0x4df   : > { %6287 = vst [vmem:[%s8021_s7 + $0x218] sm:$0xf] %v6893_v14  ;;  %v4366_v33 = vmul.f32 0.0015625, %v10895_v25  ;;  %v4369_v7 = vmul.f32 0.0015625, %v10897_v44  ;;  %7428 = vrsqrt.f32 %v4424_v0  ;;  %v4663_v60 = vmul.f32 %v7411_v22, %v12483_v16 }
 0x4e0   : > { %v4368_v35 = vmul.f32 0.0015625, %v4208_v1  ;;  %v4371_v58 = vmul.f32 0.0015625, %v4226_v5  ;;  %v4428_v56 = vadd.f32 1e-06, %v4364_v11  ;;  %7430 = vrsqrt.f32 %v4427_v12  ;;  %v7415_v5 = vpop.eup %7414 }
 0x4e1   : > { %v4370_v13 = vmul.f32 0.0015625, %v4220_v26  ;;  %7432 = vrsqrt.f32 %v4426_v41  ;;  %v10962_v34 = vadd.f32 1e-06, %v4367_v15  ;;  %v10964_v17 = vadd.f32 1e-06, %v4366_v33  ;;  %v7417_v62 = vpop.eup %7416 }
 0x4e2   : > { %v10966_v57 = vmul.f32 0.0015625, %v4238_v19  ;;  %7434 = vrsqrt.f32 %v4429_v39  ;;  %v10968_v59 = vadd.f32 1e-06, %v4369_v7  ;;  %v10970_v25 = vadd.f32 1e-06, %v4368_v35  ;;  %v7419_v31 = vpop.eup %7418 }
 0x4e3   : > { %v10972_v44 = vadd.f32 1e-06, %v4371_v58  ;;  %7436 = vrsqrt.f32 %v4428_v56  ;;  %v10974_v9 = vadd.f32 1e-06, %v4370_v13  ;;  %v10976_v4 = vmul.f32 0.0015625, %v4232_v20  ;;  %v10996_v12 = vpop.eup %7420 }
 0x4e4   : > { %v10978_v32 = vmul.f32 0.0015625, %v4250_v63  ;;  %v4664_v1 = vmul.f32 %v7411_v22, %v12484_v18  ;;  %v4665_v40 = vmul.f32 %v7411_v22, %v12485_v27  ;;  %v4656_v36 = vmul.f32 %v7413_v43, %v12486_v52  ;;  %v12489_v47 = vld [vmem:[#allocation161_spill] sm:$0xff]  ;;  %v12490_v19 = vld [vmem:[#allocation162_spill] sm:$0xff]  ;;  %v12491_v13 = vld [vmem:[#allocation163_spill] sm:$0xff] }
 0x4e5   : > { %v4657_v29 = vmul.f32 %v7413_v43, %v12487_v2  ;;  %v4658_v48 = vmul.f32 %v7413_v43, %v12488_v24  ;;  %v5008_v51 = vmul.f32 %v8713_v42, %v4661_v54  ;;  %v5009_v21 = vmul.f32 %v10347_v38, %v4662_v55  ;;  %v12493_v54 = vld [vmem:[#allocation165_spill] sm:$0xff]  ;;  %v12494_v55 = vld [vmem:[#allocation166_spill] sm:$0xff]  ;;  %v12495_v27 = vld [vmem:[#allocation167_spill] sm:$0xff] }
 0x4e6   : > { %v5010_v14 = vmul.f32 %v10357_v61, %v4663_v60  ;;  %v5011_v3 = vmul.f32 %v10361_v45, %v4664_v1  ;;  %v5012_v30 = vmul.f32 %v10365_v10, %v4665_v40  ;;  %v4659_v26 = vmul.f32 %v7413_v43, %v12489_v47 }
 0x4e7   : > { %v4660_v0 = vmul.f32 %v7413_v43, %v12490_v19  ;;  %v5003_v11 = vmul.f32 %v8713_v42, %v4656_v36  ;;  %v6900_v41 = vpack.c.bf16 %v5009_v21, %v5008_v51  ;;  %v5004_v15 = vmul.f32 %v10347_v38, %v4657_v29  ;;  %v12492_v43 = vld [vmem:[#allocation164_spill] sm:$0xff] }
 0x4e8   : > { %v6901_v39 = vpack.c.bf16 %v5011_v3, %v5010_v14  ;;  %v5005_v33 = vmul.f32 %v10357_v61, %v4658_v48  ;;  %v11000_v7 = vpop.eup %7422  ;;  %v6902_v35 = vpack.c.bf16 %v5012_v30, %v5012_v30  ;;  %v5006_v58 = vmul.f32 %v10361_v45, %v4659_v26  ;;  %v12496_v48 = vld [vmem:[#allocation168_spill] sm:$0xff]  ;;  %v12497_v14 = vld [vmem:[#allocation169_spill] sm:$0xff]  ;;  %v12498_v30 = vld [vmem:[#allocation170_spill] sm:$0xff] }
 0x4e9   : > { %v5007_v56 = vmul.f32 %v10365_v10, %v4660_v0  ;;  %v4671_v20 = vmul.f32 %v7415_v5, %v12491_v13  ;;  %6294 = vst [vmem:[%s8021_s7 + $0x244] sm:$0xff] %v6900_v41  ;;  %v6897_v22 = vpack.c.bf16 %v5004_v15, %v5003_v11  ;;  %v4672_v23 = vmul.f32 %v7415_v5, %v12492_v43  ;;  %v12499_v26 = vld [vmem:[#allocation171_spill] sm:$0xff] }
 0x4ea   : > { %v11005_v63 = vpop.eup %7424  ;;  %6295 = vst [vmem:[%s8021_s7 + $0x24c] sm:$0xff] %v6901_v39  ;;  %v4673_v8 = vmul.f32 %v7415_v5, %v12493_v54  ;;  %v4674_v16 = vmul.f32 %v7415_v5, %v12494_v55  ;;  %6296 = vst [vmem:[%s8021_s7 + $0x254] sm:$0xf] %v6902_v35  ;;  %v6898_v18 = vpack.c.bf16 %v5006_v58, %v5005_v33  ;;  %v12500_v39 = vld [vmem:[#allocation172_spill] sm:$0xff]  ;;  %v12502_v54 = vld [vmem:[#allocation174_spill] sm:$0xff]  ;;  %7438 = vrsqrt.f32 %v10962_v34 }
 0x4eb   : > { %v11012_v60 = vpop.eup %7426  ;;  %v6899_v1 = vpack.c.bf16 %v5007_v56, %v5007_v56  ;;  %v4675_v40 = vmul.f32 %v7415_v5, %v12495_v27  ;;  %v5018_v52 = vmul.f32 %v8713_v42, %v4671_v20  ;;  %6291 = vst [vmem:[%s8021_s7 + $0x230] sm:$0xff] %v6897_v22  ;;  %v5019_v2 = vmul.f32 %v10347_v38, %v4672_v23  ;;  %v12503_v55 = vld [vmem:[#allocation175_spill] sm:$0xff]  ;;  %v12504_v27 = vld [vmem:[#allocation176_spill] sm:$0xff] }
 0x4ec   : > { %v11017_v36 = vpop.eup %7428  ;;  %v5020_v29 = vmul.f32 %v10357_v61, %v4673_v8  ;;  %v5021_v24 = vmul.f32 %v10361_v45, %v4674_v16  ;;  %v4666_v51 = vmul.f32 %v7417_v62, %v12496_v48  ;;  %6292 = vst [vmem:[%s8021_s7 + $0x238] sm:$0xff] %v6898_v18  ;;  %v4667_v3 = vmul.f32 %v7417_v62, %v12497_v14 }
 0x4ed   : > { %v11024_v21 = vpop.eup %7430  ;;  %6293 = vst [vmem:[%s8021_s7 + $0x240] sm:$0xf] %v6899_v1  ;;  %v5022_v5 = vmul.f32 %v10365_v10, %v4675_v40  ;;  %v4668_v47 = vmul.f32 %v7417_v62, %v12498_v30  ;;  %v4669_v19 = vmul.f32 %v7417_v62, %v12499_v26  ;;  %v6906_v11 = vpack.c.bf16 %v5019_v2, %v5018_v52  ;;  %v12505_v52 = vld [vmem:[#allocation177_spill] sm:$0xff] }
 0x4ee   : > { %v11032_v0 = vpop.eup %7432  ;;  %v6907_v41 = vpack.c.bf16 %v5021_v24, %v5020_v29  ;;  %v4670_v15 = vmul.f32 %v7417_v62, %v12500_v39  ;;  %v5013_v33 = vmul.f32 %v8713_v42, %v4666_v51  ;;  %v5014_v56 = vmul.f32 %v10347_v38, %v4667_v3  ;;  %v12501_v62 = vld [vmem:[#allocation173_spill] sm:$0xff]  ;;  %v12506_v3 = vld [vmem:[#allocation178_spill] sm:$0xff] }
 0x4ef   : > { %v11036_v35 = vpop.eup %7434  ;;  %v6908_v58 = vpack.c.bf16 %v5022_v5, %v5022_v5  ;;  %v5015_v13 = vmul.f32 %v10357_v61, %v4668_v47  ;;  %v5016_v20 = vmul.f32 %v10361_v45, %v4669_v19  ;;  %6300 = vst [vmem:[%s8021_s7 + $0x26c] sm:$0xff] %v6906_v11  ;;  %v4681_v23 = vmul.f32 %v7419_v31, %v12501_v62  ;;  %v12507_v47 = vld [vmem:[#allocation179_spill] sm:$0xff]  ;;  %v12508_v19 = vld [vmem:[#allocation180_spill] sm:$0xff] }
 0x4f0   : > { %v11041_v22 = vpop.eup %7436  ;;  %6301 = vst [vmem:[%s8021_s7 + $0x274] sm:$0xff] %v6907_v41  ;;  %v5017_v43 = vmul.f32 %v10365_v10, %v4670_v15  ;;  %v4682_v8 = vmul.f32 %v7419_v31, %v12502_v54  ;;  %v4683_v16 = vmul.f32 %v7419_v31, %v12503_v55  ;;  %v6903_v18 = vpack.c.bf16 %v5014_v56, %v5013_v33  ;;  %v12509_v41 = vld [vmem:[#allocation181_spill] sm:$0xff]  ;;  %v12510_v15 = vld [vmem:[#allocation182_spill] sm:$0xff]  ;;  %v12511_v54 = vld [vmem:[#allocation183_spill] sm:$0xff] }
 0x4f1   : > { %6302 = vst [vmem:[%s8021_s7 + $0x27c] sm:$0xf] %v6908_v58  ;;  %v6904_v1 = vpack.c.bf16 %v5016_v20, %v5015_v13  ;;  %v4684_v40 = vmul.f32 %v7419_v31, %v12504_v27  ;;  %v4685_v2 = vmul.f32 %v7419_v31, %v12505_v52  ;;  %v5028_v24 = vmul.f32 %v8713_v42, %v4681_v23  ;;  %v12512_v55 = vld [vmem:[#allocation184_spill] sm:$0xff]  ;;  %v12514_v27 = vld [vmem:[#allocation186_spill] sm:$0xff] }
 0x4f2   : > { %v6905_v29 = vpack.c.bf16 %v5017_v43, %v5017_v43  ;;  %v5029_v48 = vmul.f32 %v10347_v38, %v4682_v8  ;;  %v5030_v51 = vmul.f32 %v10357_v61, %v4683_v16  ;;  %6297 = vst [vmem:[%s8021_s7 + $0x258] sm:$0xff] %v6903_v18  ;;  %v4676_v30 = vmul.f32 %v10996_v12, %v12506_v3  ;;  %v12513_v18 = vld [vmem:[#allocation185_spill] sm:$0xff]  ;;  %v12516_v3 = vld [vmem:[#allocation188_spill] sm:$0xff] }
 0x4f3   : > { %6298 = vst [vmem:[%s8021_s7 + $0x260] sm:$0xff] %v6904_v1  ;;  %v5031_v5 = vmul.f32 %v10361_v45, %v4684_v40  ;;  %v5032_v14 = vmul.f32 %v10365_v10, %v4685_v2  ;;  %v4677_v31 = vmul.f32 %v10996_v12, %v12507_v47  ;;  %v4678_v11 = vmul.f32 %v10996_v12, %v12508_v19 }
 0x4f4   : > { %6299 = vst [vmem:[%s8021_s7 + $0x268] sm:$0xf] %v6905_v29  ;;  %v6912_v26 = vpack.c.bf16 %v5029_v48, %v5028_v24  ;;  %v4679_v39 = vmul.f32 %v10996_v12, %v12509_v41  ;;  %v4680_v33 = vmul.f32 %v10996_v12, %v12510_v15  ;;  %v5023_v13 = vmul.f32 %v8713_v42, %v4676_v30  ;;  %v12515_v29 = vld [vmem:[#allocation187_spill] sm:$0xff] }
 0x4f5   : > { %v6913_v58 = vpack.c.bf16 %v5031_v5, %v5030_v51  ;;  %v6914_v56 = vpack.c.bf16 %v5032_v14, %v5032_v14  ;;  %v5024_v20 = vmul.f32 %v10347_v38, %v4677_v31  ;;  %v5025_v43 = vmul.f32 %v10357_v61, %v4678_v11  ;;  %v12517_v31 = vld [vmem:[#allocation189_spill] sm:$0xff]  ;;  %v12519_v11 = vld [vmem:[#allocation191_spill] sm:$0xff] }
 0x4f6   : > { %6306 = vst [vmem:[%s8021_s7 + $0x294] sm:$0xff] %v6912_v26  ;;  %v5026_v62 = vmul.f32 %v10361_v45, %v4679_v39  ;;  %v5027_v23 = vmul.f32 %v10365_v10, %v4680_v33  ;;  %v4691_v8 = vmul.f32 %v11000_v7, %v12511_v54  ;;  %v4692_v16 = vmul.f32 %v11000_v7, %v12512_v55  ;;  %v12518_v26 = vld [vmem:[#allocation190_spill] sm:$0xff]  ;;  %v12520_v33 = vld [vmem:[#allocation192_spill] sm:$0xff]  ;;  %v12521_v54 = vld [vmem:[#allocation193_spill] sm:$0xff] }
 0x4f7   : > { %6307 = vst [vmem:[%s8021_s7 + $0x29c] sm:$0xff] %v6913_v58  ;;  %6308 = vst [vmem:[%s8021_s7 + $0x2a4] sm:$0xf] %v6914_v56  ;;  %v6909_v12 = vpack.c.bf16 %v5024_v20, %v5023_v13  ;;  %v4693_v1 = vmul.f32 %v11000_v7, %v12513_v18  ;;  %v4694_v40 = vmul.f32 %v11000_v7, %v12514_v27  ;;  %v12523_v55 = vld [vmem:[#allocation195_spill] sm:$0xff]  ;;  %v12524_v27 = vld [vmem:[#allocation196_spill] sm:$0xff]  ;;  %7440 = vrsqrt.f32 %v10964_v17 }
 0x4f8   : > { %v6910_v52 = vpack.c.bf16 %v5026_v62, %v5025_v43  ;;  %v6911_v2 = vpack.c.bf16 %v5027_v23, %v5027_v23  ;;  %v4695_v24 = vmul.f32 %v11000_v7, %v12515_v29  ;;  %v5038_v48 = vmul.f32 %v8713_v42, %v4691_v8 }
 0x4f9   : > { %6303 = vst [vmem:[%s8021_s7 + $0x280] sm:$0xff] %v6909_v12  ;;  %v5039_v51 = vmul.f32 %v10347_v38, %v4692_v16  ;;  %v5040_v5 = vmul.f32 %v10357_v61, %v4693_v1  ;;  %v5041_v14 = vmul.f32 %v10361_v45, %v4694_v40  ;;  %v4686_v30 = vmul.f32 %v11005_v63, %v12516_v3  ;;  %v12522_v12 = vld [vmem:[#allocation194_spill] sm:$0xff] }
 0x4fa   : > { %6304 = vst [vmem:[%s8021_s7 + $0x288] sm:$0xff] %v6910_v52  ;;  %6305 = vst [vmem:[%s8021_s7 + $0x290] sm:$0xf] %v6911_v2  ;;  %v5042_v47 = vmul.f32 %v10365_v10, %v4695_v24  ;;  %v4687_v7 = vmul.f32 %v11005_v63, %v12517_v31  ;;  %v4688_v19 = vmul.f32 %v11005_v63, %v12518_v26  ;;  %v12525_v52 = vld [vmem:[#allocation197_spill] sm:$0xff]  ;;  %v12526_v3 = vld [vmem:[#allocation198_spill] sm:$0xff]  ;;  %7442 = vrsqrt.f32 %v10968_v59 }
 0x4fb   : > { %v4689_v41 = vmul.f32 %v11005_v63, %v12519_v11  ;;  %v6918_v39 = vpack.c.bf16 %v5039_v51, %v5038_v48  ;;  %v6919_v15 = vpack.c.bf16 %v5041_v14, %v5040_v5  ;;  %v4690_v58 = vmul.f32 %v11005_v63, %v12520_v33 }
 0x4fc   : > { %v5033_v56 = vmul.f32 %v8713_v42, %v4686_v30  ;;  %v6920_v13 = vpack.c.bf16 %v5042_v47, %v5042_v47  ;;  %v5034_v20 = vmul.f32 %v10347_v38, %v4687_v7  ;;  %v5035_v43 = vmul.f32 %v10357_v61, %v4688_v19  ;;  %v12527_v47 = vld [vmem:[#allocation199_spill] sm:$0xff]  ;;  %v12528_v7 = vld [vmem:[#allocation200_spill] sm:$0xff]  ;;  %v12529_v19 = vld [vmem:[#allocation201_spill] sm:$0xff] }
 0x4fd   : > { %v5036_v62 = vmul.f32 %v10361_v45, %v4689_v41  ;;  %6312 = vst [vmem:[%s8021_s7 + $0x2bc] sm:$0xff] %v6918_v39  ;;  %6313 = vst [vmem:[%s8021_s7 + $0x2c4] sm:$0xff] %v6919_v15  ;;  %v5037_v23 = vmul.f32 %v10365_v10, %v4690_v58  ;;  %v4701_v8 = vmul.f32 %v11012_v60, %v12521_v54  ;;  %v12530_v41 = vld [vmem:[#allocation202_spill] sm:$0xff]  ;;  %7444 = vrsqrt.f32 %v10970_v25 }
 0x4fe   : > { %v4702_v63 = vmul.f32 %v11012_v60, %v12522_v12  ;;  %v4703_v16 = vmul.f32 %v11012_v60, %v12523_v55  ;;  %6314 = vst [vmem:[%s8021_s7 + $0x2cc] sm:$0xf] %v6920_v13  ;;  %v6915_v18 = vpack.c.bf16 %v5034_v20, %v5033_v56  ;;  %v4704_v40 = vmul.f32 %v11012_v60, %v12524_v27  ;;  %v11144_v13 = vpop.xlane.xlu0 %4243 }
 0x4ff   : > { %v6916_v1 = vpack.c.bf16 %v5036_v62, %v5035_v43  ;;  %v4705_v2 = vmul.f32 %v11012_v60, %v12525_v52  ;;  %v6917_v29 = vpack.c.bf16 %v5037_v23, %v5037_v23  ;;  %v5048_v24 = vmul.f32 %v8713_v42, %v4701_v8  ;;  %v12531_v23 = vld [vmem:[#allocation203_spill] sm:$0xff]  ;;  %v12532_v8 = vld [vmem:[#allocation204_spill] sm:$0xff] }
 0x500   : > { %v5049_v48 = vmul.f32 %v10347_v38, %v4702_v63  ;;  %v5050_v51 = vmul.f32 %v10357_v61, %v4703_v16  ;;  %6309 = vst [vmem:[%s8021_s7 + $0x2a8] sm:$0xff] %v6915_v18  ;;  %v5051_v5 = vmul.f32 %v10361_v45, %v4704_v40  ;;  %v4696_v30 = vmul.f32 %v11017_v36, %v12526_v3  ;;  %v12533_v63 = vld [vmem:[#allocation205_spill] sm:$0xff]  ;;  %v12534_v16 = vld [vmem:[#allocation206_spill] sm:$0xff]  ;;  %v12535_v52 = vld [vmem:[#allocation207_spill] sm:$0xff] }
 0x501   : > { %6310 = vst [vmem:[%s8021_s7 + $0x2b0] sm:$0xff] %v6916_v1  ;;  %v5052_v14 = vmul.f32 %v10365_v10, %v4705_v2  ;;  %v4697_v60 = vmul.f32 %v11017_v36, %v12527_v47  ;;  %6311 = vst [vmem:[%s8021_s7 + $0x2b8] sm:$0xf] %v6917_v29  ;;  %v4698_v26 = vmul.f32 %v11017_v36, %v12528_v7  ;;  %v11160_v1 = vpop.xlane.xlu1 %4261  ;;  %v12538_v47 = vld [vmem:[#allocation210_spill] sm:$0xff]  ;;  %v4436_v34 = vadd.f32 1e-06, %v10976_v4 }
 0x502   : > { %v6924_v31 = vpack.c.bf16 %v5049_v48, %v5048_v24  ;;  %v4699_v11 = vmul.f32 %v11017_v36, %v12529_v19  ;;  %v4700_v39 = vmul.f32 %v11017_v36, %v12530_v41  ;;  %v6925_v15 = vpack.c.bf16 %v5051_v5, %v5050_v51  ;;  %v12536_v5 = vld [vmem:[#allocation208_spill] sm:$0xff] }
 0x503   : > { %v6926_v33 = vpack.c.bf16 %v5052_v14, %v5052_v14  ;;  %v5043_v58 = vmul.f32 %v8713_v42, %v4696_v30  ;;  %v5044_v56 = vmul.f32 %v10347_v38, %v4697_v60  ;;  %v5045_v20 = vmul.f32 %v10357_v61, %v4698_v26  ;;  %v12537_v30 = vld [vmem:[#allocation209_spill] sm:$0xff] }
 0x504   : > { %6318 = vst [vmem:[%s8021_s7 + $0x2e4] sm:$0xff] %v6924_v31  ;;  %v5046_v43 = vmul.f32 %v10361_v45, %v4699_v11  ;;  %v5047_v62 = vmul.f32 %v10365_v10, %v4700_v39  ;;  %v4711_v54 = vmul.f32 %v11024_v21, %v12531_v23  ;;  %6319 = vst [vmem:[%s8021_s7 + $0x2ec] sm:$0xff] %v6925_v15  ;;  %v12539_v31 = vld [vmem:[#allocation211_spill] sm:$0xff]  ;;  %v12540_v11 = vld [vmem:[#allocation212_spill] sm:$0xff]  ;;  %v4256_v15 = vpop.xlane.xlu0 %4255  ;;  %7446 = vrsqrt.f32 %v10972_v44 }
 0x505   : > { %6320 = vst [vmem:[%s8021_s7 + $0x2f4] sm:$0xf] %v6926_v33  ;;  %v6921_v36 = vpack.c.bf16 %v5044_v56, %v5043_v58  ;;  %v4712_v12 = vmul.f32 %v11024_v21, %v12532_v8  ;;  %v4713_v55 = vmul.f32 %v11024_v21, %v12533_v63  ;;  %v4714_v18 = vmul.f32 %v11024_v21, %v12534_v16  ;;  %v12544_v16 = vld [vmem:[#allocation216_spill] sm:$0xff] }
 0x506   : > { %v6922_v27 = vpack.c.bf16 %v5046_v43, %v5045_v20  ;;  %v6923_v40 = vpack.c.bf16 %v5047_v62, %v5047_v62  ;;  %v4715_v2 = vmul.f32 %v11024_v21, %v12535_v52  ;;  %v5058_v29 = vmul.f32 %v8713_v42, %v4711_v54  ;;  %v12541_v62 = vld [vmem:[#allocation213_spill] sm:$0xff] }
 0x507   : > { %6315 = vst [vmem:[%s8021_s7 + $0x2d0] sm:$0xff] %v6921_v36  ;;  %v5059_v24 = vmul.f32 %v10347_v38, %v4712_v12  ;;  %v5060_v48 = vmul.f32 %v10357_v61, %v4713_v55  ;;  %v5061_v51 = vmul.f32 %v10361_v45, %v4714_v18  ;;  %v4706_v14 = vmul.f32 %v11032_v0, %v12536_v5  ;;  %v12543_v36 = vld [vmem:[#allocation215_spill] sm:$0xff]  ;;  %v4274_v12 = vpop.xlane.xlu1 %4273  ;;  %v12546_v5 = vld [vmem:[#allocation218_spill] sm:$0xff] }
 0x508   : > { %6316 = vst [vmem:[%s8021_s7 + $0x2d8] sm:$0xff] %v6922_v27  ;;  %6317 = vst [vmem:[%s8021_s7 + $0x2e0] sm:$0xf] %v6923_v40  ;;  %v5062_v3 = vmul.f32 %v10365_v10, %v4715_v2  ;;  %v4707_v21 = vmul.f32 %v11032_v0, %v12537_v30  ;;  %v4708_v60 = vmul.f32 %v11032_v0, %v12538_v47  ;;  %v12545_v27 = vld [vmem:[#allocation217_spill] sm:$0xff]  ;;  %v4439_v17 = vadd.f32 1e-06, %v10978_v32 }
 0x509   : > { %v4709_v7 = vmul.f32 %v11032_v0, %v12539_v31  ;;  %v6930_v26 = vpack.c.bf16 %v5059_v24, %v5058_v29  ;;  %v6931_v19 = vpack.c.bf16 %v5061_v51, %v5060_v48  ;;  %v4710_v41 = vmul.f32 %v11032_v0, %v12540_v11  ;;  %v12542_v0 = vld [vmem:[#allocation214_spill] sm:$0xff] }
 0x50a   : > { %v5053_v39 = vmul.f32 %v8713_v42, %v4706_v14  ;;  %v6932_v33 = vpack.c.bf16 %v5062_v3, %v5062_v3  ;;  %v5054_v58 = vmul.f32 %v10347_v38, %v4707_v21  ;;  %v5055_v56 = vmul.f32 %v10357_v61, %v4708_v60  ;;  %v12547_v3 = vld [vmem:[#allocation219_spill] sm:$0xff]  ;;  %v12548_v21 = vld [vmem:[#allocation220_spill] sm:$0xff]  ;;  %v12549_v60 = vld [vmem:[#allocation221_spill] sm:$0xff] }
 0x50b   : > { %v5056_v20 = vmul.f32 %v10361_v45, %v4709_v7  ;;  %6324 = vst [vmem:[%s8021_s7 + $0x30c] sm:$0xff] %v6930_v26  ;;  %6325 = vst [vmem:[%s8021_s7 + $0x314] sm:$0xff] %v6931_v19  ;;  %v5057_v43 = vmul.f32 %v10365_v10, %v4710_v41  ;;  %v4721_v23 = vmul.f32 %v11036_v35, %v12541_v62  ;;  %v12550_v7 = vld [vmem:[#allocation222_spill] sm:$0xff]  ;;  %v4268_v19 = vpop.xlane.xlu0 %4267  ;;  %v4437_v62 = vadd.f32 1e-06, %v10966_v57 }
 0x50c   : > { %v4722_v54 = vmul.f32 %v11036_v35, %v12542_v0  ;;  %v4723_v8 = vmul.f32 %v11036_v35, %v12543_v36  ;;  %6326 = vst [vmem:[%s8021_s7 + $0x31c] sm:$0xf] %v6932_v33  ;;  %v6927_v63 = vpack.c.bf16 %v5054_v58, %v5053_v39  ;;  %v4724_v18 = vmul.f32 %v11036_v35, %v12544_v16 }
 0x50d   : > { %v6928_v55 = vpack.c.bf16 %v5056_v20, %v5055_v56  ;;  %v4725_v40 = vmul.f32 %v11036_v35, %v12545_v27  ;;  %v6929_v52 = vpack.c.bf16 %v5057_v43, %v5057_v43  ;;  %v5068_v2 = vmul.f32 %v8713_v42, %v4721_v23  ;;  %v4286_v43 = vpop.xlane.xlu1 %4285 }
 0x50e   : > { %v5069_v29 = vmul.f32 %v10347_v38, %v4722_v54  ;;  %v5070_v24 = vmul.f32 %v10357_v61, %v4723_v8  ;;  %6321 = vst [vmem:[%s8021_s7 + $0x2f8] sm:$0xff] %v6927_v63  ;;  %v5071_v48 = vmul.f32 %v10361_v45, %v4724_v18  ;;  %v4716_v14 = vmul.f32 %v11041_v22, %v12546_v5  ;;  %v12553_v5 = vld [vmem:[#allocation225_spill] sm:$0xff] }
 0x50f   : > { %6322 = vst [vmem:[%s8021_s7 + $0x300] sm:$0xff] %v6928_v55  ;;  %v5072_v51 = vmul.f32 %v10365_v10, %v4725_v40  ;;  %v4717_v35 = vmul.f32 %v11041_v22, %v12547_v3  ;;  %6323 = vst [vmem:[%s8021_s7 + $0x308] sm:$0xf] %v6929_v52  ;;  %v4718_v47 = vmul.f32 %v11041_v22, %v12548_v21  ;;  %v4374_v23 = vmul.f32 0.0015625, %v11144_v13  ;;  %v4280_v13 = vpop.xlane.xlu0 %4279  ;;  %v12554_v3 = vld [vmem:[#allocation226_spill] sm:$0xff] }
 0x510   : > { %v6936_v30 = vpack.c.bf16 %v5069_v29, %v5068_v2  ;;  %v4719_v31 = vmul.f32 %v11041_v22, %v12549_v60  ;;  %v4720_v26 = vmul.f32 %v11041_v22, %v12550_v7  ;;  %v6937_v11 = vpack.c.bf16 %v5071_v48, %v5070_v24  ;;  %v12551_v29 = vld [vmem:[#allocation223_spill] sm:$0xff]  ;;  %v12552_v48 = vld [vmem:[#allocation224_spill] sm:$0xff]  ;;  %v12557_v7 = vld [vmem:[#allocation229_spill] sm:$0xff] }
 0x511   : > { %v6938_v41 = vpack.c.bf16 %v5072_v51, %v5072_v51  ;;  %v5063_v39 = vmul.f32 %v8713_v42, %v4716_v14  ;;  %v5064_v33 = vmul.f32 %v10347_v38, %v4717_v35  ;;  %v5065_v58 = vmul.f32 %v10357_v61, %v4718_v47  ;;  %v4298_v55 = vpop.xlane.xlu1 %4297  ;;  %v12555_v21 = vld [vmem:[#allocation227_spill] sm:$0xff]  ;;  %v12556_v60 = vld [vmem:[#allocation228_spill] sm:$0xff] }
 0x512   : > { %6330 = vst [vmem:[%s8021_s7 + $0x334] sm:$0xff] %v6936_v30  ;;  %v5066_v56 = vmul.f32 %v10361_v45, %v4719_v31  ;;  %v5067_v20 = vmul.f32 %v10365_v10, %v4720_v26  ;;  %6331 = vst [vmem:[%s8021_s7 + $0x33c] sm:$0xff] %v6937_v11  ;;  %v4377_v36 = vmul.f32 0.0015625, %v11160_v1  ;;  %v4376_v8 = vmul.f32 0.0015625, %v4256_v15 }
 0x513   : > { %6332 = vst [vmem:[%s8021_s7 + $0x344] sm:$0xf] %v6938_v41  ;;  %v6933_v22 = vpack.c.bf16 %v5064_v33, %v5063_v39  ;;  %v4379_v57 = vmul.f32 0.0015625, %v4274_v12  ;;  %7448 = vrsqrt.f32 %v10974_v9  ;;  %v4438_v63 = vadd.f32 1e-06, %v4374_v23  ;;  %v4292_v32 = vpop.xlane.xlu0 %4291  ;;  %v7439_v9 = vpop.eup %7438 }
 0x514   : > { %v6934_v0 = vpack.c.bf16 %v5066_v56, %v5065_v58  ;;  %v6935_v54 = vpack.c.bf16 %v5067_v20, %v5067_v20  ;;  %v4378_v59 = vmul.f32 0.0015625, %v4268_v19  ;;  %7450 = vrsqrt.f32 %v4437_v62  ;;  %v7441_v2 = vpop.eup %7440  ;;  %v12558_v19 = vld [vmem:[#allocation230_spill] sm:$0xff]  ;;  %v12560_v23 = vld [vmem:[#allocation232_spill] sm:$0xff] }
 0x515   : > { %6327 = vst [vmem:[%s8021_s7 + $0x320] sm:$0xff] %v6933_v22  ;;  %v4441_v1 = vadd.f32 1e-06, %v4377_v36  ;;  %7452 = vrsqrt.f32 %v4436_v34  ;;  %v4440_v25 = vadd.f32 1e-06, %v4376_v8  ;;  %v4731_v24 = vmul.f32 %v7439_v9, %v12551_v29  ;;  %v7443_v30 = vpop.eup %7442  ;;  %v12559_v22 = vld [vmem:[#allocation231_spill] sm:$0xff] }
 0x516   : > { %6328 = vst [vmem:[%s8021_s7 + $0x328] sm:$0xff] %v6934_v0  ;;  %6329 = vst [vmem:[%s8021_s7 + $0x330] sm:$0xf] %v6935_v54  ;;  %7454 = vrsqrt.f32 %v4439_v17  ;;  %v4443_v4 = vadd.f32 1e-06, %v4379_v57  ;;  %v4732_v51 = vmul.f32 %v7439_v9, %v12552_v48  ;;  %v4733_v14 = vmul.f32 %v7439_v9, %v12553_v5  ;;  %v7445_v41 = vpop.eup %7444 }
 0x517   : > { %v4381_v15 = vmul.f32 0.0015625, %v4286_v43  ;;  %7456 = vrsqrt.f32 %v4438_v63  ;;  %v4442_v16 = vadd.f32 1e-06, %v4378_v59  ;;  %v4380_v18 = vmul.f32 0.0015625, %v4280_v13  ;;  %v7447_v20 = vpop.eup %7446 }
 0x518   : > { %v4383_v44 = vmul.f32 0.0015625, %v4298_v55  ;;  %7458 = vrsqrt.f32 %v4441_v1  ;;  %v11246_v52 = vmul.f32 0.0015625, %v4292_v32  ;;  %v4734_v35 = vmul.f32 %v7439_v9, %v12554_v3  ;;  %v12561_v55 = vld [vmem:[#allocation233_spill] sm:$0xff] }
 0x519   : > { %7460 = vrsqrt.f32 %v4440_v25  ;;  %v11240_v12 = vadd.f32 1e-06, %v4381_v15  ;;  %v11242_v27 = vadd.f32 1e-06, %v4380_v18  ;;  %v4735_v47 = vmul.f32 %v7439_v9, %v12555_v21  ;;  %v12564_v9 = vld [vmem:[#allocation236_spill] sm:$0xff] }
 0x51a   : > { %7462 = vrsqrt.f32 %v4443_v4  ;;  %v11244_v40 = vadd.f32 1e-06, %v4383_v44  ;;  %v4726_v31 = vmul.f32 %v7441_v2, %v12556_v60  ;;  %v4727_v26 = vmul.f32 %v7441_v2, %v12557_v7  ;;  %v12563_v44 = vld [vmem:[#allocation235_spill] sm:$0xff]  ;;  %v12566_v60 = vld [vmem:[#allocation238_spill] sm:$0xff] }
 0x51b   : > { %7464 = vrsqrt.f32 %v4442_v16  ;;  %v4728_v11 = vmul.f32 %v7441_v2, %v12558_v19  ;;  %v5078_v39 = vmul.f32 %v8713_v42, %v4731_v24  ;;  %v5079_v33 = vmul.f32 %v10347_v38, %v4732_v51  ;;  %v12562_v16 = vld [vmem:[#allocation234_spill] sm:$0xff]  ;;  %v12565_v51 = vld [vmem:[#allocation237_spill] sm:$0xff] }
 0x51c   : > { %v5080_v58 = vmul.f32 %v10357_v61, %v4733_v14  ;;  %v5081_v56 = vmul.f32 %v10361_v45, %v4734_v35  ;;  %v5082_v43 = vmul.f32 %v10365_v10, %v4735_v47  ;;  %v4729_v62 = vmul.f32 %v7441_v2, %v12559_v22 }
 0x51d   : > { %v4730_v0 = vmul.f32 %v7441_v2, %v12560_v23  ;;  %v5073_v54 = vmul.f32 %v8713_v42, %v4726_v31  ;;  %v6942_v34 = vpack.c.bf16 %v5079_v33, %v5078_v39  ;;  %v5074_v17 = vmul.f32 %v10347_v38, %v4727_v26  ;;  %v12567_v26 = vld [vmem:[#allocation239_spill] sm:$0xff]  ;;  %v12569_v33 = vld [vmem:[#allocation241_spill] sm:$0xff] }
 0x51e   : > { %v6943_v8 = vpack.c.bf16 %v5081_v56, %v5080_v58  ;;  %v5075_v57 = vmul.f32 %v10357_v61, %v4728_v11  ;;  %v6944_v63 = vpack.c.bf16 %v5082_v43, %v5082_v43  ;;  %v5076_v59 = vmul.f32 %v10361_v45, %v4729_v62  ;;  %v12568_v11 = vld [vmem:[#allocation240_spill] sm:$0xff]  ;;  %v12570_v62 = vld [vmem:[#allocation242_spill] sm:$0xff] }
 0x51f   : > { %v5077_v1 = vmul.f32 %v10365_v10, %v4730_v0  ;;  %v4741_v25 = vmul.f32 %v7443_v30, %v12561_v55  ;;  %6336 = vst [vmem:[%s8021_s7 + $0x35c] sm:$0xff] %v6942_v34  ;;  %v6939_v15 = vpack.c.bf16 %v5074_v17, %v5073_v54  ;;  %v4742_v18 = vmul.f32 %v7443_v30, %v12562_v16  ;;  %v12572_v55 = vld [vmem:[#allocation244_spill] sm:$0xff] }
 0x520   : > { %v11264_v36 = vpop.eup %7448  ;;  %6337 = vst [vmem:[%s8021_s7 + $0x364] sm:$0xff] %v6943_v8  ;;  %v4743_v32 = vmul.f32 %v7443_v30, %v12563_v44  ;;  %v4744_v2 = vmul.f32 %v7443_v30, %v12564_v9  ;;  %6338 = vst [vmem:[%s8021_s7 + $0x36c] sm:$0xf] %v6944_v63  ;;  %v6940_v24 = vpack.c.bf16 %v5076_v59, %v5075_v57  ;;  %7466 = vrsqrt.f32 %v11240_v12 }
 0x521   : > { %v11268_v13 = vpop.eup %7450  ;;  %v6941_v48 = vpack.c.bf16 %v5077_v1, %v5077_v1  ;;  %v4745_v5 = vmul.f32 %v7443_v30, %v12565_v51  ;;  %v5088_v14 = vmul.f32 %v8713_v42, %v4741_v25  ;;  %6333 = vst [vmem:[%s8021_s7 + $0x348] sm:$0xff] %v6939_v15  ;;  %v5089_v35 = vmul.f32 %v10347_v38, %v4742_v18  ;;  %v12573_v15 = vld [vmem:[#allocation245_spill] sm:$0xff] }
 0x522   : > { %v11273_v4 = vpop.eup %7452  ;;  %v5090_v21 = vmul.f32 %v10357_v61, %v4743_v32  ;;  %v5091_v47 = vmul.f32 %v10361_v45, %v4744_v2  ;;  %v4736_v31 = vmul.f32 %v7445_v41, %v12566_v60  ;;  %6334 = vst [vmem:[%s8021_s7 + $0x350] sm:$0xff] %v6940_v24  ;;  %v4737_v19 = vmul.f32 %v7445_v41, %v12567_v26  ;;  %v12574_v32 = vld [vmem:[#allocation246_spill] sm:$0xff]  ;;  %v12575_v2 = vld [vmem:[#allocation247_spill] sm:$0xff] }
 0x523   : > { %v11280_v29 = vpop.eup %7454  ;;  %6335 = vst [vmem:[%s8021_s7 + $0x358] sm:$0xf] %v6941_v48  ;;  %v5092_v30 = vmul.f32 %v10365_v10, %v4745_v5  ;;  %v4738_v39 = vmul.f32 %v7445_v41, %v12568_v11  ;;  %v4739_v58 = vmul.f32 %v7445_v41, %v12569_v33  ;;  %v6948_v43 = vpack.c.bf16 %v5089_v35, %v5088_v14  ;;  %v12578_v26 = vld [vmem:[#allocation250_spill] sm:$0xff]  ;;  %v12579_v11 = vld [vmem:[#allocation251_spill] sm:$0xff]  ;;  %v12580_v33 = vld [vmem:[#allocation252_spill] sm:$0xff] }
 0x524   : > { %v11285_v3 = vpop.eup %7456  ;;  %v6949_v22 = vpack.c.bf16 %v5091_v47, %v5090_v21  ;;  %v4740_v23 = vmul.f32 %v7445_v41, %v12570_v62  ;;  %v5083_v0 = vmul.f32 %v8713_v42, %v4736_v31  ;;  %v5084_v8 = vmul.f32 %v10347_v38, %v4737_v19  ;;  %v12571_v41 = vld [vmem:[#allocation243_spill] sm:$0xff]  ;;  %v12576_v47 = vld [vmem:[#allocation248_spill] sm:$0xff]  ;;  %v12577_v31 = vld [vmem:[#allocation249_spill] sm:$0xff] }
 0x525   : > { %v11292_v7 = vpop.eup %7458  ;;  %v6950_v34 = vpack.c.bf16 %v5092_v30, %v5092_v30  ;;  %v5085_v17 = vmul.f32 %v10357_v61, %v4738_v39  ;;  %v5086_v57 = vmul.f32 %v10361_v45, %v4739_v58  ;;  %6342 = vst [vmem:[%s8021_s7 + $0x384] sm:$0xff] %v6948_v43  ;;  %v4751_v1 = vmul.f32 %v7447_v20, %v12571_v41 }
 0x526   : > { %v11300_v56 = vpop.eup %7460  ;;  %6343 = vst [vmem:[%s8021_s7 + $0x38c] sm:$0xff] %v6949_v22  ;;  %v5087_v59 = vmul.f32 %v10365_v10, %v4740_v23  ;;  %v4752_v25 = vmul.f32 %v7447_v20, %v12572_v55  ;;  %v4753_v16 = vmul.f32 %v7447_v20, %v12573_v15  ;;  %v6945_v18 = vpack.c.bf16 %v5084_v8, %v5083_v0 }
 0x527   : > { %v11304_v54 = vpop.eup %7462  ;;  %6344 = vst [vmem:[%s8021_s7 + $0x394] sm:$0xf] %v6950_v34  ;;  %v6946_v44 = vpack.c.bf16 %v5086_v57, %v5085_v17  ;;  %v4754_v9 = vmul.f32 %v7447_v20, %v12574_v32  ;;  %v4755_v24 = vmul.f32 %v7447_v20, %v12575_v2  ;;  %v5098_v51 = vmul.f32 %v8713_v42, %v4751_v1  ;;  %v12581_v17 = vld [vmem:[#allocation253_spill] sm:$0xff]  ;;  %v12583_v1 = vld [vmem:[#allocation255_spill] sm:$0xff] }
 0x528   : > { %v11309_v63 = vpop.eup %7464  ;;  %v6947_v48 = vpack.c.bf16 %v5087_v59, %v5087_v59  ;;  %v5099_v5 = vmul.f32 %v10347_v38, %v4752_v25  ;;  %v5100_v14 = vmul.f32 %v10357_v61, %v4753_v16  ;;  %6339 = vst [vmem:[%s8021_s7 + $0x370] sm:$0xff] %v6945_v18  ;;  %v4746_v60 = vmul.f32 %v11264_v36, %v12576_v47  ;;  %v12582_v59 = vld [vmem:[#allocation254_spill] sm:$0xff]  ;;  %v12584_v25 = vld [vmem:[#allocation256_spill] sm:$0xff] }
 0x529   : > { %6340 = vst [vmem:[%s8021_s7 + $0x378] sm:$0xff] %v6946_v44  ;;  %v5101_v35 = vmul.f32 %v10361_v45, %v4754_v9  ;;  %v5102_v21 = vmul.f32 %v10365_v10, %v4755_v24  ;;  %v4747_v20 = vmul.f32 %v11264_v36, %v12577_v31  ;;  %v4748_v19 = vmul.f32 %v11264_v36, %v12578_v26  ;;  %v12585_v44 = vld [vmem:[#allocation257_spill] sm:$0xff]  ;;  %v12590_v26 = vld [vmem:[#allocation262_spill] sm:$0xff] }
 0x52a   : > { %6341 = vst [vmem:[%s8021_s7 + $0x380] sm:$0xf] %v6947_v48  ;;  %v6954_v30 = vpack.c.bf16 %v5099_v5, %v5098_v51  ;;  %v4749_v39 = vmul.f32 %v11264_v36, %v12579_v11  ;;  %v4750_v58 = vmul.f32 %v11264_v36, %v12580_v33  ;;  %v5093_v62 = vmul.f32 %v8713_v42, %v4746_v60  ;;  %v12586_v51 = vld [vmem:[#allocation258_spill] sm:$0xff]  ;;  %v12589_v60 = vld [vmem:[#allocation261_spill] sm:$0xff] }
 0x52b   : > { %v6955_v43 = vpack.c.bf16 %v5101_v35, %v5100_v14  ;;  %v6956_v22 = vpack.c.bf16 %v5102_v21, %v5102_v21  ;;  %v5094_v23 = vmul.f32 %v10347_v38, %v4747_v20  ;;  %v5095_v0 = vmul.f32 %v10357_v61, %v4748_v19  ;;  %v12587_v35 = vld [vmem:[#allocation259_spill] sm:$0xff]  ;;  %v12588_v21 = vld [vmem:[#allocation260_spill] sm:$0xff] }
 0x52c   : > { %6348 = vst [vmem:[%s8021_s7 + $0x3ac] sm:$0xff] %v6954_v30  ;;  %v5096_v34 = vmul.f32 %v10361_v45, %v4749_v39  ;;  %v5097_v8 = vmul.f32 %v10365_v10, %v4750_v58  ;;  %v4761_v57 = vmul.f32 %v11268_v13, %v12581_v17  ;;  %v4762_v41 = vmul.f32 %v11268_v13, %v12582_v59 }
 0x52d   : > { %6349 = vst [vmem:[%s8021_s7 + $0x3b4] sm:$0xff] %v6955_v43  ;;  %6350 = vst [vmem:[%s8021_s7 + $0x3bc] sm:$0xf] %v6956_v22  ;;  %v6951_v36 = vpack.c.bf16 %v5094_v23, %v5093_v62  ;;  %v4763_v55 = vmul.f32 %v11268_v13, %v12583_v1  ;;  %v4764_v15 = vmul.f32 %v11268_v13, %v12584_v25  ;;  %v12591_v62 = vld [vmem:[#allocation263_spill] sm:$0xff]  ;;  %7468 = vrsqrt.f32 %v11242_v27 }
 0x52e   : > { %v6952_v16 = vpack.c.bf16 %v5096_v34, %v5095_v0  ;;  %v6953_v18 = vpack.c.bf16 %v5097_v8, %v5097_v8  ;;  %v4765_v32 = vmul.f32 %v11268_v13, %v12585_v44  ;;  %v5108_v9 = vmul.f32 %v8713_v42, %v4761_v57  ;;  %v12592_v0 = vld [vmem:[#allocation264_spill] sm:$0xff]  ;;  %v12593_v34 = vld [vmem:[#allocation265_spill] sm:$0xff] }
 0x52f   : > { %6345 = vst [vmem:[%s8021_s7 + $0x398] sm:$0xff] %v6951_v36  ;;  %v5109_v2 = vmul.f32 %v10347_v38, %v4762_v41  ;;  %v5110_v24 = vmul.f32 %v10357_v61, %v4763_v55  ;;  %v5111_v48 = vmul.f32 %v10361_v45, %v4764_v15  ;;  %v4756_v5 = vmul.f32 %v11273_v4, %v12586_v51  ;;  %v12594_v36 = vld [vmem:[#allocation266_spill] sm:$0xff]  ;;  %v12595_v41 = vld [vmem:[#allocation267_spill] sm:$0xff] }
 0x530   : > { %6346 = vst [vmem:[%s8021_s7 + $0x3a0] sm:$0xff] %v6952_v16  ;;  %6347 = vst [vmem:[%s8021_s7 + $0x3a8] sm:$0xf] %v6953_v18  ;;  %v5112_v14 = vmul.f32 %v10365_v10, %v4765_v32  ;;  %v4757_v13 = vmul.f32 %v11273_v4, %v12587_v35  ;;  %v4758_v47 = vmul.f32 %v11273_v4, %v12588_v21  ;;  %v12596_v32 = vld [vmem:[#allocation268_spill] sm:$0xff]  ;;  %7470 = vrsqrt.f32 %v11244_v40 }
 0x531   : > { %v4759_v31 = vmul.f32 %v11273_v4, %v12589_v60  ;;  %v6960_v20 = vpack.c.bf16 %v5109_v2, %v5108_v9  ;;  %v6961_v30 = vpack.c.bf16 %v5111_v48, %v5110_v24  ;;  %v4760_v19 = vmul.f32 %v11273_v4, %v12590_v26  ;;  %v12597_v2 = vld [vmem:[#allocation269_spill] sm:$0xff]  ;;  %v12598_v48 = vld [vmem:[#allocation270_spill] sm:$0xff]  ;;  %v12600_v35 = vld [vmem:[#allocation272_spill] sm:$0xff] }
 0x532   : > { %v5103_v11 = vmul.f32 %v8713_v42, %v4756_v5  ;;  %v6962_v39 = vpack.c.bf16 %v5112_v14, %v5112_v14  ;;  %v5104_v33 = vmul.f32 %v10347_v38, %v4757_v13  ;;  %v5105_v58 = vmul.f32 %v10357_v61, %v4758_v47  ;;  %v12599_v5 = vld [vmem:[#allocation271_spill] sm:$0xff] }
 0x533   : > { %v5106_v43 = vmul.f32 %v10361_v45, %v4759_v31  ;;  %6354 = vst [vmem:[%s8021_s7 + $0x3d4] sm:$0xff] %v6960_v20  ;;  %6355 = vst [vmem:[%s8021_s7 + $0x3dc] sm:$0xff] %v6961_v30  ;;  %v5107_v22 = vmul.f32 %v10365_v10, %v4760_v19  ;;  %v4771_v23 = vmul.f32 %v11280_v29, %v12591_v62  ;;  %v12601_v19 = vld [vmem:[#allocation273_spill] sm:$0xff] }
 0x534   : > { %v4772_v4 = vmul.f32 %v11280_v29, %v12592_v0  ;;  %v4773_v8 = vmul.f32 %v11280_v29, %v12593_v34  ;;  %6356 = vst [vmem:[%s8021_s7 + $0x3e4] sm:$0xf] %v6962_v39  ;;  %v6957_v17 = vpack.c.bf16 %v5104_v33, %v5103_v11  ;;  %v4774_v59 = vmul.f32 %v11280_v29, %v12594_v36  ;;  %v12602_v39 = vld [vmem:[#allocation274_spill] sm:$0xff] }
 0x535   : > { %v6958_v57 = vpack.c.bf16 %v5106_v43, %v5105_v58  ;;  %v4775_v1 = vmul.f32 %v11280_v29, %v12595_v41  ;;  %v6959_v55 = vpack.c.bf16 %v5107_v22, %v5107_v22  ;;  %v5118_v25 = vmul.f32 %v8713_v42, %v4771_v23  ;;  %v12603_v58 = vld [vmem:[#allocation275_spill] sm:$0xff]  ;;  %v12604_v22 = vld [vmem:[#allocation276_spill] sm:$0xff] }
 0x536   : > { %v5119_v15 = vmul.f32 %v10347_v38, %v4772_v4  ;;  %v5120_v16 = vmul.f32 %v10357_v61, %v4773_v8  ;;  %6351 = vst [vmem:[%s8021_s7 + $0x3c0] sm:$0xff] %v6957_v17  ;;  %v5121_v18 = vmul.f32 %v10361_v45, %v4774_v59  ;;  %v4766_v9 = vmul.f32 %v11285_v3, %v12596_v32  ;;  %v12605_v4 = vld [vmem:[#allocation277_spill] sm:$0xff]  ;;  %v12606_v59 = vld [vmem:[#allocation278_spill] sm:$0xff] }
 0x537   : > { %6352 = vst [vmem:[%s8021_s7 + $0x3c8] sm:$0xff] %v6958_v57  ;;  %v5122_v44 = vmul.f32 %v10365_v10, %v4775_v1  ;;  %v4767_v29 = vmul.f32 %v11285_v3, %v12597_v2  ;;  %6353 = vst [vmem:[%s8021_s7 + $0x3d0] sm:$0xf] %v6959_v55  ;;  %v4768_v51 = vmul.f32 %v11285_v3, %v12598_v48  ;;  %v12607_v55 = vld [vmem:[#allocation279_spill] sm:$0xff] }
 0x538   : > { %v6966_v24 = vpack.c.bf16 %v5119_v15, %v5118_v25  ;;  %v4769_v14 = vmul.f32 %v11285_v3, %v12599_v5  ;;  %v4770_v13 = vmul.f32 %v11285_v3, %v12600_v35  ;;  %v6967_v21 = vpack.c.bf16 %v5121_v18, %v5120_v16  ;;  %v12608_v25 = vld [vmem:[#allocation280_spill] sm:$0xff]  ;;  %v12609_v16 = vld [vmem:[#allocation281_spill] sm:$0xff]  ;;  %v12611_v35 = vld [vmem:[#allocation283_spill] sm:$0xff] }
 0x539   : > { %v6968_v47 = vpack.c.bf16 %v5122_v44, %v5122_v44  ;;  %v5113_v60 = vmul.f32 %v8713_v42, %v4766_v9  ;;  %v5114_v31 = vmul.f32 %v10347_v38, %v4767_v29  ;;  %v5115_v20 = vmul.f32 %v10357_v61, %v4768_v51  ;;  %v12610_v9 = vld [vmem:[#allocation282_spill] sm:$0xff] }
 0x53a   : > { %6360 = vst [vmem:[%s8021_s7 + $0x3fc] sm:$0xff] %v6966_v24  ;;  %v5116_v30 = vmul.f32 %v10361_v45, %v4769_v14  ;;  %v5117_v26 = vmul.f32 %v10365_v10, %v4770_v13  ;;  %v4781_v11 = vmul.f32 %v11292_v7, %v12601_v19  ;;  %6361 = vst [vmem:[%s8021_s7 + $0x404] sm:$0xff] %v6967_v21  ;;  %v12612_v21 = vld [vmem:[#allocation284_spill] sm:$0xff]  ;;  %v12615_v19 = vld [vmem:[#allocation287_spill] sm:$0xff] }
 0x53b   : > { %6362 = vst [vmem:[%s8021_s7 + $0x40c] sm:$0xf] %v6968_v47  ;;  %v6963_v3 = vpack.c.bf16 %v5114_v31, %v5113_v60  ;;  %v4782_v33 = vmul.f32 %v11292_v7, %v12602_v39  ;;  %v4783_v43 = vmul.f32 %v11292_v7, %v12603_v58  ;;  %v4784_v62 = vmul.f32 %v11292_v7, %v12604_v22  ;;  %v12613_v47 = vld [vmem:[#allocation285_spill] sm:$0xff]  ;;  %v4304_v22 = vpop.xlane.xlu0 %4303 }
 0x53c   : > { %v6964_v23 = vpack.c.bf16 %v5116_v30, %v5115_v20  ;;  %v6965_v0 = vpack.c.bf16 %v5117_v26, %v5117_v26  ;;  %v4785_v34 = vmul.f32 %v11292_v7, %v12605_v4  ;;  %v5128_v8 = vmul.f32 %v8713_v42, %v4781_v11  ;;  %v12614_v30 = vld [vmem:[#allocation286_spill] sm:$0xff] }
 0x53d   : > { %6357 = vst [vmem:[%s8021_s7 + $0x3e8] sm:$0xff] %v6963_v3  ;;  %v5129_v17 = vmul.f32 %v10347_v38, %v4782_v33  ;;  %v5130_v57 = vmul.f32 %v10357_v61, %v4783_v43  ;;  %v5131_v36 = vmul.f32 %v10361_v45, %v4784_v62  ;;  %v4776_v41 = vmul.f32 %v11300_v56, %v12606_v59  ;;  %v4310_v3 = vpop.xlane.xlu1 %4309 }
 0x53e   : > { %6358 = vst [vmem:[%s8021_s7 + $0x3f0] sm:$0xff] %v6964_v23  ;;  %6359 = vst [vmem:[%s8021_s7 + $0x3f8] sm:$0xf] %v6965_v0  ;;  %v5132_v1 = vmul.f32 %v10365_v10, %v4785_v34  ;;  %v4777_v7 = vmul.f32 %v11300_v56, %v12607_v55  ;;  %v4778_v15 = vmul.f32 %v11300_v56, %v12608_v25  ;;  %v12616_v0 = vld [vmem:[#allocation288_spill] sm:$0xff] }
 0x53f   : > { %v4779_v18 = vmul.f32 %v11300_v56, %v12609_v16  ;;  %v6972_v44 = vpack.c.bf16 %v5129_v17, %v5128_v8  ;;  %v6973_v32 = vpack.c.bf16 %v5131_v36, %v5130_v57  ;;  %v4780_v2 = vmul.f32 %v11300_v56, %v12610_v9  ;;  %v12618_v17 = vld [vmem:[#allocation290_spill] sm:$0xff]  ;;  %v12619_v36 = vld [vmem:[#allocation291_spill] sm:$0xff] }
 0x540   : > { %v5123_v29 = vmul.f32 %v8713_v42, %v4776_v41  ;;  %v6974_v24 = vpack.c.bf16 %v5132_v1, %v5132_v1  ;;  %v5124_v48 = vmul.f32 %v10347_v38, %v4777_v7  ;;  %v5125_v51 = vmul.f32 %v10357_v61, %v4778_v15  ;;  %v12620_v41 = vld [vmem:[#allocation292_spill] sm:$0xff] }
 0x541   : > { %v5126_v5 = vmul.f32 %v10361_v45, %v4779_v18  ;;  %6366 = vst [vmem:[%s8021_s7 + $0x424] sm:$0xff] %v6972_v44  ;;  %6367 = vst [vmem:[%s8021_s7 + $0x42c] sm:$0xff] %v6973_v32  ;;  %v5127_v14 = vmul.f32 %v10365_v10, %v4780_v2  ;;  %v4791_v13 = vmul.f32 %v11304_v54, %v12611_v35  ;;  %v4322_v32 = vpop.xlane.xlu1 %4321 }
 0x542   : > { %v4792_v56 = vmul.f32 %v11304_v54, %v12612_v21  ;;  %v4793_v60 = vmul.f32 %v11304_v54, %v12613_v47  ;;  %6368 = vst [vmem:[%s8021_s7 + $0x434] sm:$0xf] %v6974_v24  ;;  %v6969_v31 = vpack.c.bf16 %v5124_v48, %v5123_v29  ;;  %v4794_v26 = vmul.f32 %v11304_v54, %v12614_v30  ;;  %v4316_v48 = vpop.xlane.xlu0 %4315  ;;  %v7467_v21 = vpop.eup %7466  ;;  %v12624_v30 = vld [vmem:[#allocation296_spill] sm:$0xff] }
 0x543   : > { %v6970_v20 = vpack.c.bf16 %v5126_v5, %v5125_v51  ;;  %v4795_v11 = vmul.f32 %v11304_v54, %v12615_v19  ;;  %v6971_v39 = vpack.c.bf16 %v5127_v14, %v5127_v14  ;;  %v5138_v33 = vmul.f32 %v8713_v42, %v4791_v13  ;;  %v12617_v54 = vld [vmem:[#allocation289_spill] sm:$0xff] }
 0x544   : > { %v5139_v58 = vmul.f32 %v10347_v38, %v4792_v56  ;;  %v5140_v43 = vmul.f32 %v10357_v61, %v4793_v60  ;;  %6363 = vst [vmem:[%s8021_s7 + $0x410] sm:$0xff] %v6969_v31  ;;  %v5141_v62 = vmul.f32 %v10361_v45, %v4794_v26  ;;  %v4786_v4 = vmul.f32 %v11309_v63, %v12616_v0  ;;  %v12621_v56 = vld [vmem:[#allocation293_spill] sm:$0xff]  ;;  %v12622_v60 = vld [vmem:[#allocation294_spill] sm:$0xff]  ;;  %v12623_v31 = vld [vmem:[#allocation295_spill] sm:$0xff] }
 0x545   : > { %6364 = vst [vmem:[%s8021_s7 + $0x418] sm:$0xff] %v6970_v20  ;;  %v5142_v23 = vmul.f32 %v10365_v10, %v4795_v11  ;;  %v4787_v34 = vmul.f32 %v11309_v63, %v12617_v54  ;;  %6365 = vst [vmem:[%s8021_s7 + $0x420] sm:$0xf] %v6971_v39  ;;  %v4788_v57 = vmul.f32 %v11309_v63, %v12618_v17  ;;  %v4446_v29 = vadd.f32 1e-06, %v11246_v52  ;;  %v7469_v52 = vpop.eup %7468  ;;  %v12625_v19 = vld [vmem:[#allocation297_spill] sm:$0xff] }
 0x546   : > { %v6978_v8 = vpack.c.bf16 %v5139_v58, %v5138_v33  ;;  %v4789_v59 = vmul.f32 %v11309_v63, %v12619_v36  ;;  %v4790_v1 = vmul.f32 %v11309_v63, %v12620_v41  ;;  %v6979_v55 = vpack.c.bf16 %v5141_v62, %v5140_v43  ;;  %v12627_v33 = vld [vmem:[#allocation299_spill] sm:$0xff]  ;;  %v12628_v43 = vld [vmem:[#allocation300_spill] sm:$0xff]  ;;  %v7471_v62 = vpop.eup %7470 }
 0x547   : > { %v6980_v7 = vpack.c.bf16 %v5142_v23, %v5142_v23  ;;  %v5133_v25 = vmul.f32 %v8713_v42, %v4786_v4  ;;  %v5134_v15 = vmul.f32 %v10347_v38, %v4787_v34  ;;  %v5135_v16 = vmul.f32 %v10357_v61, %v4788_v57  ;;  %v12630_v57 = vld [vmem:[#allocation302_spill] sm:$0xff] }
 0x548   : > { %6372 = vst [vmem:[%s8021_s7 + $0x44c] sm:$0xff] %v6978_v8  ;;  %v5136_v18 = vmul.f32 %v10361_v45, %v4789_v59  ;;  %v5137_v44 = vmul.f32 %v10365_v10, %v4790_v1  ;;  %6373 = vst [vmem:[%s8021_s7 + $0x454] sm:$0xff] %v6979_v55  ;;  %v4385_v24 = vmul.f32 0.0015625, %v4310_v3  ;;  %v4384_v51 = vmul.f32 0.0015625, %v4304_v22 }
 0x549   : > { %6374 = vst [vmem:[%s8021_s7 + $0x45c] sm:$0xf] %v6980_v7  ;;  %v6975_v63 = vpack.c.bf16 %v5134_v15, %v5133_v25  ;;  %v4387_v5 = vmul.f32 0.0015625, %v4322_v32  ;;  %v4386_v12 = vmul.f32 0.0015625, %v4316_v48  ;;  %7472 = vrsqrt.f32 %v4446_v29 }
 0x54a   : > { %v6976_v9 = vpack.c.bf16 %v5136_v18, %v5135_v16  ;;  %v6977_v2 = vpack.c.bf16 %v5137_v44, %v5137_v44  ;;  %v4449_v14 = vadd.f32 1e-06, %v4385_v24  ;;  %v4448_v35 = vadd.f32 1e-06, %v4384_v51  ;;  %v12626_v3 = vld [vmem:[#allocation298_spill] sm:$0xff]  ;;  %v12629_v8 = vld [vmem:[#allocation301_spill] sm:$0xff] }
 0x54b   : > { %6369 = vst [vmem:[%s8021_s7 + $0x438] sm:$0xff] %v6975_v63  ;;  %v4451_v13 = vadd.f32 1e-06, %v4387_v5  ;;  %v4450_v27 = vadd.f32 1e-06, %v4386_v12  ;;  %v4801_v47 = vmul.f32 %v7467_v21, %v12621_v56  ;;  %v4802_v40 = vmul.f32 %v7467_v21, %v12622_v60  ;;  %v12631_v44 = vld [vmem:[#allocation303_spill] sm:$0xff] }
 0x54c   : > { %6370 = vst [vmem:[%s8021_s7 + $0x440] sm:$0xff] %v6976_v9  ;;  %6371 = vst [vmem:[%s8021_s7 + $0x448] sm:$0xf] %v6977_v2  ;;  %7474 = vrsqrt.f32 %v4449_v14  ;;  %v4803_v20 = vmul.f32 %v7467_v21, %v12623_v31  ;;  %v4804_v26 = vmul.f32 %v7467_v21, %v12624_v30  ;;  %v4805_v11 = vmul.f32 %v7467_v21, %v12625_v19  ;;  %v12632_v9 = vld [vmem:[#allocation304_spill] sm:$0xff]  ;;  %v12633_v29 = vld [vmem:[#allocation305_spill] sm:$0xff] }
 0x54d   : > { %7476 = vrsqrt.f32 %v4448_v35  ;;  %v4796_v39 = vmul.f32 %v7469_v52, %v12626_v3  ;;  %v4797_v58 = vmul.f32 %v7469_v52, %v12627_v33  ;;  %v4798_v22 = vmul.f32 %v7469_v52, %v12628_v43  ;;  %v12634_v48 = vld [vmem:[#allocation306_spill] sm:$0xff]  ;;  %v12635_v14 = vld [vmem:[#allocation307_spill] sm:$0xff]  ;;  %v12636_v56 = vld [vmem:[#allocation308_spill] sm:$0xff] }
 0x54e   : > { %7478 = vrsqrt.f32 %v4451_v13  ;;  %v5148_v23 = vmul.f32 %v8713_v42, %v4801_v47  ;;  %v5149_v0 = vmul.f32 %v10347_v38, %v4802_v40  ;;  %v5150_v4 = vmul.f32 %v10357_v61, %v4803_v20  ;;  %v12637_v31 = vld [vmem:[#allocation309_spill] sm:$0xff]  ;;  %v12638_v30 = vld [vmem:[#allocation310_spill] sm:$0xff]  ;;  %v12639_v19 = vld [vmem:[#allocation311_spill] sm:$0xff] }
 0x54f   : > { %7480 = vrsqrt.f32 %v4450_v27  ;;  %v5151_v54 = vmul.f32 %v10361_v45, %v4804_v26  ;;  %v5152_v34 = vmul.f32 %v10365_v10, %v4805_v11  ;;  %v4799_v17 = vmul.f32 %v7469_v52, %v12629_v8 }
 0x550   : > { %v4800_v36 = vmul.f32 %v7469_v52, %v12630_v57  ;;  %v5143_v59 = vmul.f32 %v8713_v42, %v4796_v39  ;;  %v6984_v41 = vpack.c.bf16 %v5149_v0, %v5148_v23  ;;  %v5144_v55 = vmul.f32 %v10347_v38, %v4797_v58  ;;  %v12640_v58 = vld [vmem:[#allocation312_spill] sm:$0xff] }
 0x551   : > { %v6985_v1 = vpack.c.bf16 %v5151_v54, %v5150_v4  ;;  %v5145_v7 = vmul.f32 %v10357_v61, %v4798_v22  ;;  %v6986_v15 = vpack.c.bf16 %v5152_v34, %v5152_v34  ;;  %v5146_v16 = vmul.f32 %v10361_v45, %v4799_v17  ;;  %v12641_v17 = vld [vmem:[#allocation313_spill] sm:$0xff] }
 0x552   : > { %v5147_v18 = vmul.f32 %v10365_v10, %v4800_v36  ;;  %v4811_v63 = vmul.f32 %v7471_v62, %v12631_v44  ;;  %6378 = vst [vmem:[%s8021_s7 + $0x474] sm:$0xff] %v6984_v41  ;;  %v6981_v32 = vpack.c.bf16 %v5144_v55, %v5143_v59  ;;  %v4812_v2 = vmul.f32 %v7471_v62, %v12632_v9  ;;  %v12642_v36 = vld [vmem:[#allocation314_spill] sm:$0xff]  ;;  %v12643_v41 = vld [vmem:[#allocation315_spill] sm:$0xff] }
 0x553   : > { %6379 = vst [vmem:[%s8021_s7 + $0x47c] sm:$0xff] %v6985_v1  ;;  %v4813_v24 = vmul.f32 %v7471_v62, %v12633_v29  ;;  %v4814_v51 = vmul.f32 %v7471_v62, %v12634_v48  ;;  %6380 = vst [vmem:[%s8021_s7 + $0x484] sm:$0xf] %v6986_v15  ;;  %v6982_v5 = vpack.c.bf16 %v5146_v16, %v5145_v7  ;;  %v12645_v16 = vld [vmem:[#allocation317_spill] sm:$0xff] }
 0x554   : > { %v6983_v12 = vpack.c.bf16 %v5147_v18, %v5147_v18  ;;  %v4815_v35 = vmul.f32 %v7471_v62, %v12635_v14  ;;  %v5158_v13 = vmul.f32 %v8713_v42, %v4811_v63  ;;  %6375 = vst [vmem:[%s8021_s7 + $0x460] sm:$0xff] %v6981_v32  ;;  %v5159_v27 = vmul.f32 %v10347_v38, %v4812_v2 }
 0x555   : > { %v5160_v21 = vmul.f32 %v10357_v61, %v4813_v24  ;;  %v5161_v52 = vmul.f32 %v10361_v45, %v4814_v51  ;;  %6376 = vst [vmem:[%s8021_s7 + $0x468] sm:$0xff] %v6982_v5  ;;  %v12646_v24 = vld [vmem:[#allocation318_spill] sm:$0xff]  ;;  %v12647_v51 = vld [vmem:[#allocation319_spill] sm:$0xff] }
 0x556   : > { %v7473_v25 = vpop.eup %7472  ;;  %6377 = vst [vmem:[%s8021_s7 + $0x470] sm:$0xf] %v6983_v12  ;;  %v5162_v40 = vmul.f32 %v10365_v10, %v4815_v35  ;;  %v6990_v39 = vpack.c.bf16 %v5159_v27, %v5158_v13  ;;  %v12648_v35 = vld [vmem:[#allocation320_spill] sm:$0xff]  ;;  %v12649_v27 = vld [vmem:[#allocation321_spill] sm:$0xff] }
 0x557   : > { %v4806_v47 = vmul.f32 %v7473_v25, %v12636_v56  ;;  %v4807_v20 = vmul.f32 %v7473_v25, %v12637_v31  ;;  %v4808_v26 = vmul.f32 %v7473_v25, %v12638_v30  ;;  %v4809_v11 = vmul.f32 %v7473_v25, %v12639_v19  ;;  %v12650_v30 = vld [vmem:[#allocation322_spill] sm:$0xff]  ;;  %v12651_v19 = vld [vmem:[#allocation323_spill] sm:$0xff] }
 0x558   : > { %v6991_v33 = vpack.c.bf16 %v5161_v52, %v5160_v21  ;;  %v4810_v43 = vmul.f32 %v7473_v25, %v12640_v58  ;;  %v6992_v23 = vpack.c.bf16 %v5162_v40, %v5162_v40  ;;  %6384 = vst [vmem:[%s8021_s7 + $0x49c] sm:$0xff] %v6990_v39  ;;  %v12644_v25 = vld [vmem:[#allocation316_spill] sm:$0xff] }
 0x559   : > { %v7475_v60 = vpop.eup %7474  ;;  %v5153_v22 = vmul.f32 %v8713_v42, %v4806_v47  ;;  %v5154_v0 = vmul.f32 %v10347_v38, %v4807_v20  ;;  %v5155_v4 = vmul.f32 %v10357_v61, %v4808_v26  ;;  %v5156_v54 = vmul.f32 %v10361_v45, %v4809_v11 }
 0x55a   : > { %v7477_v3 = vpop.eup %7476  ;;  %6385 = vst [vmem:[%s8021_s7 + $0x4a4] sm:$0xff] %v6991_v33  ;;  %v5157_v8 = vmul.f32 %v10365_v10, %v4810_v43  ;;  %v4821_v57 = vmul.f32 %v7475_v60, %v12641_v17  ;;  %v4822_v59 = vmul.f32 %v7475_v60, %v12642_v36  ;;  %v4823_v1 = vmul.f32 %v7475_v60, %v12643_v41 }
 0x55b   : > { %v7479_v62 = vpop.eup %7478  ;;  %6386 = vst [vmem:[%s8021_s7 + $0x4ac] sm:$0xf] %v6992_v23  ;;  %v6987_v55 = vpack.c.bf16 %v5154_v0, %v5153_v22  ;;  %v6988_v7 = vpack.c.bf16 %v5156_v54, %v5155_v4  ;;  %v4824_v15 = vmul.f32 %v7475_v60, %v12644_v25  ;;  %v4825_v18 = vmul.f32 %v7475_v60, %v12645_v16 }
 0x55c   : > { %v7481_v34 = vpop.eup %7480  ;;  %v6989_v44 = vpack.c.bf16 %v5157_v8, %v5157_v8  ;;  %v5168_v63 = vmul.f32 %v8713_v42, %v4821_v57  ;;  %v5169_v32 = vmul.f32 %v10347_v38, %v4822_v59  ;;  %v5170_v9 = vmul.f32 %v10357_v61, %v4823_v1  ;;  %v12653_v59 = vld [vmem:[#allocation325_spill] sm:$0xff] }
 0x55d   : > { %6381 = vst [vmem:[%s8021_s7 + $0x488] sm:$0xff] %v6987_v55  ;;  %6382 = vst [vmem:[%s8021_s7 + $0x490] sm:$0xff] %v6988_v7  ;;  %v5171_v2 = vmul.f32 %v10361_v45, %v4824_v15  ;;  %v5172_v29 = vmul.f32 %v10365_v10, %v4825_v18  ;;  %v4816_v48 = vmul.f32 %v7477_v3, %v12646_v24 }
 0x55e   : > { %v4817_v5 = vmul.f32 %v7477_v3, %v12647_v51  ;;  %6383 = vst [vmem:[%s8021_s7 + $0x498] sm:$0xf] %v6989_v44  ;;  %v6996_v12 = vpack.c.bf16 %v5169_v32, %v5168_v63  ;;  %v4818_v14 = vmul.f32 %v7477_v3, %v10260_v50  ;;  %v4819_v13 = vmul.f32 %v7477_v3, %v12648_v35 }
 0x55f   : > { %v4820_v21 = vmul.f32 %v7477_v3, %v12649_v27  ;;  %v6997_v52 = vpack.c.bf16 %v5171_v2, %v5170_v9  ;;  %v6998_v56 = vpack.c.bf16 %v5172_v29, %v5172_v29  ;;  %v5163_v47 = vmul.f32 %v8713_v42, %v4816_v48  ;;  %v12652_v3 = vld [vmem:[#allocation324_spill] sm:$0xff] }
 0x560   : > { %v5164_v60 = vmul.f32 %v10347_v38, %v4817_v5  ;;  %6390 = vst [vmem:[%s8021_s7 + $0x4c4] sm:$0xff] %v6996_v12  ;;  %v5165_v40 = vmul.f32 %v10357_v61, %v4818_v14  ;;  %v5166_v31 = vmul.f32 %v10361_v45, %v4819_v13  ;;  %v4831_v50 = vmul.f32 %v7479_v62, %v12650_v30 }
 0x561   : > { %v5167_v20 = vmul.f32 %v10365_v10, %v4820_v21  ;;  %6391 = vst [vmem:[%s8021_s7 + $0x4cc] sm:$0xff] %v6997_v52  ;;  %6392 = vst [vmem:[%s8021_s7 + $0x4d4] sm:$0xf] %v6998_v56  ;;  %v4832_v11 = vmul.f32 %v7479_v62, %v12651_v19  ;;  %v4833_v39 = vmul.f32 %v7479_v62, %v12652_v3 }
 0x562   : > { %v6993_v26 = vpack.c.bf16 %v5164_v60, %v5163_v47  ;;  %v4834_v33 = vmul.f32 %v7479_v62, %v10290_v49  ;;  %v6994_v58 = vpack.c.bf16 %v5166_v31, %v5165_v40  ;;  %v4835_v22 = vmul.f32 %v7479_v62, %v10293_v53 }
 0x563   : > { %v6995_v43 = vpack.c.bf16 %v5167_v20, %v5167_v20  ;;  %v5178_v23 = vmul.f32 %v8713_v42, %v4831_v50  ;;  %v5179_v0 = vmul.f32 %v10347_v38, %v4832_v11  ;;  %v5180_v4 = vmul.f32 %v10357_v61, %v4833_v39 }
 0x564   : > { %6387 = vst [vmem:[%s8021_s7 + $0x4b0] sm:$0xff] %v6993_v26  ;;  %v5181_v54 = vmul.f32 %v10361_v45, %v4834_v33  ;;  %v4826_v8 = vmul.f32 %v7481_v34, %v10304_v28  ;;  %6388 = vst [vmem:[%s8021_s7 + $0x4b8] sm:$0xff] %v6994_v58  ;;  %v5182_v49 = vmul.f32 %v10365_v10, %v4835_v22 }
 0x565   : > { %6389 = vst [vmem:[%s8021_s7 + $0x4c0] sm:$0xf] %v6995_v43  ;;  %v4827_v53 = vmul.f32 %v7481_v34, %v10311_v37  ;;  %v4828_v62 = vmul.f32 %v7481_v34, %v10316_v6  ;;  %v4829_v17 = vmul.f32 %v7481_v34, %v10319_v46  ;;  %v7002_v57 = vpack.c.bf16 %v5179_v0, %v5178_v23 }
 0x566   : > { %v7003_v36 = vpack.c.bf16 %v5181_v54, %v5180_v4  ;;  %v4830_v41 = vmul.f32 %v7481_v34, %v12653_v59  ;;  %v5173_v28 = vmul.f32 %v8713_v42, %v4826_v8  ;;  %v7004_v1 = vpack.c.bf16 %v5182_v49, %v5182_v49 }
 0x567   : > { %v5174_v55 = vmul.f32 %v10347_v38, %v4827_v53  ;;  %v5175_v7 = vmul.f32 %v10357_v61, %v4828_v62  ;;  %v5176_v37 = vmul.f32 %v10361_v45, %v4829_v17  ;;  %6396 = vst [vmem:[%s8021_s7 + $0x4ec] sm:$0xff] %v7002_v57 }
 0x568   : > { %6397 = vst [vmem:[%s8021_s7 + $0x4f4] sm:$0xff] %v7003_v36  ;;  %v5177_v6 = vmul.f32 %v10365_v10, %v4830_v41  ;;  %6398 = vst [vmem:[%s8021_s7 + $0x4fc] sm:$0xf] %v7004_v1 }
 0x569   : > { %v6999_v46 = vpack.c.bf16 %v5174_v55, %v5173_v28  ;;  %v7000_v25 = vpack.c.bf16 %v5176_v37, %v5175_v7 }
 0x56a   : > { %v7001_v15 = vpack.c.bf16 %v5177_v6, %v5177_v6 }
 0x56b   : > { %6393 = vst [vmem:[%s8021_s7 + $0x4d8] sm:$0xff] %v6999_v46  ;;  %6394 = vst [vmem:[%s8021_s7 + $0x4e0] sm:$0xff] %v7000_v25 }
 0x56c   : > { %6395 = vst [vmem:[%s8021_s7 + $0x4e8] sm:$0xf] %v7001_v15 }
 0x56d PF: > { %s11603_s24 = scalar_lea.sflag [#allocation5], %s301_s10  ;;  %s12654_s29 = sld [smem:[#allocation27_spill]] }
 0x573   : > { %p12655_p7 = scmp.ne.s32.totalorder %s12654_s29, 0 }
 0x574   : > { %s12656_s5 = sld [smem:[#allocation20_spill]] (%p12655_p7) }
 0x575   : > { %6406 = sbr.rel (!%p12655_p7) target bundleno = 1435 (0x59b), region = 64 }
 0x57a   : > { %s6804_s4 = sshll.u32 %s12656_s5, 6 }
 0x57b   : > { %s6408_s17 = ssub.s32 80, %s6804_s4 }
 0x57c   : > { %p6409_p8 = scmp.lt.s32.totalorder %s6408_s17, 64 }
 0x57e   : > { %s12690_s17 = smov (!%p6409_p8, %s6408_s17), 64 }
 0x57f   : > { %s11608_s15 = smul.u32 320, %s12690_s17 }
 0x581   : > { %s6414_s21 = ssub.s32 20480, %s11608_s15 }
 0x582   : > { %6415 = vsyncadd %s11603_s24, %s6414_s21  ;;  %p6807_p6 = scmp.ne.s32.totalorder %s11608_s15, 0  ;;  %s7146_s23 = smul.u32 20480, %s12656_s5 }
 0x583   : > { %s6421_s8 = sshll.u32 %s8021_s7, 4  ;;  %s12657_s30 = sld [smem:[#allocation329_spill]]  ;;  %s11620_s8 = int_to_ptr.vmem [resolvable:$true] %s6421_s8 }
 0x584   : > { %s7587_s3 = scalar_lea.vmem %s11620_s8, %s11608_s15  ;;  %s7756_s2 = smov [#allocation11]  }
 0x585   : > { %p7588_p3 = scmp.ne.s32.totalorder %s11620_s8, %s7587_s3  ;;  %s7591_s9 = sshll.u32 %s7756_s2, 4  ;;  %s7592_s9 = int_to_ptr.vmem [resolvable:$false] %s7591_s9 }
 0x586   : > { %s7593_s25 = scalar_lea.vmem %s7592_s9, 40960  ;;  %p7594_p10 = scmp.lt.s32.totalorder %s11620_s8, %s7592_s9 }
 0x587   : > { %p7589_p12 = pnand %p7588_p3, %p6807_p6  ;;  %p7595_p4 = scmp.lt.s32.totalorder %s7593_s25, %s7587_s3 }
 0x589   : > { %s11618_s0 = scalar_lea.hbm %s12657_s30, %s7146_s23  ;;  %p7590_p13 = pneg %p7589_p12 }
 0x58a   : > { %p7596_p2 = por %p7595_p4, %p7594_p10 }
 0x58c   : > { %p7597_p11 = pnand %p7596_p2, %p7590_p13 }
 0x58e   : > { %7600 = shalt.err (!%p7597_p11)
}
 0x58f   : > { %s7601_s27 = scalar_lea.hbm %s11618_s0, %s11608_s15  ;;  %s7605_s12 = scalar_lea.hbm %s12657_s30, 25600 }
 0x590   : > { %p7602_p0 = scmp.ne.s32.totalorder %s11618_s0, %s7601_s27  ;;  %p7606_p9 = scmp.lt.s32.totalorder %s11618_s0, %s12657_s30 }
 0x591   : > { %p7607_p7 = scmp.lt.s32.totalorder %s7605_s12, %s7601_s27 }
 0x592   : > { %p7603_p1 = pnand %p7602_p0, %p6807_p6 }
 0x593   : > { %p7608_p8 = por %p7607_p7, %p7606_p9 }
 0x594   : > { %p7604_p5 = pneg %p7603_p1 }
 0x596   : > { %p7609_p3 = pnand %p7608_p8, %p7604_p5 }
 0x598   : > { %7612 = shalt.err (!%p7609_p3)
}
 0x599   : > { %s7757_s7 = smov 320   ;;  %s7758_s29 = smov 20  }
 0x59a   : > { %6427 = dma.vmem_to_hbm [thread:$0]  (%p6807_p6), %s11620_s8, %s11608_s15, %s11618_s0, %s11603_s24, %s7757_s7, %s7757_s7, %s7758_s29  }
 0x59b PF: > { %s12658_s5 = sld [smem:[#allocation17_spill]]  ;;  %p7174_p12 = scmp.ge.s32.totalorder %s7743_s28, 2 }
 0x59c   : > { %s12659_s4 = sld [smem:[#allocation28_spill]] }
 0x5a1   : > { %s6436_s17 = sand.u32 1, %s12658_s5  }
 0x5a2   : > { %p12660_p13 = scmp.ne.s32.totalorder %s12659_s4, 0  ;;  %s6437_s21 = scalar_lea.sflag [#allocation5], %s6436_s17 }
 0x5a4   : > { %p7167_p10 = pnand %p7174_p12, %p12660_p13 }
 0x5a6   : > { %p7168_p4 = pneg %p7167_p10 }
 0x5a8   : > { %7686 = dma.done.wait (%p7168_p4), %s6437_s21, 20480  }
 0x5a9   : > { %7688 = vsyncadd (%p7168_p4), %s6437_s21, 4294946816  ;;  %s24_s28 = sadd.s32 1, %s7743_s28   ;;  %s12662_s24 = sld [smem:[#allocation18_spill]] }
 0x5aa   : > { %p11651_p2 = scmp.ge.s32.totalorder %s24_s28, 12   ;;  %s12663_s17 = sld [smem:[#allocation26_spill]] }
 0x5ab   : > { %s12664_s8 = sld [smem:[#allocation24_spill]]  ;;  %s12671_s15 = smov %s7695_s16 }
 0x5ac   : > { %s12665_s6 = sld [smem:[#allocation19_spill]]  ;;  %s12673_s18 = smov %s7707_s19 }
 0x5ad   : > { %s12666_s0 = sld [smem:[#allocation25_spill]]  ;;  %s12674_s19 = smov %s7711_s20 }
 0x5ae   : > { %s12667_s25 = sld [smem:[#allocation21_spill]]  ;;  %s12676_s21 = smov %s7719_s22 }
 0x5af   : > { %s12668_s3 = sld [smem:[#allocation22_spill]]  ;;  %s12672_s16 = smov %s12662_s24 }
 0x5b0   : > { %s12669_s27 = sld [smem:[#allocation23_spill]]  ;;  %s12679_s24 = smov %s7735_s26 }
 0x5b1   : > { %s12675_s20 = smov %s12664_s8  ;;  %23 = sbr.rel (!%p11651_p2) target bundleno = 18 (0x12), region = 110 }
 0x5b2   : > { %s12677_s22 = smov %s12665_s6 }
 0x5b3   : > { %s12678_s23 = smov %s12666_s0 }
 0x5b5   : > { %s12680_s26 = smov %s12668_s3 }
 0x5b6   :  { %6442 = vsyncpa [#allocation4], 1 }
 0x5b7   :  { %6444 = vsyncpa [#allocation4 + $0x1], 1 }
 0x5b8   :  { %6445 = vsyncpa [#allocation7], 1 }
 0x5b9   :  { %6447 = vsyncpa [#allocation7 + $0x1], 1 }
 0x5ba   :  { %6448 = vsyncpa [#allocation10], 1 }
 0x5bb   :  { %6449 = vsyncpa [#allocation5], 1 }
 0x5bc   :  { %6451 = vsyncpa [#allocation5 + $0x1], 1 }

</bundles_post_ra>
